<compile_context>
chip_gen: v6e
topology: v6e:2x2x1
jax: 0.10.0
libtpu: 0.0.40
codegen_flags: <defaults>
</compile_context>

<pallas_src>
import functools
import math

import jax
import jax.numpy as jnp
from jax.experimental import pallas as pl
from jax.experimental.pallas import tpu as pltpu


def _round_up(x, m):
    return ((x + m - 1) // m) * m


_TILE_CANDIDATES = (512, 384, 256, 128)


def _pick_tile(padded_dim):
    """Largest candidate tile (multiple of 128) that exactly divides padded_dim."""
    for c in _TILE_CANDIDATES:
        if padded_dim % c == 0:
            return c
    return padded_dim  # unreachable: padded_dim is always a multiple of 128


# --------------------------------------------------------------------------
# Pallas kernel 1: tiled bf16 matmul + bias + optional ReLU (conv & fc)
# --------------------------------------------------------------------------
def _matmul_bias_kernel(a_ref, b_ref, bias_ref, o_ref, acc_ref, *, relu):
    @pl.when(pl.program_id(2) == 0)
    def _init():
        acc_ref[...] = jnp.zeros_like(acc_ref)

    acc_ref[...] += jnp.dot(a_ref[...], b_ref[...],
                            preferred_element_type=jnp.float32)

    @pl.when(pl.program_id(2) == pl.num_programs(2) - 1)
    def _finalize():
        out = acc_ref[...] + bias_ref[...]
        if relu:
            out = jnp.maximum(out, 0.0)
        o_ref[...] = out.astype(o_ref.dtype)


def pallas_matmul_bias(a, b_padded, bias, *, relu=False):
    """a: (M, K); b_padded: (Kp, Np) bf16 (pre-padded, K<=Kp); bias: (N,) f32.

    Returns (M, N) f32 = relu?(a @ b + bias).
    """
    M, K = a.shape
    Kp, Np = b_padded.shape
    N = bias.shape[0]
    assert K <= Kp and N <= Np, (K, Kp, N, Np)

    tk = _pick_tile(Kp)
    tn = _pick_tile(Np)
    if M >= 128:
        tm = 128
        Mp = _round_up(M, tm)
    else:
        tm = _round_up(M, 8)
        Mp = tm

    a_p = jnp.pad(a.astype(jnp.bfloat16), ((0, Mp - M), (0, Kp - K)))
    b_p = b_padded.astype(jnp.bfloat16)           # no-op for prepared weights
    bias_p = jnp.pad(bias.astype(jnp.float32)[None, :], ((0, 0), (0, Np - N)))

    grid = (Mp // tm, Np // tn, Kp // tk)

    # Explicit VMEM budget: double-buffered bf16 inputs + f32 output + f32 acc.
    vmem_bytes = (2 * tm * tk * 2 + 2 * tk * tn * 2
                  + 2 * tm * tn * 4 + tm * tn * 4 + 2 * tn * 4)
    vmem_limit = int(min(64 * 1024 * 1024, max(8 * 1024 * 1024, 2 * vmem_bytes)))

    out = pl.pallas_call(
        functools.partial(_matmul_bias_kernel, relu=relu),
        out_shape=jax.ShapeDtypeStruct((Mp, Np), jnp.float32),
        grid_spec=pltpu.PrefetchScalarGridSpec(
            num_scalar_prefetch=0,
            grid=grid,
            in_specs=[
                pl.BlockSpec((tm, tk), lambda i, j, k: (i, k)),
                pl.BlockSpec((tk, tn), lambda i, j, k: (k, j)),
                pl.BlockSpec((1, tn), lambda i, j, k: (0, j)),
            ],
            out_specs=pl.BlockSpec((tm, tn), lambda i, j, k: (i, j)),
            scratch_shapes=[pltpu.VMEM((tm, tn), jnp.float32)],
        ),
        compiler_params=pltpu.CompilerParams(
            dimension_semantics=("parallel", "parallel", "arbitrary"),
            vmem_limit_bytes=vmem_limit),
    )(a_p, b_p, bias_p)
    return out[:M, :N]


# --------------------------------------------------------------------------
# Pallas kernel 2: Local Response Normalization (cross-channel, window=nbd)
#   denom = (alpha * (window-sum(x^2) / nbd) + k) ** beta ;  out = x / denom
# Channels on the lane axis; the 5-wide window sum is built from pltpu.roll
# lane shifts + wrap masks (XLU+VPU); pow(0.75) is done with rsqrt/sqrt.
# --------------------------------------------------------------------------
def _lrn_kernel(x_ref, o_ref, *, nbd, alpha, beta, k):
    x = x_ref[...]
    sq = x * x
    cp = x.shape[-1]
    lane = jax.lax.broadcasted_iota(jnp.int32, x.shape, dimension=1)

    lo = nbd // 2
    hi = (nbd - 1) // 2
    win = sq
    for d in range(1, hi + 1):
        # output lane c picks sq[(c + d) % cp]; mask off the wrap-around.
        shifted = pltpu.roll(sq, shift=cp - d, axis=1)
        win = win + jnp.where(lane < cp - d, shifted, 0.0)
    for d in range(1, lo + 1):
        # output lane c picks sq[(c - d) % cp]; mask off the wrap-around.
        shifted = pltpu.roll(sq, shift=d, axis=1)
        win = win + jnp.where(lane >= d, shifted, 0.0)

    base = win * (alpha / nbd) + k               # >= k = 1 > 0
    if beta == 0.75:
        # base ** (-0.75) = rsqrt(base) * rsqrt(sqrt(base))
        inv = jax.lax.rsqrt(base) * jax.lax.rsqrt(jax.lax.sqrt(base))
    else:
        inv = jnp.exp(-beta * jnp.log(base))
    o_ref[...] = (x * inv).astype(o_ref.dtype)


def pallas_lrn_channels_last(x2d, *, nbd=5, alpha=1e-4, beta=0.75, k=1.0):
    """x2d: (rows, C) f32; LRN across the channel (last) axis."""
    R, C = x2d.shape
    Cp = _round_up(C, 128)
    tr = min(512, _round_up(R, 8))
    Rp = _round_up(R, tr)
    x_p = jnp.pad(x2d.astype(jnp.float32), ((0, Rp - R), (0, Cp - C)))

    out = pl.pallas_call(
        functools.partial(_lrn_kernel, nbd=nbd, alpha=alpha, beta=beta, k=k),
        out_shape=jax.ShapeDtypeStruct((Rp, Cp), jnp.float32),
        grid_spec=pltpu.PrefetchScalarGridSpec(
            num_scalar_prefetch=0,
            grid=(Rp // tr,),
            in_specs=[pl.BlockSpec((tr, Cp), lambda i: (i, 0))],
            out_specs=pl.BlockSpec((tr, Cp), lambda i: (i, 0)),
        ),
        compiler_params=pltpu.CompilerParams(
            dimension_semantics=("parallel",)),
    )(x_p)
    return out[:R, :C]


# --------------------------------------------------------------------------
# JAX glue: im2col conv wrapper, pooling, flatten
# --------------------------------------------------------------------------
def conv2d_relu(x_nhwc, w_kn, bias, *, kh, kw, stride, pad, relu=True):
    """w_kn: prepared (Kp, Np) bf16 weight with K = C*kh*kw feature order
    c*(kh*kw) + ki*kw + kj (matches torch weight.reshape(OC, -1))."""
    N, H, W, C = x_nhwc.shape
    OC = bias.shape[0]
    OH = (H + 2 * pad - kh) // stride + 1
    OW = (W + 2 * pad - kw) // stride + 1

    xp = jnp.pad(x_nhwc.astype(jnp.bfloat16),
                 ((0, 0), (pad, pad), (pad, pad), (0, 0)))
    patches = []
    for ki in range(kh):
        for kj in range(kw):
            patches.append(jax.lax.slice(
                xp,
                (0, ki, kj, 0),
                (N, ki + stride * (OH - 1) + 1, kj + stride * (OW - 1) + 1, C),
                (1, stride, stride, 1)))
    patches = jnp.stack(patches, axis=-1)         # (N, OH, OW, C, kh*kw) bf16
    a = patches.reshape(N * OH * OW, C * kh * kw)
    y = pallas_matmul_bias(a, w_kn, bias, relu=relu)
    return y.reshape(N, OH, OW, OC)


def lrn_nhwc(x_nhwc):
    N, H, W, C = x_nhwc.shape
    y = pallas_lrn_channels_last(x_nhwc.reshape(N * H * W, C))
    return y.reshape(N, H, W, C)


def max_pool_3x3_s2(x_nhwc):
    return jax.lax.reduce_window(
        x_nhwc, -jnp.inf, jax.lax.max,
        window_dimensions=(1, 3, 3, 1),
        window_strides=(1, 2, 2, 1),
        padding="VALID")


def adaptive_avg_pool(x_nhwc, out_hw=(6, 6)):
    N, H, W, C = x_nhwc.shape
    OH, OW = out_hw
    rows = []
    for i in range(OH):
        h0 = (i * H) // OH
        h1 = -(-((i + 1) * H) // OH)
        cols = []
        for j in range(OW):
            w0 = (j * W) // OW
            w1 = -(-((j + 1) * W) // OW)
            cols.append(jnp.mean(x_nhwc[:, h0:h1, w0:w1, :], axis=(1, 2)))
        rows.append(jnp.stack(cols, axis=1))
    return jnp.stack(rows, axis=1)  # (N, OH, OW, C)


def linear(x, w_kn, bias, *, relu=False):
    # Prepared weight is already (in, out), padded & bf16 -> no W.T in-jit.
    return pallas_matmul_bias(x, w_kn, bias, relu=relu)


# --------------------------------------------------------------------------
# Full AlexNet forward (takes prepared params)
# --------------------------------------------------------------------------
def alexnet_forward(x_nchw, p):
    x = jnp.transpose(x_nchw, (0, 2, 3, 1))  # NCHW -> NHWC

    x = conv2d_relu(x, p["conv1_w"], p["conv1_b"], kh=11, kw=11, stride=4, pad=2)
    x = max_pool_3x3_s2(lrn_nhwc(x))

    x = conv2d_relu(x, p["conv2_w"], p["conv2_b"], kh=5, kw=5, stride=1, pad=2)
    x = max_pool_3x3_s2(lrn_nhwc(x))

    x = conv2d_relu(x, p["conv3_w"], p["conv3_b"], kh=3, kw=3, stride=1, pad=1)
    x = conv2d_relu(x, p["conv4_w"], p["conv4_b"], kh=3, kw=3, stride=1, pad=1)
    x = conv2d_relu(x, p["conv5_w"], p["conv5_b"], kh=3, kw=3, stride=1, pad=1)
    x = adaptive_avg_pool(lrn_nhwc(x), (6, 6))

    # torch.flatten(x, 1) on NCHW => flatten in (C, H, W) order.
    N = x.shape[0]
    xf = jnp.transpose(x, (0, 3, 1, 2)).reshape(N, -1)

    xf = linear(xf, p["fc1_w"], p["fc1_b"], relu=True)
    xf = linear(xf, p["fc2_w"], p["fc2_b"], relu=True)
    # dropout: identity (eval-mode semantics)
    xf = linear(xf, p["fc3_w"], p["fc3_b"], relu=False)
    return xf


# --------------------------------------------------------------------------
# Deterministic parameter init (PyTorch-default-like uniform(-1/sqrt(fan_in)))
# and one-time weight preparation (outside jit).
# --------------------------------------------------------------------------
def init_params(key):
    def conv_init(k, oc, ic, kh, kw):
        k1, k2 = jax.random.split(k)
        bound = 1.0 / math.sqrt(ic * kh * kw)
        w = jax.random.uniform(k1, (oc, ic, kh, kw), jnp.float32, -bound, bound)
        b = jax.random.uniform(k2, (oc,), jnp.float32, -bound, bound)
        return w, b

    def fc_init(k, out_f, in_f):
        k1, k2 = jax.random.split(k)
        bound = 1.0 / math.sqrt(in_f)
        w = jax.random.uniform(k1, (out_f, in_f), jnp.float32, -bound, bound)
        b = jax.random.uniform(k2, (out_f,), jnp.float32, -bound, bound)
        return w, b

    keys = jax.random.split(key, 8)
    p = {}
    p["conv1_w"], p["conv1_b"] = conv_init(keys[0], 96, 3, 11, 11)
    p["conv2_w"], p["conv2_b"] = conv_init(keys[1], 256, 96, 5, 5)
    p["conv3_w"], p["conv3_b"] = conv_init(keys[2], 384, 256, 3, 3)
    p["conv4_w"], p["conv4_b"] = conv_init(keys[3], 384, 384, 3, 3)
    p["conv5_w"], p["conv5_b"] = conv_init(keys[4], 256, 384, 3, 3)
    p["fc1_w"], p["fc1_b"] = fc_init(keys[5], 4096, 256 * 6 * 6)
    p["fc2_w"], p["fc2_b"] = fc_init(keys[6], 4096, 4096)
    p["fc3_w"], p["fc3_b"] = fc_init(keys[7], 10, 4096)
    return p


def _prep_matmul_weight(w_kn, bias):
    """Pad a (K, N) matmul weight to 128-multiples, cast to bf16 (done once)."""
    K, N = w_kn.shape
    Kp = _round_up(K, 128)
    Np = _round_up(N, 128)
    w_p = jnp.pad(w_kn.astype(jnp.bfloat16), ((0, Kp - K), (0, Np - N)))
    return w_p, bias.astype(jnp.float32)


def prepare_params(p):
    """One-time (outside jit) weight repack: conv OIHW -> (C*KH*KW, OC),
    fc (out,in) -> (in,out), both padded to 128-multiples and cast to bf16."""
    q = {}
    for name in ("conv1", "conv2", "conv3", "conv4", "conv5"):
        w = p[name + "_w"]
        oc = w.shape[0]
        w_kn = w.reshape(oc, -1).T                   # (C*KH*KW, OC)
        q[name + "_w"], q[name + "_b"] = _prep_matmul_weight(w_kn, p[name + "_b"])
    for name in ("fc1", "fc2", "fc3"):
        w_kn = p[name + "_w"].T                      # (in, out)
        q[name + "_w"], q[name + "_b"] = _prep_matmul_weight(w_kn, p[name + "_b"])
    return q


if __name__ == "__main__":
    key = jax.random.PRNGKey(0)
    pkey, xkey = jax.random.split(key)
    params = init_params(pkey)
    prepped = prepare_params(params)   # weight repack/transpose/pad: once, outside jit

    # Small input (channels fixed by the architecture): 64x64 works with the
    # conv/pool stack; AdaptiveAvgPool2d((6,6)) restores the fc1 input size.
    x = jax.random.normal(xkey, (2, 3, 64, 64), dtype=jnp.float32)

    fwd = jax.jit(alexnet_forward)
    out = jax.block_until_ready(fwd(x, prepped))
    assert out.shape == (2, 10), out.shape
    assert bool(jnp.all(jnp.isfinite(out)))
    print("KERNEL_OK")
</pallas_src>

<mosaic_0001>
module attributes {stable_mosaic.version = 11 : i64} {
  func.func @_matmul_bias_kernel(%arg0: i32, %arg1: i32, %arg2: i32, %arg3: memref<128x384xbf16, #tpu.memory_space<vmem>>, %arg4: memref<384x128xbf16, #tpu.memory_space<vmem>>, %arg5: memref<1x128xf32, #tpu.memory_space<vmem>>, %arg6: memref<128x128xf32, #tpu.memory_space<vmem>>, %arg7: memref<128x128xf32, #tpu.memory_space<vmem>>) attributes {dimension_semantics = [#tpu.dimension_semantics<parallel>, #tpu.dimension_semantics<parallel>, #tpu.dimension_semantics<arbitrary>], iteration_bounds = array<i64: 4, 1, 1>, scalar_prefetch = 0 : i64, scratch_operands = 1 : i64, tpu.core_type = #tpu.core_type<tc>, window_params = [{transform_indices = @transform_0, window_bounds = array<i64: 128, 384>}, {transform_indices = @transform_1, window_bounds = array<i64: 384, 128>}, {transform_indices = @transform_2, window_bounds = array<i64: 1, 128>}, {transform_indices = @transform_3, window_bounds = array<i64: 128, 128>}]} {
    %c0_i32 = arith.constant 0 : i32
    %0 = arith.cmpi eq, %arg2, %c0_i32 : i32
    %1 = arith.extui %0 : i1 to i32
    %c0_i32_0 = arith.constant 0 : i32
    %2 = arith.cmpi ne, %1, %c0_i32_0 : i32
    scf.if %2 {
      %cst_10 = arith.constant 0.000000e+00 : f32
      %12 = vector.broadcast %cst_10 : f32 to vector<128x128xf32>
      %c0_11 = arith.constant 0 : index
      %c0_12 = arith.constant 0 : index
      %13 = vector.load %arg7[%c0_11, %c0_12] : memref<128x128xf32, #tpu.memory_space<vmem>>, vector<128x128xf32>
      tpu.vector_store %arg7[%c0_11, %c0_12], %12 {strides = array<i32>} : memref<128x128xf32, #tpu.memory_space<vmem>>, vector<128x128xf32>,
    } else {
    }
    %c0 = arith.constant 0 : index
    %c0_1 = arith.constant 0 : index
    %3 = vector.load %arg7[%c0, %c0_1] : memref<128x128xf32, #tpu.memory_space<vmem>>, vector<128x128xf32>
    %c0_2 = arith.constant 0 : index
    %c0_3 = arith.constant 0 : index
    %4 = vector.load %arg3[%c0_2, %c0_3] : memref<128x384xbf16, #tpu.memory_space<vmem>>, vector<128x384xbf16>
    %c0_4 = arith.constant 0 : index
    %c0_5 = arith.constant 0 : index
    %5 = vector.load %arg4[%c0_4, %c0_5] : memref<384x128xbf16, #tpu.memory_space<vmem>>, vector<384x128xbf16>
    %cst = arith.constant dense<0.000000e+00> : vector<128x128xf32>
    %6 = tpu.matmul %4, %5, %cst {dimension_numbers = #tpu.dot_dimension_numbers<[1], [0], [0], [1], [0, 0, 1, 1], [], []>} : vector<128x384xbf16>, vector<384x128xbf16>, vector<128x128xf32> -> vector<128x128xf32>
    %7 = arith.addf %3, %6 : vector<128x128xf32>
    %c0_6 = arith.constant 0 : index
    %c0_7 = arith.constant 0 : index
    %8 = vector.load %arg7[%c0_6, %c0_7] : memref<128x128xf32, #tpu.memory_space<vmem>>, vector<128x128xf32>
    tpu.vector_store %arg7[%c0_6, %c0_7], %7 {strides = array<i32>} : memref<128x128xf32, #tpu.memory_space<vmem>>, vector<128x128xf32>,
    %c0_i32_8 = arith.constant 0 : i32
    %9 = arith.cmpi eq, %arg2, %c0_i32_8 : i32
    %10 = arith.extui %9 : i1 to i32
    %c0_i32_9 = arith.constant 0 : i32
    %11 = arith.cmpi ne, %10, %c0_i32_9 : i32
    scf.if %11 {
      %c0_10 = arith.constant 0 : index
      %c0_11 = arith.constant 0 : index
      %12 = vector.load %arg7[%c0_10, %c0_11] : memref<128x128xf32, #tpu.memory_space<vmem>>, vector<128x128xf32>
      %c0_12 = arith.constant 0 : index
      %c0_13 = arith.constant 0 : index
      %13 = vector.load %arg5[%c0_12, %c0_13] : memref<1x128xf32, #tpu.memory_space<vmem>>, vector<1x128xf32>
      %14 = vector.broadcast %13 : vector<1x128xf32> to vector<128x128xf32>
      %15 = arith.addf %12, %14 : vector<128x128xf32>
      %cst_14 = arith.constant 0.000000e+00 : f32
      %16 = vector.broadcast %cst_14 : f32 to vector<128x128xf32>
      %17 = arith.maximumf %15, %16 : vector<128x128xf32>
      %c0_15 = arith.constant 0 : index
      %c0_16 = arith.constant 0 : index
      %18 = vector.load %arg6[%c0_15, %c0_16] : memref<128x128xf32, #tpu.memory_space<vmem>>, vector<128x128xf32>
      tpu.vector_store %arg6[%c0_15, %c0_16], %17 {strides = array<i32>} : memref<128x128xf32, #tpu.memory_space<vmem>>, vector<128x128xf32>,
    } else {
    }
    return
  }
  func.func @transform_0(%arg0: i32, %arg1: i32, %arg2: i32) -> (i32, i32) {
    %c0_i32 = arith.constant 0 : i32
    return %arg0, %arg2 : i32, i32
  }
  func.func @transform_1(%arg0: i32, %arg1: i32, %arg2: i32) -> (i32, i32) {
    %c0_i32 = arith.constant 0 : i32
    return %arg2, %arg1 : i32, i32
  }
  func.func @transform_2(%arg0: i32, %arg1: i32, %arg2: i32) -> (i32, i32) {
    %c0_i32 = arith.constant 0 : i32
    %c0_i32_0 = arith.constant 0 : i32
    return %c0_i32, %arg1 : i32, i32
  }
  func.func @transform_3(%arg0: i32, %arg1: i32, %arg2: i32) -> (i32, i32) {
    %c0_i32 = arith.constant 0 : i32
    return %arg0, %arg1 : i32, i32
  }
}

module attributes {stable_mosaic.version = 11 : i64} {
  func.func @_lrn_kernel(%arg0: i32, %arg1: memref<456x128xf32, #tpu.memory_space<vmem>>, %arg2: memref<456x128xf32, #tpu.memory_space<vmem>>) attributes {dimension_semantics = [#tpu.dimension_semantics<parallel>], iteration_bounds = array<i64: 1>, scalar_prefetch = 0 : i64, scratch_operands = 0 : i64, tpu.core_type = #tpu.core_type<tc>, window_params = [{transform_indices = @transform_0, window_bounds = array<i64: 456, 128>}, {transform_indices = @transform_1, window_bounds = array<i64: 456, 128>}]} {
    %c0 = arith.constant 0 : index
    %c0_0 = arith.constant 0 : index
    %0 = vector.load %arg1[%c0, %c0_0] : memref<456x128xf32, #tpu.memory_space<vmem>>, vector<456x128xf32>
    %1 = arith.mulf %0, %0 : vector<456x128xf32>
    %2 = tpu.iota {dimensions = array<i32: 1>} : vector<456x128xi32>
    %c127_i32 = arith.constant 127 : i32
    %3 = tpu.dynamic_rotate %1 by %c127_i32 dim 1 : vector<456x128xf32>, i32 -> vector<456x128xf32>
    %c127_i32_1 = arith.constant 127 : i32
    %4 = vector.broadcast %c127_i32_1 : i32 to vector<456x128xi32>
    %5 = arith.cmpi slt, %2, %4 : vector<456x128xi32>
    %cst = arith.constant 0.000000e+00 : f32
    %6 = vector.broadcast %cst : f32 to vector<456x128xf32>
    %7 = arith.select %5, %3, %6 : vector<456x128xi1>, vector<456x128xf32>
    %8 = arith.addf %1, %7 : vector<456x128xf32>
    %c126_i32 = arith.constant 126 : i32
    %9 = tpu.dynamic_rotate %1 by %c126_i32 dim 1 : vector<456x128xf32>, i32 -> vector<456x128xf32>
    %c126_i32_2 = arith.constant 126 : i32
    %10 = vector.broadcast %c126_i32_2 : i32 to vector<456x128xi32>
    %11 = arith.cmpi slt, %2, %10 : vector<456x128xi32>
    %cst_3 = arith.constant 0.000000e+00 : f32
    %12 = vector.broadcast %cst_3 : f32 to vector<456x128xf32>
    %13 = arith.select %11, %9, %12 : vector<456x128xi1>, vector<456x128xf32>
    %14 = arith.addf %8, %13 : vector<456x128xf32>
    %c1_i32 = arith.constant 1 : i32
    %15 = tpu.dynamic_rotate %1 by %c1_i32 dim 1 : vector<456x128xf32>, i32 -> vector<456x128xf32>
    %c1_i32_4 = arith.constant 1 : i32
    %16 = vector.broadcast %c1_i32_4 : i32 to vector<456x128xi32>
    %17 = arith.cmpi sge, %2, %16 : vector<456x128xi32>
    %cst_5 = arith.constant 0.000000e+00 : f32
    %18 = vector.broadcast %cst_5 : f32 to vector<456x128xf32>
    %19 = arith.select %17, %15, %18 : vector<456x128xi1>, vector<456x128xf32>
    %20 = arith.addf %14, %19 : vector<456x128xf32>
    %c2_i32 = arith.constant 2 : i32
    %21 = tpu.dynamic_rotate %1 by %c2_i32 dim 1 : vector<456x128xf32>, i32 -> vector<456x128xf32>
    %c2_i32_6 = arith.constant 2 : i32
    %22 = vector.broadcast %c2_i32_6 : i32 to vector<456x128xi32>
    %23 = arith.cmpi sge, %2, %22 : vector<456x128xi32>
    %cst_7 = arith.constant 0.000000e+00 : f32
    %24 = vector.broadcast %cst_7 : f32 to vector<456x128xf32>
    %25 = arith.select %23, %21, %24 : vector<456x128xi1>, vector<456x128xf32>
    %26 = arith.addf %20, %25 : vector<456x128xf32>
    %cst_8 = arith.constant 2.000000e-05 : f32
    %27 = vector.broadcast %cst_8 : f32 to vector<456x128xf32>
    %28 = arith.mulf %26, %27 : vector<456x128xf32>
    %cst_9 = arith.constant 1.000000e+00 : f32
    %29 = vector.broadcast %cst_9 : f32 to vector<456x128xf32>
    %30 = arith.addf %28, %29 : vector<456x128xf32>
    %31 = math.rsqrt %30 : vector<456x128xf32>
    %32 = math.sqrt %30 : vector<456x128xf32>
    %33 = math.rsqrt %32 : vector<456x128xf32>
    %34 = arith.mulf %31, %33 : vector<456x128xf32>
    %35 = arith.mulf %0, %34 : vector<456x128xf32>
    %c0_10 = arith.constant 0 : index
    %c0_11 = arith.constant 0 : index
    %36 = vector.load %arg2[%c0_10, %c0_11] : memref<456x128xf32, #tpu.memory_space<vmem>>, vector<456x128xf32>
    tpu.vector_store %arg2[%c0_10, %c0_11], %35 {strides = array<i32>} : memref<456x128xf32, #tpu.memory_space<vmem>>, vector<456x128xf32>,
    return
  }
  func.func @transform_0(%arg0: i32) -> (i32, i32) {
    %c0_i32 = arith.constant 0 : i32
    %c0_i32_0 = arith.constant 0 : i32
    return %arg0, %c0_i32 : i32, i32
  }
  func.func @transform_1(%arg0: i32) -> (i32, i32) {
    %c0_i32 = arith.constant 0 : i32
    %c0_i32_0 = arith.constant 0 : i32
    return %arg0, %c0_i32 : i32, i32
  }
}

module attributes {stable_mosaic.version = 11 : i64} {
  func.func @_matmul_bias_kernel(%arg0: i32, %arg1: i32, %arg2: i32, %arg3: memref<104x128xbf16, #tpu.memory_space<vmem>>, %arg4: memref<128x256xbf16, #tpu.memory_space<vmem>>, %arg5: memref<1x256xf32, #tpu.memory_space<vmem>>, %arg6: memref<104x256xf32, #tpu.memory_space<vmem>>, %arg7: memref<104x256xf32, #tpu.memory_space<vmem>>) attributes {dimension_semantics = [#tpu.dimension_semantics<parallel>, #tpu.dimension_semantics<parallel>, #tpu.dimension_semantics<arbitrary>], iteration_bounds = array<i64: 1, 1, 19>, scalar_prefetch = 0 : i64, scratch_operands = 1 : i64, tpu.core_type = #tpu.core_type<tc>, window_params = [{transform_indices = @transform_0, window_bounds = array<i64: 104, 128>}, {transform_indices = @transform_1, window_bounds = array<i64: 128, 256>}, {transform_indices = @transform_2, window_bounds = array<i64: 1, 256>}, {transform_indices = @transform_3, window_bounds = array<i64: 104, 256>}]} {
    %c0_i32 = arith.constant 0 : i32
    %0 = arith.cmpi eq, %arg2, %c0_i32 : i32
    %1 = arith.extui %0 : i1 to i32
    %c0_i32_0 = arith.constant 0 : i32
    %2 = arith.cmpi ne, %1, %c0_i32_0 : i32
    scf.if %2 {
      %cst_9 = arith.constant 0.000000e+00 : f32
      %12 = vector.broadcast %cst_9 : f32 to vector<104x256xf32>
      %c0_10 = arith.constant 0 : index
      %c0_11 = arith.constant 0 : index
      %13 = vector.load %arg7[%c0_10, %c0_11] : memref<104x256xf32, #tpu.memory_space<vmem>>, vector<104x256xf32>
      tpu.vector_store %arg7[%c0_10, %c0_11], %12 {strides = array<i32>} : memref<104x256xf32, #tpu.memory_space<vmem>>, vector<104x256xf32>,
    } else {
    }
    %c0 = arith.constant 0 : index
    %c0_1 = arith.constant 0 : index
    %3 = vector.load %arg7[%c0, %c0_1] : memref<104x256xf32, #tpu.memory_space<vmem>>, vector<104x256xf32>
    %c0_2 = arith.constant 0 : index
    %c0_3 = arith.constant 0 : index
    %4 = vector.load %arg3[%c0_2, %c0_3] : memref<104x128xbf16, #tpu.memory_space<vmem>>, vector<104x128xbf16>
    %c0_4 = arith.constant 0 : index
    %c0_5 = arith.constant 0 : index
    %5 = vector.load %arg4[%c0_4, %c0_5] : memref<128x256xbf16, #tpu.memory_space<vmem>>, vector<128x256xbf16>
    %cst = arith.constant dense<0.000000e+00> : vector<104x256xf32>
    %6 = tpu.matmul %4, %5, %cst {dimension_numbers = #tpu.dot_dimension_numbers<[1], [0], [0], [1], [0, 0, 1, 1], [], []>} : vector<104x128xbf16>, vector<128x256xbf16>, vector<104x256xf32> -> vector<104x256xf32>
    %7 = arith.addf %3, %6 : vector<104x256xf32>
    %c0_6 = arith.constant 0 : index
    %c0_7 = arith.constant 0 : index
    %8 = vector.load %arg7[%c0_6, %c0_7] : memref<104x256xf32, #tpu.memory_space<vmem>>, vector<104x256xf32>
    tpu.vector_store %arg7[%c0_6, %c0_7], %7 {strides = array<i32>} : memref<104x256xf32, #tpu.memory_space<vmem>>, vector<104x256xf32>,
    %c18_i32 = arith.constant 18 : i32
    %9 = arith.cmpi eq, %arg2, %c18_i32 : i32
    %10 = arith.extui %9 : i1 to i32
    %c0_i32_8 = arith.constant 0 : i32
    %11 = arith.cmpi ne, %10, %c0_i32_8 : i32
    scf.if %11 {
      %c0_9 = arith.constant 0 : index
      %c0_10 = arith.constant 0 : index
      %12 = vector.load %arg7[%c0_9, %c0_10] : memref<104x256xf32, #tpu.memory_space<vmem>>, vector<104x256xf32>
      %c0_11 = arith.constant 0 : index
      %c0_12 = arith.constant 0 : index
      %13 = vector.load %arg5[%c0_11, %c0_12] : memref<1x256xf32, #tpu.memory_space<vmem>>, vector<1x256xf32>
      %14 = vector.broadcast %13 : vector<1x256xf32> to vector<104x256xf32>
      %15 = arith.addf %12, %14 : vector<104x256xf32>
      %cst_13 = arith.constant 0.000000e+00 : f32
      %16 = vector.broadcast %cst_13 : f32 to vector<104x256xf32>
      %17 = arith.maximumf %15, %16 : vector<104x256xf32>
      %c0_14 = arith.constant 0 : index
      %c0_15 = arith.constant 0 : index
      %18 = vector.load %arg6[%c0_14, %c0_15] : memref<104x256xf32, #tpu.memory_space<vmem>>, vector<104x256xf32>
      tpu.vector_store %arg6[%c0_14, %c0_15], %17 {strides = array<i32>} : memref<104x256xf32, #tpu.memory_space<vmem>>, vector<104x256xf32>,
    } else {
    }
    return
  }
  func.func @transform_0(%arg0: i32, %arg1: i32, %arg2: i32) -> (i32, i32) {
    %c0_i32 = arith.constant 0 : i32
    return %arg0, %arg2 : i32, i32
  }
  func.func @transform_1(%arg0: i32, %arg1: i32, %arg2: i32) -> (i32, i32) {
    %c0_i32 = arith.constant 0 : i32
    return %arg2, %arg1 : i32, i32
  }
  func.func @transform_2(%arg0: i32, %arg1: i32, %arg2: i32) -> (i32, i32) {
    %c0_i32 = arith.constant 0 : i32
    %c0_i32_0 = arith.constant 0 : i32
    return %c0_i32, %arg1 : i32, i32
  }
  func.func @transform_3(%arg0: i32, %arg1: i32, %arg2: i32) -> (i32, i32) {
    %c0_i32 = arith.constant 0 : i32
    return %arg0, %arg1 : i32, i32
  }
}

module attributes {stable_mosaic.version = 11 : i64} {
  func.func @_lrn_kernel(%arg0: i32, %arg1: memref<104x256xf32, #tpu.memory_space<vmem>>, %arg2: memref<104x256xf32, #tpu.memory_space<vmem>>) attributes {dimension_semantics = [#tpu.dimension_semantics<parallel>], iteration_bounds = array<i64: 1>, scalar_prefetch = 0 : i64, scratch_operands = 0 : i64, tpu.core_type = #tpu.core_type<tc>, window_params = [{transform_indices = @transform_0, window_bounds = array<i64: 104, 256>}, {transform_indices = @transform_1, window_bounds = array<i64: 104, 256>}]} {
    %c0 = arith.constant 0 : index
    %c0_0 = arith.constant 0 : index
    %0 = vector.load %arg1[%c0, %c0_0] : memref<104x256xf32, #tpu.memory_space<vmem>>, vector<104x256xf32>
    %1 = arith.mulf %0, %0 : vector<104x256xf32>
    %2 = tpu.iota {dimensions = array<i32: 1>} : vector<104x256xi32>
    %c255_i32 = arith.constant 255 : i32
    %3 = tpu.dynamic_rotate %1 by %c255_i32 dim 1 : vector<104x256xf32>, i32 -> vector<104x256xf32>
    %c255_i32_1 = arith.constant 255 : i32
    %4 = vector.broadcast %c255_i32_1 : i32 to vector<104x256xi32>
    %5 = arith.cmpi slt, %2, %4 : vector<104x256xi32>
    %cst = arith.constant 0.000000e+00 : f32
    %6 = vector.broadcast %cst : f32 to vector<104x256xf32>
    %7 = arith.select %5, %3, %6 : vector<104x256xi1>, vector<104x256xf32>
    %8 = arith.addf %1, %7 : vector<104x256xf32>
    %c254_i32 = arith.constant 254 : i32
    %9 = tpu.dynamic_rotate %1 by %c254_i32 dim 1 : vector<104x256xf32>, i32 -> vector<104x256xf32>
    %c254_i32_2 = arith.constant 254 : i32
    %10 = vector.broadcast %c254_i32_2 : i32 to vector<104x256xi32>
    %11 = arith.cmpi slt, %2, %10 : vector<104x256xi32>
    %cst_3 = arith.constant 0.000000e+00 : f32
    %12 = vector.broadcast %cst_3 : f32 to vector<104x256xf32>
    %13 = arith.select %11, %9, %12 : vector<104x256xi1>, vector<104x256xf32>
    %14 = arith.addf %8, %13 : vector<104x256xf32>
    %c1_i32 = arith.constant 1 : i32
    %15 = tpu.dynamic_rotate %1 by %c1_i32 dim 1 : vector<104x256xf32>, i32 -> vector<104x256xf32>
    %c1_i32_4 = arith.constant 1 : i32
    %16 = vector.broadcast %c1_i32_4 : i32 to vector<104x256xi32>
    %17 = arith.cmpi sge, %2, %16 : vector<104x256xi32>
    %cst_5 = arith.constant 0.000000e+00 : f32
    %18 = vector.broadcast %cst_5 : f32 to vector<104x256xf32>
    %19 = arith.select %17, %15, %18 : vector<104x256xi1>, vector<104x256xf32>
    %20 = arith.addf %14, %19 : vector<104x256xf32>
    %c2_i32 = arith.constant 2 : i32
    %21 = tpu.dynamic_rotate %1 by %c2_i32 dim 1 : vector<104x256xf32>, i32 -> vector<104x256xf32>
    %c2_i32_6 = arith.constant 2 : i32
    %22 = vector.broadcast %c2_i32_6 : i32 to vector<104x256xi32>
    %23 = arith.cmpi sge, %2, %22 : vector<104x256xi32>
    %cst_7 = arith.constant 0.000000e+00 : f32
    %24 = vector.broadcast %cst_7 : f32 to vector<104x256xf32>
    %25 = arith.select %23, %21, %24 : vector<104x256xi1>, vector<104x256xf32>
    %26 = arith.addf %20, %25 : vector<104x256xf32>
    %cst_8 = arith.constant 2.000000e-05 : f32
    %27 = vector.broadcast %cst_8 : f32 to vector<104x256xf32>
    %28 = arith.mulf %26, %27 : vector<104x256xf32>
    %cst_9 = arith.constant 1.000000e+00 : f32
    %29 = vector.broadcast %cst_9 : f32 to vector<104x256xf32>
    %30 = arith.addf %28, %29 : vector<104x256xf32>
    %31 = math.rsqrt %30 : vector<104x256xf32>
    %32 = math.sqrt %30 : vector<104x256xf32>
    %33 = math.rsqrt %32 : vector<104x256xf32>
    %34 = arith.mulf %31, %33 : vector<104x256xf32>
    %35 = arith.mulf %0, %34 : vector<104x256xf32>
    %c0_10 = arith.constant 0 : index
    %c0_11 = arith.constant 0 : index
    %36 = vector.load %arg2[%c0_10, %c0_11] : memref<104x256xf32, #tpu.memory_space<vmem>>, vector<104x256xf32>
    tpu.vector_store %arg2[%c0_10, %c0_11], %35 {strides = array<i32>} : memref<104x256xf32, #tpu.memory_space<vmem>>, vector<104x256xf32>,
    return
  }
  func.func @transform_0(%arg0: i32) -> (i32, i32) {
    %c0_i32 = arith.constant 0 : i32
    %c0_i32_0 = arith.constant 0 : i32
    return %arg0, %c0_i32 : i32, i32
  }
  func.func @transform_1(%arg0: i32) -> (i32, i32) {
    %c0_i32 = arith.constant 0 : i32
    %c0_i32_0 = arith.constant 0 : i32
    return %arg0, %c0_i32 : i32, i32
  }
}

module attributes {stable_mosaic.version = 11 : i64} {
  func.func @_matmul_bias_kernel(%arg0: i32, %arg1: i32, %arg2: i32, %arg3: memref<24x384xbf16, #tpu.memory_space<vmem>>, %arg4: memref<384x384xbf16, #tpu.memory_space<vmem>>, %arg5: memref<1x384xf32, #tpu.memory_space<vmem>>, %arg6: memref<24x384xf32, #tpu.memory_space<vmem>>, %arg7: memref<24x384xf32, #tpu.memory_space<vmem>>) attributes {dimension_semantics = [#tpu.dimension_semantics<parallel>, #tpu.dimension_semantics<parallel>, #tpu.dimension_semantics<arbitrary>], iteration_bounds = array<i64: 1, 1, 6>, scalar_prefetch = 0 : i64, scratch_operands = 1 : i64, tpu.core_type = #tpu.core_type<tc>, window_params = [{transform_indices = @transform_0, window_bounds = array<i64: 24, 384>}, {transform_indices = @transform_1, window_bounds = array<i64: 384, 384>}, {transform_indices = @transform_2, window_bounds = array<i64: 1, 384>}, {transform_indices = @transform_3, window_bounds = array<i64: 24, 384>}]} {
    %c0_i32 = arith.constant 0 : i32
    %0 = arith.cmpi eq, %arg2, %c0_i32 : i32
    %1 = arith.extui %0 : i1 to i32
    %c0_i32_0 = arith.constant 0 : i32
    %2 = arith.cmpi ne, %1, %c0_i32_0 : i32
    scf.if %2 {
      %cst_9 = arith.constant 0.000000e+00 : f32
      %12 = vector.broadcast %cst_9 : f32 to vector<24x384xf32>
      %c0_10 = arith.constant 0 : index
      %c0_11 = arith.constant 0 : index
      %13 = vector.load %arg7[%c0_10, %c0_11] : memref<24x384xf32, #tpu.memory_space<vmem>>, vector<24x384xf32>
      tpu.vector_store %arg7[%c0_10, %c0_11], %12 {strides = array<i32>} : memref<24x384xf32, #tpu.memory_space<vmem>>, vector<24x384xf32>,
    } else {
    }
    %c0 = arith.constant 0 : index
    %c0_1 = arith.constant 0 : index
    %3 = vector.load %arg7[%c0, %c0_1] : memref<24x384xf32, #tpu.memory_space<vmem>>, vector<24x384xf32>
    %c0_2 = arith.constant 0 : index
    %c0_3 = arith.constant 0 : index
    %4 = vector.load %arg3[%c0_2, %c0_3] : memref<24x384xbf16, #tpu.memory_space<vmem>>, vector<24x384xbf16>
    %c0_4 = arith.constant 0 : index
    %c0_5 = arith.constant 0 : index
    %5 = vector.load %arg4[%c0_4, %c0_5] : memref<384x384xbf16, #tpu.memory_space<vmem>>, vector<384x384xbf16>
    %cst = arith.constant dense<0.000000e+00> : vector<24x384xf32>
    %6 = tpu.matmul %4, %5, %cst {dimension_numbers = #tpu.dot_dimension_numbers<[1], [0], [0], [1], [0, 0, 1, 1], [], []>} : vector<24x384xbf16>, vector<384x384xbf16>, vector<24x384xf32> -> vector<24x384xf32>
    %7 = arith.addf %3, %6 : vector<24x384xf32>
    %c0_6 = arith.constant 0 : index
    %c0_7 = arith.constant 0 : index
    %8 = vector.load %arg7[%c0_6, %c0_7] : memref<24x384xf32, #tpu.memory_space<vmem>>, vector<24x384xf32>
    tpu.vector_store %arg7[%c0_6, %c0_7], %7 {strides = array<i32>} : memref<24x384xf32, #tpu.memory_space<vmem>>, vector<24x384xf32>,
    %c5_i32 = arith.constant 5 : i32
    %9 = arith.cmpi eq, %arg2, %c5_i32 : i32
    %10 = arith.extui %9 : i1 to i32
    %c0_i32_8 = arith.constant 0 : i32
    %11 = arith.cmpi ne, %10, %c0_i32_8 : i32
    scf.if %11 {
      %c0_9 = arith.constant 0 : index
      %c0_10 = arith.constant 0 : index
      %12 = vector.load %arg7[%c0_9, %c0_10] : memref<24x384xf32, #tpu.memory_space<vmem>>, vector<24x384xf32>
      %c0_11 = arith.constant 0 : index
      %c0_12 = arith.constant 0 : index
      %13 = vector.load %arg5[%c0_11, %c0_12] : memref<1x384xf32, #tpu.memory_space<vmem>>, vector<1x384xf32>
      %14 = vector.broadcast %13 : vector<1x384xf32> to vector<24x384xf32>
      %15 = arith.addf %12, %14 : vector<24x384xf32>
      %cst_13 = arith.constant 0.000000e+00 : f32
      %16 = vector.broadcast %cst_13 : f32 to vector<24x384xf32>
      %17 = arith.maximumf %15, %16 : vector<24x384xf32>
      %c0_14 = arith.constant 0 : index
      %c0_15 = arith.constant 0 : index
      %18 = vector.load %arg6[%c0_14, %c0_15] : memref<24x384xf32, #tpu.memory_space<vmem>>, vector<24x384xf32>
      tpu.vector_store %arg6[%c0_14, %c0_15], %17 {strides = array<i32>} : memref<24x384xf32, #tpu.memory_space<vmem>>, vector<24x384xf32>,
    } else {
    }
    return
  }
  func.func @transform_0(%arg0: i32, %arg1: i32, %arg2: i32) -> (i32, i32) {
    %c0_i32 = arith.constant 0 : i32
    return %arg0, %arg2 : i32, i32
  }
  func.func @transform_1(%arg0: i32, %arg1: i32, %arg2: i32) -> (i32, i32) {
    %c0_i32 = arith.constant 0 : i32
    return %arg2, %arg1 : i32, i32
  }
  func.func @transform_2(%arg0: i32, %arg1: i32, %arg2: i32) -> (i32, i32) {
    %c0_i32 = arith.constant 0 : i32
    %c0_i32_0 = arith.constant 0 : i32
    return %c0_i32, %arg1 : i32, i32
  }
  func.func @transform_3(%arg0: i32, %arg1: i32, %arg2: i32) -> (i32, i32) {
    %c0_i32 = arith.constant 0 : i32
    return %arg0, %arg1 : i32, i32
  }
}

module attributes {stable_mosaic.version = 11 : i64} {
  func.func @_matmul_bias_kernel(%arg0: i32, %arg1: i32, %arg2: i32, %arg3: memref<24x384xbf16, #tpu.memory_space<vmem>>, %arg4: memref<384x384xbf16, #tpu.memory_space<vmem>>, %arg5: memref<1x384xf32, #tpu.memory_space<vmem>>, %arg6: memref<24x384xf32, #tpu.memory_space<vmem>>, %arg7: memref<24x384xf32, #tpu.memory_space<vmem>>) attributes {dimension_semantics = [#tpu.dimension_semantics<parallel>, #tpu.dimension_semantics<parallel>, #tpu.dimension_semantics<arbitrary>], iteration_bounds = array<i64: 1, 1, 9>, scalar_prefetch = 0 : i64, scratch_operands = 1 : i64, tpu.core_type = #tpu.core_type<tc>, window_params = [{transform_indices = @transform_0, window_bounds = array<i64: 24, 384>}, {transform_indices = @transform_1, window_bounds = array<i64: 384, 384>}, {transform_indices = @transform_2, window_bounds = array<i64: 1, 384>}, {transform_indices = @transform_3, window_bounds = array<i64: 24, 384>}]} {
    %c0_i32 = arith.constant 0 : i32
    %0 = arith.cmpi eq, %arg2, %c0_i32 : i32
    %1 = arith.extui %0 : i1 to i32
    %c0_i32_0 = arith.constant 0 : i32
    %2 = arith.cmpi ne, %1, %c0_i32_0 : i32
    scf.if %2 {
      %cst_9 = arith.constant 0.000000e+00 : f32
      %12 = vector.broadcast %cst_9 : f32 to vector<24x384xf32>
      %c0_10 = arith.constant 0 : index
      %c0_11 = arith.constant 0 : index
      %13 = vector.load %arg7[%c0_10, %c0_11] : memref<24x384xf32, #tpu.memory_space<vmem>>, vector<24x384xf32>
      tpu.vector_store %arg7[%c0_10, %c0_11], %12 {strides = array<i32>} : memref<24x384xf32, #tpu.memory_space<vmem>>, vector<24x384xf32>,
    } else {
    }
    %c0 = arith.constant 0 : index
    %c0_1 = arith.constant 0 : index
    %3 = vector.load %arg7[%c0, %c0_1] : memref<24x384xf32, #tpu.memory_space<vmem>>, vector<24x384xf32>
    %c0_2 = arith.constant 0 : index
    %c0_3 = arith.constant 0 : index
    %4 = vector.load %arg3[%c0_2, %c0_3] : memref<24x384xbf16, #tpu.memory_space<vmem>>, vector<24x384xbf16>
    %c0_4 = arith.constant 0 : index
    %c0_5 = arith.constant 0 : index
    %5 = vector.load %arg4[%c0_4, %c0_5] : memref<384x384xbf16, #tpu.memory_space<vmem>>, vector<384x384xbf16>
    %cst = arith.constant dense<0.000000e+00> : vector<24x384xf32>
    %6 = tpu.matmul %4, %5, %cst {dimension_numbers = #tpu.dot_dimension_numbers<[1], [0], [0], [1], [0, 0, 1, 1], [], []>} : vector<24x384xbf16>, vector<384x384xbf16>, vector<24x384xf32> -> vector<24x384xf32>
    %7 = arith.addf %3, %6 : vector<24x384xf32>
    %c0_6 = arith.constant 0 : index
    %c0_7 = arith.constant 0 : index
    %8 = vector.load %arg7[%c0_6, %c0_7] : memref<24x384xf32, #tpu.memory_space<vmem>>, vector<24x384xf32>
    tpu.vector_store %arg7[%c0_6, %c0_7], %7 {strides = array<i32>} : memref<24x384xf32, #tpu.memory_space<vmem>>, vector<24x384xf32>,
    %c8_i32 = arith.constant 8 : i32
    %9 = arith.cmpi eq, %arg2, %c8_i32 : i32
    %10 = arith.extui %9 : i1 to i32
    %c0_i32_8 = arith.constant 0 : i32
    %11 = arith.cmpi ne, %10, %c0_i32_8 : i32
    scf.if %11 {
      %c0_9 = arith.constant 0 : index
      %c0_10 = arith.constant 0 : index
      %12 = vector.load %arg7[%c0_9, %c0_10] : memref<24x384xf32, #tpu.memory_space<vmem>>, vector<24x384xf32>
      %c0_11 = arith.constant 0 : index
      %c0_12 = arith.constant 0 : index
      %13 = vector.load %arg5[%c0_11, %c0_12] : memref<1x384xf32, #tpu.memory_space<vmem>>, vector<1x384xf32>
      %14 = vector.broadcast %13 : vector<1x384xf32> to vector<24x384xf32>
      %15 = arith.addf %12, %14 : vector<24x384xf32>
      %cst_13 = arith.constant 0.000000e+00 : f32
      %16 = vector.broadcast %cst_13 : f32 to vector<24x384xf32>
      %17 = arith.maximumf %15, %16 : vector<24x384xf32>
      %c0_14 = arith.constant 0 : index
      %c0_15 = arith.constant 0 : index
      %18 = vector.load %arg6[%c0_14, %c0_15] : memref<24x384xf32, #tpu.memory_space<vmem>>, vector<24x384xf32>
      tpu.vector_store %arg6[%c0_14, %c0_15], %17 {strides = array<i32>} : memref<24x384xf32, #tpu.memory_space<vmem>>, vector<24x384xf32>,
    } else {
    }
    return
  }
  func.func @transform_0(%arg0: i32, %arg1: i32, %arg2: i32) -> (i32, i32) {
    %c0_i32 = arith.constant 0 : i32
    return %arg0, %arg2 : i32, i32
  }
  func.func @transform_1(%arg0: i32, %arg1: i32, %arg2: i32) -> (i32, i32) {
    %c0_i32 = arith.constant 0 : i32
    return %arg2, %arg1 : i32, i32
  }
  func.func @transform_2(%arg0: i32, %arg1: i32, %arg2: i32) -> (i32, i32) {
    %c0_i32 = arith.constant 0 : i32
    %c0_i32_0 = arith.constant 0 : i32
    return %c0_i32, %arg1 : i32, i32
  }
  func.func @transform_3(%arg0: i32, %arg1: i32, %arg2: i32) -> (i32, i32) {
    %c0_i32 = arith.constant 0 : i32
    return %arg0, %arg1 : i32, i32
  }
}

module attributes {stable_mosaic.version = 11 : i64} {
  func.func @_matmul_bias_kernel(%arg0: i32, %arg1: i32, %arg2: i32, %arg3: memref<24x384xbf16, #tpu.memory_space<vmem>>, %arg4: memref<384x256xbf16, #tpu.memory_space<vmem>>, %arg5: memref<1x256xf32, #tpu.memory_space<vmem>>, %arg6: memref<24x256xf32, #tpu.memory_space<vmem>>, %arg7: memref<24x256xf32, #tpu.memory_space<vmem>>) attributes {dimension_semantics = [#tpu.dimension_semantics<parallel>, #tpu.dimension_semantics<parallel>, #tpu.dimension_semantics<arbitrary>], iteration_bounds = array<i64: 1, 1, 9>, scalar_prefetch = 0 : i64, scratch_operands = 1 : i64, tpu.core_type = #tpu.core_type<tc>, window_params = [{transform_indices = @transform_0, window_bounds = array<i64: 24, 384>}, {transform_indices = @transform_1, window_bounds = array<i64: 384, 256>}, {transform_indices = @transform_2, window_bounds = array<i64: 1, 256>}, {transform_indices = @transform_3, window_bounds = array<i64: 24, 256>}]} {
    %c0_i32 = arith.constant 0 : i32
    %0 = arith.cmpi eq, %arg2, %c0_i32 : i32
    %1 = arith.extui %0 : i1 to i32
    %c0_i32_0 = arith.constant 0 : i32
    %2 = arith.cmpi ne, %1, %c0_i32_0 : i32
    scf.if %2 {
      %cst_9 = arith.constant 0.000000e+00 : f32
      %12 = vector.broadcast %cst_9 : f32 to vector<24x256xf32>
      %c0_10 = arith.constant 0 : index
      %c0_11 = arith.constant 0 : index
      %13 = vector.load %arg7[%c0_10, %c0_11] : memref<24x256xf32, #tpu.memory_space<vmem>>, vector<24x256xf32>
      tpu.vector_store %arg7[%c0_10, %c0_11], %12 {strides = array<i32>} : memref<24x256xf32, #tpu.memory_space<vmem>>, vector<24x256xf32>,
    } else {
    }
    %c0 = arith.constant 0 : index
    %c0_1 = arith.constant 0 : index
    %3 = vector.load %arg7[%c0, %c0_1] : memref<24x256xf32, #tpu.memory_space<vmem>>, vector<24x256xf32>
    %c0_2 = arith.constant 0 : index
    %c0_3 = arith.constant 0 : index
    %4 = vector.load %arg3[%c0_2, %c0_3] : memref<24x384xbf16, #tpu.memory_space<vmem>>, vector<24x384xbf16>
    %c0_4 = arith.constant 0 : index
    %c0_5 = arith.constant 0 : index
    %5 = vector.load %arg4[%c0_4, %c0_5] : memref<384x256xbf16, #tpu.memory_space<vmem>>, vector<384x256xbf16>
    %cst = arith.constant dense<0.000000e+00> : vector<24x256xf32>
    %6 = tpu.matmul %4, %5, %cst {dimension_numbers = #tpu.dot_dimension_numbers<[1], [0], [0], [1], [0, 0, 1, 1], [], []>} : vector<24x384xbf16>, vector<384x256xbf16>, vector<24x256xf32> -> vector<24x256xf32>
    %7 = arith.addf %3, %6 : vector<24x256xf32>
    %c0_6 = arith.constant 0 : index
    %c0_7 = arith.constant 0 : index
    %8 = vector.load %arg7[%c0_6, %c0_7] : memref<24x256xf32, #tpu.memory_space<vmem>>, vector<24x256xf32>
    tpu.vector_store %arg7[%c0_6, %c0_7], %7 {strides = array<i32>} : memref<24x256xf32, #tpu.memory_space<vmem>>, vector<24x256xf32>,
    %c8_i32 = arith.constant 8 : i32
    %9 = arith.cmpi eq, %arg2, %c8_i32 : i32
    %10 = arith.extui %9 : i1 to i32
    %c0_i32_8 = arith.constant 0 : i32
    %11 = arith.cmpi ne, %10, %c0_i32_8 : i32
    scf.if %11 {
      %c0_9 = arith.constant 0 : index
      %c0_10 = arith.constant 0 : index
      %12 = vector.load %arg7[%c0_9, %c0_10] : memref<24x256xf32, #tpu.memory_space<vmem>>, vector<24x256xf32>
      %c0_11 = arith.constant 0 : index
      %c0_12 = arith.constant 0 : index
      %13 = vector.load %arg5[%c0_11, %c0_12] : memref<1x256xf32, #tpu.memory_space<vmem>>, vector<1x256xf32>
      %14 = vector.broadcast %13 : vector<1x256xf32> to vector<24x256xf32>
      %15 = arith.addf %12, %14 : vector<24x256xf32>
      %cst_13 = arith.constant 0.000000e+00 : f32
      %16 = vector.broadcast %cst_13 : f32 to vector<24x256xf32>
      %17 = arith.maximumf %15, %16 : vector<24x256xf32>
      %c0_14 = arith.constant 0 : index
      %c0_15 = arith.constant 0 : index
      %18 = vector.load %arg6[%c0_14, %c0_15] : memref<24x256xf32, #tpu.memory_space<vmem>>, vector<24x256xf32>
      tpu.vector_store %arg6[%c0_14, %c0_15], %17 {strides = array<i32>} : memref<24x256xf32, #tpu.memory_space<vmem>>, vector<24x256xf32>,
    } else {
    }
    return
  }
  func.func @transform_0(%arg0: i32, %arg1: i32, %arg2: i32) -> (i32, i32) {
    %c0_i32 = arith.constant 0 : i32
    return %arg0, %arg2 : i32, i32
  }
  func.func @transform_1(%arg0: i32, %arg1: i32, %arg2: i32) -> (i32, i32) {
    %c0_i32 = arith.constant 0 : i32
    return %arg2, %arg1 : i32, i32
  }
  func.func @transform_2(%arg0: i32, %arg1: i32, %arg2: i32) -> (i32, i32) {
    %c0_i32 = arith.constant 0 : i32
    %c0_i32_0 = arith.constant 0 : i32
    return %c0_i32, %arg1 : i32, i32
  }
  func.func @transform_3(%arg0: i32, %arg1: i32, %arg2: i32) -> (i32, i32) {
    %c0_i32 = arith.constant 0 : i32
    return %arg0, %arg1 : i32, i32
  }
}

module attributes {stable_mosaic.version = 11 : i64} {
  func.func @_lrn_kernel(%arg0: i32, %arg1: memref<24x256xf32, #tpu.memory_space<vmem>>, %arg2: memref<24x256xf32, #tpu.memory_space<vmem>>) attributes {dimension_semantics = [#tpu.dimension_semantics<parallel>], iteration_bounds = array<i64: 1>, scalar_prefetch = 0 : i64, scratch_operands = 0 : i64, tpu.core_type = #tpu.core_type<tc>, window_params = [{transform_indices = @transform_0, window_bounds = array<i64: 24, 256>}, {transform_indices = @transform_1, window_bounds = array<i64: 24, 256>}]} {
    %c0 = arith.constant 0 : index
    %c0_0 = arith.constant 0 : index
    %0 = vector.load %arg1[%c0, %c0_0] : memref<24x256xf32, #tpu.memory_space<vmem>>, vector<24x256xf32>
    %1 = arith.mulf %0, %0 : vector<24x256xf32>
    %2 = tpu.iota {dimensions = array<i32: 1>} : vector<24x256xi32>
    %c255_i32 = arith.constant 255 : i32
    %3 = tpu.dynamic_rotate %1 by %c255_i32 dim 1 : vector<24x256xf32>, i32 -> vector<24x256xf32>
    %c255_i32_1 = arith.constant 255 : i32
    %4 = vector.broadcast %c255_i32_1 : i32 to vector<24x256xi32>
    %5 = arith.cmpi slt, %2, %4 : vector<24x256xi32>
    %cst = arith.constant 0.000000e+00 : f32
    %6 = vector.broadcast %cst : f32 to vector<24x256xf32>
    %7 = arith.select %5, %3, %6 : vector<24x256xi1>, vector<24x256xf32>
    %8 = arith.addf %1, %7 : vector<24x256xf32>
    %c254_i32 = arith.constant 254 : i32
    %9 = tpu.dynamic_rotate %1 by %c254_i32 dim 1 : vector<24x256xf32>, i32 -> vector<24x256xf32>
    %c254_i32_2 = arith.constant 254 : i32
    %10 = vector.broadcast %c254_i32_2 : i32 to vector<24x256xi32>
    %11 = arith.cmpi slt, %2, %10 : vector<24x256xi32>
    %cst_3 = arith.constant 0.000000e+00 : f32
    %12 = vector.broadcast %cst_3 : f32 to vector<24x256xf32>
    %13 = arith.select %11, %9, %12 : vector<24x256xi1>, vector<24x256xf32>
    %14 = arith.addf %8, %13 : vector<24x256xf32>
    %c1_i32 = arith.constant 1 : i32
    %15 = tpu.dynamic_rotate %1 by %c1_i32 dim 1 : vector<24x256xf32>, i32 -> vector<24x256xf32>
    %c1_i32_4 = arith.constant 1 : i32
    %16 = vector.broadcast %c1_i32_4 : i32 to vector<24x256xi32>
    %17 = arith.cmpi sge, %2, %16 : vector<24x256xi32>
    %cst_5 = arith.constant 0.000000e+00 : f32
    %18 = vector.broadcast %cst_5 : f32 to vector<24x256xf32>
    %19 = arith.select %17, %15, %18 : vector<24x256xi1>, vector<24x256xf32>
    %20 = arith.addf %14, %19 : vector<24x256xf32>
    %c2_i32 = arith.constant 2 : i32
    %21 = tpu.dynamic_rotate %1 by %c2_i32 dim 1 : vector<24x256xf32>, i32 -> vector<24x256xf32>
    %c2_i32_6 = arith.constant 2 : i32
    %22 = vector.broadcast %c2_i32_6 : i32 to vector<24x256xi32>
    %23 = arith.cmpi sge, %2, %22 : vector<24x256xi32>
    %cst_7 = arith.constant 0.000000e+00 : f32
    %24 = vector.broadcast %cst_7 : f32 to vector<24x256xf32>
    %25 = arith.select %23, %21, %24 : vector<24x256xi1>, vector<24x256xf32>
    %26 = arith.addf %20, %25 : vector<24x256xf32>
    %cst_8 = arith.constant 2.000000e-05 : f32
    %27 = vector.broadcast %cst_8 : f32 to vector<24x256xf32>
    %28 = arith.mulf %26, %27 : vector<24x256xf32>
    %cst_9 = arith.constant 1.000000e+00 : f32
    %29 = vector.broadcast %cst_9 : f32 to vector<24x256xf32>
    %30 = arith.addf %28, %29 : vector<24x256xf32>
    %31 = math.rsqrt %30 : vector<24x256xf32>
    %32 = math.sqrt %30 : vector<24x256xf32>
    %33 = math.rsqrt %32 : vector<24x256xf32>
    %34 = arith.mulf %31, %33 : vector<24x256xf32>
    %35 = arith.mulf %0, %34 : vector<24x256xf32>
    %c0_10 = arith.constant 0 : index
    %c0_11 = arith.constant 0 : index
    %36 = vector.load %arg2[%c0_10, %c0_11] : memref<24x256xf32, #tpu.memory_space<vmem>>, vector<24x256xf32>
    tpu.vector_store %arg2[%c0_10, %c0_11], %35 {strides = array<i32>} : memref<24x256xf32, #tpu.memory_space<vmem>>, vector<24x256xf32>,
    return
  }
  func.func @transform_0(%arg0: i32) -> (i32, i32) {
    %c0_i32 = arith.constant 0 : i32
    %c0_i32_0 = arith.constant 0 : i32
    return %arg0, %c0_i32 : i32, i32
  }
  func.func @transform_1(%arg0: i32) -> (i32, i32) {
    %c0_i32 = arith.constant 0 : i32
    %c0_i32_0 = arith.constant 0 : i32
    return %arg0, %c0_i32 : i32, i32
  }
}

module attributes {stable_mosaic.version = 11 : i64} {
  func.func @_matmul_bias_kernel(%arg0: i32, %arg1: i32, %arg2: i32, %arg3: memref<8x512xbf16, #tpu.memory_space<vmem>>, %arg4: memref<512x512xbf16, #tpu.memory_space<vmem>>, %arg5: memref<1x512xf32, #tpu.memory_space<vmem>>, %arg6: memref<8x512xf32, #tpu.memory_space<vmem>>, %arg7: memref<8x512xf32, #tpu.memory_space<vmem>>) attributes {dimension_semantics = [#tpu.dimension_semantics<parallel>, #tpu.dimension_semantics<parallel>, #tpu.dimension_semantics<arbitrary>], iteration_bounds = array<i64: 1, 8, 18>, scalar_prefetch = 0 : i64, scratch_operands = 1 : i64, tpu.core_type = #tpu.core_type<tc>, window_params = [{transform_indices = @transform_0, window_bounds = array<i64: 8, 512>}, {transform_indices = @transform_1, window_bounds = array<i64: 512, 512>}, {transform_indices = @transform_2, window_bounds = array<i64: 1, 512>}, {transform_indices = @transform_3, window_bounds = array<i64: 8, 512>}]} {
    %c0_i32 = arith.constant 0 : i32
    %0 = arith.cmpi eq, %arg2, %c0_i32 : i32
    %1 = arith.extui %0 : i1 to i32
    %c0_i32_0 = arith.constant 0 : i32
    %2 = arith.cmpi ne, %1, %c0_i32_0 : i32
    scf.if %2 {
      %cst_9 = arith.constant 0.000000e+00 : f32
      %12 = vector.broadcast %cst_9 : f32 to vector<8x512xf32>
      %c0_10 = arith.constant 0 : index
      %c0_11 = arith.constant 0 : index
      %13 = vector.load %arg7[%c0_10, %c0_11] : memref<8x512xf32, #tpu.memory_space<vmem>>, vector<8x512xf32>
      tpu.vector_store %arg7[%c0_10, %c0_11], %12 {strides = array<i32>} : memref<8x512xf32, #tpu.memory_space<vmem>>, vector<8x512xf32>,
    } else {
    }
    %c0 = arith.constant 0 : index
    %c0_1 = arith.constant 0 : index
    %3 = vector.load %arg7[%c0, %c0_1] : memref<8x512xf32, #tpu.memory_space<vmem>>, vector<8x512xf32>
    %c0_2 = arith.constant 0 : index
    %c0_3 = arith.constant 0 : index
    %4 = vector.load %arg3[%c0_2, %c0_3] : memref<8x512xbf16, #tpu.memory_space<vmem>>, vector<8x512xbf16>
    %c0_4 = arith.constant 0 : index
    %c0_5 = arith.constant 0 : index
    %5 = vector.load %arg4[%c0_4, %c0_5] : memref<512x512xbf16, #tpu.memory_space<vmem>>, vector<512x512xbf16>
    %cst = arith.constant dense<0.000000e+00> : vector<8x512xf32>
    %6 = tpu.matmul %4, %5, %cst {dimension_numbers = #tpu.dot_dimension_numbers<[1], [0], [0], [1], [0, 0, 1, 1], [], []>} : vector<8x512xbf16>, vector<512x512xbf16>, vector<8x512xf32> -> vector<8x512xf32>
    %7 = arith.addf %3, %6 : vector<8x512xf32>
    %c0_6 = arith.constant 0 : index
    %c0_7 = arith.constant 0 : index
    %8 = vector.load %arg7[%c0_6, %c0_7] : memref<8x512xf32, #tpu.memory_space<vmem>>, vector<8x512xf32>
    tpu.vector_store %arg7[%c0_6, %c0_7], %7 {strides = array<i32>} : memref<8x512xf32, #tpu.memory_space<vmem>>, vector<8x512xf32>,
    %c17_i32 = arith.constant 17 : i32
    %9 = arith.cmpi eq, %arg2, %c17_i32 : i32
    %10 = arith.extui %9 : i1 to i32
    %c0_i32_8 = arith.constant 0 : i32
    %11 = arith.cmpi ne, %10, %c0_i32_8 : i32
    scf.if %11 {
      %c0_9 = arith.constant 0 : index
      %c0_10 = arith.constant 0 : index
      %12 = vector.load %arg7[%c0_9, %c0_10] : memref<8x512xf32, #tpu.memory_space<vmem>>, vector<8x512xf32>
      %c0_11 = arith.constant 0 : index
      %c0_12 = arith.constant 0 : index
      %13 = vector.load %arg5[%c0_11, %c0_12] : memref<1x512xf32, #tpu.memory_space<vmem>>, vector<1x512xf32>
      %14 = vector.broadcast %13 : vector<1x512xf32> to vector<8x512xf32>
      %15 = arith.addf %12, %14 : vector<8x512xf32>
      %cst_13 = arith.constant 0.000000e+00 : f32
      %16 = vector.broadcast %cst_13 : f32 to vector<8x512xf32>
      %17 = arith.maximumf %15, %16 : vector<8x512xf32>
      %c0_14 = arith.constant 0 : index
      %c0_15 = arith.constant 0 : index
      %18 = vector.load %arg6[%c0_14, %c0_15] : memref<8x512xf32, #tpu.memory_space<vmem>>, vector<8x512xf32>
      tpu.vector_store %arg6[%c0_14, %c0_15], %17 {strides = array<i32>} : memref<8x512xf32, #tpu.memory_space<vmem>>, vector<8x512xf32>,
    } else {
    }
    return
  }
  func.func @transform_0(%arg0: i32, %arg1: i32, %arg2: i32) -> (i32, i32) {
    %c0_i32 = arith.constant 0 : i32
    return %arg0, %arg2 : i32, i32
  }
  func.func @transform_1(%arg0: i32, %arg1: i32, %arg2: i32) -> (i32, i32) {
    %c0_i32 = arith.constant 0 : i32
    return %arg2, %arg1 : i32, i32
  }
  func.func @transform_2(%arg0: i32, %arg1: i32, %arg2: i32) -> (i32, i32) {
    %c0_i32 = arith.constant 0 : i32
    %c0_i32_0 = arith.constant 0 : i32
    return %c0_i32, %arg1 : i32, i32
  }
  func.func @transform_3(%arg0: i32, %arg1: i32, %arg2: i32) -> (i32, i32) {
    %c0_i32 = arith.constant 0 : i32
    return %arg0, %arg1 : i32, i32
  }
}

module attributes {stable_mosaic.version = 11 : i64} {
  func.func @_matmul_bias_kernel(%arg0: i32, %arg1: i32, %arg2: i32, %arg3: memref<8x512xbf16, #tpu.memory_space<vmem>>, %arg4: memref<512x512xbf16, #tpu.memory_space<vmem>>, %arg5: memref<1x512xf32, #tpu.memory_space<vmem>>, %arg6: memref<8x512xf32, #tpu.memory_space<vmem>>, %arg7: memref<8x512xf32, #tpu.memory_space<vmem>>) attributes {dimension_semantics = [#tpu.dimension_semantics<parallel>, #tpu.dimension_semantics<parallel>, #tpu.dimension_semantics<arbitrary>], iteration_bounds = array<i64: 1, 8, 8>, scalar_prefetch = 0 : i64, scratch_operands = 1 : i64, tpu.core_type = #tpu.core_type<tc>, window_params = [{transform_indices = @transform_0, window_bounds = array<i64: 8, 512>}, {transform_indices = @transform_1, window_bounds = array<i64: 512, 512>}, {transform_indices = @transform_2, window_bounds = array<i64: 1, 512>}, {transform_indices = @transform_3, window_bounds = array<i64: 8, 512>}]} {
    %c0_i32 = arith.constant 0 : i32
    %0 = arith.cmpi eq, %arg2, %c0_i32 : i32
    %1 = arith.extui %0 : i1 to i32
    %c0_i32_0 = arith.constant 0 : i32
    %2 = arith.cmpi ne, %1, %c0_i32_0 : i32
    scf.if %2 {
      %cst_9 = arith.constant 0.000000e+00 : f32
      %12 = vector.broadcast %cst_9 : f32 to vector<8x512xf32>
      %c0_10 = arith.constant 0 : index
      %c0_11 = arith.constant 0 : index
      %13 = vector.load %arg7[%c0_10, %c0_11] : memref<8x512xf32, #tpu.memory_space<vmem>>, vector<8x512xf32>
      tpu.vector_store %arg7[%c0_10, %c0_11], %12 {strides = array<i32>} : memref<8x512xf32, #tpu.memory_space<vmem>>, vector<8x512xf32>,
    } else {
    }
    %c0 = arith.constant 0 : index
    %c0_1 = arith.constant 0 : index
    %3 = vector.load %arg7[%c0, %c0_1] : memref<8x512xf32, #tpu.memory_space<vmem>>, vector<8x512xf32>
    %c0_2 = arith.constant 0 : index
    %c0_3 = arith.constant 0 : index
    %4 = vector.load %arg3[%c0_2, %c0_3] : memref<8x512xbf16, #tpu.memory_space<vmem>>, vector<8x512xbf16>
    %c0_4 = arith.constant 0 : index
    %c0_5 = arith.constant 0 : index
    %5 = vector.load %arg4[%c0_4, %c0_5] : memref<512x512xbf16, #tpu.memory_space<vmem>>, vector<512x512xbf16>
    %cst = arith.constant dense<0.000000e+00> : vector<8x512xf32>
    %6 = tpu.matmul %4, %5, %cst {dimension_numbers = #tpu.dot_dimension_numbers<[1], [0], [0], [1], [0, 0, 1, 1], [], []>} : vector<8x512xbf16>, vector<512x512xbf16>, vector<8x512xf32> -> vector<8x512xf32>
    %7 = arith.addf %3, %6 : vector<8x512xf32>
    %c0_6 = arith.constant 0 : index
    %c0_7 = arith.constant 0 : index
    %8 = vector.load %arg7[%c0_6, %c0_7] : memref<8x512xf32, #tpu.memory_space<vmem>>, vector<8x512xf32>
    tpu.vector_store %arg7[%c0_6, %c0_7], %7 {strides = array<i32>} : memref<8x512xf32, #tpu.memory_space<vmem>>, vector<8x512xf32>,
    %c7_i32 = arith.constant 7 : i32
    %9 = arith.cmpi eq, %arg2, %c7_i32 : i32
    %10 = arith.extui %9 : i1 to i32
    %c0_i32_8 = arith.constant 0 : i32
    %11 = arith.cmpi ne, %10, %c0_i32_8 : i32
    scf.if %11 {
      %c0_9 = arith.constant 0 : index
      %c0_10 = arith.constant 0 : index
      %12 = vector.load %arg7[%c0_9, %c0_10] : memref<8x512xf32, #tpu.memory_space<vmem>>, vector<8x512xf32>
      %c0_11 = arith.constant 0 : index
      %c0_12 = arith.constant 0 : index
      %13 = vector.load %arg5[%c0_11, %c0_12] : memref<1x512xf32, #tpu.memory_space<vmem>>, vector<1x512xf32>
      %14 = vector.broadcast %13 : vector<1x512xf32> to vector<8x512xf32>
      %15 = arith.addf %12, %14 : vector<8x512xf32>
      %cst_13 = arith.constant 0.000000e+00 : f32
      %16 = vector.broadcast %cst_13 : f32 to vector<8x512xf32>
      %17 = arith.maximumf %15, %16 : vector<8x512xf32>
      %c0_14 = arith.constant 0 : index
      %c0_15 = arith.constant 0 : index
      %18 = vector.load %arg6[%c0_14, %c0_15] : memref<8x512xf32, #tpu.memory_space<vmem>>, vector<8x512xf32>
      tpu.vector_store %arg6[%c0_14, %c0_15], %17 {strides = array<i32>} : memref<8x512xf32, #tpu.memory_space<vmem>>, vector<8x512xf32>,
    } else {
    }
    return
  }
  func.func @transform_0(%arg0: i32, %arg1: i32, %arg2: i32) -> (i32, i32) {
    %c0_i32 = arith.constant 0 : i32
    return %arg0, %arg2 : i32, i32
  }
  func.func @transform_1(%arg0: i32, %arg1: i32, %arg2: i32) -> (i32, i32) {
    %c0_i32 = arith.constant 0 : i32
    return %arg2, %arg1 : i32, i32
  }
  func.func @transform_2(%arg0: i32, %arg1: i32, %arg2: i32) -> (i32, i32) {
    %c0_i32 = arith.constant 0 : i32
    %c0_i32_0 = arith.constant 0 : i32
    return %c0_i32, %arg1 : i32, i32
  }
  func.func @transform_3(%arg0: i32, %arg1: i32, %arg2: i32) -> (i32, i32) {
    %c0_i32 = arith.constant 0 : i32
    return %arg0, %arg1 : i32, i32
  }
}

module attributes {stable_mosaic.version = 11 : i64} {
  func.func @_matmul_bias_kernel(%arg0: i32, %arg1: i32, %arg2: i32, %arg3: memref<8x512xbf16, #tpu.memory_space<vmem>>, %arg4: memref<512x128xbf16, #tpu.memory_space<vmem>>, %arg5: memref<1x128xf32, #tpu.memory_space<vmem>>, %arg6: memref<8x128xf32, #tpu.memory_space<vmem>>, %arg7: memref<8x128xf32, #tpu.memory_space<vmem>>) attributes {dimension_semantics = [#tpu.dimension_semantics<parallel>, #tpu.dimension_semantics<parallel>, #tpu.dimension_semantics<arbitrary>], iteration_bounds = array<i64: 1, 1, 8>, scalar_prefetch = 0 : i64, scratch_operands = 1 : i64, tpu.core_type = #tpu.core_type<tc>, window_params = [{transform_indices = @transform_0, window_bounds = array<i64: 8, 512>}, {transform_indices = @transform_1, window_bounds = array<i64: 512, 128>}, {transform_indices = @transform_2, window_bounds = array<i64: 1, 128>}, {transform_indices = @transform_3, window_bounds = array<i64: 8, 128>}]} {
    %c0_i32 = arith.constant 0 : i32
    %0 = arith.cmpi eq, %arg2, %c0_i32 : i32
    %1 = arith.extui %0 : i1 to i32
    %c0_i32_0 = arith.constant 0 : i32
    %2 = arith.cmpi ne, %1, %c0_i32_0 : i32
    scf.if %2 {
      %cst_9 = arith.constant 0.000000e+00 : f32
      %12 = vector.broadcast %cst_9 : f32 to vector<8x128xf32>
      %c0_10 = arith.constant 0 : index
      %c0_11 = arith.constant 0 : index
      %13 = vector.load %arg7[%c0_10, %c0_11] : memref<8x128xf32, #tpu.memory_space<vmem>>, vector<8x128xf32>
      tpu.vector_store %arg7[%c0_10, %c0_11], %12 {strides = array<i32>} : memref<8x128xf32, #tpu.memory_space<vmem>>, vector<8x128xf32>,
    } else {
    }
    %c0 = arith.constant 0 : index
    %c0_1 = arith.constant 0 : index
    %3 = vector.load %arg7[%c0, %c0_1] : memref<8x128xf32, #tpu.memory_space<vmem>>, vector<8x128xf32>
    %c0_2 = arith.constant 0 : index
    %c0_3 = arith.constant 0 : index
    %4 = vector.load %arg3[%c0_2, %c0_3] : memref<8x512xbf16, #tpu.memory_space<vmem>>, vector<8x512xbf16>
    %c0_4 = arith.constant 0 : index
    %c0_5 = arith.constant 0 : index
    %5 = vector.load %arg4[%c0_4, %c0_5] : memref<512x128xbf16, #tpu.memory_space<vmem>>, vector<512x128xbf16>
    %cst = arith.constant dense<0.000000e+00> : vector<8x128xf32>
    %6 = tpu.matmul %4, %5, %cst {dimension_numbers = #tpu.dot_dimension_numbers<[1], [0], [0], [1], [0, 0, 1, 1], [], []>} : vector<8x512xbf16>, vector<512x128xbf16>, vector<8x128xf32> -> vector<8x128xf32>
    %7 = arith.addf %3, %6 : vector<8x128xf32>
    %c0_6 = arith.constant 0 : index
    %c0_7 = arith.constant 0 : index
    %8 = vector.load %arg7[%c0_6, %c0_7] : memref<8x128xf32, #tpu.memory_space<vmem>>, vector<8x128xf32>
    tpu.vector_store %arg7[%c0_6, %c0_7], %7 {strides = array<i32>} : memref<8x128xf32, #tpu.memory_space<vmem>>, vector<8x128xf32>,
    %c7_i32 = arith.constant 7 : i32
    %9 = arith.cmpi eq, %arg2, %c7_i32 : i32
    %10 = arith.extui %9 : i1 to i32
    %c0_i32_8 = arith.constant 0 : i32
    %11 = arith.cmpi ne, %10, %c0_i32_8 : i32
    scf.if %11 {
      %c0_9 = arith.constant 0 : index
      %c0_10 = arith.constant 0 : index
      %12 = vector.load %arg7[%c0_9, %c0_10] : memref<8x128xf32, #tpu.memory_space<vmem>>, vector<8x128xf32>
      %c0_11 = arith.constant 0 : index
      %c0_12 = arith.constant 0 : index
      %13 = vector.load %arg5[%c0_11, %c0_12] : memref<1x128xf32, #tpu.memory_space<vmem>>, vector<1x128xf32>
      %14 = vector.broadcast %13 : vector<1x128xf32> to vector<8x128xf32>
      %15 = arith.addf %12, %14 : vector<8x128xf32>
      %c0_13 = arith.constant 0 : index
      %c0_14 = arith.constant 0 : index
      %16 = vector.load %arg6[%c0_13, %c0_14] : memref<8x128xf32, #tpu.memory_space<vmem>>, vector<8x128xf32>
      tpu.vector_store %arg6[%c0_13, %c0_14], %15 {strides = array<i32>} : memref<8x128xf32, #tpu.memory_space<vmem>>, vector<8x128xf32>,
    } else {
    }
    return
  }
  func.func @transform_0(%arg0: i32, %arg1: i32, %arg2: i32) -> (i32, i32) {
    %c0_i32 = arith.constant 0 : i32
    return %arg0, %arg2 : i32, i32
  }
  func.func @transform_1(%arg0: i32, %arg1: i32, %arg2: i32) -> (i32, i32) {
    %c0_i32 = arith.constant 0 : i32
    return %arg2, %arg1 : i32, i32
  }
  func.func @transform_2(%arg0: i32, %arg1: i32, %arg2: i32) -> (i32, i32) {
    %c0_i32 = arith.constant 0 : i32
    %c0_i32_0 = arith.constant 0 : i32
    return %c0_i32, %arg1 : i32, i32
  }
  func.func @transform_3(%arg0: i32, %arg1: i32, %arg2: i32) -> (i32, i32) {
    %c0_i32 = arith.constant 0 : i32
    return %arg0, %arg1 : i32, i32
  }
}

</mosaic_0001>

<bundles_post_ra>
// kernel: alexnet_forward.12
= control target key start
LH: loop header
LB: loop body
LE: loop exit
PB: predicated region body
PF: predicated region fallthrough
CT: control target
= control target key end

     0   :  { %s2131_s14 = smov 127   ;;  %s2132_s8 = smov 126   ;;  %s5607_s0 = inlined_call_operand.vmem [shape: f32[456,128], index: 0, kind: input, shape index: {}]   ;;  %s5608_s1 = inlined_call_operand.vmem [shape: f32[456,128], index: 1, kind: output, shape index: {}]  }
   0x1   :  { %v10_v0 = vld [vmem:[%s5607_s0 + $0x10] sm:$0xff]  ;;  %v8_v1 = vld [vmem:[%s5607_s0] sm:$0xff]  ;;  %v11_v2 = vld [vmem:[%s5607_s0 + $0x18] sm:$0xff]  ;;  %s2134_s9 = smov 2  }
   0x2   :  { %v2154_v3 = vmul.f32 %v10_v0, %v10_v0  ;;  %v2156_v4 = vmul.f32 %v8_v1, %v8_v1  ;;  %v9_v5 = vld [vmem:[%s5607_s0 + $0x8] sm:$0xff]  ;;  %v2165_v6 = vmul.f32 %v11_v2, %v11_v2  ;;  %v12_v9 = vld [vmem:[%s5607_s0 + $0x20] sm:$0xff]  ;;  %v15_v12 = vld [vmem:[%s5607_s0 + $0x38] sm:$0xff] }
   0x3   :  { %v2167_v7 = vmul.f32 %v9_v5, %v9_v5  ;;  %v13_v8 = vld [vmem:[%s5607_s0 + $0x28] sm:$0xff]  ;;  %v2181_v11 = vmul.f32 %v12_v9, %v12_v9  ;;  %v14_v13 = vld [vmem:[%s5607_s0 + $0x30] sm:$0xff]  ;;  %v2193_v14 = vmul.f32 %v15_v12, %v15_v12  ;;  %v16_v17 = vld [vmem:[%s5607_s0 + $0x40] sm:$0xff] }
   0x4   :  { %128 = vrot.lane.b32.xlu1 %v2154_v3, %s2131_s14  ;;  %124 = vrot.lane.b32.xlu0 %v2156_v4, %s2131_s14  ;;  %v2179_v10 = vmul.f32 %v13_v8, %v13_v8  ;;  %v2195_v15 = vmul.f32 %v14_v13, %v14_v13  ;;  %v17_v16 = vld [vmem:[%s5607_s0 + $0x48] sm:$0xff]  ;;  %v2209_v19 = vmul.f32 %v16_v17, %v16_v17  ;;  %v19_v20 = vld [vmem:[%s5607_s0 + $0x58] sm:$0xff] }
   0x5   :  { %v2207_v18 = vmul.f32 %v17_v16, %v17_v16  ;;  %v18_v21 = vld [vmem:[%s5607_s0 + $0x50] sm:$0xff]  ;;  %v2221_v22 = vmul.f32 %v19_v20, %v19_v20  ;;  %v21_v24 = vld [vmem:[%s5607_s0 + $0x68] sm:$0xff]  ;;  %v20_v25 = vld [vmem:[%s5607_s0 + $0x60] sm:$0xff] }
   0x6   :  { %v2223_v23 = vmul.f32 %v18_v21, %v18_v21  ;;  %v2235_v26 = vmul.f32 %v21_v24, %v21_v24  ;;  %v2237_v27 = vmul.f32 %v20_v25, %v20_v25  ;;  %v23_v28 = vld [vmem:[%s5607_s0 + $0x78] sm:$0xff]  ;;  %v22_v29 = vld [vmem:[%s5607_s0 + $0x70] sm:$0xff]  ;;  %v25_v32 = vld [vmem:[%s5607_s0 + $0x88] sm:$0xff] }
   0x7   :  { %v2249_v30 = vmul.f32 %v23_v28, %v23_v28  ;;  %v2251_v31 = vmul.f32 %v22_v29, %v22_v29  ;;  %v24_v33 = vld [vmem:[%s5607_s0 + $0x80] sm:$0xff]  ;;  %v2263_v34 = vmul.f32 %v25_v32, %v25_v32  ;;  %v27_v36 = vld [vmem:[%s5607_s0 + $0x98] sm:$0xff]  ;;  %v26_v37 = vld [vmem:[%s5607_s0 + $0x90] sm:$0xff] }
   0x8   :  { %130 = vrot.lane.b32.xlu1 %v2165_v6, %s2131_s14  ;;  %126 = vrot.lane.b32.xlu0 %v2167_v7, %s2131_s14  ;;  %v2265_v35 = vmul.f32 %v24_v33, %v24_v33  ;;  %v2277_v38 = vmul.f32 %v27_v36, %v27_v36  ;;  %v2279_v39 = vmul.f32 %v26_v37, %v26_v37  ;;  %v29_v40 = vld [vmem:[%s5607_s0 + $0xa8] sm:$0xff]  ;;  %v28_v41 = vld [vmem:[%s5607_s0 + $0xa0] sm:$0xff] }
   0x9   :  { %v2291_v42 = vmul.f32 %v29_v40, %v29_v40  ;;  %v2293_v43 = vmul.f32 %v28_v41, %v28_v41  ;;  %v31_v44 = vld [vmem:[%s5607_s0 + $0xb8] sm:$0xff]  ;;  %v30_v45 = vld [vmem:[%s5607_s0 + $0xb0] sm:$0xff]  ;;  %v33_v48 = vld [vmem:[%s5607_s0 + $0xc8] sm:$0xff] }
   0xa   :  { %v2305_v46 = vmul.f32 %v31_v44, %v31_v44  ;;  %v2307_v47 = vmul.f32 %v30_v45, %v30_v45  ;;  %v32_v49 = vld [vmem:[%s5607_s0 + $0xc0] sm:$0xff]  ;;  %v2319_v50 = vmul.f32 %v33_v48, %v33_v48  ;;  %v35_v52 = vld [vmem:[%s5607_s0 + $0xd8] sm:$0xff]  ;;  %v34_v53 = vld [vmem:[%s5607_s0 + $0xd0] sm:$0xff] }
   0xb   :  { %v2321_v51 = vmul.f32 %v32_v49, %v32_v49  ;;  %v2333_v54 = vmul.f32 %v35_v52, %v35_v52  ;;  %v2335_v55 = vmul.f32 %v34_v53, %v34_v53  ;;  %v37_v56 = vld [vmem:[%s5607_s0 + $0xe8] sm:$0xff]  ;;  %v36_v57 = vld [vmem:[%s5607_s0 + $0xe0] sm:$0xff]  ;;  %v39_v60 = vld [vmem:[%s5607_s0 + $0xf8] sm:$0xff] }
   0xc   :  { %134 = vrot.lane.b32.xlu1 %v2179_v10, %s2131_s14  ;;  %132 = vrot.lane.b32.xlu0 %v2181_v11, %s2131_s14  ;;  %v2347_v58 = vmul.f32 %v37_v56, %v37_v56  ;;  %v2349_v59 = vmul.f32 %v36_v57, %v36_v57  ;;  %v38_v61 = vld [vmem:[%s5607_s0 + $0xf0] sm:$0xff]  ;;  %v2361_v62 = vmul.f32 %v39_v60, %v39_v60  ;;  %v41_v0 = vld [vmem:[%s5607_s0 + $0x108] sm:$0xff] }
   0xd   :  { %v2363_v63 = vmul.f32 %v38_v61, %v38_v61  ;;  %v40_v1 = vld [vmem:[%s5607_s0 + $0x100] sm:$0xff]  ;;  %v2375_v2 = vmul.f32 %v41_v0, %v41_v0  ;;  %v43_v8 = vld [vmem:[%s5607_s0 + $0x118] sm:$0xff]  ;;  %v42_v9 = vld [vmem:[%s5607_s0 + $0x110] sm:$0xff] }
   0xe   :  { %v2377_v5 = vmul.f32 %v40_v1, %v40_v1  ;;  %v2389_v12 = vmul.f32 %v43_v8, %v43_v8  ;;  %v2391_v13 = vmul.f32 %v42_v9, %v42_v9  ;;  %v45_v16 = vld [vmem:[%s5607_s0 + $0x128] sm:$0xff]  ;;  %v44_v17 = vld [vmem:[%s5607_s0 + $0x120] sm:$0xff]  ;;  %v47_v24 = vld [vmem:[%s5607_s0 + $0x138] sm:$0xff] }
   0xf   :  { %v2403_v20 = vmul.f32 %v45_v16, %v45_v16  ;;  %v2405_v21 = vmul.f32 %v44_v17, %v44_v17  ;;  %v46_v25 = vld [vmem:[%s5607_s0 + $0x130] sm:$0xff]  ;;  %v2417_v28 = vmul.f32 %v47_v24, %v47_v24  ;;  %v49_v32 = vld [vmem:[%s5607_s0 + $0x148] sm:$0xff]  ;;  %v48_v33 = vld [vmem:[%s5607_s0 + $0x140] sm:$0xff] }
  0x10   :  { %138 = vrot.lane.b32.xlu1 %v2193_v14, %s2131_s14  ;;  %136 = vrot.lane.b32.xlu0 %v2195_v15, %s2131_s14  ;;  %v2419_v29 = vmul.f32 %v46_v25, %v46_v25  ;;  %v2431_v36 = vmul.f32 %v49_v32, %v49_v32  ;;  %v2433_v37 = vmul.f32 %v48_v33, %v48_v33  ;;  %v51_v40 = vld [vmem:[%s5607_s0 + $0x158] sm:$0xff]  ;;  %v50_v41 = vld [vmem:[%s5607_s0 + $0x150] sm:$0xff] }
  0x11   :  { %v2445_v44 = vmul.f32 %v51_v40, %v51_v40  ;;  %v2447_v45 = vmul.f32 %v50_v41, %v50_v41  ;;  %v53_v48 = vld [vmem:[%s5607_s0 + $0x168] sm:$0xff]  ;;  %v52_v49 = vld [vmem:[%s5607_s0 + $0x160] sm:$0xff]  ;;  %v55_v56 = vld [vmem:[%s5607_s0 + $0x178] sm:$0xff] }
  0x12   :  { %v2459_v52 = vmul.f32 %v53_v48, %v53_v48  ;;  %v2461_v53 = vmul.f32 %v52_v49, %v52_v49  ;;  %v54_v57 = vld [vmem:[%s5607_s0 + $0x170] sm:$0xff]  ;;  %v2473_v60 = vmul.f32 %v55_v56, %v55_v56  ;;  %v57_v0 = vld [vmem:[%s5607_s0 + $0x188] sm:$0xff]  ;;  %v56_v1 = vld [vmem:[%s5607_s0 + $0x180] sm:$0xff] }
  0x13   :  { %v2475_v61 = vmul.f32 %v54_v57, %v54_v57  ;;  %v2487_v8 = vmul.f32 %v57_v0, %v57_v0  ;;  %v2489_v9 = vmul.f32 %v56_v1, %v56_v1  ;;  %v59_v16 = vld [vmem:[%s5607_s0 + $0x198] sm:$0xff]  ;;  %v58_v17 = vld [vmem:[%s5607_s0 + $0x190] sm:$0xff]  ;;  %v61_v32 = vld [vmem:[%s5607_s0 + $0x1a8] sm:$0xff] }
  0x14   :  { %142 = vrot.lane.b32.xlu1 %v2207_v18, %s2131_s14  ;;  %140 = vrot.lane.b32.xlu0 %v2209_v19, %s2131_s14  ;;  %5629 = vst [vmem:[#allocation2_spill] sm:$0xff] %v2459_v52  ;;  %5630 = vst [vmem:[#allocation3_spill] sm:$0xff] %v2473_v60  ;;  %v2501_v24 = vmul.f32 %v59_v16, %v59_v16  ;;  %v2503_v25 = vmul.f32 %v58_v17, %v58_v17  ;;  %v60_v33 = vld [vmem:[%s5607_s0 + $0x1a0] sm:$0xff]  ;;  %v63_v48 = vld [vmem:[%s5607_s0 + $0x1b8] sm:$0xff] }
  0x15   :  { %5631 = vst [vmem:[#allocation4_spill] sm:$0xff] %v2475_v61  ;;  %5632 = vst [vmem:[#allocation5_spill] sm:$0xff] %v2487_v8  ;;  %v2515_v40 = vmul.f32 %v61_v32, %v61_v32  ;;  %v2517_v41 = vmul.f32 %v60_v33, %v60_v33  ;;  %v62_v49 = vld [vmem:[%s5607_s0 + $0x1b0] sm:$0xff]  ;;  %v2529_v56 = vmul.f32 %v63_v48, %v63_v48  ;;  %v64_v0 = vld [vmem:[%s5607_s0 + $0x1c0] sm:$0xff] }
  0x16   :  { %5633 = vst [vmem:[#allocation6_spill] sm:$0xff] %v2489_v9  ;;  %5634 = vst [vmem:[#allocation7_spill] sm:$0xff] %v2501_v24  ;;  %v2531_v57 = vmul.f32 %v62_v49, %v62_v49  ;;  %v2540_v1 = vmul.f32 %v64_v0, %v64_v0 }
  0x17   :  { %5635 = vst [vmem:[#allocation8_spill] sm:$0xff] %v2503_v25  ;;  %5636 = vst [vmem:[#allocation9_spill] sm:$0xff] %v2515_v40 }
  0x18   :  { %146 = vrot.lane.b32.xlu1 %v2221_v22, %s2131_s14  ;;  %144 = vrot.lane.b32.xlu0 %v2223_v23, %s2131_s14  ;;  %5637 = vst [vmem:[#allocation10_spill] sm:$0xff] %v2517_v41  ;;  %5638 = vst [vmem:[#allocation11_spill] sm:$0xff] %v2529_v56 }
  0x19   :  { %5639 = vst [vmem:[#allocation12_spill] sm:$0xff] %v2531_v57  ;;  %5640 = vst [vmem:[#allocation13_spill] sm:$0xff] %v2540_v1 }
  0x1c   :  { %150 = vrot.lane.b32.xlu1 %v2235_v26, %s2131_s14  ;;  %148 = vrot.lane.b32.xlu0 %v2237_v27, %s2131_s14 }
  0x20   :  { %154 = vrot.lane.b32.xlu1 %v2249_v30, %s2131_s14  ;;  %152 = vrot.lane.b32.xlu0 %v2251_v31, %s2131_s14 }
  0x24   :  { %158 = vrot.lane.b32.xlu1 %v2263_v34, %s2131_s14  ;;  %156 = vrot.lane.b32.xlu0 %v2265_v35, %s2131_s14 }
  0x28   :  { %162 = vrot.lane.b32.xlu1 %v2277_v38, %s2131_s14  ;;  %160 = vrot.lane.b32.xlu0 %v2279_v39, %s2131_s14 }
  0x2c   :  { %166 = vrot.lane.b32.xlu1 %v2291_v42, %s2131_s14  ;;  %164 = vrot.lane.b32.xlu0 %v2293_v43, %s2131_s14 }
  0x30   :  { %170 = vrot.lane.b32.xlu1 %v2305_v46, %s2131_s14  ;;  %168 = vrot.lane.b32.xlu0 %v2307_v47, %s2131_s14 }
  0x34   :  { %174 = vrot.lane.b32.xlu1 %v2319_v50, %s2131_s14  ;;  %172 = vrot.lane.b32.xlu0 %v2321_v51, %s2131_s14 }
  0x38   :  { %178 = vrot.lane.b32.xlu1 %v2333_v54, %s2131_s14  ;;  %176 = vrot.lane.b32.xlu0 %v2335_v55, %s2131_s14 }
  0x3c   :  { %182 = vrot.lane.b32.xlu1 %v2347_v58, %s2131_s14  ;;  %180 = vrot.lane.b32.xlu0 %v2349_v59, %s2131_s14 }
  0x40   :  { %186 = vrot.lane.b32.xlu1 %v2361_v62, %s2131_s14  ;;  %184 = vrot.lane.b32.xlu0 %v2363_v63, %s2131_s14 }
  0x44   :  { %190 = vrot.lane.b32.xlu1 %v2375_v2, %s2131_s14  ;;  %188 = vrot.lane.b32.xlu0 %v2377_v5, %s2131_s14 }
  0x48   :  { %194 = vrot.lane.b32.xlu1 %v2389_v12, %s2131_s14  ;;  %192 = vrot.lane.b32.xlu0 %v2391_v13, %s2131_s14 }
  0x4c   :  { %198 = vrot.lane.b32.xlu1 %v2403_v20, %s2131_s14  ;;  %196 = vrot.lane.b32.xlu0 %v2405_v21, %s2131_s14 }
  0x50   :  { %202 = vrot.lane.b32.xlu1 %v2417_v28, %s2131_s14  ;;  %200 = vrot.lane.b32.xlu0 %v2419_v29, %s2131_s14 }
  0x54   :  { %206 = vrot.lane.b32.xlu1 %v2431_v36, %s2131_s14  ;;  %204 = vrot.lane.b32.xlu0 %v2433_v37, %s2131_s14 }
  0x58   :  { %210 = vrot.lane.b32.xlu1 %v2445_v44, %s2131_s14  ;;  %208 = vrot.lane.b32.xlu0 %v2447_v45, %s2131_s14 }
  0x5c   :  { %214 = vrot.lane.b32.xlu1 %v2459_v52, %s2131_s14  ;;  %212 = vrot.lane.b32.xlu0 %v2461_v53, %s2131_s14 }
  0x60   :  { %218 = vrot.lane.b32.xlu1 %v2473_v60, %s2131_s14  ;;  %216 = vrot.lane.b32.xlu0 %v2475_v61, %s2131_s14 }
  0x64   :  { %222 = vrot.lane.b32.xlu1 %v2487_v8, %s2131_s14  ;;  %220 = vrot.lane.b32.xlu0 %v2489_v9, %s2131_s14 }
  0x68   :  { %226 = vrot.lane.b32.xlu1 %v2501_v24, %s2131_s14  ;;  %224 = vrot.lane.b32.xlu0 %v2503_v25, %s2131_s14 }
  0x6c   :  { %230 = vrot.lane.b32.xlu1 %v2515_v40, %s2131_s14  ;;  %228 = vrot.lane.b32.xlu0 %v2517_v41, %s2131_s14 }
  0x70   :  { %234 = vrot.lane.b32.xlu1 %v2529_v56, %s2131_s14  ;;  %232 = vrot.lane.b32.xlu0 %v2531_v57, %s2131_s14 }
  0x74   :  { %353 = vrot.lane.b32.xlu1 %v2156_v4, %s2132_s8  ;;  %236 = vrot.lane.b32.xlu0 %v2540_v1, %s2131_s14  ;;  %s2133_s14 = smov 1  }
  0x76   :  { %v2546_v16 = vpop.permute.xlu1 %128  ;;  %v2548_v17 = vpop.permute.xlu0 %124 }
  0x78   :  { %357 = vrot.lane.b32.xlu1 %v2154_v3, %s2132_s8  ;;  %355 = vrot.lane.b32.xlu0 %v2167_v7, %s2132_s8 }
  0x7a   :  { %v2554_v32 = vpop.permute.xlu1 %130  ;;  %v2556_v33 = vpop.permute.xlu0 %126 }
  0x7b   :  { %5641 = vst [vmem:[#allocation14_spill] sm:$0xff] %v2554_v32  ;;  %5642 = vst [vmem:[#allocation15_spill] sm:$0xff] %v2556_v33 }
  0x7c   :  { %361 = vrot.lane.b32.xlu1 %v2181_v11, %s2132_s8  ;;  %359 = vrot.lane.b32.xlu0 %v2165_v6, %s2132_s8 }
  0x7e   :  { %v2562_v48 = vpop.permute.xlu1 %134  ;;  %v2564_v49 = vpop.permute.xlu0 %132 }
  0x7f   :  { %5643 = vst [vmem:[#allocation16_spill] sm:$0xff] %v2562_v48  ;;  %5644 = vst [vmem:[#allocation17_spill] sm:$0xff] %v2564_v49 }
  0x80   :  { %365 = vrot.lane.b32.xlu1 %v2195_v15, %s2132_s8  ;;  %363 = vrot.lane.b32.xlu0 %v2179_v10, %s2132_s8 }
  0x82   :  { %v2570_v0 = vpop.permute.xlu1 %138  ;;  %v2572_v32 = vpop.permute.xlu0 %136 }
  0x83   :  { %5645 = vst [vmem:[#allocation18_spill] sm:$0xff] %v2570_v0  ;;  %5646 = vst [vmem:[#allocation19_spill] sm:$0xff] %v2572_v32 }
  0x84   :  { %369 = vrot.lane.b32.xlu1 %v2209_v19, %s2132_s8  ;;  %367 = vrot.lane.b32.xlu0 %v2193_v14, %s2132_s8 }
  0x86   :  { %v2578_v33 = vpop.permute.xlu1 %142  ;;  %v2580_v48 = vpop.permute.xlu0 %140 }
  0x87   :  { %5647 = vst [vmem:[#allocation20_spill] sm:$0xff] %v2578_v33  ;;  %5648 = vst [vmem:[#allocation21_spill] sm:$0xff] %v2580_v48 }
  0x88   :  { %373 = vrot.lane.b32.xlu1 %v2223_v23, %s2132_s8  ;;  %371 = vrot.lane.b32.xlu0 %v2207_v18, %s2132_s8 }
  0x8a   :  { %v2586_v49 = vpop.permute.xlu1 %146  ;;  %v2588_v0 = vpop.permute.xlu0 %144 }
  0x8b   :  { %5649 = vst [vmem:[#allocation22_spill] sm:$0xff] %v2586_v49  ;;  %5650 = vst [vmem:[#allocation23_spill] sm:$0xff] %v2588_v0 }
  0x8c   :  { %377 = vrot.lane.b32.xlu1 %v2237_v27, %s2132_s8  ;;  %375 = vrot.lane.b32.xlu0 %v2221_v22, %s2132_s8 }
  0x8e   :  { %v2594_v32 = vpop.permute.xlu1 %150  ;;  %v2596_v33 = vpop.permute.xlu0 %148 }
  0x8f   :  { %5651 = vst [vmem:[#allocation24_spill] sm:$0xff] %v2594_v32  ;;  %5652 = vst [vmem:[#allocation25_spill] sm:$0xff] %v2596_v33 }
  0x90   :  { %381 = vrot.lane.b32.xlu1 %v2251_v31, %s2132_s8  ;;  %379 = vrot.lane.b32.xlu0 %v2235_v26, %s2132_s8 }
  0x92   :  { %v2602_v48 = vpop.permute.xlu1 %154  ;;  %v2604_v49 = vpop.permute.xlu0 %152 }
  0x93   :  { %5653 = vst [vmem:[#allocation26_spill] sm:$0xff] %v2602_v48  ;;  %5654 = vst [vmem:[#allocation27_spill] sm:$0xff] %v2604_v49 }
  0x94   :  { %385 = vrot.lane.b32.xlu1 %v2265_v35, %s2132_s8  ;;  %383 = vrot.lane.b32.xlu0 %v2249_v30, %s2132_s8 }
  0x96   :  { %v2610_v0 = vpop.permute.xlu1 %158  ;;  %v2612_v32 = vpop.permute.xlu0 %156 }
  0x97   :  { %5655 = vst [vmem:[#allocation28_spill] sm:$0xff] %v2610_v0  ;;  %5656 = vst [vmem:[#allocation29_spill] sm:$0xff] %v2612_v32 }
  0x98   :  { %389 = vrot.lane.b32.xlu1 %v2279_v39, %s2132_s8  ;;  %387 = vrot.lane.b32.xlu0 %v2263_v34, %s2132_s8 }
  0x9a   :  { %v2618_v33 = vpop.permute.xlu1 %162  ;;  %v2620_v48 = vpop.permute.xlu0 %160 }
  0x9b   :  { %5657 = vst [vmem:[#allocation30_spill] sm:$0xff] %v2618_v33  ;;  %5658 = vst [vmem:[#allocation31_spill] sm:$0xff] %v2620_v48 }
  0x9c   :  { %393 = vrot.lane.b32.xlu1 %v2293_v43, %s2132_s8  ;;  %391 = vrot.lane.b32.xlu0 %v2277_v38, %s2132_s8 }
  0x9e   :  { %v2626_v49 = vpop.permute.xlu1 %166  ;;  %v2628_v0 = vpop.permute.xlu0 %164 }
  0x9f   :  { %5659 = vst [vmem:[#allocation32_spill] sm:$0xff] %v2626_v49  ;;  %5660 = vst [vmem:[#allocation33_spill] sm:$0xff] %v2628_v0 }
  0xa0   :  { %397 = vrot.lane.b32.xlu1 %v2307_v47, %s2132_s8  ;;  %395 = vrot.lane.b32.xlu0 %v2291_v42, %s2132_s8 }
  0xa2   :  { %v2634_v32 = vpop.permute.xlu1 %170  ;;  %v2636_v33 = vpop.permute.xlu0 %168 }
  0xa3   :  { %5661 = vst [vmem:[#allocation34_spill] sm:$0xff] %v2634_v32  ;;  %5662 = vst [vmem:[#allocation35_spill] sm:$0xff] %v2636_v33 }
  0xa4   :  { %401 = vrot.lane.b32.xlu1 %v2321_v51, %s2132_s8  ;;  %399 = vrot.lane.b32.xlu0 %v2305_v46, %s2132_s8 }
  0xa6   :  { %v2642_v48 = vpop.permute.xlu1 %174  ;;  %v2644_v49 = vpop.permute.xlu0 %172 }
  0xa7   :  { %5663 = vst [vmem:[#allocation36_spill] sm:$0xff] %v2642_v48  ;;  %5664 = vst [vmem:[#allocation37_spill] sm:$0xff] %v2644_v49 }
  0xa8   :  { %405 = vrot.lane.b32.xlu1 %v2335_v55, %s2132_s8  ;;  %403 = vrot.lane.b32.xlu0 %v2319_v50, %s2132_s8 }
  0xaa   :  { %v2650_v0 = vpop.permute.xlu1 %178  ;;  %v2652_v32 = vpop.permute.xlu0 %176 }
  0xab   :  { %5665 = vst [vmem:[#allocation38_spill] sm:$0xff] %v2650_v0  ;;  %5666 = vst [vmem:[#allocation39_spill] sm:$0xff] %v2652_v32 }
  0xac   :  { %409 = vrot.lane.b32.xlu1 %v2349_v59, %s2132_s8  ;;  %407 = vrot.lane.b32.xlu0 %v2333_v54, %s2132_s8 }
  0xae   :  { %v2658_v33 = vpop.permute.xlu1 %182  ;;  %v2660_v48 = vpop.permute.xlu0 %180 }
  0xaf   :  { %5667 = vst [vmem:[#allocation40_spill] sm:$0xff] %v2658_v33  ;;  %5668 = vst [vmem:[#allocation41_spill] sm:$0xff] %v2660_v48 }
  0xb0   :  { %413 = vrot.lane.b32.xlu1 %v2363_v63, %s2132_s8  ;;  %411 = vrot.lane.b32.xlu0 %v2347_v58, %s2132_s8 }
  0xb2   :  { %v2666_v49 = vpop.permute.xlu1 %186  ;;  %v2668_v0 = vpop.permute.xlu0 %184 }
  0xb3   :  { %5669 = vst [vmem:[#allocation42_spill] sm:$0xff] %v2666_v49  ;;  %5670 = vst [vmem:[#allocation43_spill] sm:$0xff] %v2668_v0 }
  0xb4   :  { %417 = vrot.lane.b32.xlu1 %v2377_v5, %s2132_s8  ;;  %415 = vrot.lane.b32.xlu0 %v2361_v62, %s2132_s8 }
  0xb6   :  { %v2674_v32 = vpop.permute.xlu1 %190  ;;  %v2676_v33 = vpop.permute.xlu0 %188 }
  0xb7   :  { %5671 = vst [vmem:[#allocation44_spill] sm:$0xff] %v2674_v32  ;;  %5672 = vst [vmem:[#allocation45_spill] sm:$0xff] %v2676_v33 }
  0xb8   :  { %421 = vrot.lane.b32.xlu1 %v2391_v13, %s2132_s8  ;;  %419 = vrot.lane.b32.xlu0 %v2375_v2, %s2132_s8 }
  0xba   :  { %v2682_v48 = vpop.permute.xlu1 %194  ;;  %v2684_v49 = vpop.permute.xlu0 %192 }
  0xbb   :  { %5673 = vst [vmem:[#allocation46_spill] sm:$0xff] %v2682_v48  ;;  %5674 = vst [vmem:[#allocation47_spill] sm:$0xff] %v2684_v49 }
  0xbc   :  { %425 = vrot.lane.b32.xlu1 %v2405_v21, %s2132_s8  ;;  %423 = vrot.lane.b32.xlu0 %v2389_v12, %s2132_s8 }
  0xbe   :  { %v2690_v0 = vpop.permute.xlu1 %198  ;;  %v2692_v32 = vpop.permute.xlu0 %196 }
  0xbf   :  { %5675 = vst [vmem:[#allocation48_spill] sm:$0xff] %v2690_v0  ;;  %5676 = vst [vmem:[#allocation49_spill] sm:$0xff] %v2692_v32 }
  0xc0   :  { %429 = vrot.lane.b32.xlu1 %v2419_v29, %s2132_s8  ;;  %427 = vrot.lane.b32.xlu0 %v2403_v20, %s2132_s8 }
  0xc2   :  { %v2698_v33 = vpop.permute.xlu1 %202  ;;  %v2700_v48 = vpop.permute.xlu0 %200 }
  0xc3   :  { %5677 = vst [vmem:[#allocation50_spill] sm:$0xff] %v2698_v33  ;;  %5678 = vst [vmem:[#allocation51_spill] sm:$0xff] %v2700_v48 }
  0xc4   :  { %433 = vrot.lane.b32.xlu1 %v2433_v37, %s2132_s8  ;;  %431 = vrot.lane.b32.xlu0 %v2417_v28, %s2132_s8 }
  0xc6   :  { %v2706_v49 = vpop.permute.xlu1 %206  ;;  %v2708_v0 = vpop.permute.xlu0 %204 }
  0xc7   :  { %5679 = vst [vmem:[#allocation52_spill] sm:$0xff] %v2706_v49  ;;  %5680 = vst [vmem:[#allocation53_spill] sm:$0xff] %v2708_v0 }
  0xc8   :  { %437 = vrot.lane.b32.xlu1 %v2447_v45, %s2132_s8  ;;  %435 = vrot.lane.b32.xlu0 %v2431_v36, %s2132_s8 }
  0xca   :  { %v2714_v32 = vpop.permute.xlu1 %210  ;;  %v2716_v33 = vpop.permute.xlu0 %208 }
  0xcb   :  { %5681 = vst [vmem:[#allocation54_spill] sm:$0xff] %v2714_v32  ;;  %5682 = vst [vmem:[#allocation55_spill] sm:$0xff] %v2716_v33 }
  0xcc   :  { %441 = vrot.lane.b32.xlu1 %v2461_v53, %s2132_s8  ;;  %439 = vrot.lane.b32.xlu0 %v2445_v44, %s2132_s8 }
  0xce   :  { %v2722_v48 = vpop.permute.xlu1 %214  ;;  %v2724_v49 = vpop.permute.xlu0 %212 }
  0xcf   :  { %5683 = vst [vmem:[#allocation56_spill] sm:$0xff] %v2722_v48  ;;  %5684 = vst [vmem:[#allocation57_spill] sm:$0xff] %v2724_v49 }
  0xd0   :  { %445 = vrot.lane.b32.xlu1 %v2475_v61, %s2132_s8  ;;  %443 = vrot.lane.b32.xlu0 %v2459_v52, %s2132_s8 }
  0xd2   :  { %v2730_v0 = vpop.permute.xlu1 %218  ;;  %v2732_v32 = vpop.permute.xlu0 %216 }
  0xd3   :  { %5685 = vst [vmem:[#allocation58_spill] sm:$0xff] %v2730_v0  ;;  %5686 = vst [vmem:[#allocation59_spill] sm:$0xff] %v2732_v32 }
  0xd4   :  { %449 = vrot.lane.b32.xlu1 %v2489_v9, %s2132_s8  ;;  %447 = vrot.lane.b32.xlu0 %v2473_v60, %s2132_s8 }
  0xd6   :  { %v2738_v33 = vpop.permute.xlu1 %222  ;;  %v2740_v48 = vpop.permute.xlu0 %220 }
  0xd7   :  { %5687 = vst [vmem:[#allocation60_spill] sm:$0xff] %v2738_v33  ;;  %5688 = vst [vmem:[#allocation61_spill] sm:$0xff] %v2740_v48 }
  0xd8   :  { %453 = vrot.lane.b32.xlu1 %v2503_v25, %s2132_s8  ;;  %451 = vrot.lane.b32.xlu0 %v2487_v8, %s2132_s8 }
  0xda   :  { %v2746_v49 = vpop.permute.xlu1 %226  ;;  %v2748_v0 = vpop.permute.xlu0 %224 }
  0xdb   :  { %5689 = vst [vmem:[#allocation62_spill] sm:$0xff] %v2746_v49  ;;  %5690 = vst [vmem:[#allocation63_spill] sm:$0xff] %v2748_v0 }
  0xdc   :  { %457 = vrot.lane.b32.xlu1 %v2517_v41, %s2132_s8  ;;  %455 = vrot.lane.b32.xlu0 %v2501_v24, %s2132_s8 }
  0xde   :  { %v2754_v32 = vpop.permute.xlu1 %230  ;;  %v2756_v33 = vpop.permute.xlu0 %228 }
  0xdf   :  { %5691 = vst [vmem:[#allocation64_spill] sm:$0xff] %v2754_v32  ;;  %5692 = vst [vmem:[#allocation65_spill] sm:$0xff] %v2756_v33 }
  0xe0   :  { %461 = vrot.lane.b32.xlu1 %v2531_v57, %s2132_s8  ;;  %459 = vrot.lane.b32.xlu0 %v2515_v40, %s2132_s8 }
  0xe2   :  { %v2762_v48 = vpop.permute.xlu1 %234  ;;  %v2764_v49 = vpop.permute.xlu0 %232 }
  0xe3   :  { %5693 = vst [vmem:[#allocation66_spill] sm:$0xff] %v2762_v48  ;;  %5694 = vst [vmem:[#allocation67_spill] sm:$0xff] %v2764_v49 }
  0xe4   :  { %465 = vrot.lane.b32.xlu1 %v2540_v1, %s2132_s8  ;;  %463 = vrot.lane.b32.xlu0 %v2529_v56, %s2132_s8 }
  0xe6   :  { %v2770_v0 = vpop.permute.xlu1 %353  ;;  %v2772_v32 = vpop.permute.xlu0 %236 }
  0xe7   :  { %5695 = vst [vmem:[#allocation68_spill] sm:$0xff] %v2770_v0  ;;  %5696 = vst [vmem:[#allocation69_spill] sm:$0xff] %v2772_v32 }
  0xe8   :  { %584 = vrot.lane.b32.xlu1 %v2167_v7, %s2133_s14  ;;  %582 = vrot.lane.b32.xlu0 %v2156_v4, %s2133_s14 }
  0xea   :  { %v2778_v48 = vpop.permute.xlu1 %357  ;;  %v2780_v49 = vpop.permute.xlu0 %355 }
  0xeb   :  { %5697 = vst [vmem:[#allocation70_spill] sm:$0xff] %v2778_v48  ;;  %5698 = vst [vmem:[#allocation71_spill] sm:$0xff] %v2780_v49 }
  0xec   :  { %588 = vrot.lane.b32.xlu1 %v2165_v6, %s2133_s14  ;;  %586 = vrot.lane.b32.xlu0 %v2154_v3, %s2133_s14 }
  0xee   :  { %v2786_v0 = vpop.permute.xlu1 %361  ;;  %v2788_v32 = vpop.permute.xlu0 %359 }
  0xef   :  { %5699 = vst [vmem:[#allocation72_spill] sm:$0xff] %v2786_v0  ;;  %5700 = vst [vmem:[#allocation73_spill] sm:$0xff] %v2788_v32 }
  0xf0   :  { %592 = vrot.lane.b32.xlu1 %v2179_v10, %s2133_s14  ;;  %590 = vrot.lane.b32.xlu0 %v2181_v11, %s2133_s14 }
  0xf2   :  { %v2794_v33 = vpop.permute.xlu1 %365  ;;  %v2796_v48 = vpop.permute.xlu0 %363 }
  0xf3   :  { %5701 = vst [vmem:[#allocation74_spill] sm:$0xff] %v2794_v33  ;;  %5702 = vst [vmem:[#allocation75_spill] sm:$0xff] %v2796_v48 }
  0xf4   :  { %596 = vrot.lane.b32.xlu1 %v2193_v14, %s2133_s14  ;;  %594 = vrot.lane.b32.xlu0 %v2195_v15, %s2133_s14 }
  0xf6   :  { %v2802_v49 = vpop.permute.xlu1 %369  ;;  %v2804_v0 = vpop.permute.xlu0 %367 }
  0xf7   :  { %5703 = vst [vmem:[#allocation76_spill] sm:$0xff] %v2802_v49  ;;  %5704 = vst [vmem:[#allocation77_spill] sm:$0xff] %v2804_v0 }
  0xf8   :  { %600 = vrot.lane.b32.xlu1 %v2207_v18, %s2133_s14  ;;  %598 = vrot.lane.b32.xlu0 %v2209_v19, %s2133_s14 }
  0xfa   :  { %v2810_v32 = vpop.permute.xlu1 %373  ;;  %v2812_v33 = vpop.permute.xlu0 %371 }
  0xfb   :  { %5705 = vst [vmem:[#allocation78_spill] sm:$0xff] %v2810_v32  ;;  %5706 = vst [vmem:[#allocation79_spill] sm:$0xff] %v2812_v33 }
  0xfc   :  { %604 = vrot.lane.b32.xlu1 %v2221_v22, %s2133_s14  ;;  %602 = vrot.lane.b32.xlu0 %v2223_v23, %s2133_s14 }
  0xfe   :  { %v2818_v48 = vpop.permute.xlu1 %377  ;;  %v2820_v49 = vpop.permute.xlu0 %375 }
  0xff   :  { %5707 = vst [vmem:[#allocation80_spill] sm:$0xff] %v2818_v48  ;;  %5708 = vst [vmem:[#allocation81_spill] sm:$0xff] %v2820_v49 }
 0x100   :  { %608 = vrot.lane.b32.xlu1 %v2235_v26, %s2133_s14  ;;  %606 = vrot.lane.b32.xlu0 %v2237_v27, %s2133_s14 }
 0x102   :  { %v2826_v0 = vpop.permute.xlu1 %381  ;;  %v2828_v32 = vpop.permute.xlu0 %379 }
 0x103   :  { %5709 = vst [vmem:[#allocation82_spill] sm:$0xff] %v2826_v0  ;;  %5710 = vst [vmem:[#allocation83_spill] sm:$0xff] %v2828_v32 }
 0x104   :  { %612 = vrot.lane.b32.xlu1 %v2249_v30, %s2133_s14  ;;  %610 = vrot.lane.b32.xlu0 %v2251_v31, %s2133_s14 }
 0x106   :  { %v2834_v33 = vpop.permute.xlu1 %385  ;;  %v2836_v48 = vpop.permute.xlu0 %383 }
 0x107   :  { %5711 = vst [vmem:[#allocation84_spill] sm:$0xff] %v2834_v33  ;;  %5712 = vst [vmem:[#allocation85_spill] sm:$0xff] %v2836_v48 }
 0x108   :  { %616 = vrot.lane.b32.xlu1 %v2263_v34, %s2133_s14  ;;  %614 = vrot.lane.b32.xlu0 %v2265_v35, %s2133_s14 }
 0x10a   :  { %v2842_v49 = vpop.permute.xlu1 %389  ;;  %v2844_v0 = vpop.permute.xlu0 %387 }
 0x10b   :  { %5713 = vst [vmem:[#allocation86_spill] sm:$0xff] %v2842_v49  ;;  %5714 = vst [vmem:[#allocation87_spill] sm:$0xff] %v2844_v0 }
 0x10c   :  { %620 = vrot.lane.b32.xlu1 %v2277_v38, %s2133_s14  ;;  %618 = vrot.lane.b32.xlu0 %v2279_v39, %s2133_s14 }
 0x10e   :  { %v2850_v32 = vpop.permute.xlu1 %393  ;;  %v2852_v33 = vpop.permute.xlu0 %391 }
 0x10f   :  { %5715 = vst [vmem:[#allocation88_spill] sm:$0xff] %v2850_v32  ;;  %5716 = vst [vmem:[#allocation89_spill] sm:$0xff] %v2852_v33 }
 0x110   :  { %624 = vrot.lane.b32.xlu1 %v2291_v42, %s2133_s14  ;;  %622 = vrot.lane.b32.xlu0 %v2293_v43, %s2133_s14 }
 0x112   :  { %v2858_v48 = vpop.permute.xlu1 %397  ;;  %v2860_v49 = vpop.permute.xlu0 %395 }
 0x113   :  { %5717 = vst [vmem:[#allocation90_spill] sm:$0xff] %v2858_v48  ;;  %5718 = vst [vmem:[#allocation91_spill] sm:$0xff] %v2860_v49 }
 0x114   :  { %628 = vrot.lane.b32.xlu1 %v2305_v46, %s2133_s14  ;;  %626 = vrot.lane.b32.xlu0 %v2307_v47, %s2133_s14 }
 0x116   :  { %v2866_v0 = vpop.permute.xlu1 %401  ;;  %v2868_v32 = vpop.permute.xlu0 %399 }
 0x117   :  { %5719 = vst [vmem:[#allocation92_spill] sm:$0xff] %v2866_v0  ;;  %5720 = vst [vmem:[#allocation93_spill] sm:$0xff] %v2868_v32 }
 0x118   :  { %632 = vrot.lane.b32.xlu1 %v2319_v50, %s2133_s14  ;;  %630 = vrot.lane.b32.xlu0 %v2321_v51, %s2133_s14 }
 0x11a   :  { %v2874_v33 = vpop.permute.xlu1 %405  ;;  %v2876_v48 = vpop.permute.xlu0 %403 }
 0x11b   :  { %5721 = vst [vmem:[#allocation94_spill] sm:$0xff] %v2874_v33  ;;  %5722 = vst [vmem:[#allocation95_spill] sm:$0xff] %v2876_v48 }
 0x11c   :  { %636 = vrot.lane.b32.xlu1 %v2333_v54, %s2133_s14  ;;  %634 = vrot.lane.b32.xlu0 %v2335_v55, %s2133_s14 }
 0x11e   :  { %v2882_v49 = vpop.permute.xlu1 %409  ;;  %v2884_v0 = vpop.permute.xlu0 %407 }
 0x11f   :  { %5723 = vst [vmem:[#allocation96_spill] sm:$0xff] %v2882_v49  ;;  %5724 = vst [vmem:[#allocation97_spill] sm:$0xff] %v2884_v0 }
 0x120   :  { %640 = vrot.lane.b32.xlu1 %v2347_v58, %s2133_s14  ;;  %638 = vrot.lane.b32.xlu0 %v2349_v59, %s2133_s14 }
 0x122   :  { %v2890_v32 = vpop.permute.xlu1 %413  ;;  %v2892_v33 = vpop.permute.xlu0 %411 }
 0x123   :  { %5725 = vst [vmem:[#allocation98_spill] sm:$0xff] %v2890_v32  ;;  %5726 = vst [vmem:[#allocation99_spill] sm:$0xff] %v2892_v33 }
 0x124   :  { %644 = vrot.lane.b32.xlu1 %v2361_v62, %s2133_s14  ;;  %642 = vrot.lane.b32.xlu0 %v2363_v63, %s2133_s14 }
 0x126   :  { %v2898_v48 = vpop.permute.xlu1 %417  ;;  %v2900_v49 = vpop.permute.xlu0 %415 }
 0x127   :  { %5727 = vst [vmem:[#allocation100_spill] sm:$0xff] %v2898_v48  ;;  %5728 = vst [vmem:[#allocation101_spill] sm:$0xff] %v2900_v49 }
 0x128   :  { %648 = vrot.lane.b32.xlu1 %v2375_v2, %s2133_s14  ;;  %646 = vrot.lane.b32.xlu0 %v2377_v5, %s2133_s14 }
 0x12a   :  { %v2906_v0 = vpop.permute.xlu1 %421  ;;  %v2908_v32 = vpop.permute.xlu0 %419 }
 0x12b   :  { %5729 = vst [vmem:[#allocation102_spill] sm:$0xff] %v2906_v0  ;;  %5730 = vst [vmem:[#allocation103_spill] sm:$0xff] %v2908_v32 }
 0x12c   :  { %652 = vrot.lane.b32.xlu1 %v2389_v12, %s2133_s14  ;;  %650 = vrot.lane.b32.xlu0 %v2391_v13, %s2133_s14 }
 0x12e   :  { %v2914_v33 = vpop.permute.xlu1 %425  ;;  %v2916_v48 = vpop.permute.xlu0 %423 }
 0x12f   :  { %5731 = vst [vmem:[#allocation104_spill] sm:$0xff] %v2914_v33  ;;  %5732 = vst [vmem:[#allocation105_spill] sm:$0xff] %v2916_v48 }
 0x130   :  { %656 = vrot.lane.b32.xlu1 %v2403_v20, %s2133_s14  ;;  %654 = vrot.lane.b32.xlu0 %v2405_v21, %s2133_s14 }
 0x132   :  { %v2922_v49 = vpop.permute.xlu1 %429  ;;  %v2924_v0 = vpop.permute.xlu0 %427 }
 0x133   :  { %5733 = vst [vmem:[#allocation106_spill] sm:$0xff] %v2922_v49  ;;  %5734 = vst [vmem:[#allocation107_spill] sm:$0xff] %v2924_v0 }
 0x134   :  { %660 = vrot.lane.b32.xlu1 %v2417_v28, %s2133_s14  ;;  %658 = vrot.lane.b32.xlu0 %v2419_v29, %s2133_s14 }
 0x136   :  { %v2930_v32 = vpop.permute.xlu1 %433  ;;  %v2932_v33 = vpop.permute.xlu0 %431 }
 0x137   :  { %5735 = vst [vmem:[#allocation108_spill] sm:$0xff] %v2930_v32  ;;  %5736 = vst [vmem:[#allocation109_spill] sm:$0xff] %v2932_v33 }
 0x138   :  { %664 = vrot.lane.b32.xlu1 %v2431_v36, %s2133_s14  ;;  %662 = vrot.lane.b32.xlu0 %v2433_v37, %s2133_s14 }
 0x13a   :  { %v2938_v48 = vpop.permute.xlu1 %437  ;;  %v2940_v49 = vpop.permute.xlu0 %435 }
 0x13b   :  { %5737 = vst [vmem:[#allocation110_spill] sm:$0xff] %v2938_v48  ;;  %5738 = vst [vmem:[#allocation111_spill] sm:$0xff] %v2940_v49 }
 0x13c   :  { %668 = vrot.lane.b32.xlu1 %v2445_v44, %s2133_s14  ;;  %666 = vrot.lane.b32.xlu0 %v2447_v45, %s2133_s14 }
 0x13e   :  { %v2946_v0 = vpop.permute.xlu1 %441  ;;  %v2948_v32 = vpop.permute.xlu0 %439 }
 0x13f   :  { %5739 = vst [vmem:[#allocation112_spill] sm:$0xff] %v2946_v0  ;;  %5740 = vst [vmem:[#allocation113_spill] sm:$0xff] %v2948_v32 }
 0x140   :  { %672 = vrot.lane.b32.xlu1 %v2459_v52, %s2133_s14  ;;  %670 = vrot.lane.b32.xlu0 %v2461_v53, %s2133_s14 }
 0x142   :  { %v2954_v33 = vpop.permute.xlu1 %445  ;;  %v2956_v48 = vpop.permute.xlu0 %443 }
 0x143   :  { %5741 = vst [vmem:[#allocation114_spill] sm:$0xff] %v2954_v33  ;;  %5742 = vst [vmem:[#allocation115_spill] sm:$0xff] %v2956_v48 }
 0x144   :  { %676 = vrot.lane.b32.xlu1 %v2473_v60, %s2133_s14  ;;  %674 = vrot.lane.b32.xlu0 %v2475_v61, %s2133_s14 }
 0x146   :  { %v2962_v49 = vpop.permute.xlu1 %449  ;;  %v2964_v0 = vpop.permute.xlu0 %447 }
 0x147   :  { %5743 = vst [vmem:[#allocation116_spill] sm:$0xff] %v2962_v49  ;;  %5744 = vst [vmem:[#allocation117_spill] sm:$0xff] %v2964_v0 }
 0x148   :  { %680 = vrot.lane.b32.xlu1 %v2487_v8, %s2133_s14  ;;  %678 = vrot.lane.b32.xlu0 %v2489_v9, %s2133_s14 }
 0x14a   :  { %v2970_v32 = vpop.permute.xlu1 %453  ;;  %v2972_v33 = vpop.permute.xlu0 %451 }
 0x14b   :  { %5745 = vst [vmem:[#allocation118_spill] sm:$0xff] %v2970_v32  ;;  %5746 = vst [vmem:[#allocation119_spill] sm:$0xff] %v2972_v33 }
 0x14c   :  { %684 = vrot.lane.b32.xlu1 %v2501_v24, %s2133_s14  ;;  %682 = vrot.lane.b32.xlu0 %v2503_v25, %s2133_s14 }
 0x14e   :  { %v2978_v48 = vpop.permute.xlu1 %457  ;;  %v2980_v49 = vpop.permute.xlu0 %455 }
 0x14f   :  { %5747 = vst [vmem:[#allocation120_spill] sm:$0xff] %v2978_v48  ;;  %5748 = vst [vmem:[#allocation121_spill] sm:$0xff] %v2980_v49 }
 0x150   :  { %688 = vrot.lane.b32.xlu1 %v2515_v40, %s2133_s14  ;;  %686 = vrot.lane.b32.xlu0 %v2517_v41, %s2133_s14  ;;  %v5777_v41 = vld [vmem:[#allocation17_spill] sm:$0xff] }
 0x152   :  { %v2986_v0 = vpop.permute.xlu1 %461  ;;  %v2988_v32 = vpop.permute.xlu0 %459 }
 0x153   :  { %5749 = vst [vmem:[#allocation122_spill] sm:$0xff] %v2986_v0  ;;  %5750 = vst [vmem:[#allocation123_spill] sm:$0xff] %v2988_v32 }
 0x154   :  { %692 = vrot.lane.b32.xlu1 %v2529_v56, %s2133_s14  ;;  %690 = vrot.lane.b32.xlu0 %v2531_v57, %s2133_s14  ;;  %v5775_v57 = vld [vmem:[#allocation15_spill] sm:$0xff]  ;;  %v5776_v56 = vld [vmem:[#allocation16_spill] sm:$0xff] }
 0x156   :  { %v2994_v33 = vpop.permute.xlu1 %465  ;;  %v2996_v48 = vpop.permute.xlu0 %463 }
 0x157   :  { %5751 = vst [vmem:[#allocation124_spill] sm:$0xff] %v2994_v33  ;;  %5752 = vst [vmem:[#allocation125_spill] sm:$0xff] %v2996_v48 }
 0x158   :  { %811 = vrot.lane.b32.xlu1 %v2156_v4, %s2134_s9  ;;  %694 = vrot.lane.b32.xlu0 %v2540_v1, %s2133_s14 }
 0x15a   :  { %v3002_v0 = vpop.permute.xlu1 %584  ;;  %v3004_v32 = vpop.permute.xlu0 %582 }
 0x15b   :  { %5753 = vst [vmem:[#allocation126_spill] sm:$0xff] %v3002_v0  ;;  %5754 = vst [vmem:[#allocation127_spill] sm:$0xff] %v3004_v32 }
 0x15c   :  { %815 = vrot.lane.b32.xlu1 %v2154_v3, %s2134_s9  ;;  %813 = vrot.lane.b32.xlu0 %v2167_v7, %s2134_s9 }
 0x15e   :  { %v3010_v33 = vpop.permute.xlu1 %588  ;;  %v3012_v48 = vpop.permute.xlu0 %586 }
 0x15f   :  { %5755 = vst [vmem:[#allocation128_spill] sm:$0xff] %v3010_v33  ;;  %5756 = vst [vmem:[#allocation129_spill] sm:$0xff] %v3012_v48 }
 0x160   :  { %819 = vrot.lane.b32.xlu1 %v2181_v11, %s2134_s9  ;;  %817 = vrot.lane.b32.xlu0 %v2165_v6, %s2134_s9 }
 0x162   :  { %v3018_v49 = vpop.permute.xlu1 %592  ;;  %v3020_v0 = vpop.permute.xlu0 %590 }
 0x163   :  { %5757 = vst [vmem:[#allocation130_spill] sm:$0xff] %v3018_v49  ;;  %5758 = vst [vmem:[#allocation131_spill] sm:$0xff] %v3020_v0 }
 0x164   :  { %823 = vrot.lane.b32.xlu1 %v2195_v15, %s2134_s9  ;;  %821 = vrot.lane.b32.xlu0 %v2179_v10, %s2134_s9 }
 0x166   :  { %v3026_v32 = vpop.permute.xlu1 %596  ;;  %v3028_v33 = vpop.permute.xlu0 %594 }
 0x167   :  { %5759 = vst [vmem:[#allocation132_spill] sm:$0xff] %v3026_v32  ;;  %5760 = vst [vmem:[#allocation133_spill] sm:$0xff] %v3028_v33 }
 0x168   :  { %827 = vrot.lane.b32.xlu1 %v2209_v19, %s2134_s9  ;;  %825 = vrot.lane.b32.xlu0 %v2193_v14, %s2134_s9 }
 0x16a   :  { %v3034_v48 = vpop.permute.xlu1 %600  ;;  %v3036_v49 = vpop.permute.xlu0 %598 }
 0x16b   :  { %5761 = vst [vmem:[#allocation134_spill] sm:$0xff] %v3034_v48  ;;  %5762 = vst [vmem:[#allocation135_spill] sm:$0xff] %v3036_v49  ;;  %v122_v49 = vlaneseq }
 0x16c   :  { %831 = vrot.lane.b32.xlu1 %v2223_v23, %s2134_s9  ;;  %829 = vrot.lane.b32.xlu0 %v2207_v18, %s2134_s9 }
 0x16d   :  { %v3062_v1 = vand.u32 127, %v122_v49 }
 0x16e   :  { %v3042_v0 = vpop.permute.xlu1 %604  ;;  %v3044_v32 = vpop.permute.xlu0 %602 }
 0x16f   :  { %5763 = vst [vmem:[#allocation136_spill] sm:$0xff] %v3042_v0  ;;  %5764 = vst [vmem:[#allocation137_spill] sm:$0xff] %v3044_v32  ;;  %vm238_vm0 = vcmp.lt.s32.totalorder %v3062_v1, 127  ;;  %vm467_vm1 = vcmp.lt.s32.totalorder %v3062_v1, 126  ;;  %vm696_vm2 = vcmp.ge.s32.totalorder %v3062_v1, 1  ;;  %vm925_vm3 = vcmp.ge.s32.totalorder %v3062_v1, 2 }
 0x170   :  { %835 = vrot.lane.b32.xlu1 %v2237_v27, %s2134_s9  ;;  %833 = vrot.lane.b32.xlu0 %v2221_v22, %s2134_s9  ;;  %v243_v40 = vsel %vm238_vm0, %v5777_v41, 0.0 }
 0x172   :  { %v3050_v33 = vpop.permute.xlu1 %608  ;;  %v3052_v48 = vpop.permute.xlu0 %606 }
 0x173   :  { %5765 = vst [vmem:[#allocation138_spill] sm:$0xff] %v3050_v33  ;;  %5766 = vst [vmem:[#allocation139_spill] sm:$0xff] %v3052_v48 }
 0x174   :  { %839 = vrot.lane.b32.xlu1 %v2251_v31, %s2134_s9  ;;  %837 = vrot.lane.b32.xlu0 %v2235_v26, %s2134_s9 }
 0x176   :  { %v3058_v0 = vpop.permute.xlu1 %612  ;;  %v3060_v32 = vpop.permute.xlu0 %610 }
 0x177   :  { %5767 = vst [vmem:[#allocation140_spill] sm:$0xff] %v3058_v0  ;;  %5768 = vst [vmem:[#allocation141_spill] sm:$0xff] %v3060_v32  ;;  %v241_v0 = vsel %vm238_vm0, %v2546_v16, 0.0  ;;  %v240_v16 = vsel %vm238_vm0, %v5775_v57, 0.0  ;;  %v5782_v57 = vld [vmem:[#allocation19_spill] sm:$0xff] }
 0x178   :  { %843 = vrot.lane.b32.xlu1 %v2265_v35, %s2134_s9  ;;  %841 = vrot.lane.b32.xlu0 %v2249_v30, %s2134_s9 }
 0x17a   :  { %v3068_v48 = vpop.permute.xlu1 %616  ;;  %v3070_v33 = vpop.permute.xlu0 %614 }
 0x17b   :  { %5769 = vst [vmem:[#allocation142_spill] sm:$0xff] %v3068_v48  ;;  %5770 = vst [vmem:[#allocation143_spill] sm:$0xff] %v3070_v33  ;;  %v239_v33 = vsel %vm238_vm0, %v2548_v17, 0.0  ;;  %v5773_v48 = vld [vmem:[#allocation14_spill] sm:$0xff]  ;;  %v244_v17 = vsel %vm238_vm0, %v5776_v56, 0.0  ;;  %v5783_v56 = vld [vmem:[#allocation20_spill] sm:$0xff] }
 0x17c   :  { %847 = vrot.lane.b32.xlu1 %v2279_v39, %s2134_s9  ;;  %845 = vrot.lane.b32.xlu0 %v2263_v34, %s2134_s9  ;;  %v248_v9 = vsel %vm238_vm0, %v5783_v56, 0.0 }
 0x17e   :  { %v3077_v49 = vpop.permute.xlu1 %620  ;;  %v3079_v32 = vpop.permute.xlu0 %618 }
 0x17f   :  { %5771 = vst [vmem:[#allocation144_spill] sm:$0xff] %v3077_v49  ;;  %5772 = vst [vmem:[#allocation145_spill] sm:$0xff] %v3079_v32  ;;  %v242_v49 = vsel %vm238_vm0, %v5773_v48, 0.0  ;;  %v3095_v32 = vadd.f32 %v241_v0, %v2154_v3  ;;  %v3111_v48 = vadd.f32 %v239_v33, %v2156_v4  ;;  %v5781_v3 = vld [vmem:[#allocation18_spill] sm:$0xff] }
 0x180   :  { %851 = vrot.lane.b32.xlu1 %v2293_v43, %s2134_s9  ;;  %849 = vrot.lane.b32.xlu0 %v2277_v38, %s2134_s9  ;;  %v246_v0 = vsel %vm238_vm0, %v5781_v3, 0.0  ;;  %v3123_v41 = vadd.f32 %v242_v49, %v2165_v6  ;;  %v5786_v33 = vld [vmem:[#allocation22_spill] sm:$0xff]  ;;  %v5787_v3 = vld [vmem:[#allocation23_spill] sm:$0xff]  ;;  %v3139_v6 = vadd.f32 %v240_v16, %v2167_v7  ;;  %v3142_v49 = vadd.f32 %v244_v17, %v2179_v10  ;;  %v5789_v7 = vld [vmem:[#allocation25_spill] sm:$0xff] }
 0x181   :  { %5774 = vst [vmem:[#allocation14_spill] sm:$0xff] %v3095_v32  ;;  %5780 = vst [vmem:[#allocation17_spill] sm:$0xff] %v3111_v48  ;;  %v245_v32 = vsel %vm238_vm0, %v5782_v57, 0.0  ;;  %v249_v48 = vsel %vm238_vm0, %v5787_v3, 0.0  ;;  %v5788_v57 = vld [vmem:[#allocation24_spill] sm:$0xff]  ;;  %v251_v10 = vsel %vm238_vm0, %v5789_v7, 0.0 }
 0x182   :  { %v3106_v25 = vpop.permute.xlu1 %624  ;;  %v3108_v24 = vpop.permute.xlu0 %622  ;;  %5784 = vst [vmem:[#allocation18_spill] sm:$0xff] %v3123_v41  ;;  %v252_v56 = vsel %vm238_vm0, %v5788_v57, 0.0  ;;  %v3154_v3 = vadd.f32 %v245_v32, %v2195_v15  ;;  %v3157_v41 = vadd.f32 %v248_v9, %v2207_v18  ;;  %v3173_v15 = vadd.f32 %v249_v48, %v2223_v23  ;;  %v5792_v32 = vld [vmem:[#allocation26_spill] sm:$0xff]  ;;  %v5793_v17 = vld [vmem:[#allocation27_spill] sm:$0xff]  ;;  %v5794_v57 = vld [vmem:[#allocation28_spill] sm:$0xff] }
 0x183   :  { %5778 = vst [vmem:[#allocation15_spill] sm:$0xff] %v3106_v25  ;;  %5779 = vst [vmem:[#allocation16_spill] sm:$0xff] %v3108_v24  ;;  %v5785_v25 = vld [vmem:[#allocation21_spill] sm:$0xff]  ;;  %v250_v24 = vsel %vm238_vm0, %v5786_v33, 0.0  ;;  %v3151_v33 = vadd.f32 %v246_v0, %v2193_v14  ;;  %v254_v18 = vsel %vm238_vm0, %v5792_v32, 0.0  ;;  %v3179_v9 = vadd.f32 %v252_v56, %v2235_v26  ;;  %v5798_v7 = vld [vmem:[#allocation32_spill] sm:$0xff] }
 0x184   :  { %v247_v4 = vsel %vm238_vm0, %v5785_v25, 0.0  ;;  %855 = vrot.lane.b32.xlu1 %v2307_v47, %s2134_s9  ;;  %853 = vrot.lane.b32.xlu0 %v2291_v42, %s2134_s9  ;;  %v3145_v25 = vadd.f32 %v243_v40, %v2181_v11  ;;  %v3170_v14 = vadd.f32 %v250_v24, %v2221_v22  ;;  %v253_v0 = vsel %vm238_vm0, %v5793_v17, 0.0  ;;  %v5795_v22 = vld [vmem:[#allocation29_spill] sm:$0xff]  ;;  %v5796_v24 = vld [vmem:[#allocation30_spill] sm:$0xff] }
 0x185   :  { %v3167_v40 = vadd.f32 %v247_v4, %v2209_v19  ;;  %v256_v19 = vsel %vm238_vm0, %v5794_v57, 0.0  ;;  %v255_v23 = vsel %vm238_vm0, %v5795_v22, 0.0  ;;  %v3195_v26 = vadd.f32 %v251_v10, %v2237_v27  ;;  %v5797_v4 = vld [vmem:[#allocation31_spill] sm:$0xff]  ;;  %v5800_v57 = vld [vmem:[#allocation33_spill] sm:$0xff]  ;;  %v5801_v10 = vld [vmem:[#allocation34_spill] sm:$0xff] }
 0x186   :  { %v3162_v16 = vpop.permute.xlu1 %628  ;;  %v3164_v11 = vpop.permute.xlu0 %626  ;;  %v258_v48 = vsel %vm238_vm0, %v5796_v24, 0.0  ;;  %v257_v56 = vsel %vm238_vm0, %v5797_v4, 0.0  ;;  %v260_v32 = vsel %vm238_vm0, %v5798_v7, 0.0  ;;  %v3207_v17 = vadd.f32 %v254_v18, %v2249_v30  ;;  %v5802_v24 = vld [vmem:[#allocation35_spill] sm:$0xff] }
 0x187   :  { %5790 = vst [vmem:[#allocation19_spill] sm:$0xff] %v3162_v16  ;;  %5791 = vst [vmem:[#allocation20_spill] sm:$0xff] %v3164_v11  ;;  %v259_v27 = vsel %vm238_vm0, %v5800_v57, 0.0  ;;  %v262_v22 = vsel %vm238_vm0, %v5801_v10, 0.0  ;;  %v261_v11 = vsel %vm238_vm0, %v5802_v24, 0.0  ;;  %v3223_v7 = vadd.f32 %v253_v0, %v2251_v31  ;;  %v5805_v57 = vld [vmem:[#allocation36_spill] sm:$0xff] }
 0x188   :  { %859 = vrot.lane.b32.xlu1 %v2321_v51, %s2134_s9  ;;  %857 = vrot.lane.b32.xlu0 %v2305_v46, %s2134_s9  ;;  %5799 = vst [vmem:[#allocation21_spill] sm:$0xff] %v3207_v17  ;;  %v3226_v30 = vadd.f32 %v256_v19, %v2263_v34  ;;  %v3229_v18 = vadd.f32 %v255_v23, %v2265_v35  ;;  %v264_v10 = vsel %vm238_vm0, %v5805_v57, 0.0  ;;  %v5806_v31 = vld [vmem:[#allocation37_spill] sm:$0xff]  ;;  %v5808_v23 = vld [vmem:[#allocation39_spill] sm:$0xff] }
 0x189   :  { %v3235_v17 = vadd.f32 %v258_v48, %v2277_v38  ;;  %v3238_v24 = vadd.f32 %v257_v56, %v2279_v39  ;;  %v263_v34 = vsel %vm238_vm0, %v5806_v31, 0.0  ;;  %v3251_v35 = vadd.f32 %v259_v27, %v2293_v43  ;;  %v5809_v56 = vld [vmem:[#allocation40_spill] sm:$0xff]  ;;  %v5814_v57 = vld [vmem:[#allocation43_spill] sm:$0xff] }
 0x18a   :  { %v3218_v4 = vpop.permute.xlu1 %632  ;;  %v3220_v16 = vpop.permute.xlu0 %630  ;;  %v3254_v38 = vadd.f32 %v262_v22, %v2305_v46  ;;  %v3257_v39 = vadd.f32 %v261_v11, %v2307_v47  ;;  %v3263_v19 = vadd.f32 %v264_v10, %v2319_v50  ;;  %v265_v48 = vsel %vm238_vm0, %v5808_v23, 0.0  ;;  %v5810_v46 = vld [vmem:[#allocation41_spill] sm:$0xff]  ;;  %v5815_v31 = vld [vmem:[#allocation44_spill] sm:$0xff] }
 0x18b   :  { %5803 = vst [vmem:[#allocation22_spill] sm:$0xff] %v3218_v4  ;;  %5804 = vst [vmem:[#allocation23_spill] sm:$0xff] %v3220_v16  ;;  %v3241_v16 = vadd.f32 %v260_v32, %v2291_v42  ;;  %v5807_v42 = vld [vmem:[#allocation38_spill] sm:$0xff]  ;;  %v268_v43 = vsel %vm238_vm0, %v5809_v56, 0.0  ;;  %v267_v47 = vsel %vm238_vm0, %v5810_v46, 0.0  ;;  %v3279_v27 = vadd.f32 %v263_v34, %v2321_v51  ;;  %v5816_v56 = vld [vmem:[#allocation45_spill] sm:$0xff] }
 0x18c   :  { %863 = vrot.lane.b32.xlu1 %v2335_v55, %s2134_s9  ;;  %861 = vrot.lane.b32.xlu0 %v2319_v50, %s2134_s9  ;;  %v266_v0 = vsel %vm238_vm0, %v5807_v42, 0.0  ;;  %v5813_v50 = vld [vmem:[#allocation42_spill] sm:$0xff]  ;;  %v269_v10 = vsel %vm238_vm0, %v5814_v57, 0.0  ;;  %v272_v42 = vsel %vm238_vm0, %v5815_v31, 0.0  ;;  %v271_v51 = vsel %vm238_vm0, %v5816_v56, 0.0  ;;  %v5819_v56 = vld [vmem:[#allocation48_spill] sm:$0xff] }
 0x18d   :  { %v270_v22 = vsel %vm238_vm0, %v5813_v50, 0.0  ;;  %v3291_v23 = vadd.f32 %v266_v0, %v2333_v54  ;;  %v5817_v34 = vld [vmem:[#allocation46_spill] sm:$0xff]  ;;  %v5818_v50 = vld [vmem:[#allocation47_spill] sm:$0xff]  ;;  %v3308_v0 = vadd.f32 %v265_v48, %v2335_v55  ;;  %v3311_v57 = vadd.f32 %v268_v43, %v2347_v58  ;;  %v5822_v55 = vld [vmem:[#allocation49_spill] sm:$0xff] }
 0x18e   :  { %v3274_v11 = vpop.permute.xlu1 %636  ;;  %v3276_v32 = vpop.permute.xlu0 %634  ;;  %v274_v46 = vsel %vm238_vm0, %v5817_v34, 0.0  ;;  %v3314_v31 = vadd.f32 %v267_v47, %v2349_v59  ;;  %v276_v34 = vsel %vm238_vm0, %v5819_v56, 0.0  ;;  %v275_v48 = vsel %vm238_vm0, %v5822_v55, 0.0  ;;  %v5828_v56 = vld [vmem:[#allocation50_spill] sm:$0xff]  ;;  %v5830_v55 = vld [vmem:[#allocation51_spill] sm:$0xff] }
 0x18f   :  { %5811 = vst [vmem:[#allocation24_spill] sm:$0xff] %v3274_v11  ;;  %5812 = vst [vmem:[#allocation25_spill] sm:$0xff] %v3276_v32  ;;  %v273_v32 = vsel %vm238_vm0, %v5818_v50, 0.0  ;;  %v3320_v50 = vadd.f32 %v270_v22, %v2361_v62  ;;  %v3323_v11 = vadd.f32 %v269_v10, %v2363_v63  ;;  %v3336_v47 = vadd.f32 %v271_v51, %v2377_v5 }
 0x190   :  { %867 = vrot.lane.b32.xlu1 %v2349_v59, %s2134_s9  ;;  %865 = vrot.lane.b32.xlu0 %v2333_v54, %s2134_s9  ;;  %v3326_v54 = vadd.f32 %v272_v42, %v2375_v2  ;;  %v3339_v22 = vadd.f32 %v274_v46, %v2389_v12  ;;  %v3342_v10 = vadd.f32 %v273_v32, %v2391_v13  ;;  %v278_v42 = vsel %vm238_vm0, %v5828_v56, 0.0  ;;  %v5832_v46 = vld [vmem:[#allocation53_spill] sm:$0xff]  ;;  %v5834_v56 = vld [vmem:[#allocation54_spill] sm:$0xff] }
 0x191   :  { %5820 = vst [vmem:[#allocation26_spill] sm:$0xff] %v3320_v50  ;;  %5825 = vst [vmem:[#allocation30_spill] sm:$0xff] %v3336_v47  ;;  %v3348_v4 = vadd.f32 %v276_v34, %v2403_v20  ;;  %v279_v32 = vsel %vm238_vm0, %v5832_v46, 0.0  ;;  %v3364_v34 = vadd.f32 %v275_v48, %v2405_v21  ;;  %v5839_v48 = vld [vmem:[#allocation58_spill] sm:$0xff] }
 0x192   :  { %5821 = vst [vmem:[#allocation27_spill] sm:$0xff] %v3326_v54  ;;  %v3331_v43 = vpop.permute.xlu1 %640  ;;  %v3333_v59 = vpop.permute.xlu0 %638  ;;  %5826 = vst [vmem:[#allocation31_spill] sm:$0xff] %v3339_v22  ;;  %v5836_v22 = vld [vmem:[#allocation56_spill] sm:$0xff]  ;;  %v5838_v54 = vld [vmem:[#allocation57_spill] sm:$0xff] }
 0x193   :  { %5823 = vst [vmem:[#allocation28_spill] sm:$0xff] %v3331_v43  ;;  %5824 = vst [vmem:[#allocation29_spill] sm:$0xff] %v3333_v59  ;;  %v277_v59 = vsel %vm238_vm0, %v5830_v55, 0.0  ;;  %v5831_v43 = vld [vmem:[#allocation52_spill] sm:$0xff]  ;;  %v282_v55 = vsel %vm238_vm0, %v5834_v56, 0.0  ;;  %v284_v46 = vsel %vm238_vm0, %v5836_v22, 0.0 }
 0x194   :  { %5827 = vst [vmem:[#allocation32_spill] sm:$0xff] %v3342_v10  ;;  %5829 = vst [vmem:[#allocation33_spill] sm:$0xff] %v3348_v4  ;;  %v280_v51 = vsel %vm238_vm0, %v5831_v43, 0.0  ;;  %871 = vrot.lane.b32.xlu1 %v2363_v63, %s2134_s9  ;;  %869 = vrot.lane.b32.xlu0 %v2347_v58, %s2134_s9  ;;  %v5835_v4 = vld [vmem:[#allocation55_spill] sm:$0xff]  ;;  %v3376_v63 = vadd.f32 %v278_v42, %v2417_v28  ;;  %v283_v58 = vsel %vm238_vm0, %v5838_v54, 0.0 }
 0x195   :  { %5833 = vst [vmem:[#allocation34_spill] sm:$0xff] %v3364_v34  ;;  %v281_v43 = vsel %vm238_vm0, %v5835_v4, 0.0  ;;  %v286_v34 = vsel %vm238_vm0, %v5839_v48, 0.0  ;;  %v5840_v56 = vld [vmem:[#allocation59_spill] sm:$0xff]  ;;  %v3392_v22 = vadd.f32 %v277_v59, %v2419_v29  ;;  %v3395_v42 = vadd.f32 %v280_v51, %v2431_v36  ;;  %v5847_v59 = vld [vmem:[#allocation61_spill] sm:$0xff] }
 0x196   :  { %5837 = vst [vmem:[#allocation35_spill] sm:$0xff] %v3376_v63  ;;  %v285_v10 = vsel %vm238_vm0, %v5840_v56, 0.0  ;;  %v3387_v4 = vpop.permute.xlu1 %644  ;;  %v3389_v50 = vpop.permute.xlu0 %642  ;;  %v3398_v54 = vadd.f32 %v279_v32, %v2433_v37  ;;  %v5844_v63 = vld [vmem:[#allocation60_spill] sm:$0xff]  ;;  %v3404_v47 = vadd.f32 %v282_v55, %v2445_v44  ;;  %v3407_v56 = vadd.f32 %v281_v43, %v2447_v45 }
 0x197   :  { %5841 = vst [vmem:[#allocation36_spill] sm:$0xff] %v3387_v4  ;;  %5842 = vst [vmem:[#allocation37_spill] sm:$0xff] %v3389_v50  ;;  %v288_v48 = vsel %vm238_vm0, %v5844_v63, 0.0  ;;  %v3410_v50 = vadd.f32 %v284_v46, %v2459_v52  ;;  %v287_v51 = vsel %vm238_vm0, %v5847_v59, 0.0  ;;  %v3420_v32 = vadd.f32 %v283_v58, %v2461_v53  ;;  %v5851_v46 = vld [vmem:[#allocation62_spill] sm:$0xff]  ;;  %v5854_v4 = vld [vmem:[#allocation64_spill] sm:$0xff] }
 0x198   :  { %5843 = vst [vmem:[#allocation38_spill] sm:$0xff] %v3395_v42  ;;  %5845 = vst [vmem:[#allocation39_spill] sm:$0xff] %v3404_v47  ;;  %875 = vrot.lane.b32.xlu1 %v2377_v5, %s2134_s9  ;;  %873 = vrot.lane.b32.xlu0 %v2361_v62, %s2134_s9  ;;  %v3423_v55 = vadd.f32 %v286_v34, %v2473_v60  ;;  %v3426_v43 = vadd.f32 %v285_v10, %v2475_v61  ;;  %v290_v63 = vsel %vm238_vm0, %v5851_v46, 0.0  ;;  %v5853_v5 = vld [vmem:[#allocation63_spill] sm:$0xff]  ;;  %v5855_v34 = vld [vmem:[#allocation65_spill] sm:$0xff] }
 0x199   :  { %5846 = vst [vmem:[#allocation40_spill] sm:$0xff] %v3410_v50  ;;  %5848 = vst [vmem:[#allocation41_spill] sm:$0xff] %v3420_v32  ;;  %v3432_v59 = vadd.f32 %v288_v48, %v2487_v8  ;;  %v289_v62 = vsel %vm238_vm0, %v5853_v5, 0.0  ;;  %v292_v58 = vsel %vm238_vm0, %v5854_v4, 0.0  ;;  %v291_v10 = vsel %vm238_vm0, %v5855_v34, 0.0  ;;  %v5858_v46 = vld [vmem:[#allocation6_spill] sm:$0xff] }
 0x19a   :  { %5849 = vst [vmem:[#allocation42_spill] sm:$0xff] %v3423_v55  ;;  %5850 = vst [vmem:[#allocation43_spill] sm:$0xff] %v3426_v43  ;;  %v3443_v60 = vpop.permute.xlu1 %648  ;;  %v3445_v55 = vpop.permute.xlu0 %646  ;;  %v3448_v50 = vadd.f32 %v287_v51, %v5858_v46  ;;  %v5860_v48 = vld [vmem:[#allocation66_spill] sm:$0xff]  ;;  %v5861_v5 = vld [vmem:[#allocation67_spill] sm:$0xff] }
 0x19b   :  { %5852 = vst [vmem:[#allocation44_spill] sm:$0xff] %v3432_v59  ;;  %5856 = vst [vmem:[#allocation45_spill] sm:$0xff] %v3443_v60  ;;  %v294_v8 = vsel %vm238_vm0, %v5860_v48, 0.0  ;;  %v293_v59 = vsel %vm238_vm0, %v5861_v5, 0.0  ;;  %v5862_v4 = vld [vmem:[#allocation68_spill] sm:$0xff]  ;;  %v5863_v34 = vld [vmem:[#allocation7_spill] sm:$0xff] }
 0x19c   :  { %5857 = vst [vmem:[#allocation46_spill] sm:$0xff] %v3445_v55  ;;  %5859 = vst [vmem:[#allocation47_spill] sm:$0xff] %v3448_v50  ;;  %v468_v43 = vsel %vm467_vm1, %v5862_v4, 0.0  ;;  %v3460_v47 = vadd.f32 %v290_v63, %v5863_v34  ;;  %v5865_v60 = vld [vmem:[#allocation69_spill] sm:$0xff]  ;;  %v5866_v55 = vld [vmem:[#allocation70_spill] sm:$0xff]  ;;  %879 = vrot.lane.b32.xlu1 %v2391_v13, %s2134_s9  ;;  %877 = vrot.lane.b32.xlu0 %v2375_v2, %s2134_s9 }
 0x19d   :  { %v295_v51 = vsel %vm238_vm0, %v5865_v60, 0.0  ;;  %v470_v46 = vsel %vm467_vm1, %v5866_v55, 0.0  ;;  %v5867_v48 = vld [vmem:[#allocation71_spill] sm:$0xff]  ;;  %v5868_v63 = vld [vmem:[#allocation8_spill] sm:$0xff]  ;;  %v5869_v4 = vld [vmem:[#allocation9_spill] sm:$0xff] }
 0x19e   :  { %5864 = vst [vmem:[#allocation48_spill] sm:$0xff] %v3460_v47  ;;  %v469_v50 = vsel %vm467_vm1, %v5867_v48, 0.0  ;;  %v3476_v5 = vadd.f32 %v289_v62, %v5868_v63  ;;  %v3479_v34 = vadd.f32 %v292_v58, %v5869_v4  ;;  %v5870_v60 = vld [vmem:[#allocation10_spill] sm:$0xff]  ;;  %v5871_v55 = vld [vmem:[#allocation72_spill] sm:$0xff]  ;;  %v5872_v48 = vld [vmem:[#allocation11_spill] sm:$0xff]  ;;  %v3499_v4 = vpop.permute.xlu1 %652 }
 0x19f   :  { %v3482_v47 = vadd.f32 %v291_v10, %v5870_v60  ;;  %v472_v32 = vsel %vm467_vm1, %v5871_v55, 0.0  ;;  %v3488_v42 = vadd.f32 %v294_v8, %v5872_v48  ;;  %v5873_v13 = vld [vmem:[#allocation12_spill] sm:$0xff]  ;;  %v5874_v2 = vld [vmem:[#allocation17_spill] sm:$0xff]  ;;  %5876 = vst [vmem:[#allocation49_spill] sm:$0xff] %v3499_v4  ;;  %v3501_v10 = vpop.permute.xlu0 %650  ;;  %v5879_v55 = vld [vmem:[#allocation14_spill] sm:$0xff] }
 0x1a0   :  { %v3491_v52 = vadd.f32 %v293_v59, %v5873_v13  ;;  %v3494_v61 = vadd.f32 %v468_v43, %v5874_v2  ;;  %v5875_v62 = vld [vmem:[#allocation73_spill] sm:$0xff]  ;;  %5877 = vst [vmem:[#allocation50_spill] sm:$0xff] %v3501_v10  ;;  %v3507_v8 = vadd.f32 %v470_v46, %v5879_v55  ;;  %v3510_v59 = vadd.f32 %v469_v50, %v3139_v6  ;;  %v5880_v48 = vld [vmem:[#allocation74_spill] sm:$0xff]  ;;  %v5883_v4 = vld [vmem:[#allocation76_spill] sm:$0xff] }
 0x1a1   :  { %v471_v58 = vsel %vm467_vm1, %v5875_v62, 0.0  ;;  %v5878_v60 = vld [vmem:[#allocation13_spill] sm:$0xff]  ;;  %v474_v43 = vsel %vm467_vm1, %v5880_v48, 0.0  ;;  %v3516_v2 = vadd.f32 %v472_v32, %v3145_v25  ;;  %v5882_v62 = vld [vmem:[#allocation75_spill] sm:$0xff]  ;;  %883 = vrot.lane.b32.xlu1 %v2405_v21, %s2134_s9  ;;  %881 = vrot.lane.b32.xlu0 %v2389_v12, %s2134_s9  ;;  %v5885_v25 = vld [vmem:[#allocation18_spill] sm:$0xff] }
 0x1a2   :  { %v3504_v63 = vadd.f32 %v295_v51, %v5878_v60  ;;  %v473_v10 = vsel %vm467_vm1, %v5882_v62, 0.0  ;;  %v476_v51 = vsel %vm467_vm1, %v5883_v4, 0.0  ;;  %v5884_v46 = vld [vmem:[#allocation77_spill] sm:$0xff]  ;;  %v3532_v50 = vadd.f32 %v471_v58, %v5885_v25  ;;  %v5886_v32 = vld [vmem:[#allocation78_spill] sm:$0xff]  ;;  %v5887_v55 = vld [vmem:[#allocation79_spill] sm:$0xff] }
 0x1a3   :  { %5881 = vst [vmem:[#allocation51_spill] sm:$0xff] %v3516_v2  ;;  %v475_v6 = vsel %vm467_vm1, %v5884_v46, 0.0  ;;  %v478_v48 = vsel %vm467_vm1, %v5886_v32, 0.0  ;;  %v477_v4 = vsel %vm467_vm1, %v5887_v55, 0.0  ;;  %v5888_v62 = vld [vmem:[#allocation80_spill] sm:$0xff]  ;;  %v3544_v21 = vadd.f32 %v474_v43, %v3154_v3  ;;  %v5890_v60 = vld [vmem:[#allocation81_spill] sm:$0xff]  ;;  %v3555_v55 = vpop.permute.xlu1 %656  ;;  %v3557_v2 = vpop.permute.xlu0 %654 }
 0x1a4   :  { %v480_v46 = vsel %vm467_vm1, %v5888_v62, 0.0  ;;  %v479_v12 = vsel %vm467_vm1, %v5890_v60, 0.0  ;;  %v5891_v58 = vld [vmem:[#allocation82_spill] sm:$0xff]  ;;  %v5892_v32 = vld [vmem:[#allocation83_spill] sm:$0xff]  ;;  %5893 = vst [vmem:[#allocation53_spill] sm:$0xff] %v3557_v2  ;;  %v3560_v62 = vadd.f32 %v473_v10, %v3142_v49  ;;  %v3563_v3 = vadd.f32 %v476_v51, %v3167_v40  ;;  %v5894_v43 = vld [vmem:[#allocation84_spill] sm:$0xff] }
 0x1a5   :  { %5889 = vst [vmem:[#allocation52_spill] sm:$0xff] %v3544_v21  ;;  %v482_v25 = vsel %vm467_vm1, %v5891_v58, 0.0  ;;  %v481_v13 = vsel %vm467_vm1, %v5892_v32, 0.0  ;;  %v3566_v60 = vadd.f32 %v475_v6, %v3151_v33  ;;  %v484_v58 = vsel %vm467_vm1, %v5894_v43, 0.0  ;;  %v5895_v49 = vld [vmem:[#allocation85_spill] sm:$0xff]  ;;  %887 = vrot.lane.b32.xlu1 %v2419_v29, %s2134_s9  ;;  %885 = vrot.lane.b32.xlu0 %v2403_v20, %s2134_s9  ;;  %v5897_v29 = vld [vmem:[#allocation87_spill] sm:$0xff] }
 0x1a6   :  { %v3572_v21 = vadd.f32 %v478_v48, %v3173_v15  ;;  %v3575_v32 = vadd.f32 %v477_v4, %v3157_v41  ;;  %v3578_v2 = vadd.f32 %v480_v46, %v3195_v26  ;;  %v483_v40 = vsel %vm467_vm1, %v5895_v49, 0.0  ;;  %v5896_v26 = vld [vmem:[#allocation86_spill] sm:$0xff]  ;;  %v5898_v6 = vld [vmem:[#allocation88_spill] sm:$0xff]  ;;  %v5902_v4 = vld [vmem:[#allocation21_spill] sm:$0xff] }
 0x1a7   :  { %v3588_v33 = vadd.f32 %v479_v12, %v3170_v14  ;;  %v3591_v15 = vadd.f32 %v482_v25, %v3223_v7  ;;  %v3594_v41 = vadd.f32 %v481_v13, %v3179_v9  ;;  %v486_v10 = vsel %vm467_vm1, %v5896_v26, 0.0  ;;  %v5899_v7 = vld [vmem:[#allocation89_spill] sm:$0xff]  ;;  %v3611_v13 = vpop.permute.xlu1 %660  ;;  %v3613_v48 = vpop.permute.xlu0 %658  ;;  %v5904_v25 = vld [vmem:[#allocation91_spill] sm:$0xff] }
 0x1a8   :  { %v3600_v51 = vadd.f32 %v484_v58, %v3229_v18  ;;  %v485_v20 = vsel %vm467_vm1, %v5897_v29, 0.0  ;;  %v488_v14 = vsel %vm467_vm1, %v5898_v6, 0.0  ;;  %v487_v9 = vsel %vm467_vm1, %v5899_v7, 0.0  ;;  %5900 = vst [vmem:[#allocation54_spill] sm:$0xff] %v3611_v13  ;;  %5901 = vst [vmem:[#allocation55_spill] sm:$0xff] %v3613_v48  ;;  %v5903_v18 = vld [vmem:[#allocation90_spill] sm:$0xff] }
 0x1a9   :  { %v3616_v46 = vadd.f32 %v483_v40, %v5902_v4  ;;  %v490_v12 = vsel %vm467_vm1, %v5903_v18, 0.0  ;;  %v489_v43 = vsel %vm467_vm1, %v5904_v25, 0.0  ;;  %v5905_v58 = vld [vmem:[#allocation92_spill] sm:$0xff]  ;;  %v3628_v26 = vadd.f32 %v486_v10, %v3238_v24  ;;  %v5906_v29 = vld [vmem:[#allocation93_spill] sm:$0xff]  ;;  %v5907_v6 = vld [vmem:[#allocation94_spill] sm:$0xff]  ;;  %891 = vrot.lane.b32.xlu1 %v2433_v37, %s2134_s9  ;;  %889 = vrot.lane.b32.xlu0 %v2417_v28, %s2134_s9 }
 0x1aa   :  { %v492_v49 = vsel %vm467_vm1, %v5905_v58, 0.0  ;;  %v491_v40 = vsel %vm467_vm1, %v5906_v29, 0.0  ;;  %v494_v7 = vsel %vm467_vm1, %v5907_v6, 0.0  ;;  %v5908_v4 = vld [vmem:[#allocation95_spill] sm:$0xff]  ;;  %v3644_v24 = vadd.f32 %v485_v20, %v3226_v30  ;;  %v5909_v58 = vld [vmem:[#allocation96_spill] sm:$0xff]  ;;  %v5910_v30 = vld [vmem:[#allocation97_spill] sm:$0xff] }
 0x1ab   :  { %v493_v18 = vsel %vm467_vm1, %v5908_v4, 0.0  ;;  %v3647_v10 = vadd.f32 %v488_v14, %v3251_v35  ;;  %v3650_v25 = vadd.f32 %v487_v9, %v3235_v17  ;;  %v496_v29 = vsel %vm467_vm1, %v5909_v58, 0.0  ;;  %v3667_v20 = vpop.permute.xlu1 %664  ;;  %v3669_v17 = vpop.permute.xlu0 %662  ;;  %v5913_v9 = vld [vmem:[#allocation98_spill] sm:$0xff]  ;;  %v5915_v4 = vld [vmem:[#allocation100_spill] sm:$0xff]  ;;  %v5930_v48 = vld [vmem:[#allocation27_spill] sm:$0xff] }
 0x1ac   :  { %v3656_v6 = vadd.f32 %v490_v12, %v3257_v39  ;;  %v3659_v37 = vadd.f32 %v489_v43, %v3241_v16  ;;  %v3662_v28 = vadd.f32 %v492_v49, %v3279_v27  ;;  %v495_v35 = vsel %vm467_vm1, %v5910_v30, 0.0  ;;  %5911 = vst [vmem:[#allocation56_spill] sm:$0xff] %v3667_v20  ;;  %5912 = vst [vmem:[#allocation57_spill] sm:$0xff] %v3669_v17  ;;  %v5914_v43 = vld [vmem:[#allocation99_spill] sm:$0xff] }
 0x1ad   :  { %v3672_v14 = vadd.f32 %v491_v40, %v3254_v38  ;;  %v3675_v39 = vadd.f32 %v494_v7, %v3308_v0  ;;  %v3678_v16 = vadd.f32 %v493_v18, %v3263_v19  ;;  %v498_v27 = vsel %vm467_vm1, %v5913_v9, 0.0  ;;  %v5916_v0 = vld [vmem:[#allocation101_spill] sm:$0xff]  ;;  %895 = vrot.lane.b32.xlu1 %v2447_v45, %s2134_s9  ;;  %893 = vrot.lane.b32.xlu0 %v2431_v36, %s2134_s9  ;;  %v5917_v40 = vld [vmem:[#allocation102_spill] sm:$0xff]  ;;  %v5918_v18 = vld [vmem:[#allocation103_spill] sm:$0xff] }
 0x1ae   :  { %v3684_v12 = vadd.f32 %v496_v29, %v3314_v31  ;;  %v497_v49 = vsel %vm467_vm1, %v5914_v43, 0.0  ;;  %v500_v38 = vsel %vm467_vm1, %v5915_v4, 0.0  ;;  %v499_v19 = vsel %vm467_vm1, %v5916_v0, 0.0  ;;  %v5919_v29 = vld [vmem:[#allocation104_spill] sm:$0xff]  ;;  %v5920_v9 = vld [vmem:[#allocation105_spill] sm:$0xff]  ;;  %v5922_v43 = vld [vmem:[#allocation107_spill] sm:$0xff] }
 0x1af   :  { %v3700_v31 = vadd.f32 %v495_v35, %v3291_v23  ;;  %v502_v7 = vsel %vm467_vm1, %v5917_v40, 0.0  ;;  %v501_v58 = vsel %vm467_vm1, %v5918_v18, 0.0  ;;  %v504_v30 = vsel %vm467_vm1, %v5919_v29, 0.0  ;;  %v5921_v23 = vld [vmem:[#allocation106_spill] sm:$0xff]  ;;  %v3724_v0 = vpop.permute.xlu1 %668  ;;  %v3726_v40 = vpop.permute.xlu0 %666 }
 0x1b0   :  { %v3712_v45 = vadd.f32 %v498_v27, %v3323_v11  ;;  %v503_v36 = vsel %vm467_vm1, %v5920_v9, 0.0  ;;  %v506_v35 = vsel %vm467_vm1, %v5921_v23, 0.0  ;;  %v505_v4 = vsel %vm467_vm1, %v5922_v43, 0.0  ;;  %5923 = vst [vmem:[#allocation58_spill] sm:$0xff] %v3724_v0  ;;  %5924 = vst [vmem:[#allocation59_spill] sm:$0xff] %v3726_v40  ;;  %v5925_v27 = vld [vmem:[#allocation30_spill] sm:$0xff] }
 0x1b1   :  { %v3729_v11 = vadd.f32 %v497_v49, %v3311_v57  ;;  %v3732_v18 = vadd.f32 %v500_v38, %v5925_v27  ;;  %v5926_v29 = vld [vmem:[#allocation26_spill] sm:$0xff]  ;;  %v5927_v23 = vld [vmem:[#allocation108_spill] sm:$0xff]  ;;  %v3744_v0 = vadd.f32 %v501_v58, %v5930_v48  ;;  %v5933_v57 = vld [vmem:[#allocation109_spill] sm:$0xff]  ;;  %899 = vrot.lane.b32.xlu1 %v2461_v53, %s2134_s9  ;;  %897 = vrot.lane.b32.xlu0 %v2445_v44, %s2134_s9 }
 0x1b2   :  { %v3735_v9 = vadd.f32 %v499_v19, %v5926_v29  ;;  %v508_v17 = vsel %vm467_vm1, %v5927_v23, 0.0  ;;  %v5928_v43 = vld [vmem:[#allocation32_spill] sm:$0xff]  ;;  %v5931_v40 = vld [vmem:[#allocation34_spill] sm:$0xff]  ;;  %v507_v49 = vsel %vm467_vm1, %v5933_v57, 0.0  ;;  %v5934_v38 = vld [vmem:[#allocation31_spill] sm:$0xff] }
 0x1b3   :  { %v3741_v20 = vadd.f32 %v502_v7, %v5928_v43  ;;  %v3747_v13 = vadd.f32 %v504_v30, %v5931_v40  ;;  %v3757_v19 = vadd.f32 %v503_v36, %v5934_v38  ;;  %v3760_v7 = vadd.f32 %v506_v35, %v3392_v22  ;;  %v5936_v48 = vld [vmem:[#allocation33_spill] sm:$0xff]  ;;  %v5938_v30 = vld [vmem:[#allocation110_spill] sm:$0xff]  ;;  %v5940_v53 = vld [vmem:[#allocation111_spill] sm:$0xff]  ;;  %v3782_v23 = vpop.permute.xlu0 %670 }
 0x1b4   :  { %v3763_v58 = vadd.f32 %v505_v4, %v5936_v48  ;;  %v510_v40 = vsel %vm467_vm1, %v5938_v30, 0.0  ;;  %v3769_v27 = vadd.f32 %v508_v17, %v3398_v54  ;;  %v509_v44 = vsel %vm467_vm1, %v5940_v53, 0.0  ;;  %v5941_v29 = vld [vmem:[#allocation112_spill] sm:$0xff]  ;;  %v5942_v22 = vld [vmem:[#allocation113_spill] sm:$0xff]  ;;  %v3780_v4 = vpop.permute.xlu1 %672  ;;  %5944 = vst [vmem:[#allocation66_spill] sm:$0xff] %v3782_v23  ;;  %v5945_v43 = vld [vmem:[#allocation35_spill] sm:$0xff] }
 0x1b5   :  { %5929 = vst [vmem:[#allocation60_spill] sm:$0xff] %v3741_v20  ;;  %5932 = vst [vmem:[#allocation61_spill] sm:$0xff] %v3747_v13  ;;  %v512_v36 = vsel %vm467_vm1, %v5941_v29, 0.0  ;;  %v511_v35 = vsel %vm467_vm1, %v5942_v22, 0.0  ;;  %v3785_v57 = vadd.f32 %v507_v49, %v5945_v43  ;;  %v5947_v54 = vld [vmem:[#allocation114_spill] sm:$0xff]  ;;  %v5948_v38 = vld [vmem:[#allocation115_spill] sm:$0xff]  ;;  %v3797_v29 = vadd.f32 %v510_v40, %v3407_v56 }
 0x1b6   :  { %5935 = vst [vmem:[#allocation62_spill] sm:$0xff] %v3760_v7  ;;  %5937 = vst [vmem:[#allocation63_spill] sm:$0xff] %v3763_v58  ;;  %v514_v17 = vsel %vm467_vm1, %v5947_v54, 0.0  ;;  %v513_v48 = vsel %vm467_vm1, %v5948_v38, 0.0  ;;  %v5949_v30 = vld [vmem:[#allocation116_spill] sm:$0xff]  ;;  %v5951_v22 = vld [vmem:[#allocation117_spill] sm:$0xff] }
 0x1b7   :  { %5939 = vst [vmem:[#allocation64_spill] sm:$0xff] %v3769_v27  ;;  %5943 = vst [vmem:[#allocation65_spill] sm:$0xff] %v3780_v4  ;;  %v516_v53 = vsel %vm467_vm1, %v5949_v30, 0.0  ;;  %v515_v49 = vsel %vm467_vm1, %v5951_v22, 0.0  ;;  %v5952_v43 = vld [vmem:[#allocation118_spill] sm:$0xff]  ;;  %v5953_v54 = vld [vmem:[#allocation119_spill] sm:$0xff] }
 0x1b8   :  { %5946 = vst [vmem:[#allocation67_spill] sm:$0xff] %v3785_v57  ;;  %5950 = vst [vmem:[#allocation68_spill] sm:$0xff] %v3797_v29  ;;  %v518_v23 = vsel %vm467_vm1, %v5952_v43, 0.0  ;;  %v517_v4 = vsel %vm467_vm1, %v5953_v54, 0.0  ;;  %v5954_v38 = vld [vmem:[#allocation4_spill] sm:$0xff]  ;;  %v5955_v30 = vld [vmem:[#allocation2_spill] sm:$0xff] }
 0x1b9   :  { %903 = vrot.lane.b32.xlu1 %v5954_v38, %s2134_s9  ;;  %901 = vrot.lane.b32.xlu0 %v5955_v30, %s2134_s9  ;;  %v5956_v56 = vld [vmem:[#allocation38_spill] sm:$0xff]  ;;  %v5957_v29 = vld [vmem:[#allocation41_spill] sm:$0xff]  ;;  %v5958_v22 = vld [vmem:[#allocation39_spill] sm:$0xff] }
 0x1ba   :  { %v3813_v40 = vadd.f32 %v509_v44, %v5956_v56  ;;  %v3816_v27 = vadd.f32 %v512_v36, %v5957_v29  ;;  %v3819_v7 = vadd.f32 %v511_v35, %v5958_v22  ;;  %v5959_v43 = vld [vmem:[#allocation120_spill] sm:$0xff]  ;;  %v5960_v54 = vld [vmem:[#allocation43_spill] sm:$0xff]  ;;  %v5964_v44 = vld [vmem:[#allocation121_spill] sm:$0xff]  ;;  %v3836_v29 = vpop.permute.xlu1 %676  ;;  %v3838_v35 = vpop.permute.xlu0 %674 }
 0x1bb   :  { %v520_v57 = vsel %vm467_vm1, %v5959_v43, 0.0  ;;  %v3825_v13 = vadd.f32 %v514_v17, %v5960_v54  ;;  %v5961_v38 = vld [vmem:[#allocation40_spill] sm:$0xff]  ;;  %v5962_v30 = vld [vmem:[#allocation47_spill] sm:$0xff]  ;;  %v519_v36 = vsel %vm467_vm1, %v5964_v44, 0.0  ;;  %v5965_v56 = vld [vmem:[#allocation42_spill] sm:$0xff]  ;;  %v3844_v17 = vadd.f32 %v518_v23, %v3476_v5 }
 0x1bc   :  { %v3828_v58 = vadd.f32 %v513_v48, %v5961_v38  ;;  %v3831_v20 = vadd.f32 %v516_v53, %v5962_v30  ;;  %v3841_v22 = vadd.f32 %v515_v49, %v5965_v56  ;;  %v5967_v43 = vld [vmem:[#allocation44_spill] sm:$0xff]  ;;  %v5969_v54 = vld [vmem:[#allocation122_spill] sm:$0xff]  ;;  %v3853_v38 = vadd.f32 %v520_v57, %v3482_v47  ;;  %v5971_v30 = vld [vmem:[#allocation123_spill] sm:$0xff] }
 0x1bd   :  { %5966 = vst [vmem:[#allocation70_spill] sm:$0xff] %v3844_v17  ;;  %v3847_v48 = vadd.f32 %v517_v4, %v5967_v43  ;;  %v522_v53 = vsel %vm467_vm1, %v5969_v54, 0.0  ;;  %v521_v44 = vsel %vm467_vm1, %v5971_v30, 0.0  ;;  %v5973_v5 = vld [vmem:[#allocation125_spill] sm:$0xff]  ;;  %v5974_v23 = vld [vmem:[#allocation6_spill] sm:$0xff]  ;;  %v5975_v56 = vld [vmem:[#allocation3_spill] sm:$0xff] }
 0x1be   :  { %5963 = vst [vmem:[#allocation69_spill] sm:$0xff] %v3831_v20  ;;  %5970 = vst [vmem:[#allocation72_spill] sm:$0xff] %v3853_v38  ;;  %v5972_v20 = vld [vmem:[#allocation124_spill] sm:$0xff]  ;;  %v523_v4 = vsel %vm467_vm1, %v5973_v5, 0.0  ;;  %907 = vrot.lane.b32.xlu1 %v5974_v23, %s2134_s9  ;;  %905 = vrot.lane.b32.xlu0 %v5975_v56, %s2134_s9  ;;  %v5978_v43 = vld [vmem:[#allocation126_spill] sm:$0xff]  ;;  %v3881_v23 = vadd.f32 %v522_v53, %v3491_v52 }
 0x1bf   :  { %5968 = vst [vmem:[#allocation71_spill] sm:$0xff] %v3847_v48  ;;  %v524_v49 = vsel %vm467_vm1, %v5972_v20, 0.0  ;;  %v5976_v47 = vld [vmem:[#allocation48_spill] sm:$0xff]  ;;  %v698_v54 = vsel %vm696_vm2, %v5978_v43, 0.0  ;;  %v5979_v30 = vld [vmem:[#allocation127_spill] sm:$0xff]  ;;  %v5982_v17 = vld [vmem:[#allocation129_spill] sm:$0xff]  ;;  %v3894_v48 = vpop.permute.xlu0 %678 }
 0x1c0   :  { %v3869_v57 = vadd.f32 %v519_v36, %v5976_v47  ;;  %v697_v20 = vsel %vm696_vm2, %v5979_v30, 0.0  ;;  %v5980_v38 = vld [vmem:[#allocation128_spill] sm:$0xff]  ;;  %5981 = vst [vmem:[#allocation73_spill] sm:$0xff] %v3881_v23  ;;  %v699_v36 = vsel %vm696_vm2, %v5982_v17, 0.0  ;;  %v5983_v56 = vld [vmem:[#allocation130_spill] sm:$0xff]  ;;  %v5984_v43 = vld [vmem:[#allocation131_spill] sm:$0xff]  ;;  %v3892_v30 = vpop.permute.xlu1 %680  ;;  %v3900_v52 = vadd.f32 %v524_v49, %v3504_v63 }
 0x1c1   :  { %v700_v5 = vsel %vm696_vm2, %v5980_v38, 0.0  ;;  %v702_v47 = vsel %vm696_vm2, %v5983_v56, 0.0  ;;  %5985 = vst [vmem:[#allocation14_spill] sm:$0xff] %v3894_v48  ;;  %v3897_v38 = vadd.f32 %v521_v44, %v3479_v34  ;;  %v3903_v17 = vadd.f32 %v523_v4, %v3488_v42  ;;  %v5988_v53 = vld [vmem:[#allocation132_spill] sm:$0xff]  ;;  %v5989_v34 = vld [vmem:[#allocation133_spill] sm:$0xff] }
 0x1c2   :  { %5977 = vst [vmem:[#allocation17_spill] sm:$0xff] %v3869_v57  ;;  %v701_v57 = vsel %vm696_vm2, %v5984_v43, 0.0  ;;  %5986 = vst [vmem:[#allocation74_spill] sm:$0xff] %v3900_v52  ;;  %v704_v56 = vsel %vm696_vm2, %v5988_v53, 0.0  ;;  %v3909_v23 = vadd.f32 %v698_v54, %v3510_v59  ;;  %v3912_v43 = vadd.f32 %v697_v20, %v3494_v61  ;;  %v5990_v42 = vld [vmem:[#allocation8_spill] sm:$0xff]  ;;  %v5991_v44 = vld [vmem:[#allocation5_spill] sm:$0xff] }
 0x1c3   :  { %5987 = vst [vmem:[#allocation75_spill] sm:$0xff] %v3903_v17  ;;  %v3915_v48 = vadd.f32 %v700_v5, %v3532_v50  ;;  %v703_v63 = vsel %vm696_vm2, %v5989_v34, 0.0  ;;  %911 = vrot.lane.b32.xlu1 %v5990_v42, %s2134_s9  ;;  %909 = vrot.lane.b32.xlu0 %v5991_v44, %s2134_s9  ;;  %v3925_v49 = vadd.f32 %v699_v36, %v3507_v8  ;;  %v5992_v61 = vld [vmem:[#allocation51_spill] sm:$0xff]  ;;  %v5993_v50 = vld [vmem:[#allocation134_spill] sm:$0xff]  ;;  %v5996_v34 = vld [vmem:[#allocation136_spill] sm:$0xff] }
 0x1c4   :  { %v3928_v59 = vadd.f32 %v702_v47, %v3560_v62  ;;  %v3931_v4 = vadd.f32 %v701_v57, %v5992_v61  ;;  %v706_v54 = vsel %vm696_vm2, %v5993_v50, 0.0  ;;  %v3937_v20 = vadd.f32 %v704_v56, %v3566_v60  ;;  %v5995_v5 = vld [vmem:[#allocation135_spill] sm:$0xff]  ;;  %v5997_v62 = vld [vmem:[#allocation137_spill] sm:$0xff]  ;;  %v3948_v36 = vpop.permute.xlu1 %684  ;;  %v3950_v47 = vpop.permute.xlu0 %682  ;;  %v5998_v42 = vld [vmem:[#allocation52_spill] sm:$0xff] }
 0x1c5   :  { %v705_v53 = vsel %vm696_vm2, %v5995_v5, 0.0  ;;  %v708_v8 = vsel %vm696_vm2, %v5996_v34, 0.0  ;;  %v707_v57 = vsel %vm696_vm2, %v5997_v62, 0.0  ;;  %v3953_v44 = vadd.f32 %v703_v63, %v5998_v42  ;;  %v5999_v60 = vld [vmem:[#allocation138_spill] sm:$0xff]  ;;  %v6000_v61 = vld [vmem:[#allocation139_spill] sm:$0xff]  ;;  %v6001_v5 = vld [vmem:[#allocation140_spill] sm:$0xff] }
 0x1c6   :  { %5994 = vst [vmem:[#allocation76_spill] sm:$0xff] %v3937_v20  ;;  %v710_v56 = vsel %vm696_vm2, %v5999_v60, 0.0  ;;  %v709_v50 = vsel %vm696_vm2, %v6000_v61, 0.0  ;;  %v712_v34 = vsel %vm696_vm2, %v6001_v5, 0.0  ;;  %v3965_v62 = vadd.f32 %v706_v54, %v3575_v32  ;;  %v6003_v52 = vld [vmem:[#allocation141_spill] sm:$0xff]  ;;  %v6004_v42 = vld [vmem:[#allocation142_spill] sm:$0xff] }
 0x1c7   :  { %v711_v63 = vsel %vm696_vm2, %v6003_v52, 0.0  ;;  %v714_v17 = vsel %vm696_vm2, %v6004_v42, 0.0  ;;  %v6005_v60 = vld [vmem:[#allocation143_spill] sm:$0xff]  ;;  %v6006_v61 = vld [vmem:[#allocation10_spill] sm:$0xff]  ;;  %v3982_v32 = vadd.f32 %v705_v53, %v3563_v3  ;;  %v3985_v52 = vadd.f32 %v708_v8, %v3588_v33  ;;  %v6008_v42 = vld [vmem:[#allocation144_spill] sm:$0xff] }
 0x1c8   :  { %6002 = vst [vmem:[#allocation77_spill] sm:$0xff] %v3965_v62  ;;  %v713_v20 = vsel %vm696_vm2, %v6005_v60, 0.0  ;;  %915 = vrot.lane.b32.xlu1 %v6006_v61, %s2134_s9  ;;  %v6007_v5 = vld [vmem:[#allocation7_spill] sm:$0xff]  ;;  %v3988_v54 = vadd.f32 %v707_v57, %v3572_v21  ;;  %v716_v60 = vsel %vm696_vm2, %v6008_v42, 0.0  ;;  %v3994_v61 = vadd.f32 %v710_v56, %v3594_v41  ;;  %v6009_v3 = vld [vmem:[#allocation145_spill] sm:$0xff]  ;;  %v4005_v53 = vpop.permute.xlu1 %688  ;;  %v4007_v21 = vpop.permute.xlu0 %686 }
 0x1c9   :  { %913 = vrot.lane.b32.xlu0 %v6007_v5, %s2134_s9  ;;  %v3997_v5 = vadd.f32 %v709_v50, %v3578_v2  ;;  %v4000_v62 = vadd.f32 %v712_v34, %v3616_v46  ;;  %v715_v33 = vsel %vm696_vm2, %v6009_v3, 0.0  ;;  %v4010_v8 = vadd.f32 %v711_v63, %v3591_v15  ;;  %v6011_v57 = vld [vmem:[#allocation15_spill] sm:$0xff]  ;;  %v6013_v50 = vld [vmem:[#allocation16_spill] sm:$0xff]  ;;  %v6018_v63 = vld [vmem:[#allocation22_spill] sm:$0xff] }
 0x1ca   :  { %v4013_v41 = vadd.f32 %v714_v17, %v3644_v24  ;;  %v4016_v2 = vadd.f32 %v713_v20, %v3600_v51  ;;  %v718_v46 = vsel %vm696_vm2, %v6011_v57, 0.0  ;;  %v4022_v56 = vadd.f32 %v716_v60, %v3650_v25  ;;  %v6014_v42 = vld [vmem:[#allocation19_spill] sm:$0xff]  ;;  %v6015_v24 = vld [vmem:[#allocation20_spill] sm:$0xff]  ;;  %v6017_v20 = vld [vmem:[#allocation9_spill] sm:$0xff] }
 0x1cb   :  { %v717_v34 = vsel %vm696_vm2, %v6013_v50, 0.0  ;;  %v720_v15 = vsel %vm696_vm2, %v6014_v42, 0.0  ;;  %v719_v51 = vsel %vm696_vm2, %v6015_v24, 0.0  ;;  %v6016_v17 = vld [vmem:[#allocation12_spill] sm:$0xff]  ;;  %v4038_v25 = vadd.f32 %v715_v33, %v3628_v26  ;;  %v6019_v3 = vld [vmem:[#allocation23_spill] sm:$0xff] }
 0x1cc   :  { %6010 = vst [vmem:[#allocation18_spill] sm:$0xff] %v4013_v41  ;;  %6012 = vst [vmem:[#allocation78_spill] sm:$0xff] %v4022_v56  ;;  %919 = vrot.lane.b32.xlu1 %v6016_v17, %s2134_s9  ;;  %v722_v60 = vsel %vm696_vm2, %v6018_v63, 0.0  ;;  %v721_v57 = vsel %vm696_vm2, %v6019_v3, 0.0  ;;  %v6020_v50 = vld [vmem:[#allocation24_spill] sm:$0xff]  ;;  %v4050_v24 = vadd.f32 %v718_v46, %v3659_v37  ;;  %v6022_v17 = vld [vmem:[#allocation25_spill] sm:$0xff]  ;;  %v4061_v3 = vpop.permute.xlu1 %692  ;;  %v4063_v41 = vpop.permute.xlu0 %690  ;;  %v4069_v37 = vadd.f32 %v720_v15, %v3672_v14 }
 0x1cd   :  { %917 = vrot.lane.b32.xlu0 %v6017_v20, %s2134_s9  ;;  %v724_v42 = vsel %vm696_vm2, %v6020_v50, 0.0  ;;  %v723_v26 = vsel %vm696_vm2, %v6022_v17, 0.0  ;;  %v6023_v33 = vld [vmem:[#allocation28_spill] sm:$0xff]  ;;  %v6024_v63 = vld [vmem:[#allocation29_spill] sm:$0xff]  ;;  %6025 = vst [vmem:[#allocation80_spill] sm:$0xff] %v4063_v41  ;;  %v4066_v50 = vadd.f32 %v717_v34, %v3647_v10  ;;  %v4072_v46 = vadd.f32 %v719_v51, %v3656_v6  ;;  %v6029_v34 = vld [vmem:[#allocation11_spill] sm:$0xff] }
 0x1ce   :  { %6021 = vst [vmem:[#allocation79_spill] sm:$0xff] %v4050_v24  ;;  %v726_v20 = vsel %vm696_vm2, %v6023_v33, 0.0  ;;  %v725_v56 = vsel %vm696_vm2, %v6024_v63, 0.0  ;;  %v6026_v17 = vld [vmem:[#allocation36_spill] sm:$0xff]  ;;  %v4078_v24 = vadd.f32 %v722_v60, %v3678_v16  ;;  %v4081_v63 = vadd.f32 %v721_v57, %v3662_v28  ;;  %v6027_v10 = vld [vmem:[#allocation37_spill] sm:$0xff]  ;;  %v6031_v57 = vld [vmem:[#allocation46_spill] sm:$0xff] }
 0x1cf   :  { %v728_v33 = vsel %vm696_vm2, %v6026_v17, 0.0  ;;  %v4084_v41 = vadd.f32 %v724_v42, %v3700_v31  ;;  %v727_v14 = vsel %vm696_vm2, %v6027_v10, 0.0  ;;  %v6028_v6 = vld [vmem:[#allocation13_spill] sm:$0xff]  ;;  %v4094_v15 = vadd.f32 %v723_v26, %v3675_v39 }
 0x1d0   :  { %923 = vrot.lane.b32.xlu1 %v6028_v6, %s2134_s9  ;;  %v4097_v16 = vadd.f32 %v726_v20, %v3729_v11  ;;  %v4100_v28 = vadd.f32 %v725_v56, %v3684_v12  ;;  %v6030_v31 = vld [vmem:[#allocation45_spill] sm:$0xff]  ;;  %v4106_v60 = vadd.f32 %v728_v33, %v3735_v9  ;;  %v729_v42 = vsel %vm696_vm2, %v6031_v57, 0.0  ;;  %v6033_v11 = vld [vmem:[#allocation50_spill] sm:$0xff]  ;;  %v812_v56 = vpop.permute.xlu1 %811  ;;  %v4117_v26 = vpop.permute.xlu0 %694 }
 0x1d1   :  { %921 = vrot.lane.b32.xlu0 %v6029_v34, %s2134_s9  ;;  %v730_v51 = vsel %vm696_vm2, %v6030_v31, 0.0  ;;  %v6032_v17 = vld [vmem:[#allocation49_spill] sm:$0xff]  ;;  %v731_v12 = vsel %vm696_vm2, %v6033_v11, 0.0  ;;  %6034 = vst [vmem:[#allocation81_spill] sm:$0xff] %v4117_v26  ;;  %v4120_v20 = vadd.f32 %v727_v14, %v3712_v45  ;;  %v734_v9 = vsel %vm696_vm2, %v3555_v55, 0.0  ;;  %v6037_v31 = vld [vmem:[#allocation54_spill] sm:$0xff] }
 0x1d2   :  { %v732_v39 = vsel %vm696_vm2, %v6032_v17, 0.0  ;;  %v6035_v33 = vld [vmem:[#allocation53_spill] sm:$0xff]  ;;  %v926_v6 = vsel %vm925_vm3, %v812_v56, 0.0  ;;  %v4131_v34 = vadd.f32 %v730_v51, %v3744_v0  ;;  %v736_v57 = vsel %vm696_vm2, %v6037_v31, 0.0  ;;  %v6038_v45 = vld [vmem:[#allocation55_spill] sm:$0xff]  ;;  %v6040_v56 = vld [vmem:[#allocation60_spill] sm:$0xff] }
 0x1d3   :  { %v733_v10 = vsel %vm696_vm2, %v6035_v33, 0.0  ;;  %v735_v14 = vsel %vm696_vm2, %v6038_v45, 0.0  ;;  %v983_v55 = vadd.f32 %v926_v6, %v3912_v43  ;;  %v4141_v17 = vadd.f32 %v729_v42, %v3732_v18  ;;  %v6041_v0 = vld [vmem:[#allocation56_spill] sm:$0xff]  ;;  %v6042_v31 = vld [vmem:[#allocation63_spill] sm:$0xff]  ;;  %v6043_v26 = vld [vmem:[#allocation61_spill] sm:$0xff] }
 0x1d4   :  { %6036 = vst [vmem:[#allocation82_spill] sm:$0xff] %v4131_v34  ;;  %v4144_v11 = vadd.f32 %v732_v39, %v3757_v19  ;;  %v4147_v33 = vadd.f32 %v731_v12, %v6040_v56  ;;  %v738_v51 = vsel %vm696_vm2, %v6041_v0, 0.0  ;;  %v4153_v34 = vadd.f32 %v734_v9, %v6042_v31  ;;  %v6044_v43 = vld [vmem:[#allocation57_spill] sm:$0xff]  ;;  %v816_v19 = vpop.permute.xlu1 %815  ;;  %v814_v39 = vpop.permute.xlu0 %813  ;;  %v6045_v6 = vld [vmem:[#allocation67_spill] sm:$0xff]  ;;  %v6047_v56 = vld [vmem:[#allocation62_spill] sm:$0xff] }
 0x1d5   :  { %v4156_v45 = vadd.f32 %v733_v10, %v6043_v26  ;;  %v737_v18 = vsel %vm696_vm2, %v6044_v43, 0.0  ;;  %v1040_v42 = vmul.f32 2e-05, %v983_v55  ;;  %v4162_v12 = vadd.f32 %v736_v57, %v6045_v6  ;;  %v6049_v57 = vld [vmem:[#allocation64_spill] sm:$0xff] }
 0x1d6   :  { %6039 = vst [vmem:[#allocation83_spill] sm:$0xff] %v4144_v11  ;;  %v4165_v11 = vadd.f32 %v735_v14, %v6047_v56  ;;  %v928_v9 = vsel %vm925_vm3, %v816_v19, 0.0  ;;  %v927_v26 = vsel %vm925_vm3, %v814_v39, 0.0  ;;  %v4172_v10 = vadd.f32 %v738_v51, %v3813_v40  ;;  %v6050_v14 = vld [vmem:[#allocation58_spill] sm:$0xff]  ;;  %v6051_v19 = vld [vmem:[#allocation59_spill] sm:$0xff]  ;;  %v6052_v56 = vld [vmem:[#allocation65_spill] sm:$0xff] }
 0x1d7   :  { %6046 = vst [vmem:[#allocation84_spill] sm:$0xff] %v4162_v12  ;;  %v4174_v0 = vadd.f32 1.0, %v1040_v42  ;;  %v985_v55 = vadd.f32 %v928_v9, %v3925_v49  ;;  %v984_v31 = vadd.f32 %v927_v26, %v3909_v23  ;;  %v4179_v43 = vadd.f32 %v737_v18, %v6049_v57  ;;  %v6053_v51 = vld [vmem:[#allocation66_spill] sm:$0xff] }
 0x1d8   :  { %6048 = vst [vmem:[#allocation85_spill] sm:$0xff] %v4172_v10  ;;  %v740_v6 = vsel %vm696_vm2, %v6050_v14, 0.0  ;;  %v739_v39 = vsel %vm696_vm2, %v6051_v19, 0.0  ;;  %v742_v40 = vsel %vm696_vm2, %v6052_v56, 0.0  ;;  %v741_v49 = vsel %vm696_vm2, %v6053_v51, 0.0  ;;  %v820_v42 = vpop.permute.xlu1 %819  ;;  %v818_v9 = vpop.permute.xlu0 %817 }
 0x1d9   :  { %v744_v23 = vsel %vm696_vm2, %v3836_v29, 0.0  ;;  %v743_v18 = vsel %vm696_vm2, %v3838_v35, 0.0  ;;  %1846 = vrsqrt.f32 %v4174_v0  ;;  %v1042_v26 = vmul.f32 2e-05, %v985_v55  ;;  %v6054_v29 = vld [vmem:[#allocation68_spill] sm:$0xff] }
 0x1da   :  { %v1041_v57 = vmul.f32 2e-05, %v984_v31  ;;  %v930_v14 = vsel %vm925_vm3, %v820_v42, 0.0  ;;  %v929_v19 = vsel %vm925_vm3, %v818_v9, 0.0  ;;  %v4205_v56 = vadd.f32 %v740_v6, %v3819_v7 }
 0x1db   :  { %v4208_v51 = vadd.f32 %v739_v39, %v6054_v29  ;;  %v987_v35 = vadd.f32 %v930_v14, %v3931_v4  ;;  %v986_v10 = vadd.f32 %v929_v19, %v3915_v48  ;;  %v4213_v12 = vadd.f32 %v742_v40, %v3828_v58 }
 0x1dc   :  { %v4216_v55 = vadd.f32 %v741_v49, %v3816_v27  ;;  %v4218_v31 = vadd.f32 1.0, %v1042_v26  ;;  %v4220_v42 = vadd.f32 1.0, %v1041_v57  ;;  %v4223_v7 = vadd.f32 %v744_v23, %v3841_v22  ;;  %v824_v9 = vpop.permute.xlu1 %823  ;;  %v822_v48 = vpop.permute.xlu0 %821  ;;  %v6055_v27 = vld [vmem:[#allocation14_spill] sm:$0xff] }
 0x1dd   :  { %v4226_v6 = vadd.f32 %v743_v18, %v3825_v13  ;;  %v1044_v39 = vmul.f32 2e-05, %v987_v35  ;;  %v1043_v4 = vmul.f32 2e-05, %v986_v10  ;;  %v746_v58 = vsel %vm696_vm2, %v3892_v30, 0.0  ;;  %v6056_v18 = vld [vmem:[#allocation71_spill] sm:$0xff] }
 0x1de   :  { %v745_v40 = vsel %vm696_vm2, %v6055_v27, 0.0  ;;  %v748_v22 = vsel %vm696_vm2, %v3948_v36, 0.0  ;;  %1848 = vrsqrt.f32 %v4218_v31  ;;  %v747_v13 = vsel %vm696_vm2, %v3950_v47, 0.0  ;;  %v6059_v35 = vld [vmem:[#allocation17_spill] sm:$0xff] }
 0x1df   :  { %v750_v10 = vsel %vm696_vm2, %v4005_v53, 0.0  ;;  %v749_v30 = vsel %vm696_vm2, %v4007_v21, 0.0  ;;  %1850 = vrsqrt.f32 %v4220_v42  ;;  %v4248_v49 = vadd.f32 1.0, %v1044_v39  ;;  %v6058_v53 = vld [vmem:[#allocation69_spill] sm:$0xff] }
 0x1e0   :  { %v4250_v23 = vadd.f32 1.0, %v1043_v4  ;;  %v932_v36 = vsel %vm925_vm3, %v824_v9, 0.0  ;;  %v931_v47 = vsel %vm925_vm3, %v822_v48, 0.0  ;;  %v4257_v26 = vadd.f32 %v746_v58, %v6056_v18  ;;  %v828_v19 = vpop.permute.xlu1 %827  ;;  %v826_v29 = vpop.permute.xlu0 %825  ;;  %v6061_v4 = vld [vmem:[#allocation70_spill] sm:$0xff]  ;;  %v6063_v58 = vld [vmem:[#allocation72_spill] sm:$0xff] }
 0x1e1   :  { %v4260_v57 = vadd.f32 %v745_v40, %v6058_v53  ;;  %v989_v21 = vadd.f32 %v932_v36, %v3953_v44  ;;  %v988_v14 = vadd.f32 %v931_v47, %v3928_v59  ;;  %v4265_v39 = vadd.f32 %v748_v22, %v6059_v35 }
 0x1e2   :  { %6057 = vst [vmem:[#allocation86_spill] sm:$0xff] %v4257_v26  ;;  %v4268_v9 = vadd.f32 %v747_v13, %v6061_v4  ;;  %v4271_v48 = vadd.f32 %v750_v10, %v3897_v38  ;;  %1852 = vrsqrt.f32 %v4248_v49  ;;  %v4275_v27 = vadd.f32 %v749_v30, %v6063_v58 }
 0x1e3   :  { %6060 = vst [vmem:[#allocation87_spill] sm:$0xff] %v4265_v39  ;;  %v4280_v59 = vsel %vm696_vm2, %v4061_v3, 0.0  ;;  %vm1213_vm4 = vcmp.eq.f32.partialorder %v4174_v0, inf  ;;  %1854 = vrsqrt.f32 %v4250_v23  ;;  %v1046_v44 = vmul.f32 2e-05, %v989_v21  ;;  %v6065_v3 = vld [vmem:[#allocation76_spill] sm:$0xff] }
 0x1e4   :  { %6062 = vst [vmem:[#allocation88_spill] sm:$0xff] %v4271_v48  ;;  %6064 = vst [vmem:[#allocation89_spill] sm:$0xff] %v4275_v27  ;;  %v1045_v40 = vmul.f32 2e-05, %v988_v14  ;;  %v934_v38 = vsel %vm925_vm3, %v828_v19, 0.0  ;;  %v933_v22 = vsel %vm925_vm3, %v826_v29, 0.0  ;;  %v832_v36 = vpop.permute.xlu1 %831  ;;  %v830_v47 = vpop.permute.xlu0 %829 }
 0x1e5   :  { %vm1215_vm5 = vcmp.eq.f32.partialorder %v4174_v0, 0.0  ;;  %v1216_v13 = vand.u32 2147483648, %v4174_v0  ;;  %v991_v10 = vadd.f32 %v934_v38, %v3982_v32  ;;  %v990_v30 = vadd.f32 %v933_v22, %v6065_v3 }
 0x1e6   :  { %v4292_v18 = vpop.eup %1846  ;;  %vm1227_vm6 = vcmp.eq.f32.partialorder %v4218_v31, inf  ;;  %v4295_v53 = vadd.f32 1.0, %v1046_v44  ;;  %v4297_v21 = vadd.f32 1.0, %v1045_v40  ;;  %v936_v14 = vsel %vm925_vm3, %v832_v36, 0.0  ;;  %v6066_v36 = vld [vmem:[#allocation77_spill] sm:$0xff] }
 0x1e7   :  { %v1212_v19 = vmul.f32 %v4292_v18, %v4174_v0  ;;  %v1048_v29 = vmul.f32 2e-05, %v991_v10  ;;  %v1047_v32 = vmul.f32 2e-05, %v990_v30  ;;  %v993_v35 = vadd.f32 %v936_v14, %v3988_v54 }
 0x1e8   :  { %vm1229_vm7 = vcmp.eq.f32.partialorder %v4218_v31, 0.0  ;;  %v1230_v4 = vand.u32 2147483648, %v4218_v31  ;;  %1856 = vrsqrt.f32 %v4295_v53  ;;  %v935_v58 = vsel %vm925_vm3, %v830_v47, 0.0  ;;  %v836_v54 = vpop.permute.xlu1 %835 }
 0x1e9   :  { %v1214_v44 = vsel %vm1213_vm4, %v4174_v0, %v1212_v19  ;;  %vm1220_vm8 = vcmp.eq.f32.partialorder %v4220_v42, inf  ;;  %vm1222_vm9 = vcmp.eq.f32.partialorder %v4220_v42, 0.0  ;;  %1858 = vrsqrt.f32 %v4297_v21 }
 0x1ea   :  { %v1217_v40 = vsel %vm1215_vm5, %v1216_v13, %v1214_v44  ;;  %v1223_v38 = vand.u32 2147483648, %v4220_v42  ;;  %v4318_v22 = vadd.f32 1.0, %v1048_v29  ;;  %v4320_v10 = vadd.f32 1.0, %v1047_v32 }
 0x1eb   :  { %v4322_v3 = vpop.eup %1848  ;;  %1860 = vrsqrt.f32 %v1217_v40  ;;  %vm1241_vm10 = vcmp.eq.f32.partialorder %v4248_v49, inf  ;;  %v1050_v30 = vmul.f32 2e-05, %v993_v35  ;;  %v992_v47 = vadd.f32 %v935_v58, %v6066_v36 }
 0x1ec   :  { %v4326_v14 = vpop.eup %1850  ;;  %v1226_v0 = vmul.f32 %v4322_v3, %v4218_v31  ;;  %vm1243_vm11 = vcmp.eq.f32.partialorder %v4248_v49, 0.0  ;;  %1862 = vrsqrt.f32 %v4318_v22  ;;  %v938_v13 = vsel %vm925_vm3, %v836_v54, 0.0 }
 0x1ed   :  { %v1219_v19 = vmul.f32 %v4326_v14, %v4220_v42  ;;  %v1244_v29 = vand.u32 2147483648, %v4248_v49  ;;  %vm1234_vm12 = vcmp.eq.f32.partialorder %v4250_v23, inf  ;;  %1864 = vrsqrt.f32 %v4320_v10 }
 0x1ee   :  { %v1228_v32 = vsel %vm1227_vm6, %v4218_v31, %v1226_v0  ;;  %vm1236_vm13 = vcmp.eq.f32.partialorder %v4250_v23, 0.0  ;;  %v1237_v35 = vand.u32 2147483648, %v4250_v23  ;;  %v4344_v58 = vadd.f32 1.0, %v1050_v30 }
 0x1ef   :  { %v4346_v44 = vpop.eup %1852  ;;  %v1231_v54 = vsel %vm1229_vm7, %v1230_v4, %v1228_v32  ;;  %v1221_v40 = vsel %vm1220_vm8, %v4220_v42, %v1219_v19  ;;  %vm1255_vm14 = vcmp.eq.f32.partialorder %v4295_v53, inf  ;;  %v1049_v36 = vmul.f32 2e-05, %v992_v47  ;;  %v834_v4 = vpop.permute.xlu0 %833 }
 0x1f0   :  { %v995_v0 = vadd.f32 %v938_v13, %v3997_v5  ;;  %v4355_v48 = vpop.eup %1854  ;;  %1866 = vrsqrt.f32 %v1231_v54  ;;  %v1224_v30 = vsel %vm1222_vm9, %v1223_v38, %v1221_v40  ;;  %v1240_v39 = vmul.f32 %v4346_v44, %v4248_v49  ;;  %v840_v19 = vpop.permute.xlu1 %839 }
 0x1f1   :  { %vm1257_vm15 = vcmp.eq.f32.partialorder %v4295_v53, 0.0  ;;  %v1258_v31 = vand.u32 2147483648, %v4295_v53  ;;  %1868 = vrsqrt.f32 %v1224_v30  ;;  %v1233_v47 = vmul.f32 %v4355_v48, %v4250_v23 }
 0x1f2   :  { %vm1248_vm0 = vcmp.eq.f32.partialorder %v4297_v21, inf  ;;  %vm1250_vm1 = vcmp.eq.f32.partialorder %v4297_v21, 0.0  ;;  %v1242_v5 = vsel %vm1241_vm10, %v4248_v49, %v1240_v39  ;;  %1870 = vrsqrt.f32 %v4344_v58 }
 0x1f3   :  { %v4371_v42 = vadd.f32 1.0, %v1049_v36  ;;  %v1052_v38 = vmul.f32 2e-05, %v995_v0  ;;  %v1245_v13 = vsel %vm1243_vm11, %v1244_v29, %v1242_v5  ;;  %v1235_v32 = vsel %vm1234_vm12, %v4250_v23, %v1233_v47 }
 0x1f4   :  { %v937_v54 = vsel %vm925_vm3, %v834_v4, 0.0  ;;  %v940_v40 = vsel %vm925_vm3, %v840_v19, 0.0  ;;  %1872 = vrsqrt.f32 %v1245_v13  ;;  %v1238_v39 = vsel %vm1236_vm13, %v1237_v35, %v1235_v32  ;;  %v838_v19 = vpop.permute.xlu0 %837 }
 0x1f5   :  { %v1251_v36 = vand.u32 2147483648, %v4297_v21  ;;  %vm1269_vm4 = vcmp.eq.f32.partialorder %v4318_v22, inf  ;;  %v4386_v49 = vpop.eup %1856  ;;  %1874 = vrsqrt.f32 %v1238_v39  ;;  %vm1271_vm5 = vcmp.eq.f32.partialorder %v4318_v22, 0.0 }
 0x1f6   :  { %v4389_v29 = vadd.f32 1.0, %v1052_v38  ;;  %v994_v0 = vadd.f32 %v937_v54, %v3985_v52  ;;  %v4392_v30 = vpop.eup %1858  ;;  %v1254_v4 = vmul.f32 %v4386_v49, %v4295_v53  ;;  %v1272_v23 = vand.u32 2147483648, %v4318_v22 }
 0x1f7   :  { %1876 = vrsqrt.f32 %v4371_v42  ;;  %v997_v35 = vadd.f32 %v940_v40, %v4010_v8  ;;  %v1247_v47 = vmul.f32 %v4392_v30, %v4297_v21  ;;  %vm1262_vm6 = vcmp.eq.f32.partialorder %v4320_v10, inf  ;;  %v844_v8 = vpop.permute.xlu1 %843 }
 0x1f8   :  { %vm1264_vm7 = vcmp.eq.f32.partialorder %v4320_v10, 0.0  ;;  %1878 = vrsqrt.f32 %v4389_v29  ;;  %v1861_v52 = vpop.eup %1860  ;;  %v1256_v5 = vsel %vm1255_vm14, %v4295_v53, %v1254_v4  ;;  %v1265_v38 = vand.u32 2147483648, %v4320_v10 }
 0x1f9   :  { %v1051_v13 = vmul.f32 2e-05, %v994_v0  ;;  %v1054_v32 = vmul.f32 2e-05, %v997_v35  ;;  %v4408_v54 = vpop.eup %1862  ;;  %v1667_v40 = vmul.f32 %v1861_v52, %v4292_v18  ;;  %v1259_v39 = vsel %vm1257_vm15, %v1258_v31, %v1256_v5  ;;  %v2074_v31 = vld [vmem:[%s5607_s0] sm:$0xff]  ;;  %v842_v52 = vpop.permute.xlu0 %841 }
 0x1fa   :  { %v1249_v27 = vsel %vm1248_vm0, %v4297_v21, %v1247_v47  ;;  %vm1283_vm8 = vcmp.eq.f32.partialorder %v4344_v58, inf  ;;  %v939_v4 = vsel %vm925_vm3, %v838_v19, 0.0  ;;  %v4419_v26 = vpop.eup %1864  ;;  %1880 = vrsqrt.f32 %v1259_v39 }
 0x1fb   :  { %v1252_v0 = vsel %vm1250_vm1, %v1251_v36, %v1249_v27  ;;  %v1268_v18 = vmul.f32 %v4408_v54, %v4318_v22  ;;  %vm1285_vm9 = vcmp.eq.f32.partialorder %v4344_v58, 0.0  ;;  %v4426_v53 = vadd.f32 1.0, %v1051_v13 }
 0x1fc   :  { %v1724_v35 = vmul.f32 %v2074_v31, %v1667_v40  ;;  %1882 = vrsqrt.f32 %v1252_v0  ;;  %v1261_v19 = vmul.f32 %v4419_v26, %v4320_v10  ;;  %v4433_v47 = vadd.f32 1.0, %v1054_v32 }
 0x1fd   :  { %v1270_v27 = vsel %vm1269_vm4, %v4318_v22, %v1268_v18  ;;  %v1286_v21 = vand.u32 2147483648, %v4344_v58  ;;  %1884 = vrsqrt.f32 %v4426_v53  ;;  %v996_v36 = vadd.f32 %v939_v4, %v3994_v61  ;;  %v1867_v5 = vpop.eup %1866  ;;  %v848_v4 = vpop.permute.xlu1 %847 }
 0x1fe   :  { %1781 = vst [vmem:[%s5608_s1] sm:$0xff] %v1724_v35  ;;  %v1273_v13 = vsel %vm1271_vm5, %v1272_v23, %v1270_v27  ;;  %v1263_v32 = vsel %vm1262_vm6, %v4320_v10, %v1261_v19  ;;  %vm1276_vm10 = vcmp.eq.f32.partialorder %v4371_v42, inf  ;;  %1886 = vrsqrt.f32 %v4433_v47  ;;  %v1869_v40 = vpop.eup %1868 }
 0x1ff   :  { %v1669_v61 = vmul.f32 %v1867_v5, %v4322_v3  ;;  %1888 = vrsqrt.f32 %v1273_v13  ;;  %v1266_v39 = vsel %vm1264_vm7, %v1265_v38, %v1263_v32  ;;  %vm1278_vm11 = vcmp.eq.f32.partialorder %v4371_v42, 0.0  ;;  %v4455_v22 = vpop.eup %1870  ;;  %v2075_v3 = vld [vmem:[%s5607_s0 + $0x10] sm:$0xff] }
 0x200   :  { %v1668_v23 = vmul.f32 %v1869_v40, %v4326_v14  ;;  %1890 = vrsqrt.f32 %v1266_v39  ;;  %v1279_v0 = vand.u32 2147483648, %v4371_v42  ;;  %vm1297_vm12 = vcmp.eq.f32.partialorder %v4389_v29, inf  ;;  %v2076_v14 = vld [vmem:[%s5607_s0 + $0x8] sm:$0xff] }
 0x201   :  { %v1726_v18 = vmul.f32 %v2075_v3, %v1669_v61  ;;  %v1282_v10 = vmul.f32 %v4455_v22, %v4344_v58  ;;  %v1053_v38 = vmul.f32 2e-05, %v996_v36  ;;  %v942_v31 = vsel %vm925_vm3, %v844_v8, 0.0  ;;  %v1873_v35 = vpop.eup %1872  ;;  %v846_v61 = vpop.permute.xlu0 %845 }
 0x202   :  { %v1725_v19 = vmul.f32 %v2076_v14, %v1668_v23  ;;  %v999_v27 = vadd.f32 %v942_v31, %v4016_v2  ;;  %v941_v5 = vsel %vm925_vm3, %v842_v52, 0.0  ;;  %v944_v13 = vsel %vm925_vm3, %v848_v4, 0.0  ;;  %v1875_v32 = vpop.eup %1874 }
 0x203   :  { %1783 = vst [vmem:[%s5608_s1 + $0x10] sm:$0xff] %v1726_v18  ;;  %v1671_v8 = vmul.f32 %v1873_v35, %v4346_v44  ;;  %v1284_v36 = vsel %vm1283_vm8, %v4344_v58, %v1282_v10  ;;  %v4482_v40 = vadd.f32 1.0, %v1053_v38  ;;  %v998_v2 = vadd.f32 %v941_v5, %v4000_v62  ;;  %v2077_v62 = vld [vmem:[%s5607_s0 + $0x20] sm:$0xff] }
 0x204   :  { %v4485_v52 = vpop.eup %1876  ;;  %1782 = vst [vmem:[%s5608_s1 + $0x8] sm:$0xff] %v1725_v19  ;;  %v1670_v39 = vmul.f32 %v1875_v32, %v4355_v48  ;;  %v1287_v44 = vsel %vm1285_vm9, %v1286_v21, %v1284_v36  ;;  %v1056_v4 = vmul.f32 2e-05, %v999_v27  ;;  %v1001_v23 = vadd.f32 %v944_v13, %v4038_v25  ;;  %v2078_v48 = vld [vmem:[%s5607_s0 + $0x18] sm:$0xff] }
 0x205   :  { %v4494_v3 = vpop.eup %1878  ;;  %v1728_v18 = vmul.f32 %v2077_v62, %v1671_v8  ;;  %1892 = vrsqrt.f32 %v1287_v44  ;;  %v1275_v10 = vmul.f32 %v4485_v52, %v4371_v42  ;;  %vm1299_vm13 = vcmp.eq.f32.partialorder %v4389_v29, 0.0 }
 0x206   :  { %v1727_v58 = vmul.f32 %v2078_v48, %v1670_v39  ;;  %v1296_v25 = vmul.f32 %v4494_v3, %v4389_v29  ;;  %v1300_v21 = vand.u32 2147483648, %v4389_v29  ;;  %1894 = vrsqrt.f32 %v4482_v40  ;;  %v850_v39 = vpop.permute.xlu0 %849 }
 0x207   :  { %1785 = vst [vmem:[%s5608_s1 + $0x20] sm:$0xff] %v1728_v18  ;;  %v1277_v38 = vsel %vm1276_vm10, %v4371_v42, %v1275_v10  ;;  %vm1290_vm14 = vcmp.eq.f32.partialorder %v4426_v53, inf  ;;  %v4516_v31 = vadd.f32 1.0, %v1056_v4  ;;  %v1055_v35 = vmul.f32 2e-05, %v998_v2  ;;  %v1881_v14 = vpop.eup %1880  ;;  %v852_v2 = vpop.permute.xlu1 %851  ;;  %v2080_v18 = vld [vmem:[%s5607_s0 + $0x28] sm:$0xff] }
 0x208   :  { %1784 = vst [vmem:[%s5608_s1 + $0x18] sm:$0xff] %v1727_v58  ;;  %v1280_v19 = vsel %vm1278_vm11, %v1279_v0, %v1277_v38  ;;  %v1298_v27 = vsel %vm1297_vm12, %v4389_v29, %v1296_v25  ;;  %vm1292_vm15 = vcmp.eq.f32.partialorder %v4426_v53, 0.0  ;;  %v1058_v5 = vmul.f32 2e-05, %v1001_v23 }
 0x209   :  { %v1883_v13 = vpop.eup %1882  ;;  %v1673_v32 = vmul.f32 %v1881_v14, %v4386_v49  ;;  %1896 = vrsqrt.f32 %v1280_v19  ;;  %v1301_v8 = vsel %vm1299_vm13, %v1300_v21, %v1298_v27  ;;  %v1293_v36 = vand.u32 2147483648, %v4426_v53  ;;  %v2079_v49 = vld [vmem:[%s5607_s0 + $0x30] sm:$0xff] }
 0x20a   :  { %v4531_v42 = vpop.eup %1884  ;;  %v1672_v0 = vmul.f32 %v1883_v13, %v4392_v30  ;;  %1898 = vrsqrt.f32 %v1301_v8  ;;  %vm1311_vm0 = vcmp.eq.f32.partialorder %v4433_v47, inf  ;;  %v943_v44 = vsel %vm925_vm3, %v846_v61, 0.0 }
 0x20b   :  { %v4537_v4 = vpop.eup %1886  ;;  %v1730_v29 = vmul.f32 %v2079_v49, %v1673_v32  ;;  %v1289_v23 = vmul.f32 %v4531_v42, %v4426_v53  ;;  %1900 = vrsqrt.f32 %v4516_v31  ;;  %v4545_v62 = vadd.f32 1.0, %v1055_v35  ;;  %v6067_v35 = vld [vmem:[#allocation18_spill] sm:$0xff] }
 0x20c   :  { %v1889_v30 = vpop.eup %1888  ;;  %v1729_v61 = vmul.f32 %v2080_v18, %v1672_v0  ;;  %v1310_v10 = vmul.f32 %v4537_v4, %v4433_v47  ;;  %v1314_v48 = vand.u32 2147483648, %v4433_v47  ;;  %v4553_v58 = vadd.f32 1.0, %v1058_v5  ;;  %v6068_v5 = vld [vmem:[#allocation80_spill] sm:$0xff]  ;;  %v2081_v32 = vld [vmem:[%s5607_s0 + $0x40] sm:$0xff]  ;;  %v6069_v0 = vld [vmem:[#allocation75_spill] sm:$0xff] }
 0x20d   :  { %v1891_v25 = vpop.eup %1890  ;;  %1787 = vst [vmem:[%s5608_s1 + $0x30] sm:$0xff] %v1730_v29  ;;  %v1675_v21 = vmul.f32 %v1889_v30, %v4408_v54  ;;  %v1291_v38 = vsel %vm1290_vm14, %v4426_v53, %v1289_v23  ;;  %1902 = vrsqrt.f32 %v4545_v62  ;;  %v1000_v14 = vadd.f32 %v943_v44, %v6067_v35  ;;  %v856_v53 = vpop.permute.xlu1 %855 }
 0x20e   :  { %1786 = vst [vmem:[%s5608_s1 + $0x28] sm:$0xff] %v1729_v61  ;;  %v1674_v19 = vmul.f32 %v1891_v25, %v4419_v26  ;;  %v1294_v27 = vsel %vm1292_vm15, %v1293_v36, %v1291_v38  ;;  %v1312_v54 = vsel %vm1311_vm0, %v4433_v47, %v1310_v10  ;;  %vm1313_vm1 = vcmp.eq.f32.partialorder %v4433_v47, 0.0  ;;  %v854_v36 = vpop.permute.xlu0 %853  ;;  %v2082_v47 = vld [vmem:[%s5607_s0 + $0x38] sm:$0xff] }
 0x20f   :  { %v4577_v13 = vsel %vm696_vm2, %v6068_v5, 0.0  ;;  %v1732_v8 = vmul.f32 %v2081_v32, %v1675_v21  ;;  %1904 = vrsqrt.f32 %v1294_v27  ;;  %v1315_v26 = vsel %vm1313_vm1, %v1314_v48, %v1312_v54  ;;  %v6070_v21 = vld [vmem:[#allocation78_spill] sm:$0xff]  ;;  %v2083_v54 = vld [vmem:[%s5607_s0 + $0x50] sm:$0xff] }
 0x210   :  { %v4584_v44 = vadd.f32 %v4280_v59, %v6069_v0  ;;  %v1731_v49 = vmul.f32 %v2082_v47, %v1674_v19  ;;  %1906 = vrsqrt.f32 %v1315_v26  ;;  %vm1304_vm4 = vcmp.eq.f32.partialorder %v4482_v40, inf  ;;  %v6071_v19 = vld [vmem:[#allocation79_spill] sm:$0xff] }
 0x211   :  { %1789 = vst [vmem:[%s5608_s1 + $0x40] sm:$0xff] %v1732_v8  ;;  %vm1306_vm5 = vcmp.eq.f32.partialorder %v4482_v40, 0.0  ;;  %1908 = vrsqrt.f32 %v4553_v58  ;;  %v1057_v29 = vmul.f32 2e-05, %v1000_v14  ;;  %v946_v59 = vsel %vm925_vm3, %v852_v2, 0.0 }
 0x212   :  { %v1893_v23 = vpop.eup %1892  ;;  %1788 = vst [vmem:[%s5608_s1 + $0x38] sm:$0xff] %v1731_v49  ;;  %v1003_v30 = vadd.f32 %v946_v59, %v4066_v50  ;;  %v945_v18 = vsel %vm925_vm3, %v850_v39, 0.0  ;;  %v948_v61 = vsel %vm925_vm3, %v856_v53, 0.0  ;;  %v947_v10 = vsel %vm925_vm3, %v854_v36, 0.0  ;;  %v860_v49 = vpop.permute.xlu1 %859 }
 0x213   :  { %v4607_v48 = vpop.eup %1894  ;;  %v1677_v2 = vmul.f32 %v1893_v23, %v4455_v22  ;;  %v4610_v25 = vadd.f32 1.0, %v1057_v29  ;;  %v1002_v38 = vadd.f32 %v945_v18, %v6070_v21  ;;  %v1005_v35 = vadd.f32 %v948_v61, %v4072_v46  ;;  %v858_v61 = vpop.permute.xlu0 %857 }
 0x214   :  { %v1303_v50 = vmul.f32 %v4607_v48, %v4482_v40  ;;  %v1307_v39 = vand.u32 2147483648, %v4482_v40  ;;  %v1060_v14 = vmul.f32 2e-05, %v1003_v30  ;;  %v1004_v27 = vadd.f32 %v947_v10, %v6071_v19  ;;  %v2084_v30 = vld [vmem:[%s5607_s0 + $0x48] sm:$0xff] }
 0x215   :  { %v1734_v5 = vmul.f32 %v2083_v54, %v1677_v2  ;;  %vm1325_vm6 = vcmp.eq.f32.partialorder %v4516_v31, inf  ;;  %vm1327_vm7 = vcmp.eq.f32.partialorder %v4516_v31, 0.0  ;;  %1910 = vrsqrt.f32 %v4610_v25 }
 0x216   :  { %v1897_v46 = vpop.eup %1896  ;;  %v1305_v22 = vsel %vm1304_vm4, %v4482_v40, %v1303_v50  ;;  %v1328_v32 = vand.u32 2147483648, %v4516_v31  ;;  %v4628_v8 = vadd.f32 1.0, %v1060_v14  ;;  %v1059_v26 = vmul.f32 2e-05, %v1002_v38 }
 0x217   :  { %v1899_v53 = vpop.eup %1898  ;;  %1791 = vst [vmem:[%s5608_s1 + $0x50] sm:$0xff] %v1734_v5  ;;  %v1676_v36 = vmul.f32 %v1897_v46, %v4485_v52  ;;  %v1308_v0 = vsel %vm1306_vm5, %v1307_v39, %v1305_v22  ;;  %vm1318_vm8 = vcmp.eq.f32.partialorder %v4545_v62, inf  ;;  %v1062_v47 = vmul.f32 2e-05, %v1005_v35 }
 0x218   :  { %v4637_v29 = vpop.eup %1900  ;;  %v1679_v59 = vmul.f32 %v1899_v53, %v4494_v3  ;;  %1912 = vrsqrt.f32 %v1308_v0  ;;  %vm1320_vm9 = vcmp.eq.f32.partialorder %v4545_v62, 0.0  ;;  %v1061_v23 = vmul.f32 2e-05, %v1004_v27  ;;  %v2085_v3 = vld [vmem:[%s5607_s0 + $0x60] sm:$0xff] }
 0x219   :  { %v1733_v52 = vmul.f32 %v2084_v30, %v1676_v36  ;;  %v1324_v40 = vmul.f32 %v4637_v29, %v4516_v31  ;;  %v1321_v18 = vand.u32 2147483648, %v4545_v62  ;;  %1914 = vrsqrt.f32 %v4628_v8 }
 0x21a   :  { %v4648_v10 = vpop.eup %1902  ;;  %v1736_v2 = vmul.f32 %v2085_v3, %v1679_v59  ;;  %v4653_v21 = vadd.f32 1.0, %v1059_v26  ;;  %v4655_v38 = vadd.f32 1.0, %v1062_v47  ;;  %v950_v35 = vsel %vm925_vm3, %v860_v49, 0.0  ;;  %v862_v47 = vpop.permute.xlu0 %861 }
 0x21b   :  { %1790 = vst [vmem:[%s5608_s1 + $0x48] sm:$0xff] %v1733_v52  ;;  %v1326_v50 = vsel %vm1325_vm6, %v4516_v31, %v1324_v40  ;;  %v1317_v39 = vmul.f32 %v4648_v10, %v4545_v62  ;;  %vm1339_vm10 = vcmp.eq.f32.partialorder %v4553_v58, inf  ;;  %vm1341_vm11 = vcmp.eq.f32.partialorder %v4553_v58, 0.0 }
 0x21c   :  { %v1905_v14 = vpop.eup %1904  ;;  %1793 = vst [vmem:[%s5608_s1 + $0x60] sm:$0xff] %v1736_v2  ;;  %v1329_v19 = vsel %vm1327_vm7, %v1328_v32, %v1326_v50  ;;  %v1342_v27 = vand.u32 2147483648, %v4553_v58  ;;  %1916 = vrsqrt.f32 %v4653_v21  ;;  %v4676_v54 = vadd.f32 1.0, %v1061_v23 }
 0x21d   :  { %v1907_v5 = vpop.eup %1906  ;;  %v1678_v46 = vmul.f32 %v1905_v14, %v4531_v42  ;;  %1918 = vrsqrt.f32 %v1329_v19  ;;  %v1319_v22 = vsel %vm1318_vm8, %v4545_v62, %v1317_v39  ;;  %v1007_v26 = vadd.f32 %v950_v35, %v4081_v63  ;;  %v2086_v42 = vld [vmem:[%s5607_s0 + $0x58] sm:$0xff]  ;;  %v2087_v62 = vld [vmem:[%s5607_s0 + $0x70] sm:$0xff] }
 0x21e   :  { %v4683_v53 = vpop.eup %1908  ;;  %v1681_v31 = vmul.f32 %v1907_v5, %v4537_v4  ;;  %v1322_v32 = vsel %vm1320_vm9, %v1321_v18, %v1319_v22  ;;  %vm1332_vm12 = vcmp.eq.f32.partialorder %v4610_v25, inf  ;;  %1920 = vrsqrt.f32 %v4655_v38  ;;  %v864_v4 = vpop.permute.xlu1 %863 }
 0x21f   :  { %v1735_v36 = vmul.f32 %v2086_v42, %v1678_v46  ;;  %1922 = vrsqrt.f32 %v1322_v32  ;;  %v1338_v63 = vmul.f32 %v4683_v53, %v4553_v58  ;;  %v949_v0 = vsel %vm925_vm3, %v858_v61, 0.0 }
 0x220   :  { %v1738_v49 = vmul.f32 %v2087_v62, %v1681_v31  ;;  %vm1334_vm13 = vcmp.eq.f32.partialorder %v4610_v25, 0.0  ;;  %v1335_v59 = vand.u32 2147483648, %v4610_v25  ;;  %1924 = vrsqrt.f32 %v4676_v54 }
 0x221   :  { %1792 = vst [vmem:[%s5608_s1 + $0x58] sm:$0xff] %v1735_v36  ;;  %v1340_v23 = vsel %vm1339_vm10, %v4553_v58, %v1338_v63  ;;  %vm1353_vm14 = vcmp.eq.f32.partialorder %v4628_v8, inf  ;;  %vm1355_vm15 = vcmp.eq.f32.partialorder %v4628_v8, 0.0  ;;  %v1064_v30 = vmul.f32 2e-05, %v1007_v26  ;;  %v866_v26 = vpop.permute.xlu0 %865  ;;  %v2088_v36 = vld [vmem:[%s5607_s0 + $0x68] sm:$0xff] }
 0x222   :  { %v4711_v52 = vpop.eup %1910  ;;  %1795 = vst [vmem:[%s5608_s1 + $0x70] sm:$0xff] %v1738_v49  ;;  %v1343_v40 = vsel %vm1341_vm11, %v1342_v27, %v1340_v23  ;;  %v1006_v18 = vadd.f32 %v949_v0, %v4069_v37  ;;  %v952_v61 = vsel %vm925_vm3, %v864_v4, 0.0  ;;  %v951_v3 = vsel %vm925_vm3, %v862_v47, 0.0  ;;  %v868_v5 = vpop.permute.xlu1 %867 }
 0x223   :  { %1926 = vrsqrt.f32 %v1343_v40  ;;  %v1331_v2 = vmul.f32 %v4711_v52, %v4610_v25  ;;  %v4725_v35 = vadd.f32 1.0, %v1064_v30  ;;  %v1009_v50 = vadd.f32 %v952_v61, %v4094_v15 }
 0x224   :  { %v1356_v39 = vand.u32 2147483648, %v4628_v8  ;;  %vm1346_vm0 = vcmp.eq.f32.partialorder %v4653_v21, inf  ;;  %v1063_v58 = vmul.f32 2e-05, %v1006_v18  ;;  %v1008_v37 = vadd.f32 %v951_v3, %v4078_v24 }
 0x225   :  { %v1913_v14 = vpop.eup %1912  ;;  %v1333_v19 = vsel %vm1332_vm12, %v4610_v25, %v1331_v2  ;;  %vm1348_vm1 = vcmp.eq.f32.partialorder %v4653_v21, 0.0  ;;  %v1349_v27 = vand.u32 2147483648, %v4653_v21  ;;  %1928 = vrsqrt.f32 %v4725_v35 }
 0x226   :  { %v4737_v15 = vpop.eup %1914  ;;  %v1680_v46 = vmul.f32 %v1913_v14, %v4607_v48  ;;  %v1336_v22 = vsel %vm1334_vm13, %v1335_v59, %v1333_v19  ;;  %vm1367_vm4 = vcmp.eq.f32.partialorder %v4655_v38, inf  ;;  %v4743_v24 = vadd.f32 1.0, %v1063_v58 }
 0x227   :  { %1930 = vrsqrt.f32 %v1336_v22  ;;  %v1352_v31 = vmul.f32 %v4737_v15, %v4628_v8  ;;  %v1066_v32 = vmul.f32 2e-05, %v1009_v50  ;;  %v1065_v42 = vmul.f32 2e-05, %v1008_v37 }
 0x228   :  { %v1737_v63 = vmul.f32 %v2088_v36, %v1680_v46  ;;  %vm1369_vm5 = vcmp.eq.f32.partialorder %v4655_v38, 0.0  ;;  %1932 = vrsqrt.f32 %v4743_v24  ;;  %v954_v48 = vsel %vm925_vm3, %v868_v5, 0.0  ;;  %v870_v46 = vpop.permute.xlu0 %869 }
 0x229   :  { %v4754_v25 = vpop.eup %1916  ;;  %v1354_v0 = vsel %vm1353_vm14, %v4628_v8, %v1352_v31  ;;  %v4759_v4 = vadd.f32 1.0, %v1066_v32  ;;  %v4761_v47 = vadd.f32 1.0, %v1065_v42  ;;  %v953_v62 = vsel %vm925_vm3, %v866_v26, 0.0 }
 0x22a   :  { %v1919_v49 = vpop.eup %1918  ;;  %1794 = vst [vmem:[%s5608_s1 + $0x68] sm:$0xff] %v1737_v63  ;;  %v1357_v59 = vsel %vm1355_vm15, %v1356_v39, %v1354_v0  ;;  %v1345_v23 = vmul.f32 %v4754_v25, %v4653_v21  ;;  %v1370_v30 = vand.u32 2147483648, %v4655_v38  ;;  %vm1360_vm6 = vcmp.eq.f32.partialorder %v4676_v54, inf  ;;  %v872_v39 = vpop.permute.xlu1 %871 }
 0x22b   :  { %v4774_v40 = vpop.eup %1920  ;;  %v1683_v18 = vmul.f32 %v1919_v49, %v4637_v29  ;;  %1934 = vrsqrt.f32 %v1357_v59  ;;  %vm1362_vm7 = vcmp.eq.f32.partialorder %v4676_v54, 0.0  ;;  %v1011_v61 = vadd.f32 %v954_v48, %v4100_v28  ;;  %v2089_v29 = vld [vmem:[%s5607_s0 + $0x80] sm:$0xff] }
 0x22c   :  { %v1923_v3 = vpop.eup %1922  ;;  %v1347_v8 = vsel %vm1346_vm0, %v4653_v21, %v1345_v23  ;;  %v1366_v2 = vmul.f32 %v4774_v40, %v4655_v38  ;;  %1936 = vrsqrt.f32 %v4759_v4  ;;  %v1010_v50 = vadd.f32 %v953_v62, %v4084_v41 }
 0x22d   :  { %v4786_v58 = vpop.eup %1924  ;;  %v1740_v28 = vmul.f32 %v2089_v29, %v1683_v18  ;;  %v1682_v37 = vmul.f32 %v1923_v3, %v4648_v10  ;;  %v1350_v14 = vsel %vm1348_vm1, %v1349_v27, %v1347_v8  ;;  %1938 = vrsqrt.f32 %v4761_v47  ;;  %v2090_v10 = vld [vmem:[%s5607_s0 + $0x78] sm:$0xff] }
 0x22e   :  { %1940 = vrsqrt.f32 %v1350_v14  ;;  %v1368_v41 = vsel %vm1367_vm4, %v4655_v38, %v1366_v2  ;;  %v1359_v19 = vmul.f32 %v4786_v58, %v4676_v54  ;;  %v1363_v5 = vand.u32 2147483648, %v4676_v54  ;;  %v876_v59 = vpop.permute.xlu1 %875 }
 0x22f   :  { %1797 = vst [vmem:[%s5608_s1 + $0x80] sm:$0xff] %v1740_v28  ;;  %v1739_v21 = vmul.f32 %v2090_v10, %v1682_v37  ;;  %v1371_v27 = vsel %vm1369_vm5, %v1370_v30, %v1368_v41  ;;  %vm1381_vm8 = vcmp.eq.f32.partialorder %v4725_v35, inf  ;;  %vm1383_vm9 = vcmp.eq.f32.partialorder %v4725_v35, 0.0 }
 0x230   :  { %v1927_v22 = vpop.eup %1926  ;;  %1942 = vrsqrt.f32 %v1371_v27  ;;  %v1361_v26 = vsel %vm1360_vm6, %v4676_v54, %v1359_v19  ;;  %v1068_v31 = vmul.f32 2e-05, %v1011_v61  ;;  %v1067_v32 = vmul.f32 2e-05, %v1010_v50  ;;  %v2091_v54 = vld [vmem:[%s5607_s0 + $0x90] sm:$0xff]  ;;  %v874_v50 = vpop.permute.xlu0 %873 }
 0x231   :  { %1796 = vst [vmem:[%s5608_s1 + $0x78] sm:$0xff] %v1739_v21  ;;  %v1685_v42 = vmul.f32 %v1927_v22, %v4683_v53  ;;  %v1364_v38 = vsel %vm1362_vm7, %v1363_v5, %v1361_v26  ;;  %v956_v36 = vsel %vm925_vm3, %v872_v39, 0.0  ;;  %v955_v63 = vsel %vm925_vm3, %v870_v46, 0.0 }
 0x232   :  { %v4824_v48 = vpop.eup %1928  ;;  %1944 = vrsqrt.f32 %v1364_v38  ;;  %v1384_v0 = vand.u32 2147483648, %v4725_v35  ;;  %v4827_v62 = vadd.f32 1.0, %v1068_v31  ;;  %v4829_v49 = vadd.f32 1.0, %v1067_v32  ;;  %v880_v31 = vpop.permute.xlu1 %879 }
 0x233   :  { %v1742_v53 = vmul.f32 %v2091_v54, %v1685_v42  ;;  %v1380_v23 = vmul.f32 %v4824_v48, %v4725_v35  ;;  %v1013_v30 = vadd.f32 %v956_v36, %v4120_v20  ;;  %v1012_v18 = vadd.f32 %v955_v63, %v4097_v16 }
 0x234   :  { %v1931_v61 = vpop.eup %1930  ;;  %vm1374_vm10 = vcmp.eq.f32.partialorder %v4743_v24, inf  ;;  %vm1376_vm11 = vcmp.eq.f32.partialorder %v4743_v24, 0.0  ;;  %v1377_v3 = vand.u32 2147483648, %v4743_v24  ;;  %1946 = vrsqrt.f32 %v4827_v62  ;;  %v878_v63 = vpop.permute.xlu0 %877 }
 0x235   :  { %v4842_v8 = vpop.eup %1932  ;;  %1799 = vst [vmem:[%s5608_s1 + $0x90] sm:$0xff] %v1742_v53  ;;  %v1684_v2 = vmul.f32 %v1931_v61, %v4711_v52  ;;  %v1382_v16 = vsel %vm1381_vm8, %v4725_v35, %v1380_v23  ;;  %1948 = vrsqrt.f32 %v4829_v49  ;;  %v958_v20 = vsel %vm925_vm3, %v876_v59, 0.0  ;;  %v2092_v52 = vld [vmem:[%s5607_s0 + $0x88] sm:$0xff] }
 0x236   :  { %v1385_v39 = vsel %vm1383_vm9, %v1384_v0, %v1382_v16  ;;  %v1373_v29 = vmul.f32 %v4842_v8, %v4743_v24  ;;  %vm1395_vm12 = vcmp.eq.f32.partialorder %v4759_v4, inf  ;;  %vm1397_vm13 = vcmp.eq.f32.partialorder %v4759_v4, 0.0  ;;  %v6072_v16 = vld [vmem:[#allocation73_spill] sm:$0xff] }
 0x237   :  { %v1741_v28 = vmul.f32 %v2092_v52, %v1684_v2  ;;  %1950 = vrsqrt.f32 %v1385_v39  ;;  %v1070_v37 = vmul.f32 2e-05, %v1013_v30  ;;  %v1069_v14 = vmul.f32 2e-05, %v1012_v18  ;;  %v884_v52 = vpop.permute.xlu1 %883 }
 0x238   :  { %v1935_v41 = vpop.eup %1934  ;;  %v1375_v35 = vsel %vm1374_vm10, %v4743_v24, %v1373_v29  ;;  %v1398_v19 = vand.u32 2147483648, %v4759_v4  ;;  %v1015_v5 = vadd.f32 %v958_v20, %v4141_v17  ;;  %v957_v46 = vsel %vm925_vm3, %v874_v50, 0.0  ;;  %v6073_v50 = vld [vmem:[#allocation81_spill] sm:$0xff] }
 0x239   :  { %v4870_v10 = vpop.eup %1936  ;;  %1798 = vst [vmem:[%s5608_s1 + $0x88] sm:$0xff] %v1741_v28  ;;  %v1687_v21 = vmul.f32 %v1935_v41, %v4737_v15  ;;  %v1378_v27 = vsel %vm1376_vm11, %v1377_v3, %v1375_v35  ;;  %v4878_v22 = vadd.f32 1.0, %v1070_v37  ;;  %v4880_v26 = vadd.f32 1.0, %v1069_v14  ;;  %v2093_v15 = vld [vmem:[%s5607_s0 + $0xa0] sm:$0xff]  ;;  %v882_v35 = vpop.permute.xlu0 %881 }
 0x23a   :  { %v4882_v17 = vpop.eup %1938  ;;  %1952 = vrsqrt.f32 %v1378_v27  ;;  %v1394_v32 = vmul.f32 %v4870_v10, %v4759_v4  ;;  %vm1388_vm14 = vcmp.eq.f32.partialorder %v4761_v47, inf  ;;  %vm1390_vm15 = vcmp.eq.f32.partialorder %v4761_v47, 0.0 }
 0x23b   :  { %v1941_v42 = vpop.eup %1940  ;;  %v1744_v24 = vmul.f32 %v2093_v15, %v1687_v21  ;;  %v1387_v38 = vmul.f32 %v4882_v17, %v4761_v47  ;;  %1954 = vrsqrt.f32 %v4878_v22  ;;  %v1072_v36 = vmul.f32 2e-05, %v1015_v5 }
 0x23c   :  { %v1686_v0 = vmul.f32 %v1941_v42, %v4754_v25  ;;  %v1396_v59 = vsel %vm1395_vm12, %v4759_v4, %v1394_v32  ;;  %v1391_v54 = vand.u32 2147483648, %v4761_v47  ;;  %v1014_v53 = vadd.f32 %v957_v46, %v4106_v60  ;;  %v2094_v60 = vld [vmem:[%s5607_s0 + $0x98] sm:$0xff] }
 0x23d   :  { %v1943_v23 = vpop.eup %1942  ;;  %1801 = vst [vmem:[%s5608_s1 + $0xa0] sm:$0xff] %v1744_v24  ;;  %v1399_v30 = vsel %vm1397_vm13, %v1398_v19, %v1396_v59  ;;  %v1389_v25 = vsel %vm1388_vm14, %v4761_v47, %v1387_v38  ;;  %1956 = vrsqrt.f32 %v4880_v26  ;;  %v960_v18 = vsel %vm925_vm3, %v880_v31, 0.0  ;;  %v2095_v47 = vld [vmem:[%s5607_s0 + $0xb0] sm:$0xff]  ;;  %v888_v59 = vpop.permute.xlu1 %887 }
 0x23e   :  { %v1743_v61 = vmul.f32 %v2094_v60, %v1686_v0  ;;  %v1689_v3 = vmul.f32 %v1943_v23, %v4774_v40  ;;  %1958 = vrsqrt.f32 %v1399_v30  ;;  %v1392_v4 = vsel %vm1390_vm15, %v1391_v54, %v1389_v25  ;;  %v6074_v23 = vld [vmem:[#allocation82_spill] sm:$0xff]  ;;  %v6075_v60 = vld [vmem:[#allocation83_spill] sm:$0xff] }
 0x23f   :  { %v1945_v2 = vpop.eup %1944  ;;  %v4919_v20 = vadd.f32 %v4577_v13, %v6072_v16  ;;  %v4924_v39 = vsel %vm696_vm2, %v6073_v50, 0.0  ;;  %1960 = vrsqrt.f32 %v1392_v4  ;;  %v4926_v29 = vadd.f32 1.0, %v1072_v36 }
 0x240   :  { %1800 = vst [vmem:[%s5608_s1 + $0x98] sm:$0xff] %v1743_v61  ;;  %v1746_v40 = vmul.f32 %v2095_v47, %v1689_v3  ;;  %v1688_v13 = vmul.f32 %v1945_v2, %v4786_v58  ;;  %v1071_v28 = vmul.f32 2e-05, %v1014_v53  ;;  %v1017_v37 = vadd.f32 %v960_v18, %v4147_v33  ;;  %v2096_v33 = vld [vmem:[%s5607_s0 + $0xa8] sm:$0xff]  ;;  %v2097_v18 = vld [vmem:[%s5607_s0 + $0xc0] sm:$0xff] }
 0x241   :  { %v4936_v14 = vpop.eup %1946  ;;  %vm1409_vm2 = vcmp.eq.f32.partialorder %v4827_v62, inf  ;;  %vm1411_vm0 = vcmp.eq.f32.partialorder %v4827_v62, 0.0  ;;  %v1412_v41 = vand.u32 2147483648, %v4827_v62  ;;  %1962 = vrsqrt.f32 %v4926_v29 }
 0x242   :  { %v4942_v19 = vpop.eup %1948  ;;  %1803 = vst [vmem:[%s5608_s1 + $0xb0] sm:$0xff] %v1746_v40  ;;  %v1745_v58 = vmul.f32 %v2096_v33, %v1688_v13  ;;  %v1408_v5 = vmul.f32 %v4936_v14, %v4827_v62  ;;  %v4952_v46 = vadd.f32 1.0, %v1071_v28  ;;  %v1074_v21 = vmul.f32 2e-05, %v1017_v37  ;;  %v886_v40 = vpop.permute.xlu0 %885 }
 0x243   :  { %v1401_v27 = vmul.f32 %v4942_v19, %v4829_v49  ;;  %vm1402_vm1 = vcmp.eq.f32.partialorder %v4829_v49, inf  ;;  %v1405_v31 = vand.u32 2147483648, %v4829_v49  ;;  %v959_v32 = vsel %vm925_vm3, %v878_v63, 0.0  ;;  %v892_v33 = vpop.permute.xlu1 %891 }
 0x244   :  { %v1951_v42 = vpop.eup %1950  ;;  %1802 = vst [vmem:[%s5608_s1 + $0xa8] sm:$0xff] %v1745_v58  ;;  %v1410_v15 = vsel %vm1409_vm2, %v4827_v62, %v1408_v5  ;;  %1964 = vrsqrt.f32 %v4952_v46  ;;  %v962_v24 = vsel %vm925_vm3, %v884_v52, 0.0  ;;  %v961_v38 = vsel %vm925_vm3, %v882_v35, 0.0 }
 0x245   :  { %v1691_v36 = vmul.f32 %v1951_v42, %v4824_v48  ;;  %v1413_v63 = vsel %vm1411_vm0, %v1412_v41, %v1410_v15  ;;  %v1403_v0 = vsel %vm1402_vm1, %v4829_v49, %v1401_v27  ;;  %vm1404_vm4 = vcmp.eq.f32.partialorder %v4829_v49, 0.0 }
 0x246   :  { %1966 = vrsqrt.f32 %v1413_v63  ;;  %v1406_v54 = vsel %vm1404_vm4, %v1405_v31, %v1403_v0  ;;  %v4976_v53 = vadd.f32 1.0, %v1074_v21  ;;  %v1016_v30 = vadd.f32 %v959_v32, %v6074_v23 }
 0x247   :  { %v1953_v25 = vpop.eup %1952  ;;  %v1748_v48 = vmul.f32 %v2097_v18, %v1691_v36  ;;  %1968 = vrsqrt.f32 %v1406_v54  ;;  %v1019_v62 = vadd.f32 %v962_v24, %v4156_v45  ;;  %v1018_v61 = vadd.f32 %v961_v38, %v6075_v60  ;;  %v2100_v36 = vld [vmem:[%s5607_s0 + $0xc8] sm:$0xff] }
 0x248   :  { %v4984_v3 = vpop.eup %1954  ;;  %v1690_v49 = vmul.f32 %v1953_v25, %v4842_v8  ;;  %vm1423_vm5 = vcmp.eq.f32.partialorder %v4878_v22, inf  ;;  %vm1425_vm6 = vcmp.eq.f32.partialorder %v4878_v22, 0.0  ;;  %1970 = vrsqrt.f32 %v4976_v53  ;;  %v2098_v8 = vld [vmem:[%s5607_s0 + $0xb8] sm:$0xff] }
 0x249   :  { %1805 = vst [vmem:[%s5608_s1 + $0xc0] sm:$0xff] %v1748_v48  ;;  %v1422_v4 = vmul.f32 %v4984_v3, %v4878_v22  ;;  %v1426_v45 = vand.u32 2147483648, %v4878_v22  ;;  %v1073_v2 = vmul.f32 2e-05, %v1016_v30  ;;  %v1076_v16 = vmul.f32 2e-05, %v1019_v62  ;;  %v896_v30 = vpop.permute.xlu1 %895 }
 0x24a   :  { %v4996_v50 = vpop.eup %1956  ;;  %v1747_v52 = vmul.f32 %v2098_v8, %v1690_v49  ;;  %vm1416_vm7 = vcmp.eq.f32.partialorder %v4880_v26, inf  ;;  %vm1418_vm8 = vcmp.eq.f32.partialorder %v4880_v26, 0.0  ;;  %v1075_v47 = vmul.f32 2e-05, %v1018_v61 }
 0x24b   :  { %v1959_v13 = vpop.eup %1958  ;;  %v1424_v28 = vsel %vm1423_vm5, %v4878_v22, %v1422_v4  ;;  %v1415_v37 = vmul.f32 %v4996_v50, %v4880_v26  ;;  %v5008_v41 = vadd.f32 1.0, %v1073_v2  ;;  %v964_v35 = vsel %vm925_vm3, %v888_v59, 0.0  ;;  %v890_v59 = vpop.permute.xlu0 %889 }
 0x24c   :  { %v1961_v58 = vpop.eup %1960  ;;  %1804 = vst [vmem:[%s5608_s1 + $0xb8] sm:$0xff] %v1747_v52  ;;  %v1693_v5 = vmul.f32 %v1959_v13, %v4870_v10  ;;  %v1427_v21 = vsel %vm1425_vm6, %v1426_v45, %v1424_v28  ;;  %v1419_v27 = vand.u32 2147483648, %v4880_v26  ;;  %v5019_v31 = vadd.f32 1.0, %v1076_v16  ;;  %v2099_v10 = vld [vmem:[%s5607_s0 + $0xd0] sm:$0xff] }
 0x24d   :  { %v1692_v32 = vmul.f32 %v1961_v58, %v4882_v17  ;;  %1972 = vrsqrt.f32 %v1427_v21  ;;  %v1417_v42 = vsel %vm1416_vm7, %v4880_v26, %v1415_v37  ;;  %v5025_v15 = vadd.f32 1.0, %v1075_v47  ;;  %v6076_v13 = vld [vmem:[#allocation84_spill] sm:$0xff]  ;;  %v900_v58 = vpop.permute.xlu1 %899 }
 0x24e   :  { %v5027_v24 = vpop.eup %1962  ;;  %v1750_v22 = vmul.f32 %v2099_v10, %v1693_v5  ;;  %v1420_v38 = vsel %vm1418_vm8, %v1419_v27, %v1417_v42  ;;  %1974 = vrsqrt.f32 %v5008_v41  ;;  %v1021_v17 = vadd.f32 %v964_v35, %v4165_v11 }
 0x24f   :  { %v1749_v63 = vmul.f32 %v2100_v36, %v1692_v32  ;;  %1976 = vrsqrt.f32 %v1420_v38  ;;  %v1436_v0 = vmul.f32 %v5027_v24, %v4926_v29  ;;  %vm1437_vm9 = vcmp.eq.f32.partialorder %v4926_v29, inf }
 0x250   :  { %1807 = vst [vmem:[%s5608_s1 + $0xd0] sm:$0xff] %v1750_v22  ;;  %vm1439_vm10 = vcmp.eq.f32.partialorder %v4926_v29, 0.0  ;;  %v1440_v26 = vand.u32 2147483648, %v4926_v29  ;;  %1978 = vrsqrt.f32 %v5019_v31  ;;  %v963_v11 = vsel %vm925_vm3, %v886_v40, 0.0 }
 0x251   :  { %v5050_v54 = vpop.eup %1964  ;;  %1806 = vst [vmem:[%s5608_s1 + $0xc8] sm:$0xff] %v1749_v63  ;;  %v1438_v23 = vsel %vm1437_vm9, %v4926_v29, %v1436_v0  ;;  %vm1430_vm11 = vcmp.eq.f32.partialorder %v4952_v46, inf  ;;  %vm1432_vm12 = vcmp.eq.f32.partialorder %v4952_v46, 0.0  ;;  %1980 = vrsqrt.f32 %v5025_v15 }
 0x252   :  { %v1441_v25 = vsel %vm1439_vm10, %v1440_v26, %v1438_v23  ;;  %v1429_v18 = vmul.f32 %v5050_v54, %v4952_v46  ;;  %v1433_v48 = vand.u32 2147483648, %v4952_v46  ;;  %v1078_v62 = vmul.f32 2e-05, %v1021_v17 }
 0x253   :  { %v1967_v60 = vpop.eup %1966  ;;  %1982 = vrsqrt.f32 %v1441_v25  ;;  %v1020_v61 = vadd.f32 %v963_v11, %v4153_v34  ;;  %v966_v29 = vsel %vm925_vm3, %v892_v33, 0.0  ;;  %v965_v49 = vsel %vm925_vm3, %v890_v59, 0.0  ;;  %v894_v33 = vpop.permute.xlu0 %893 }
 0x254   :  { %v1969_v4 = vpop.eup %1968  ;;  %v1695_v45 = vmul.f32 %v1967_v60, %v4936_v14  ;;  %v1431_v2 = vsel %vm1430_vm11, %v4952_v46, %v1429_v18  ;;  %v5069_v16 = vadd.f32 1.0, %v1078_v62  ;;  %v1023_v8 = vadd.f32 %v966_v29, %v4179_v43  ;;  %v2101_v14 = vld [vmem:[%s5607_s0 + $0xe0] sm:$0xff]  ;;  %v2102_v43 = vld [vmem:[%s5607_s0 + $0xd8] sm:$0xff] }
 0x255   :  { %v5072_v52 = vpop.eup %1970  ;;  %v1694_v47 = vmul.f32 %v1969_v4, %v4942_v19  ;;  %v1434_v34 = vsel %vm1432_vm12, %v1433_v48, %v1431_v2  ;;  %v1077_v40 = vmul.f32 2e-05, %v1020_v61  ;;  %v1022_v28 = vadd.f32 %v965_v49, %v6076_v13  ;;  %v6077_v29 = vld [vmem:[#allocation85_spill] sm:$0xff] }
 0x256   :  { %v1752_v37 = vmul.f32 %v2101_v14, %v1695_v45  ;;  %1984 = vrsqrt.f32 %v1434_v34  ;;  %v1450_v35 = vmul.f32 %v5072_v52, %v4976_v53  ;;  %vm1451_vm13 = vcmp.eq.f32.partialorder %v4976_v53, inf }
 0x257   :  { %v1751_v19 = vmul.f32 %v2102_v43, %v1694_v47  ;;  %vm1453_vm14 = vcmp.eq.f32.partialorder %v4976_v53, 0.0  ;;  %v1454_v46 = vand.u32 2147483648, %v4976_v53  ;;  %1986 = vrsqrt.f32 %v5069_v16  ;;  %v898_v34 = vpop.permute.xlu0 %897  ;;  %v2105_v43 = vld [vmem:[%s5607_s0 + $0x100] sm:$0xff] }
 0x258   :  { %1809 = vst [vmem:[%s5608_s1 + $0xe0] sm:$0xff] %v1752_v37  ;;  %v1452_v5 = vsel %vm1451_vm13, %v4976_v53, %v1450_v35  ;;  %v5094_v21 = vadd.f32 1.0, %v1077_v40  ;;  %v1080_v27 = vmul.f32 2e-05, %v1023_v8  ;;  %v1079_v32 = vmul.f32 2e-05, %v1022_v28 }
 0x259   :  { %1808 = vst [vmem:[%s5608_s1 + $0xd8] sm:$0xff] %v1751_v19  ;;  %v1455_v42 = vsel %vm1453_vm14, %v1454_v46, %v1452_v5  ;;  %vm1444_vm15 = vcmp.eq.f32.partialorder %v5008_v41, inf  ;;  %vm1446_vm2 = vcmp.eq.f32.partialorder %v5008_v41, 0.0  ;;  %v1447_v10 = vand.u32 2147483648, %v5008_v41 }
 0x25a   :  { %v1973_v22 = vpop.eup %1972  ;;  %1988 = vrsqrt.f32 %v1455_v42  ;;  %v968_v53 = vsel %vm925_vm3, %v896_v30, 0.0  ;;  %v967_v38 = vsel %vm925_vm3, %v894_v33, 0.0  ;;  %v970_v17 = vsel %vm925_vm3, %v900_v58, 0.0 }
 0x25b   :  { %v5108_v36 = vpop.eup %1974  ;;  %v1697_v63 = vmul.f32 %v1973_v22, %v4984_v3  ;;  %1990 = vrsqrt.f32 %v5094_v21  ;;  %v5112_v0 = vadd.f32 1.0, %v1080_v27  ;;  %v5114_v26 = vadd.f32 1.0, %v1079_v32  ;;  %v2103_v3 = vld [vmem:[%s5607_s0 + $0xf0] sm:$0xff]  ;;  %v2106_v32 = vld [vmem:[%s5607_s0 + $0xf8] sm:$0xff] }
 0x25c   :  { %v1977_v11 = vpop.eup %1976  ;;  %v1443_v59 = vmul.f32 %v5108_v36, %v5008_v41  ;;  %vm1465_vm0 = vcmp.eq.f32.partialorder %v5019_v31, inf  ;;  %vm1467_vm1 = vcmp.eq.f32.partialorder %v5019_v31, 0.0  ;;  %v1468_v23 = vand.u32 2147483648, %v5019_v31 }
 0x25d   :  { %v5121_v30 = vpop.eup %1978  ;;  %v1754_v25 = vmul.f32 %v2103_v3, %v1697_v63  ;;  %v1696_v18 = vmul.f32 %v1977_v11, %v4996_v50  ;;  %1992 = vrsqrt.f32 %v5112_v0  ;;  %v1025_v48 = vadd.f32 %v968_v53, %v4208_v51  ;;  %v2104_v51 = vld [vmem:[%s5607_s0 + $0xe8] sm:$0xff]  ;;  %v902_v53 = vpop.permute.xlu0 %901 }
 0x25e   :  { %v5129_v62 = vpop.eup %1980  ;;  %v1445_v60 = vsel %vm1444_vm15, %v5008_v41, %v1443_v59  ;;  %v1464_v61 = vmul.f32 %v5121_v30, %v5019_v31  ;;  %v1024_v49 = vadd.f32 %v967_v38, %v6077_v29  ;;  %v1027_v4 = vadd.f32 %v970_v17, %v4216_v55 }
 0x25f   :  { %1811 = vst [vmem:[%s5608_s1 + $0xf0] sm:$0xff] %v1754_v25  ;;  %v1753_v50 = vmul.f32 %v2104_v51, %v1696_v18  ;;  %v1448_v45 = vsel %vm1446_vm2, %v1447_v10, %v1445_v60  ;;  %v1457_v2 = vmul.f32 %v5129_v62, %v5025_v15  ;;  %1994 = vrsqrt.f32 %v5114_v26 }
 0x260   :  { %v1983_v8 = vpop.eup %1982  ;;  %1996 = vrsqrt.f32 %v1448_v45  ;;  %v1466_v55 = vsel %vm1465_vm0, %v5019_v31, %v1464_v61  ;;  %vm1458_vm4 = vcmp.eq.f32.partialorder %v5025_v15, inf  ;;  %v1461_v47 = vand.u32 2147483648, %v5025_v15 }
 0x261   :  { %1810 = vst [vmem:[%s5608_s1 + $0xe8] sm:$0xff] %v1753_v50  ;;  %v1699_v41 = vmul.f32 %v1983_v8, %v5027_v24  ;;  %v1469_v40 = vsel %vm1467_vm1, %v1468_v23, %v1466_v55  ;;  %v1459_v13 = vsel %vm1458_vm4, %v5025_v15, %v1457_v2  ;;  %vm1460_vm5 = vcmp.eq.f32.partialorder %v5025_v15, 0.0  ;;  %v906_v55 = vpop.permute.xlu0 %905 }
 0x262   :  { %1998 = vrsqrt.f32 %v1469_v40  ;;  %v1462_v28 = vsel %vm1460_vm5, %v1461_v47, %v1459_v13  ;;  %v1082_v14 = vmul.f32 2e-05, %v1025_v48  ;;  %v1081_v37 = vmul.f32 2e-05, %v1024_v49 }
 0x263   :  { %v1985_v35 = vpop.eup %1984  ;;  %v1756_v19 = vmul.f32 %v2105_v43, %v1699_v41  ;;  %2000 = vrsqrt.f32 %v1462_v28  ;;  %v1084_v46 = vmul.f32 2e-05, %v1027_v4  ;;  %v969_v31 = vsel %vm925_vm3, %v898_v34, 0.0 }
 0x264   :  { %v5167_v24 = vpop.eup %1986  ;;  %v1698_v33 = vmul.f32 %v1985_v35, %v5050_v54  ;;  %vm1479_vm6 = vcmp.eq.f32.partialorder %v5069_v16, inf  ;;  %v5171_v15 = vadd.f32 1.0, %v1082_v14  ;;  %v5173_v58 = vadd.f32 1.0, %v1081_v37  ;;  %v904_v54 = vpop.permute.xlu1 %903 }
 0x265   :  { %1813 = vst [vmem:[%s5608_s1 + $0x100] sm:$0xff] %v1756_v19  ;;  %v1478_v5 = vmul.f32 %v5167_v24, %v5069_v16  ;;  %vm1481_vm7 = vcmp.eq.f32.partialorder %v5069_v16, 0.0  ;;  %v1482_v27 = vand.u32 2147483648, %v5069_v16  ;;  %vm1472_vm8 = vcmp.eq.f32.partialorder %v5094_v21, inf }
 0x266   :  { %v1755_v42 = vmul.f32 %v2106_v32, %v1698_v33  ;;  %2002 = vrsqrt.f32 %v5171_v15  ;;  %v5187_v10 = vadd.f32 1.0, %v1084_v46  ;;  %v1026_v22 = vadd.f32 %v969_v31, %v4205_v56 }
 0x267   :  { %v1989_v38 = vpop.eup %1988  ;;  %v1480_v17 = vsel %vm1479_vm6, %v5069_v16, %v1478_v5  ;;  %vm1474_vm9 = vcmp.eq.f32.partialorder %v5094_v21, 0.0  ;;  %v1475_v63 = vand.u32 2147483648, %v5094_v21  ;;  %2004 = vrsqrt.f32 %v5173_v58  ;;  %v2107_v16 = vld [vmem:[%s5607_s0 + $0x110] sm:$0xff]  ;;  %v2109_v5 = vld [vmem:[%s5607_s0 + $0x120] sm:$0xff] }
 0x268   :  { %v5196_v11 = vpop.eup %1990  ;;  %1812 = vst [vmem:[%s5608_s1 + $0xf8] sm:$0xff] %v1755_v42  ;;  %v1701_v56 = vmul.f32 %v1989_v38, %v5072_v52  ;;  %v1483_v59 = vsel %vm1481_vm7, %v1482_v27, %v1480_v17  ;;  %vm1493_vm10 = vcmp.eq.f32.partialorder %v5112_v0, inf  ;;  %v972_v23 = vsel %vm925_vm3, %v904_v54, 0.0  ;;  %v908_v4 = vpop.permute.xlu1 %907 }
 0x269   :  { %2006 = vrsqrt.f32 %v1483_v59  ;;  %v1471_v3 = vmul.f32 %v5196_v11, %v5094_v21  ;;  %vm1495_vm11 = vcmp.eq.f32.partialorder %v5112_v0, 0.0  ;;  %v971_v25 = vsel %vm925_vm3, %v902_v53, 0.0  ;;  %v910_v59 = vpop.permute.xlu0 %909 }
 0x26a   :  { %v5212_v18 = vpop.eup %1992  ;;  %v1758_v52 = vmul.f32 %v2107_v16, %v1701_v56  ;;  %v1496_v48 = vand.u32 2147483648, %v5112_v0  ;;  %2008 = vrsqrt.f32 %v5187_v10  ;;  %v1083_v60 = vmul.f32 2e-05, %v1026_v22 }
 0x26b   :  { %v1473_v61 = vsel %vm1472_vm8, %v5094_v21, %v1471_v3  ;;  %v1492_v29 = vmul.f32 %v5212_v18, %v5112_v0  ;;  %vm1486_vm12 = vcmp.eq.f32.partialorder %v5114_v26, inf  ;;  %v1029_v49 = vadd.f32 %v972_v23, %v4226_v6 }
 0x26c   :  { %v5226_v51 = vpop.eup %1994  ;;  %1815 = vst [vmem:[%s5608_s1 + $0x110] sm:$0xff] %v1758_v52  ;;  %v1476_v50 = vsel %vm1474_vm9, %v1475_v63, %v1473_v61  ;;  %v1489_v45 = vand.u32 2147483648, %v5114_v26  ;;  %v5234_v2 = vadd.f32 1.0, %v1083_v60  ;;  %v1028_v8 = vadd.f32 %v971_v25, %v4213_v12  ;;  %v912_v33 = vpop.permute.xlu1 %911 }
 0x26d   :  { %v1997_v47 = vpop.eup %1996  ;;  %2010 = vrsqrt.f32 %v1476_v50  ;;  %v1494_v6 = vsel %vm1493_vm10, %v5112_v0, %v1492_v29  ;;  %v1485_v34 = vmul.f32 %v5226_v51, %v5114_v26  ;;  %v1086_v41 = vmul.f32 2e-05, %v1029_v49  ;;  %v2108_v0 = vld [vmem:[%s5607_s0 + $0x108] sm:$0xff] }
 0x26e   :  { %v1700_v21 = vmul.f32 %v1997_v47, %v5108_v36  ;;  %v1497_v40 = vsel %vm1495_vm11, %v1496_v48, %v1494_v6  ;;  %2012 = vrsqrt.f32 %v5234_v2  ;;  %v974_v12 = vsel %vm925_vm3, %v908_v4, 0.0 }
 0x26f   :  { %v1999_v13 = vpop.eup %1998  ;;  %2014 = vrsqrt.f32 %v1497_v40  ;;  %v1487_v28 = vsel %vm1486_vm12, %v5114_v26, %v1485_v34  ;;  %vm1488_vm13 = vcmp.eq.f32.partialorder %v5114_v26, 0.0  ;;  %v973_v14 = vsel %vm925_vm3, %v906_v55, 0.0 }
 0x270   :  { %v2001_v36 = vpop.eup %2000  ;;  %v1757_v37 = vmul.f32 %v2108_v0, %v1700_v21  ;;  %v1703_v35 = vmul.f32 %v1999_v13, %v5121_v30  ;;  %v1490_v43 = vsel %vm1488_vm13, %v1489_v45, %v1487_v28  ;;  %v5258_v19 = vadd.f32 1.0, %v1086_v41  ;;  %v916_v50 = vpop.permute.xlu1 %915  ;;  %v6078_v41 = vld [vmem:[#allocation86_spill] sm:$0xff] }
 0x271   :  { %v1702_v46 = vmul.f32 %v2001_v36, %v5129_v62  ;;  %2016 = vrsqrt.f32 %v1490_v43  ;;  %v1085_v31 = vmul.f32 2e-05, %v1028_v8  ;;  %v1031_v26 = vadd.f32 %v974_v12, %v4260_v57  ;;  %v2110_v57 = vld [vmem:[%s5607_s0 + $0x118] sm:$0xff] }
 0x272   :  { %1814 = vst [vmem:[%s5608_s1 + $0x108] sm:$0xff] %v1757_v37  ;;  %v1760_v27 = vmul.f32 %v2109_v5, %v1703_v35  ;;  %vm1507_vm14 = vcmp.eq.f32.partialorder %v5171_v15, inf  ;;  %vm1509_vm15 = vcmp.eq.f32.partialorder %v5171_v15, 0.0  ;;  %2018 = vrsqrt.f32 %v5258_v19 }
 0x273   :  { %v5271_v30 = vpop.eup %2002  ;;  %v1759_v62 = vmul.f32 %v2110_v57, %v1702_v46  ;;  %v1510_v54 = vand.u32 2147483648, %v5171_v15  ;;  %v5277_v32 = vadd.f32 1.0, %v1085_v31  ;;  %v1088_v42 = vmul.f32 2e-05, %v1031_v26  ;;  %v6079_v46 = vld [vmem:[#allocation89_spill] sm:$0xff] }
 0x274   :  { %v5279_v22 = vpop.eup %2004  ;;  %1817 = vst [vmem:[%s5608_s1 + $0x120] sm:$0xff] %v1760_v27  ;;  %v1506_v53 = vmul.f32 %v5271_v30, %v5171_v15  ;;  %vm1500_vm2 = vcmp.eq.f32.partialorder %v5173_v58, inf  ;;  %v1030_v38 = vadd.f32 %v973_v14, %v4223_v7  ;;  %v976_v17 = vsel %vm925_vm3, %v912_v33, 0.0 }
 0x275   :  { %1816 = vst [vmem:[%s5608_s1 + $0x118] sm:$0xff] %v1759_v62  ;;  %v1499_v63 = vmul.f32 %v5279_v22, %v5173_v58  ;;  %vm1502_vm0 = vcmp.eq.f32.partialorder %v5173_v58, 0.0  ;;  %v1503_v56 = vand.u32 2147483648, %v5173_v58  ;;  %2020 = vrsqrt.f32 %v5277_v32  ;;  %v920_v62 = vpop.permute.xlu1 %919 }
 0x276   :  { %v2007_v23 = vpop.eup %2006  ;;  %v1508_v7 = vsel %vm1507_vm14, %v5171_v15, %v1506_v53  ;;  %vm1521_vm1 = vcmp.eq.f32.partialorder %v5187_v10, inf  ;;  %v5302_v3 = vadd.f32 1.0, %v1088_v42  ;;  %v1087_v25 = vmul.f32 2e-05, %v1030_v38 }
 0x277   :  { %v5304_v16 = vpop.eup %2008  ;;  %v1705_v52 = vmul.f32 %v2007_v23, %v5167_v24  ;;  %v1511_v48 = vsel %vm1509_vm15, %v1510_v54, %v1508_v7  ;;  %v1501_v60 = vsel %vm1500_vm2, %v5173_v58, %v1499_v63  ;;  %v1033_v61 = vadd.f32 %v976_v17, %v4268_v9  ;;  %v2111_v24 = vld [vmem:[%s5607_s0 + $0x130] sm:$0xff] }
 0x278   :  { %2022 = vrsqrt.f32 %v1511_v48  ;;  %v1504_v29 = vsel %vm1502_vm0, %v1503_v56, %v1501_v60  ;;  %v1520_v49 = vmul.f32 %v5304_v16, %v5187_v10  ;;  %v975_v4 = vsel %vm925_vm3, %v910_v59, 0.0  ;;  %v6080_v59 = vld [vmem:[#allocation87_spill] sm:$0xff] }
 0x279   :  { %v1762_v15 = vmul.f32 %v2111_v24, %v1705_v52  ;;  %2024 = vrsqrt.f32 %v1504_v29  ;;  %vm1523_vm4 = vcmp.eq.f32.partialorder %v5187_v10, 0.0  ;;  %v1524_v58 = vand.u32 2147483648, %v5187_v10 }
 0x27a   :  { %v2011_v9 = vpop.eup %2010  ;;  %v1522_v45 = vsel %vm1521_vm1, %v5187_v10, %v1520_v49  ;;  %2026 = vrsqrt.f32 %v5302_v3  ;;  %v5326_v8 = vadd.f32 1.0, %v1087_v25  ;;  %v1090_v55 = vmul.f32 2e-05, %v1033_v61  ;;  %v914_v10 = vpop.permute.xlu0 %913  ;;  %v6081_v25 = vld [vmem:[#allocation74_spill] sm:$0xff] }
 0x27b   :  { %v5328_v47 = vpop.eup %2012  ;;  %1819 = vst [vmem:[%s5608_s1 + $0x130] sm:$0xff] %v1762_v15  ;;  %v1704_v6 = vmul.f32 %v2011_v9, %v5196_v11  ;;  %v1525_v34 = vsel %vm1523_vm4, %v1524_v58, %v1522_v45  ;;  %v1032_v21 = vadd.f32 %v975_v4, %v6078_v41  ;;  %v978_v40 = vsel %vm925_vm3, %v916_v50, 0.0  ;;  %v2112_v11 = vld [vmem:[%s5607_s0 + $0x128] sm:$0xff]  ;;  %v924_v9 = vpop.permute.xlu1 %923 }
 0x27c   :  { %v2015_v12 = vpop.eup %2014  ;;  %2028 = vrsqrt.f32 %v1525_v34  ;;  %v1513_v13 = vmul.f32 %v5328_v47, %v5234_v2  ;;  %vm1514_vm5 = vcmp.eq.f32.partialorder %v5234_v2, inf  ;;  %vm1516_vm6 = vcmp.eq.f32.partialorder %v5234_v2, 0.0 }
 0x27d   :  { %v1761_v28 = vmul.f32 %v2112_v11, %v1704_v6  ;;  %v1707_v14 = vmul.f32 %v2015_v12, %v5212_v18  ;;  %v1517_v36 = vand.u32 2147483648, %v5234_v2  ;;  %2030 = vrsqrt.f32 %v5326_v8  ;;  %v2113_v18 = vld [vmem:[%s5607_s0 + $0x140] sm:$0xff]  ;;  %v6082_v12 = vld [vmem:[#allocation88_spill] sm:$0xff] }
 0x27e   :  { %v2017_v0 = vpop.eup %2016  ;;  %v1515_v37 = vsel %vm1514_vm5, %v5234_v2, %v1513_v13  ;;  %v5348_v35 = vadd.f32 1.0, %v1090_v55  ;;  %v1089_v43 = vmul.f32 2e-05, %v1032_v21  ;;  %v1035_v31 = vadd.f32 %v978_v40, %v6079_v46  ;;  %v918_v38 = vpop.permute.xlu0 %917  ;;  %v2117_v46 = vld [vmem:[%s5607_s0 + $0x160] sm:$0xff] }
 0x27f   :  { %v5351_v26 = vpop.eup %2018  ;;  %1818 = vst [vmem:[%s5608_s1 + $0x128] sm:$0xff] %v1761_v28  ;;  %v1764_v33 = vmul.f32 %v2113_v18, %v1707_v14  ;;  %v1706_v5 = vmul.f32 %v2017_v0, %v5226_v51  ;;  %v1518_v27 = vsel %vm1516_vm6, %v1517_v36, %v1515_v37  ;;  %v977_v57 = vsel %vm925_vm3, %v914_v10, 0.0  ;;  %v2114_v51 = vld [vmem:[%s5607_s0 + $0x138] sm:$0xff] }
 0x280   :  { %2032 = vrsqrt.f32 %v1518_v27  ;;  %v1534_v54 = vmul.f32 %v5351_v26, %v5258_v19  ;;  %vm1535_vm7 = vcmp.eq.f32.partialorder %v5258_v19, inf  ;;  %vm1537_vm8 = vcmp.eq.f32.partialorder %v5258_v19, 0.0 }
 0x281   :  { %1821 = vst [vmem:[%s5608_s1 + $0x140] sm:$0xff] %v1764_v33  ;;  %v1763_v2 = vmul.f32 %v2114_v51, %v1706_v5  ;;  %v1538_v42 = vand.u32 2147483648, %v5258_v19  ;;  %2034 = vrsqrt.f32 %v5348_v35  ;;  %v5376_v53 = vadd.f32 1.0, %v1089_v43 }
 0x282   :  { %v5378_v17 = vpop.eup %2020  ;;  %v1536_v63 = vsel %vm1535_vm7, %v5258_v19, %v1534_v54  ;;  %v1092_v56 = vmul.f32 2e-05, %v1035_v31  ;;  %v1034_v23 = vadd.f32 %v977_v57, %v6080_v59  ;;  %v980_v7 = vsel %vm925_vm3, %v920_v62, 0.0 }
 0x283   :  { %v810_v52 = vadd.f32 %v4924_v39, %v6081_v25  ;;  %1820 = vst [vmem:[%s5608_s1 + $0x138] sm:$0xff] %v1763_v2  ;;  %v1539_v48 = vsel %vm1537_vm8, %v1538_v42, %v1536_v63  ;;  %v1527_v60 = vmul.f32 %v5378_v17, %v5277_v32  ;;  %2036 = vrsqrt.f32 %v5376_v53 }
 0x284   :  { %2038 = vrsqrt.f32 %v1539_v48  ;;  %vm1528_vm9 = vcmp.eq.f32.partialorder %v5277_v32, inf  ;;  %v1531_v19 = vand.u32 2147483648, %v5277_v32  ;;  %v5394_v61 = vadd.f32 1.0, %v1092_v56 }
 0x285   :  { %v2023_v29 = vpop.eup %2022  ;;  %v1529_v39 = vsel %vm1528_vm9, %v5277_v32, %v1527_v60  ;;  %vm1530_vm10 = vcmp.eq.f32.partialorder %v5277_v32, 0.0  ;;  %v1091_v49 = vmul.f32 2e-05, %v1034_v23  ;;  %v1037_v4 = vadd.f32 %v980_v7, %v4919_v20  ;;  %v922_v20 = vpop.permute.xlu0 %921 }
 0x286   :  { %v2025_v50 = vpop.eup %2024  ;;  %v1709_v24 = vmul.f32 %v2023_v29, %v5271_v30  ;;  %v1532_v15 = vsel %vm1530_vm10, %v1531_v19, %v1529_v39  ;;  %2040 = vrsqrt.f32 %v5394_v61  ;;  %v979_v58 = vsel %vm925_vm3, %v918_v38, 0.0  ;;  %v2115_v30 = vld [vmem:[%s5607_s0 + $0x150] sm:$0xff] }
 0x287   :  { %v5403_v45 = vpop.eup %2026  ;;  %v1708_v55 = vmul.f32 %v2025_v50, %v5279_v22  ;;  %2042 = vrsqrt.f32 %v1532_v15  ;;  %vm1549_vm11 = vcmp.eq.f32.partialorder %v5302_v3, inf  ;;  %vm1551_vm12 = vcmp.eq.f32.partialorder %v5302_v3, 0.0  ;;  %v2116_v22 = vld [vmem:[%s5607_s0 + $0x148] sm:$0xff]  ;;  %v2119_v19 = vld [vmem:[%s5607_s0 + $0x170] sm:$0xff] }
 0x288   :  { %v1766_v32 = vmul.f32 %v2115_v30, %v1709_v24  ;;  %v1548_v6 = vmul.f32 %v5403_v45, %v5302_v3  ;;  %v5413_v34 = vadd.f32 1.0, %v1091_v49  ;;  %v1094_v41 = vmul.f32 2e-05, %v1037_v4 }
 0x289   :  { %v2029_v21 = vpop.eup %2028  ;;  %v1765_v40 = vmul.f32 %v2116_v22, %v1708_v55  ;;  %v1552_v10 = vand.u32 2147483648, %v5302_v3  ;;  %v1036_v13 = vadd.f32 %v979_v58, %v6082_v12  ;;  %v982_v11 = vsel %vm925_vm3, %v924_v9, 0.0  ;;  %v2121_v22 = vld [vmem:[%s5607_s0 + $0x180] sm:$0xff] }
 0x28a   :  { %v5422_v28 = vpop.eup %2030  ;;  %1823 = vst [vmem:[%s5608_s1 + $0x150] sm:$0xff] %v1766_v32  ;;  %v1711_v14 = vmul.f32 %v2029_v21, %v5304_v16  ;;  %v1550_v36 = vsel %vm1549_vm11, %v5302_v3, %v1548_v6  ;;  %2044 = vrsqrt.f32 %v5413_v34  ;;  %v981_v0 = vsel %vm925_vm3, %v922_v20, 0.0 }
 0x28b   :  { %1822 = vst [vmem:[%s5608_s1 + $0x148] sm:$0xff] %v1765_v40  ;;  %v1553_v37 = vsel %vm1551_vm12, %v1552_v10, %v1550_v36  ;;  %v1541_v43 = vmul.f32 %v5422_v28, %v5326_v8  ;;  %vm1542_vm13 = vcmp.eq.f32.partialorder %v5326_v8, inf  ;;  %v1545_v16 = vand.u32 2147483648, %v5326_v8 }
 0x28c   :  { %v1768_v1 = vmul.f32 %v2117_v46, %v1711_v14  ;;  %2046 = vrsqrt.f32 %v1553_v37  ;;  %v5446_v31 = vadd.f32 1.0, %v1094_v41  ;;  %v1093_v18 = vmul.f32 2e-05, %v1036_v13 }
 0x28d   :  { %v2033_v33 = vpop.eup %2032  ;;  %v1543_v3 = vsel %vm1542_vm13, %v5326_v8, %v1541_v43  ;;  %vm1544_vm3 = vcmp.eq.f32.partialorder %v5326_v8, 0.0  ;;  %v1039_v5 = vadd.f32 %v982_v11, %v810_v52  ;;  %v1038_v27 = vadd.f32 %v981_v0, %v4584_v44  ;;  %v2118_v8 = vld [vmem:[%s5607_s0 + $0x158] sm:$0xff] }
 0x28e   :  { %v5451_v57 = vpop.eup %2034  ;;  %1825 = vst [vmem:[%s5608_s1 + $0x160] sm:$0xff] %v1768_v1  ;;  %v1710_v62 = vmul.f32 %v2033_v33, %v5328_v47  ;;  %v1546_v54 = vsel %vm1544_vm3, %v1545_v16, %v1543_v3  ;;  %2048 = vrsqrt.f32 %v5446_v31  ;;  %vm1563_vm14 = vcmp.eq.f32.partialorder %v5348_v35, inf  ;;  %v2122_v11 = vld [vmem:[%s5607_s0 + $0x178] sm:$0xff] }
 0x28f   :  { %2050 = vrsqrt.f32 %v1546_v54  ;;  %v1562_v51 = vmul.f32 %v5451_v57, %v5348_v35  ;;  %vm1565_vm15 = vcmp.eq.f32.partialorder %v5348_v35, 0.0  ;;  %v1566_v47 = vand.u32 2147483648, %v5348_v35 }
 0x290   :  { %v5462_v44 = vpop.eup %2036  ;;  %v1767_v2 = vmul.f32 %v2118_v8, %v1710_v62  ;;  %v5468_v42 = vadd.f32 1.0, %v1093_v18  ;;  %v1096_v38 = vmul.f32 2e-05, %v1039_v5  ;;  %vm1556_vm2 = vcmp.eq.f32.partialorder %v5376_v53, inf  ;;  %v2124_v62 = vld [vmem:[%s5607_s0 + $0x188] sm:$0xff] }
 0x291   :  { %v2039_v63 = vpop.eup %2038  ;;  %v1564_v56 = vsel %vm1563_vm14, %v5348_v35, %v1562_v51  ;;  %v1555_v59 = vmul.f32 %v5462_v44, %v5376_v53  ;;  %v1095_v23 = vmul.f32 2e-05, %v1038_v27  ;;  %v1559_v52 = vand.u32 2147483648, %v5376_v53 }
 0x292   :  { %1824 = vst [vmem:[%s5608_s1 + $0x158] sm:$0xff] %v1767_v2  ;;  %v1713_v7 = vmul.f32 %v2039_v63, %v5351_v26  ;;  %v1567_v25 = vsel %vm1565_vm15, %v1566_v47, %v1564_v56  ;;  %2052 = vrsqrt.f32 %v5468_v42  ;;  %vm1558_vm0 = vcmp.eq.f32.partialorder %v5376_v53, 0.0  ;;  %v2125_v63 = vld [vmem:[%s5607_s0 + $0x1a0] sm:$0xff] }
 0x293   :  { %v5480_v48 = vpop.eup %2040  ;;  %2054 = vrsqrt.f32 %v1567_v25  ;;  %v1557_v35 = vsel %vm1556_vm2, %v5376_v53, %v1555_v59  ;;  %vm1577_vm1 = vcmp.eq.f32.partialorder %v5394_v61, inf  ;;  %v5490_v49 = vadd.f32 1.0, %v1096_v38  ;;  %v2126_v25 = vld [vmem:[%s5607_s0 + $0x198] sm:$0xff] }
 0x294   :  { %v2043_v60 = vpop.eup %2042  ;;  %v1770_v26 = vmul.f32 %v2119_v19, %v1713_v7  ;;  %v1560_v29 = vsel %vm1558_vm0, %v1559_v52, %v1557_v35  ;;  %v1576_v39 = vmul.f32 %v5480_v48, %v5394_v61  ;;  %v1580_v50 = vand.u32 2147483648, %v5394_v61 }
 0x295   :  { %v1712_v4 = vmul.f32 %v2043_v60, %v5378_v17  ;;  %2056 = vrsqrt.f32 %v1560_v29  ;;  %v5494_v53 = vadd.f32 1.0, %v1095_v23  ;;  %vm1579_vm4 = vcmp.eq.f32.partialorder %v5394_v61, 0.0  ;;  %v2120_v17 = vld [vmem:[%s5607_s0 + $0x168] sm:$0xff]  ;;  %v2127_v60 = vld [vmem:[%s5607_s0 + $0x1b0] sm:$0xff] }
 0x296   :  { %1827 = vst [vmem:[%s5608_s1 + $0x170] sm:$0xff] %v1770_v26  ;;  %v1578_v24 = vsel %vm1577_vm1, %v5394_v61, %v1576_v39  ;;  %2058 = vrsqrt.f32 %v5490_v49  ;;  %vm1570_vm5 = vcmp.eq.f32.partialorder %v5413_v34, inf  ;;  %v1573_v61 = vand.u32 2147483648, %v5413_v34  ;;  %v2128_v39 = vld [vmem:[%s5607_s0 + $0x1a8] sm:$0xff] }
 0x297   :  { %v5502_v15 = vpop.eup %2044  ;;  %v1769_v58 = vmul.f32 %v2120_v17, %v1712_v4  ;;  %v1581_v9 = vsel %vm1579_vm4, %v1580_v50, %v1578_v24  ;;  %2060 = vrsqrt.f32 %v5494_v53  ;;  %vm1572_vm6 = vcmp.eq.f32.partialorder %v5413_v34, 0.0 }
 0x298   :  { %2062 = vrsqrt.f32 %v1581_v9  ;;  %v1569_v55 = vmul.f32 %v5502_v15, %v5413_v34  ;;  %vm1591_vm7 = vcmp.eq.f32.partialorder %v5446_v31, inf  ;;  %vm1593_vm8 = vcmp.eq.f32.partialorder %v5446_v31, 0.0 }
 0x299   :  { %v2047_v20 = vpop.eup %2046  ;;  %1826 = vst [vmem:[%s5608_s1 + $0x168] sm:$0xff] %v1769_v58  ;;  %vm1584_vm9 = vcmp.eq.f32.partialorder %v5468_v42, inf  ;;  %v1587_v43 = vand.u32 2147483648, %v5468_v42  ;;  %vm1586_vm10 = vcmp.eq.f32.partialorder %v5468_v42, 0.0  ;;  %vm1605_vm11 = vcmp.eq.f32.partialorder %v5490_v49, inf  ;;  %v2130_v58 = vld [vmem:[%s5607_s0 + $0x1b8] sm:$0xff] }
 0x29a   :  { %v1715_v30 = vmul.f32 %v2047_v20, %v5403_v45  ;;  %v1571_v32 = vsel %vm1570_vm5, %v5413_v34, %v1569_v55  ;;  %v1594_v45 = vand.u32 2147483648, %v5446_v31  ;;  %vm1607_vm12 = vcmp.eq.f32.partialorder %v5490_v49, 0.0 }
 0x29b   :  { %v5518_v6 = vpop.eup %2048  ;;  %v1574_v41 = vsel %vm1572_vm6, %v1573_v61, %v1571_v32  ;;  %v1608_v51 = vand.u32 2147483648, %v5490_v49  ;;  %vm1598_vm13 = vcmp.eq.f32.partialorder %v5494_v53, inf  ;;  %v1601_v47 = vand.u32 2147483648, %v5494_v53 }
 0x29c   :  { %v2051_v21 = vpop.eup %2050  ;;  %v1772_v40 = vmul.f32 %v2121_v22, %v1715_v30  ;;  %2064 = vrsqrt.f32 %v1574_v41  ;;  %v1590_v10 = vmul.f32 %v5518_v6, %v5446_v31  ;;  %vm1600_vm3 = vcmp.eq.f32.partialorder %v5494_v53, 0.0 }
 0x29d   :  { %v1714_v12 = vmul.f32 %v2051_v21, %v5422_v28 }
 0x29e   :  { %1829 = vst [vmem:[%s5608_s1 + $0x180] sm:$0xff] %v1772_v40  ;;  %v1592_v34 = vsel %vm1591_vm7, %v5446_v31, %v1590_v10  ;;  %v2123_v31 = vld [vmem:[%s5607_s0 + $0x190] sm:$0xff] }
 0x29f   :  { %v2053_v13 = vpop.eup %2052  ;;  %v1771_v14 = vmul.f32 %v2122_v11, %v1714_v12  ;;  %v1595_v36 = vsel %vm1593_vm8, %v1594_v45, %v1592_v34 }
 0x2a0   :  { %v2055_v28 = vpop.eup %2054  ;;  %2066 = vrsqrt.f32 %v1595_v36  ;;  %v1583_v0 = vmul.f32 %v2053_v13, %v5468_v42 }
 0x2a1   :  { %1828 = vst [vmem:[%s5608_s1 + $0x178] sm:$0xff] %v1771_v14  ;;  %v1717_v37 = vmul.f32 %v2055_v28, %v5451_v57 }
 0x2a2   :  { %v2057_v16 = vpop.eup %2056  ;;  %v1585_v46 = vsel %vm1584_vm9, %v5468_v42, %v1583_v0 }
 0x2a3   :  { %v2059_v1 = vpop.eup %2058  ;;  %v1774_v18 = vmul.f32 %v2123_v31, %v1717_v37  ;;  %v1716_v33 = vmul.f32 %v2057_v16, %v5462_v44  ;;  %v1588_v3 = vsel %vm1586_vm10, %v1587_v43, %v1585_v46 }
 0x2a4   :  { %v2061_v5 = vpop.eup %2060  ;;  %2068 = vrsqrt.f32 %v1588_v3  ;;  %v1604_v27 = vmul.f32 %v2059_v1, %v5490_v49 }
 0x2a5   :  { %v2063_v57 = vpop.eup %2062  ;;  %1831 = vst [vmem:[%s5608_s1 + $0x190] sm:$0xff] %v1774_v18  ;;  %v1773_v54 = vmul.f32 %v2124_v62, %v1716_v33  ;;  %v1597_v44 = vmul.f32 %v2061_v5, %v5494_v53 }
 0x2a6   :  { %v1719_v8 = vmul.f32 %v2063_v57, %v5480_v48  ;;  %v1606_v2 = vsel %vm1605_vm11, %v5490_v49, %v1604_v27 }
 0x2a7   :  { %1830 = vst [vmem:[%s5608_s1 + $0x188] sm:$0xff] %v1773_v54  ;;  %v1609_v42 = vsel %vm1607_vm12, %v1608_v51, %v1606_v2  ;;  %v1599_v38 = vsel %vm1598_vm13, %v5494_v53, %v1597_v44 }
 0x2a8   :  { %v1776_v56 = vmul.f32 %v2125_v63, %v1719_v8  ;;  %2070 = vrsqrt.f32 %v1609_v42  ;;  %v1602_v59 = vsel %vm1600_vm3, %v1601_v47, %v1599_v38 }
 0x2a9   :  { %v2065_v23 = vpop.eup %2064  ;;  %2072 = vrsqrt.f32 %v1602_v59 }
 0x2aa   :  { %1833 = vst [vmem:[%s5608_s1 + $0x1a0] sm:$0xff] %v1776_v56  ;;  %v1718_v7 = vmul.f32 %v2065_v23, %v5502_v15  ;;  %v2129_v15 = vld [vmem:[%s5607_s0 + $0x1c0] sm:$0xff] }
 0x2ac   :  { %v1775_v52 = vmul.f32 %v2126_v25, %v1718_v7 }
 0x2ad   :  { %v2067_v48 = vpop.eup %2066 }
 0x2ae   :  { %1832 = vst [vmem:[%s5608_s1 + $0x198] sm:$0xff] %v1775_v52  ;;  %v1721_v35 = vmul.f32 %v2067_v48, %v5518_v6 }
 0x2b0   :  { %v1778_v19 = vmul.f32 %v2127_v60, %v1721_v35 }
 0x2b1   :  { %v2069_v26 = vpop.eup %2068 }
 0x2b2   :  { %1835 = vst [vmem:[%s5608_s1 + $0x1b0] sm:$0xff] %v1778_v19  ;;  %v1720_v29 = vmul.f32 %v2069_v26, %v2053_v13 }
 0x2b4   :  { %v1777_v49 = vmul.f32 %v2128_v39, %v1720_v29 }
 0x2b5   :  { %v2071_v4 = vpop.eup %2070 }
 0x2b6   :  { %v2073_v50 = vpop.eup %2072  ;;  %1834 = vst [vmem:[%s5608_s1 + $0x1a8] sm:$0xff] %v1777_v49  ;;  %v1723_v53 = vmul.f32 %v2071_v4, %v2059_v1 }
 0x2b7   :  { %v1722_v24 = vmul.f32 %v2073_v50, %v2061_v5 }
 0x2b8   :  { %v1780_v17 = vmul.f32 %v2129_v15, %v1723_v53 }
 0x2b9   :  { %v1779_v9 = vmul.f32 %v2130_v58, %v1722_v24 }
 0x2ba   :  { %1837 = vst [vmem:[%s5608_s1 + $0x1c0] sm:$0xff] %v1780_v17 }
 0x2bb   :  { %1836 = vst [vmem:[%s5608_s1 + $0x1b8] sm:$0xff] %v1779_v9 }

// kernel: alexnet_forward.11
= control target key start
LH: loop header
LB: loop body
LE: loop exit
PB: predicated region body
PF: predicated region fallthrough
CT: control target
= control target key end

     0   :  { %s1369_s12 = smov 0   ;;  %s1371_s13 = smov 0   ;;  %s1546_s0 = inlined_call_operand.vmem [shape: bf16[512,384], index: 0, kind: input, shape index: {}]   ;;  %s1547_s1 = inlined_call_operand.vmem [shape: bf16[384,128], index: 1, kind: input, shape index: {}]   ;;  %s1548_s2 = inlined_call_operand.vmem [shape: f32[1,128], index: 2, kind: input, shape index: {}]   ;;  %s1549_s3 = inlined_call_operand.vmem [shape: f32[512,128], index: 3, kind: output, shape index: {}]  }
   0x1   :  { %s1373_s14 = smov 0  }
   0x2 LB: > { %s32_s15 = sadd.s32 1, %s1343_s13  ;;  %p1076_p0 = scmp.ge.s32.totalorder %s1347_s14, 1  ;;  %s1347_s14 = sphi %s1373_s14, %s13_s14   ;;  %s1343_s13 = sphi %s1371_s13, %s1551_s13   ;;  %s1339_s12 = sphi %s1369_s12, %s1550_s12  }
   0x3   : > { %p34_p1 = scmp.ge.s32.totalorder %s32_s15, 4  ;;  %p191_p2 = scmp.lt.s32.totalorder %s1347_s14, 5 }
   0x5   : > { %s1553_s15 = smov (%p34_p1, %s32_s15), 0  ;;  %p192_p3 = pnand %p1076_p0, %p191_p2 }
   0x6   : > { %s1077_s5 = sshll.u32 (!%p192_p3), %s1339_s12, 4 }
   0x7   : > { %195 = sbr.rel (%p192_p3) target bundleno = 309 (0x135), region = 32  ;;  %p236_p4 = scmp.lt.s32.totalorder (!%p192_p3), %s1077_s5, 63 }
   0xc   : > { %v1269_v0 = vld [vmem:[%s1547_s1 + $0x78] sm:$0xff]   ;;  %v1272_v3 = vld [vmem:[%s1547_s1 + $0x70] sm:$0xff]   ;;  %v1275_v6 = vld [vmem:[%s1547_s1 + $0x68] sm:$0xff]   ;;  %s1555_s5 = smov (!%p236_p4, %s1077_s5), 63 }
   0xd   : > { %v1270_v1 = vld [vmem:[%s1547_s1 + $0x38] sm:$0xff]   ;;  %1132 = vmatprep.subr.bf16.mxu0 %v1269_v0  ;;  %v1273_v4 = vld [vmem:[%s1547_s1 + $0x30] sm:$0xff]   ;;  %v1276_v7 = vld [vmem:[%s1547_s1 + $0x28] sm:$0xff]   ;;  %s1244_s27 = smul.u32 12, %s1555_s5  ;;  %s1080_s24 = sshll.u32 %s1555_s5, 3 }
   0xe   : > { %v1271_v2 = vld [vmem:[%s1547_s1 + $0xb8] sm:$0xff]   ;;  %1133 = vmatpush3.bf16.msra.mxu0 %v1270_v1  ;;  %v1274_v5 = vld [vmem:[%s1547_s1 + $0xb0] sm:$0xff]   ;;  %v1277_v8 = vld [vmem:[%s1547_s1 + $0xa8] sm:$0xff]  }
   0xf   : > { %1212 = vmatprep.subr.bf16.mxu1 %v1271_v2  ;;  %1134 = vmatprep.subr.bf16.mxu0 %v1272_v3  ;;  %v1278_v9 = vld [vmem:[%s1547_s1 + $0x60] sm:$0xff]   ;;  %v1281_v12 = vld [vmem:[%s1547_s1 + $0x58] sm:$0xff]   ;;  %v1284_v15 = vld [vmem:[%s1547_s1 + $0x50] sm:$0xff]   ;;  %s1459_s16 = scalar_lea.vmem %s1546_s0, %s1244_s27  ;;  %s1504_s27 = scalar_lea.vmem %s1549_s3, %s1080_s24 }
  0x10   : > { %1213 = vmatpush3.bf16.msra.mxu1 %v1271_v2  ;;  %v1279_v10 = vld [vmem:[%s1547_s1 + $0x20] sm:$0xff]   ;;  %v1283_v13 = vld [vmem:[%s1547_s1 + $0x98] sm:$0xff]   ;;  %v1286_v16 = vld [vmem:[%s1547_s1 + $0x90] sm:$0xff]  }
  0x11   : > { %1214 = vmatprep.subr.bf16.mxu1 %v1274_v5  ;;  %v1280_v11 = vld [vmem:[%s1547_s1 + $0xa0] sm:$0xff]   ;;  %v1282_v14 = vld [vmem:[%s1547_s1 + $0x18] sm:$0xff]   ;;  %v1285_v17 = vld [vmem:[%s1547_s1 + $0x10] sm:$0xff]  }
  0x12   : > { %1135 = vmatpush3.bf16.msra.mxu0 %v1273_v4  ;;  %v1287_v18 = vld [vmem:[%s1547_s1 + $0x48] sm:$0xff]   ;;  %v1290_v21 = vld [vmem:[%s1547_s1 + $0x40] sm:$0xff]   ;;  %v1305_v32 = vld [vmem:[%s1459_s16 + $0x50] ss:$12 sps:$4 sm:$0xff]  }
  0x13   : > { %1136 = vmatprep.subr.bf16.mxu0 %v1275_v6  ;;  %v1288_v19 = vld [vmem:[%s1547_s1 + $0x8] sm:$0xff]   ;;  %v1292_v22 = vld [vmem:[%s1547_s1 + $0x80] sm:$0xff]   ;;  %v1303_v34 = vld [vmem:[%s1459_s16 + $0x30] ss:$12 sps:$4 sm:$0xff]  }
  0x14   : > { %1215 = vmatpush3.bf16.msra.mxu1 %v1274_v5  ;;  %v1289_v20 = vld [vmem:[%s1547_s1 + $0x88] sm:$0xff]   ;;  %v1295_v23 = vld [vmem:[%s1459_s16 + $0x4] ss:$12 sps:$4 sm:$0xff]   ;;  %v1301_v31 = vld [vmem:[%s1459_s16 + $0x34] ss:$12 sps:$4 sm:$0xff]  }
  0x15   : > { %1216 = vmatprep.subr.bf16.mxu1 %v1277_v8  ;;  %v1296_v24 = vld [vmem:[%s1459_s16 + $0x8] ss:$12 sps:$4 sm:$0xff]   ;;  %v1291_v25 = vld [vmem:[%s1547_s1] sm:$0xff]   ;;  %688 = vmatprep.mubr.bf16.mxu0 %v1295_v23  ;;  %v1306_v35 = vld [vmem:[%s1459_s16 + $0x4c] ss:$12 sps:$4 sm:$0xff]  }
  0x16   : > { %1137 = vmatpush3.bf16.msra.mxu0 %v1276_v7  ;;  %1228 = vmatprep.mubr.bf16.mxu1 %v1296_v24  ;;  %v1293_v26 = vld [vmem:[%s1459_s16] ss:$12 sps:$4 sm:$0xff]   ;;  %v1298_v27 = vld [vmem:[%s1459_s16 + $0x1c] ss:$12 sps:$4 sm:$0xff]   ;;  %v1304_v29 = vld [vmem:[%s1459_s16 + $0x38] ss:$12 sps:$4 sm:$0xff]  }
  0x17   : > { %1138 = vmatprep.subr.bf16.mxu0 %v1278_v9  ;;  %v1297_v28 = vld [vmem:[%s1459_s16 + $0x20] ss:$12 sps:$4 sm:$0xff]   ;;  %v1300_v30 = vld [vmem:[%s1459_s16 + $0x18] ss:$12 sps:$4 sm:$0xff]   ;;  %v1312_v33 = vld [vmem:[%s1459_s16 + $0x68] ss:$12 sps:$4 sm:$0xff]  }
  0x18   : > { %1217 = vmatpush3.bf16.msra.mxu1 %v1277_v8  ;;  %v1313_v36 = vld [vmem:[%s1459_s16 + $0x80] ss:$12 sps:$4 sm:$0xff]   ;;  %v1320_v37 = vld [vmem:[%s1459_s16 + $0x98] ss:$12 sps:$4 sm:$0xff]   ;;  %v1308_v38 = vld [vmem:[%s1459_s16 + $0x48] ss:$12 sps:$4 sm:$0xff]  }
  0x19   : > { %1218 = vmatprep.subr.bf16.mxu1 %v1280_v11  ;;  %v1309_v39 = vld [vmem:[%s1459_s16 + $0x64] ss:$12 sps:$4 sm:$0xff]   ;;  %v1311_v41 = vld [vmem:[%s1459_s16 + $0x60] ss:$12 sps:$4 sm:$0xff]   ;;  %v1314_v42 = vld [vmem:[%s1459_s16 + $0x7c] ss:$12 sps:$4 sm:$0xff]  }
  0x1a   : > { %1139 = vmatpush3.bf16.msra.mxu0 %v1279_v10  ;;  %v1321_v40 = vld [vmem:[%s1459_s16 + $0xb0] ss:$12 sps:$4 sm:$0xff]   ;;  %v1316_v43 = vld [vmem:[%s1459_s16 + $0x78] ss:$12 sps:$4 sm:$0xff]   ;;  %v1317_v44 = vld [vmem:[%s1459_s16 + $0x94] ss:$12 sps:$4 sm:$0xff]  }
  0x1b   : > { %1140 = vmatprep.subr.bf16.mxu0 %v1281_v12  ;;  %v1319_v45 = vld [vmem:[%s1459_s16 + $0x90] ss:$12 sps:$4 sm:$0xff]   ;;  %v1322_v46 = vld [vmem:[%s1459_s16 + $0xac] ss:$12 sps:$4 sm:$0xff]   ;;  %v1324_v47 = vld [vmem:[%s1459_s16 + $0xa8] ss:$12 sps:$4 sm:$0xff]  }
  0x1c   : > { %1219 = vmatpush3.bf16.msra.mxu1 %v1280_v11  ;;  %v1497_v54 = vld [vmem:[%s1548_s2] ss:$0 sm:$0xff] }
  0x1d   : > { %1220 = vmatprep.subr.bf16.mxu1 %v1283_v13 }
  0x1e   : > { %1141 = vmatpush3.bf16.msra.mxu0 %v1282_v14 }
  0x1f   : > { %1142 = vmatprep.subr.bf16.mxu0 %v1284_v15 }
  0x20   : > { %1221 = vmatpush3.bf16.msra.mxu1 %v1283_v13 }
  0x21   : > { %1222 = vmatprep.subr.bf16.mxu1 %v1286_v16 }
  0x22   : > { %1143 = vmatpush3.bf16.msra.mxu0 %v1285_v17 }
  0x23   : > { %1144 = vmatprep.subr.bf16.mxu0 %v1287_v18 }
  0x24   : > { %1223 = vmatpush3.bf16.msra.mxu1 %v1286_v16 }
  0x25   : > { %1224 = vmatprep.subr.bf16.mxu1 %v1289_v20 }
  0x26   : > { %1145 = vmatpush3.bf16.msra.mxu0 %v1288_v19 }
  0x27   : > { %1146 = vmatprep.subr.bf16.mxu0 %v1290_v21 }
  0x28   : > { %1225 = vmatpush3.bf16.msra.mxu1 %v1289_v20 }
  0x29   : > { %1226 = vmatprep.subr.bf16.mxu1 %v1292_v22 }
  0x2a   : > { %1147 = vmatpush3.bf16.msra.mxu0 %v1291_v25 }
  0x2c   : > { %1227 = vmatpush3.bf16.msra.mxu1 %v1292_v22 }
  0x2d   : > { %689 = vmatmul.mubr.bf16.vlgmr.msra.gmra.mxu0 %v1293_v26 }
  0x2e   : > { %696 = vmatprep.mubr.bf16.mxu0 %v1298_v27 }
  0x2f   : > { %1229 = vmatmul.mubr.bf16.vlgmr.msra.gmra.mxu1 %v1297_v28 }
  0x30   : > { %1232 = vmatprep.mubr.bf16.mxu1 %v1304_v29 }
  0x35   : > { %697 = vmatmul.mubr.bf16.gmra.mxu0 %v1300_v30 }
  0x36   : > { %704 = vmatprep.mubr.bf16.mxu0 %v1301_v31 }
  0x37   : > { %1233 = vmatmul.mubr.bf16.gmra.mxu1 %v1305_v32 }
  0x38   : > { %1236 = vmatprep.mubr.bf16.mxu1 %v1312_v33 }
  0x3d   : > { %705 = vmatmul.mubr.bf16.gmra.mxu0 %v1303_v34 }
  0x3e   : > { %712 = vmatprep.mubr.bf16.mxu0 %v1306_v35 }
  0x3f   : > { %1237 = vmatmul.mubr.bf16.gmra.mxu1 %v1313_v36 }
  0x40   : > { %1240 = vmatprep.mubr.bf16.mxu1 %v1320_v37 }
  0x45   : > { %713 = vmatmul.mubr.bf16.gmra.mxu0 %v1308_v38 }
  0x46   : > { %720 = vmatprep.mubr.bf16.mxu0 %v1309_v39 }
  0x47   : > { %1241 = vmatmul.mubr.bf16.gmra.mxu1 %v1321_v40 }
  0x4d   : > { %721 = vmatmul.mubr.bf16.gmra.mxu0 %v1311_v41 }
  0x4e   : > { %728 = vmatprep.mubr.bf16.mxu0 %v1314_v42 }
  0x55   : > { %729 = vmatmul.mubr.bf16.gmra.mxu0 %v1316_v43 }
  0x56   : > { %736 = vmatprep.mubr.bf16.mxu0 %v1317_v44 }
  0x5d   : > { %737 = vmatmul.mubr.bf16.gmra.mxu0 %v1319_v45 }
  0x5e   : > { %744 = vmatprep.mubr.bf16.mxu0 %v1322_v46 }
  0x65   : > { %745 = vmatmul.mubr.bf16.gmra.mxu0 %v1324_v47 }
  0xed   : > { %v1148_v48 = vpop.f32.mrf.mxu0 }
  0xef   : > { %v1149_v49 = vpop.f32.mrf.mxu0  ;;  %v1230_v50 = vpop.f32.mrf.mxu1 }
  0xf0   : > { %v1150_v51 = vadd.f32 %v1149_v49, %v1148_v48 }
  0xf1   : > { %v1151_v52 = vpop.f32.mrf.mxu0  ;;  %v787_v53 = vpop.f32.mrf.mxu1 }
  0xf2   : > { %v788_v55 = vadd.f32 %v1150_v51, %v787_v53 }
  0xf3   : > { %v1152_v56 = vpop.f32.mrf.mxu0  ;;  %v1231_v57 = vpop.f32.mrf.mxu1 }
  0xf4   : > { %v908_v58 = vadd.f32 %v1497_v54, %v788_v55  ;;  %v1153_v59 = vadd.f32 %v1152_v56, %v1151_v52 }
  0xf5   : > { %v1154_v60 = vpop.f32.mrf.mxu0  ;;  %v790_v61 = vpop.f32.mrf.mxu1 }
  0xf6   : > { %v924_v62 = vmax.f32 %v908_v58, 0.0  ;;  %v791_v63 = vadd.f32 %v1153_v59, %v790_v61 }
  0xf7   : > { %v1155_v0 = vpop.f32.mrf.mxu0  ;;  %v1234_v1 = vpop.f32.mrf.mxu1 }
  0xf8   : > { %940 = vst [vmem:[%s1504_s27] sm:$0xff] %v924_v62  ;;  %v909_v2 = vadd.f32 %v1497_v54, %v791_v63  ;;  %v1156_v3 = vadd.f32 %v1155_v0, %v1154_v60 }
  0xf9   : > { %v1157_v4 = vpop.f32.mrf.mxu0  ;;  %v803_v8 = vpop.f32.mrf.mxu1 }
  0xfa   : > { %v925_v5 = vmax.f32 %v909_v2, 0.0  ;;  %v796_v6 = vadd.f32 %v1230_v50, %v1156_v3 }
  0xfb   : > { %v1158_v7 = vpop.f32.mrf.mxu0  ;;  %v1235_v15 = vpop.f32.mrf.mxu1 }
  0xfc   : > { %941 = vst [vmem:[%s1504_s27 + $0x8] sm:$0xff] %v925_v5  ;;  %v910_v9 = vadd.f32 %v1497_v54, %v796_v6  ;;  %v1159_v10 = vadd.f32 %v1158_v7, %v1157_v4 }
  0xfd   : > { %v1160_v11 = vpop.f32.mrf.mxu0  ;;  %v806_v22 = vpop.f32.mrf.mxu1 }
  0xfe   : > { %v926_v12 = vmax.f32 %v910_v9, 0.0  ;;  %v799_v13 = vadd.f32 %v1231_v57, %v1159_v10 }
  0xff   : > { %v1161_v14 = vpop.f32.mrf.mxu0  ;;  %v1238_v29 = vpop.f32.mrf.mxu1 }
 0x100   : > { %942 = vst [vmem:[%s1504_s27 + $0x10] sm:$0xff] %v926_v12  ;;  %v911_v16 = vadd.f32 %v1497_v54, %v799_v13  ;;  %v1162_v17 = vadd.f32 %v1161_v14, %v1160_v11 }
 0x101   : > { %v1163_v18 = vpop.f32.mrf.mxu0  ;;  %v819_v36 = vpop.f32.mrf.mxu1 }
 0x102   : > { %v927_v19 = vmax.f32 %v911_v16, 0.0  ;;  %v804_v20 = vadd.f32 %v1162_v17, %v803_v8 }
 0x103   : > { %v1164_v21 = vpop.f32.mrf.mxu0  ;;  %v1239_v43 = vpop.f32.mrf.mxu1 }
 0x104   : > { %943 = vst [vmem:[%s1504_s27 + $0x18] sm:$0xff] %v927_v19  ;;  %v912_v23 = vadd.f32 %v1497_v54, %v804_v20  ;;  %v1165_v24 = vadd.f32 %v1164_v21, %v1163_v18 }
 0x105   : > { %v1166_v25 = vpop.f32.mrf.mxu0  ;;  %v822_v50 = vpop.f32.mrf.mxu1 }
 0x106   : > { %v928_v26 = vmax.f32 %v912_v23, 0.0  ;;  %v807_v27 = vadd.f32 %v1165_v24, %v806_v22 }
 0x107   : > { %v1167_v28 = vpop.f32.mrf.mxu0  ;;  %v1242_v58 = vpop.f32.mrf.mxu1 }
 0x108   : > { %944 = vst [vmem:[%s1504_s27 + $0x20] sm:$0xff] %v928_v26  ;;  %v913_v30 = vadd.f32 %v1497_v54, %v807_v27  ;;  %v1168_v31 = vadd.f32 %v1167_v28, %v1166_v25 }
 0x109   : > { %v1169_v32 = vpop.f32.mrf.mxu0 }
 0x10a   : > { %v929_v33 = vmax.f32 %v913_v30, 0.0  ;;  %v812_v34 = vadd.f32 %v1234_v1, %v1168_v31  ;;  %v835_v1 = vpop.f32.mrf.mxu1 }
 0x10b   : > { %v1170_v35 = vpop.f32.mrf.mxu0 }
 0x10c   : > { %945 = vst [vmem:[%s1504_s27 + $0x28] sm:$0xff] %v929_v33  ;;  %v914_v37 = vadd.f32 %v1497_v54, %v812_v34  ;;  %v1171_v38 = vadd.f32 %v1170_v35, %v1169_v32  ;;  %v1243_v8 = vpop.f32.mrf.mxu1 }
 0x10d   : > { %v1172_v39 = vpop.f32.mrf.mxu0 }
 0x10e   : > { %v930_v40 = vmax.f32 %v914_v37, 0.0  ;;  %v815_v41 = vadd.f32 %v1235_v15, %v1171_v38  ;;  %v838_v15 = vpop.f32.mrf.mxu1 }
 0x10f   : > { %v1173_v42 = vpop.f32.mrf.mxu0 }
 0x110   : > { %946 = vst [vmem:[%s1504_s27 + $0x30] sm:$0xff] %v930_v40  ;;  %v915_v44 = vadd.f32 %v1497_v54, %v815_v41  ;;  %v1174_v45 = vadd.f32 %v1173_v42, %v1172_v39 }
 0x111   : > { %v1175_v46 = vpop.f32.mrf.mxu0 }
 0x112   : > { %v931_v47 = vmax.f32 %v915_v44, 0.0  ;;  %v820_v48 = vadd.f32 %v1174_v45, %v819_v36 }
 0x113   : > { %v1176_v49 = vpop.f32.mrf.mxu0 }
 0x114   : > { %947 = vst [vmem:[%s1504_s27 + $0x38] sm:$0xff] %v931_v47  ;;  %v916_v51 = vadd.f32 %v1497_v54, %v820_v48  ;;  %v1177_v52 = vadd.f32 %v1176_v49, %v1175_v46 }
 0x115   : > { %v1178_v53 = vpop.f32.mrf.mxu0 }
 0x116   : > { %v932_v55 = vmax.f32 %v916_v51, 0.0  ;;  %v823_v56 = vadd.f32 %v1177_v52, %v822_v50 }
 0x117   : > { %v1179_v57 = vpop.f32.mrf.mxu0 }
 0x118   : > { %948 = vst [vmem:[%s1504_s27 + $0x40] sm:$0xff] %v932_v55  ;;  %v917_v59 = vadd.f32 %v1497_v54, %v823_v56  ;;  %v1180_v60 = vadd.f32 %v1179_v57, %v1178_v53 }
 0x119   : > { %v1181_v61 = vpop.f32.mrf.mxu0 }
 0x11a   : > { %v933_v62 = vmax.f32 %v917_v59, 0.0  ;;  %v828_v63 = vadd.f32 %v1238_v29, %v1180_v60 }
 0x11b   : > { %v1182_v0 = vpop.f32.mrf.mxu0 }
 0x11c   : > { %949 = vst [vmem:[%s1504_s27 + $0x48] sm:$0xff] %v933_v62  ;;  %v918_v2 = vadd.f32 %v1497_v54, %v828_v63  ;;  %v1183_v3 = vadd.f32 %v1182_v0, %v1181_v61 }
 0x11d   : > { %v1184_v4 = vpop.f32.mrf.mxu0 }
 0x11e   : > { %v934_v5 = vmax.f32 %v918_v2, 0.0  ;;  %v831_v6 = vadd.f32 %v1239_v43, %v1183_v3 }
 0x11f   : > { %v1185_v7 = vpop.f32.mrf.mxu0 }
 0x120   : > { %950 = vst [vmem:[%s1504_s27 + $0x50] sm:$0xff] %v934_v5  ;;  %v919_v9 = vadd.f32 %v1497_v54, %v831_v6  ;;  %v1186_v10 = vadd.f32 %v1185_v7, %v1184_v4 }
 0x121   : > { %v1187_v11 = vpop.f32.mrf.mxu0 }
 0x122   : > { %v935_v12 = vmax.f32 %v919_v9, 0.0  ;;  %v836_v13 = vadd.f32 %v1186_v10, %v835_v1 }
 0x123   : > { %v1188_v14 = vpop.f32.mrf.mxu0 }
 0x124   : > { %951 = vst [vmem:[%s1504_s27 + $0x58] sm:$0xff] %v935_v12  ;;  %v920_v16 = vadd.f32 %v1497_v54, %v836_v13  ;;  %v1189_v17 = vadd.f32 %v1188_v14, %v1187_v11 }
 0x125   : > { %v1190_v18 = vpop.f32.mrf.mxu0 }
 0x126   : > { %v936_v19 = vmax.f32 %v920_v16, 0.0  ;;  %v839_v20 = vadd.f32 %v1189_v17, %v838_v15 }
 0x127   : > { %v1191_v21 = vpop.f32.mrf.mxu0 }
 0x128   : > { %952 = vst [vmem:[%s1504_s27 + $0x60] sm:$0xff] %v936_v19  ;;  %v921_v22 = vadd.f32 %v1497_v54, %v839_v20  ;;  %v1192_v23 = vadd.f32 %v1191_v21, %v1190_v18 }
 0x129   : > { %v1193_v24 = vpop.f32.mrf.mxu0 }
 0x12a   : > { %v937_v25 = vmax.f32 %v921_v22, 0.0  ;;  %v844_v26 = vadd.f32 %v1242_v58, %v1192_v23 }
 0x12b   : > { %v1194_v27 = vpop.f32.mrf.mxu0 }
 0x12c   : > { %953 = vst [vmem:[%s1504_s27 + $0x68] sm:$0xff] %v937_v25  ;;  %v922_v28 = vadd.f32 %v1497_v54, %v844_v26  ;;  %v1195_v29 = vadd.f32 %v1194_v27, %v1193_v24 }
 0x12e   : > { %v938_v30 = vmax.f32 %v922_v28, 0.0  ;;  %v847_v31 = vadd.f32 %v1243_v8, %v1195_v29 }
 0x130   : > { %954 = vst [vmem:[%s1504_s27 + $0x70] sm:$0xff] %v938_v30  ;;  %v923_v32 = vadd.f32 %v1497_v54, %v847_v31 }
 0x132   : > { %v939_v33 = vmax.f32 %v923_v32, 0.0 }
 0x134   : > { %955 = vst [vmem:[%s1504_s27 + $0x78] sm:$0xff] %v939_v33 }
 0x135 PF: > { %s13_s14 = sadd.s32 1, %s1347_s14   ;;  %s1550_s12 = smov %s1343_s13 }
 0x136   : > { %p10_p5 = scmp.ge.s32.totalorder %s13_s14, 6   ;;  %s1551_s13 = smov %s1553_s15 }
 0x138   :  { %12 = sbr.rel (!%p10_p5) target bundleno = 2 (0x2), region = 76 }

// kernel: alexnet_forward.13
= control target key start
LH: loop header
LB: loop body
LE: loop exit
PB: predicated region body
PF: predicated region fallthrough
CT: control target
= control target key end

     0   :  { %s1154_s12 = smov 0   ;;  %s1156_s13 = smov 0   ;;  %s1366_s0 = inlined_call_operand.vmem [shape: bf16[104,2432], index: 0, kind: input, shape index: {}]   ;;  %s1367_s1 = inlined_call_operand.vmem [shape: bf16[2432,256], index: 1, kind: input, shape index: {}]   ;;  %s1368_s2 = inlined_call_operand.vmem [shape: f32[1,256], index: 2, kind: input, shape index: {}]   ;;  %s1369_s3 = inlined_call_operand.vmem [shape: f32[104,256], index: 3, kind: output, shape index: {}]  }
   0x1   :  { %s1158_s14 = smov 0   ;;  %s1160_s15 = smov 0  }
   0x2   :  { %s1162_s16 = smov 0  }
   0x3 LB: > { %s25_s17 = sadd.s32 1, %s1126_s15  ;;  %p48_p1 = scmp.ne.s32.totalorder %s1118_s13, %s1114_s12  ;;  %s1130_s16 = sphi %s1162_s16, %s13_s16   ;;  %s1126_s15 = sphi %s1160_s15, %s1373_s15   ;;  %s1122_s14 = sphi %s1158_s14, %s1372_s14   ;;  %s1118_s13 = sphi %s1156_s13, %s1371_s13   ;;  %s1114_s12 = sphi %s1154_s12, %s1370_s12  }
   0x4   : > { %p26_p0 = scmp.ge.s32.totalorder %s25_s17, 19  ;;  %p49_p2 = scmp.eq.s32.totalorder %s1130_s16, 0 }
   0x5   : > { %s41_s19 = sadd.s32 1, %s1118_s13  ;;  %p965_p5 = scmp.ge.s32.totalorder %s1130_s16, 19 }
   0x6   : > { %s1375_s17 = smov (%p26_p0, %s25_s17), 0  ;;  %p50_p3 = por %p49_p2, %p48_p1 }
   0x7   : > { %s37_s18 = ssub.s32 %s1126_s15, %s1375_s17  ;;  %164 = sbr.rel (%p965_p5) target bundleno = 25 (0x19), region = 20 }
   0x8   : > { %p39_p4 = scmp.eq.s32.totalorder %s37_s18, 0 }
   0xa   : > { %s1189_s20 = scalar_select %p39_p4, %s1118_s13, %s41_s19  }
   0xc   : > { %167 = sbr.rel (!%p50_p3) target bundleno = 25 (0x19), region = 24  ;;  %s169_s21 = sand.u32 (%p50_p3), 1, %s1118_s13  }
   0xd   : > { %s966_s22 = sshll.u32 (%p50_p3), %s1126_s15, 2  ;;  %s1017_s23 = smul.u32 (%p50_p3), 52, %s169_s21 }
   0xe   : > { %s176_s26 = scalar_lea.vmem (%p50_p3), %s1366_s0, %s966_s22 }
   0xf   : > { %v193_v0 = vld [vmem:[%s176_s26] sm:$0xf] (%p50_p3)  ;;  %v195_v1 = vld [vmem:[%s176_s26 + $0x4c] sm:$0xf] (%p50_p3)  ;;  %v197_v2 = vld [vmem:[%s176_s26 + $0x98] sm:$0xf] (%p50_p3) }
  0x10   : > { %v199_v3 = vld [vmem:[%s176_s26 + $0xe4] sm:$0xf] (%p50_p3)  ;;  %v201_v4 = vld [vmem:[%s176_s26 + $0x130] sm:$0xf] (%p50_p3)  ;;  %s171_s27 = scalar_lea.vmem (%p50_p3), [#allocation3], %s1017_s23 }
  0x11   : > { %194 = vst [vmem:[%s171_s27] sm:$0xf] %v193_v0  ;;  %196 = vst [vmem:[%s171_s27 + $0x4] sm:$0xf] %v195_v1  ;;  %v203_v5 = vld [vmem:[%s176_s26 + $0x17c] sm:$0xf] }
  0x12   : > { %198 = vst [vmem:[%s171_s27 + $0x8] sm:$0xf] %v197_v2  ;;  %200 = vst [vmem:[%s171_s27 + $0xc] sm:$0xf] %v199_v3  ;;  %v205_v6 = vld [vmem:[%s176_s26 + $0x1c8] sm:$0xf] }
  0x13   : > { %202 = vst [vmem:[%s171_s27 + $0x10] sm:$0xf] %v201_v4  ;;  %v207_v7 = vld [vmem:[%s176_s26 + $0x214] sm:$0xf]  ;;  %204 = vst [vmem:[%s171_s27 + $0x14] sm:$0xf] %v203_v5 }
  0x14   : > { %206 = vst [vmem:[%s171_s27 + $0x18] sm:$0xf] %v205_v6  ;;  %208 = vst [vmem:[%s171_s27 + $0x1c] sm:$0xf] %v207_v7  ;;  %v209_v8 = vld [vmem:[%s176_s26 + $0x260] sm:$0xf] }
  0x15   : > { %v211_v9 = vld [vmem:[%s176_s26 + $0x2ac] sm:$0xf]  ;;  %v213_v10 = vld [vmem:[%s176_s26 + $0x2f8] sm:$0xf]  ;;  %210 = vst [vmem:[%s171_s27 + $0x20] sm:$0xf] %v209_v8 }
  0x16   : > { %212 = vst [vmem:[%s171_s27 + $0x24] sm:$0xf] %v211_v9  ;;  %214 = vst [vmem:[%s171_s27 + $0x28] sm:$0xf] %v213_v10  ;;  %v215_v11 = vld [vmem:[%s176_s26 + $0x344] sm:$0xf] }
  0x17   : > { %v217_v12 = vld [vmem:[%s176_s26 + $0x390] sm:$0xf]  ;;  %216 = vst [vmem:[%s171_s27 + $0x2c] sm:$0xf] %v215_v11 }
  0x18   : > { %218 = vst [vmem:[%s171_s27 + $0x30] sm:$0xf] %v217_v12 }
  0x19 PF: > { %p967_p6 = scmp.ge.s32.totalorder %s1130_s16, 1  ;;  %p282_p7 = scmp.lt.s32.totalorder %s1130_s16, 20 }
  0x1b   : > { %p283_p8 = pnand %p967_p6, %p282_p7 }
  0x1c   : > { %s289_s28 = sand.u32 (!%p283_p8), 1, %s1114_s12   ;;  %s968_s29 = sshll.u32 (!%p283_p8), %s1122_s14, 4 }
  0x1d   : > { %286 = sbr.rel (%p283_p8) target bundleno = 339 (0x153), region = 69  ;;  %p334_p9 = scmp.lt.s32.totalorder (!%p283_p8), %s968_s29, 303 }
  0x1e   : > { %s1018_s30 = smul.u32 (!%p283_p8), 52, %s289_s28  ;;  %p971_p10 = scmp.ne.s32.totalorder (!%p283_p8), %s1122_s14, 0 }
  0x20   : > { %s1206_s8 = scalar_lea.vmem (!%p283_p8), [#allocation3], %s1018_s30 }
  0x22   : > { %s1377_s29 = smov (!%p334_p9, %s968_s29), 303  ;;  %365 = sbr.rel (%p971_p10) target bundleno = 53 (0x35), region = 77 }
  0x23   : > { %s1000_s4 = sshll.u32 %s1377_s29, 3 }
  0x24   : > { %s1204_s7 = scalar_lea.vmem %s1367_s1, %s1000_s4 }
  0x27   : > { %v1132_v13 = vmov 0.0  }
  0x28   : > { %366 = vst [vmem:[#allocation2 + $0xb0] sm:$0xff] %v1132_v13  ;;  %367 = vst [vmem:[#allocation2] sm:$0xff] %v1132_v13 }
  0x29   : > { %368 = vst [vmem:[#allocation2 + $0x10] sm:$0xff] %v1132_v13  ;;  %369 = vst [vmem:[#allocation2 + $0x48] sm:$0xff] %v1132_v13 }
  0x2a   : > { %370 = vst [vmem:[#allocation2 + $0x60] sm:$0xff] %v1132_v13  ;;  %371 = vst [vmem:[#allocation2 + $0x28] sm:$0xff] %v1132_v13 }
  0x2b   : > { %372 = vst [vmem:[#allocation2 + $0x40] sm:$0xff] %v1132_v13  ;;  %373 = vst [vmem:[#allocation2 + $0x78] sm:$0xff] %v1132_v13 }
  0x2c   : > { %374 = vst [vmem:[#allocation2 + $0x80] sm:$0xff] %v1132_v13  ;;  %375 = vst [vmem:[#allocation2 + $0xa8] sm:$0xff] %v1132_v13 }
  0x2d   : > { %376 = vst [vmem:[#allocation2 + $0x50] sm:$0xff] %v1132_v13  ;;  %377 = vst [vmem:[#allocation2 + $0x30] sm:$0xff] %v1132_v13 }
  0x2e   : > { %378 = vst [vmem:[#allocation2 + $0x88] sm:$0xff] %v1132_v13  ;;  %379 = vst [vmem:[#allocation2 + $0x70] sm:$0xff] %v1132_v13 }
  0x2f   : > { %380 = vst [vmem:[#allocation2 + $0x8] sm:$0xff] %v1132_v13  ;;  %381 = vst [vmem:[#allocation2 + $0x38] sm:$0xff] %v1132_v13 }
  0x30   : > { %382 = vst [vmem:[#allocation2 + $0x20] sm:$0xff] %v1132_v13  ;;  %383 = vst [vmem:[#allocation2 + $0xb8] sm:$0xff] %v1132_v13 }
  0x31   : > { %384 = vst [vmem:[#allocation2 + $0x58] sm:$0xff] %v1132_v13  ;;  %385 = vst [vmem:[#allocation2 + $0xc8] sm:$0xff] %v1132_v13 }
  0x32   : > { %386 = vst [vmem:[#allocation2 + $0xa0] sm:$0xff] %v1132_v13  ;;  %387 = vst [vmem:[#allocation2 + $0x90] sm:$0xff] %v1132_v13 }
  0x33   : > { %388 = vst [vmem:[#allocation2 + $0x98] sm:$0xff] %v1132_v13  ;;  %389 = vst [vmem:[#allocation2 + $0x18] sm:$0xff] %v1132_v13 }
  0x34   : > { %390 = vst [vmem:[#allocation2 + $0xc0] sm:$0xff] %v1132_v13  ;;  %391 = vst [vmem:[#allocation2 + $0x68] sm:$0xff] %v1132_v13 }
  0x35 PF: > { %v1061_v14 = vld [vmem:[%s1204_s7 + $0x74] ss:$8 sps:$4 sm:$0xff]   ;;  %v1063_v15 = vld [vmem:[%s1204_s7 + $0x70] ss:$8 sps:$4 sm:$0xff]   ;;  %v1133_v16 = vmov 0   ;;  %v393_v41 = vld [vmem:[#allocation2] sm:$0xff] }
  0x36   : > { %599 = vmatprep.mubr.bf16.mxu0 %v1133_v16  ;;  %639 = vmatprep.mubr.bf16.mxu1 %v1133_v16  ;;  %v1064_v17 = vld [vmem:[%s1204_s7 + $0x64] ss:$8 sps:$4 sm:$0xff]   ;;  %v1066_v18 = vld [vmem:[%s1204_s7 + $0x60] ss:$8 sps:$4 sm:$0xff]   ;;  %v1067_v19 = vld [vmem:[%s1204_s7 + $0x54] ss:$8 sps:$4 sm:$0xff]  }
  0x37   : > { %567 = vmatprep.subr.bf16.mxu0 %v1061_v14  ;;  %1001 = vmatprep.subr.bf16.mxu1 %v1061_v14  ;;  %v1069_v20 = vld [vmem:[%s1204_s7 + $0x50] ss:$8 sps:$4 sm:$0xff]   ;;  %v1070_v21 = vld [vmem:[%s1204_s7 + $0x44] ss:$8 sps:$4 sm:$0xff]   ;;  %v1072_v22 = vld [vmem:[%s1204_s7 + $0x40] ss:$8 sps:$4 sm:$0xff]  }
  0x38   : > { %568 = vmatpush1.bf16.msra.mxu0 %v1063_v15  ;;  %1009 = vmatpush1.bf16.msra.mxu1 %v1063_v15  ;;  %v1073_v23 = vld [vmem:[%s1204_s7 + $0x34] ss:$8 sps:$4 sm:$0xff]   ;;  %v1075_v24 = vld [vmem:[%s1204_s7 + $0x30] ss:$8 sps:$4 sm:$0xff]   ;;  %v1076_v25 = vld [vmem:[%s1204_s7 + $0x24] ss:$8 sps:$4 sm:$0xff]  }
  0x39   : > { %569 = vmatprep.subr.bf16.mxu0 %v1064_v17  ;;  %1002 = vmatprep.subr.bf16.mxu1 %v1064_v17  ;;  %v1078_v26 = vld [vmem:[%s1204_s7 + $0x20] ss:$8 sps:$4 sm:$0xff]   ;;  %v1079_v27 = vld [vmem:[%s1204_s7 + $0x14] ss:$8 sps:$4 sm:$0xff]   ;;  %v1081_v28 = vld [vmem:[%s1204_s7 + $0x10] ss:$8 sps:$4 sm:$0xff]  }
  0x3a   : > { %v1082_v29 = vld [vmem:[%s1204_s7 + $0x4] ss:$8 sps:$4 sm:$0xff]   ;;  %v1084_v30 = vld [vmem:[%s1204_s7] ss:$8 sps:$4 sm:$0xff]   ;;  %v392_v38 = vld [vmem:[#allocation2 + $0xb0] sm:$0xff]  ;;  %p995_p11 = scmp.ne.s32.totalorder %s1122_s14, 18 }
  0x3b   : > { %v1085_v31 = vld [vmem:[%s1206_s8] sm:$0xff]   ;;  %v1087_v33 = vld [vmem:[%s1206_s8 + $0x8] sm:$0xff]   ;;  %v1089_v35 = vld [vmem:[%s1206_s8 + $0x10] sm:$0xff]  }
  0x3c   : > { %570 = vmatpush1.bf16.msra.mxu0 %v1066_v18  ;;  %1010 = vmatpush1.bf16.msra.mxu1 %v1066_v18  ;;  %v1086_v32 = vld [vmem:[%s1206_s8 + $0x20] sm:$0xff]   ;;  %v1088_v34 = vld [vmem:[%s1206_s8 + $0x28] sm:$0xff]   ;;  %v1090_v36 = vld [vmem:[%s1206_s8 + $0x30] ss:$0 sps:$4 sm:$0xff]  }
  0x3d   : > { %571 = vmatprep.subr.bf16.mxu0 %v1067_v19  ;;  %1003 = vmatprep.subr.bf16.mxu1 %v1067_v19  ;;  %v1091_v37 = vld [vmem:[%s1206_s8 + $0x18] sm:$0xff]   ;;  %v394_v47 = vld [vmem:[#allocation2 + $0x10] sm:$0xff] }
  0x3e   : > { %v408_v39 = vld [vmem:[#allocation2 + $0x20] sm:$0xff]  ;;  %v409_v43 = vld [vmem:[#allocation2 + $0xb8] sm:$0xff]  ;;  %v395_v53 = vld [vmem:[#allocation2 + $0x48] sm:$0xff] }
  0x3f   : > { %v410_v49 = vld [vmem:[#allocation2 + $0x58] sm:$0xff]  ;;  %v411_v55 = vld [vmem:[#allocation2 + $0xc8] sm:$0xff]  ;;  %v396_v59 = vld [vmem:[#allocation2 + $0x60] sm:$0xff] }
  0x40   : > { %572 = vmatpush1.bf16.msra.mxu0 %v1069_v20  ;;  %1011 = vmatpush1.bf16.msra.mxu1 %v1069_v20  ;;  %v412_v61 = vld [vmem:[#allocation2 + $0xa0] sm:$0xff]  ;;  %v397_v1 = vld [vmem:[#allocation2 + $0x28] sm:$0xff]  ;;  %v413_v3 = vld [vmem:[#allocation2 + $0x90] sm:$0xff] }
  0x41   : > { %573 = vmatprep.subr.bf16.mxu0 %v1070_v21  ;;  %1004 = vmatprep.subr.bf16.mxu1 %v1070_v21  ;;  %v398_v7 = vld [vmem:[#allocation2 + $0x40] sm:$0xff]  ;;  %v414_v9 = vld [vmem:[#allocation2 + $0x98] sm:$0xff] }
  0x42   : > { %v399_v13 = vld [vmem:[#allocation2 + $0x78] sm:$0xff]  ;;  %v400_v19 = vld [vmem:[#allocation2 + $0x80] sm:$0xff] }
  0x43   : > { %v415_v15 = vld [vmem:[#allocation2 + $0x18] sm:$0xff]  ;;  %v416_v21 = vld [vmem:[#allocation2 + $0xc0] sm:$0xff] }
  0x44   : > { %574 = vmatpush1.bf16.msra.mxu0 %v1072_v22  ;;  %1012 = vmatpush1.bf16.msra.mxu1 %v1072_v22 }
  0x45   : > { %575 = vmatprep.subr.bf16.mxu0 %v1073_v23  ;;  %1005 = vmatprep.subr.bf16.mxu1 %v1073_v23 }
  0x48   : > { %576 = vmatpush1.bf16.msra.mxu0 %v1075_v24  ;;  %1013 = vmatpush1.bf16.msra.mxu1 %v1075_v24 }
  0x49   : > { %577 = vmatprep.subr.bf16.mxu0 %v1076_v25  ;;  %1006 = vmatprep.subr.bf16.mxu1 %v1076_v25  ;;  %v401_v25 = vld [vmem:[#allocation2 + $0xa8] sm:$0xff] }
  0x4c   : > { %578 = vmatpush1.bf16.msra.mxu0 %v1078_v26  ;;  %1014 = vmatpush1.bf16.msra.mxu1 %v1078_v26 }
  0x4d   : > { %579 = vmatprep.subr.bf16.mxu0 %v1079_v27  ;;  %1007 = vmatprep.subr.bf16.mxu1 %v1079_v27  ;;  %v417_v27 = vld [vmem:[#allocation2 + $0x68] sm:$0xff] }
  0x50   : > { %580 = vmatpush1.bf16.msra.mxu0 %v1081_v28  ;;  %1015 = vmatpush1.bf16.msra.mxu1 %v1081_v28 }
  0x51   : > { %581 = vmatprep.subr.bf16.mxu0 %v1082_v29  ;;  %1008 = vmatprep.subr.bf16.mxu1 %v1082_v29 }
  0x54   : > { %582 = vmatpush1.bf16.msra.mxu0 %v1084_v30  ;;  %1016 = vmatpush1.bf16.msra.mxu1 %v1084_v30 }
  0x57   : > { %600 = vmatmul.mubr.bf16.vlgmr.msra.gmra.mxu0 %v1085_v31  ;;  %640 = vmatmul.mubr.bf16.vlgmr.msra.gmra.mxu1 %v1086_v32  ;;  %v402_v31 = vld [vmem:[#allocation2 + $0x50] sm:$0xff] }
  0x58   : > { %609 = vmatprep.mubr.bf16.mxu0 %v1133_v16  ;;  %649 = vmatprep.mubr.bf16.mxu1 %v1133_v16 }
  0x5f   : > { %610 = vmatmul.mubr.bf16.gmra.mxu0 %v1087_v33  ;;  %650 = vmatmul.mubr.bf16.gmra.mxu1 %v1088_v34 }
  0x60   : > { %619 = vmatprep.mubr.bf16.mxu0 %v1133_v16  ;;  %659 = vmatprep.mubr.bf16.mxu1 %v1133_v16 }
  0x67   : > { %620 = vmatmul.mubr.bf16.gmra.mxu0 %v1089_v35  ;;  %660 = vmatmul.mubr.bf16.gmra.mxu1 %v1090_v36  ;;  %v403_v36 = vld [vmem:[#allocation2 + $0x30] sm:$0xff] }
  0x68   : > { %629 = vmatprep.mubr.bf16.mxu0 %v1133_v16 }
  0x6f   : > { %630 = vmatmul.mubr.bf16.gmra.mxu0 %v1091_v37 }
 0x117   : > { %v601_v40 = vpop.f32.mrf.mxu0  ;;  %v641_v42 = vpop.f32.mrf.mxu1 }
 0x118   : > { %v668_v44 = vadd.f32 %v601_v40, %v392_v38  ;;  %v684_v45 = vadd.f32 %v641_v42, %v408_v39  ;;  %v404_v40 = vld [vmem:[#allocation2 + $0x88] sm:$0xff] }
 0x119   : > { %v603_v46 = vpop.f32.mrf.mxu0  ;;  %v643_v48 = vpop.f32.mrf.mxu1 }
 0x11a   : > { %694 = vst [vmem:[#allocation2 + $0xb0] sm:$0xff] %v668_v44  ;;  %v669_v50 = vadd.f32 %v603_v46, %v393_v41  ;;  %710 = vst [vmem:[#allocation2 + $0x20] sm:$0xff] %v684_v45  ;;  %v685_v51 = vadd.f32 %v643_v48, %v409_v43  ;;  %v405_v44 = vld [vmem:[#allocation2 + $0x70] sm:$0xff] }
 0x11b   : > { %v605_v52 = vpop.f32.mrf.mxu0  ;;  %v645_v54 = vpop.f32.mrf.mxu1 }
 0x11c   : > { %695 = vst [vmem:[#allocation2] sm:$0xff] %v669_v50  ;;  %v670_v56 = vadd.f32 %v605_v52, %v394_v47  ;;  %711 = vst [vmem:[#allocation2 + $0xb8] sm:$0xff] %v685_v51  ;;  %v686_v57 = vadd.f32 %v645_v54, %v410_v49  ;;  %v406_v47 = vld [vmem:[#allocation2 + $0x8] sm:$0xff]  ;;  %v407_v50 = vld [vmem:[#allocation2 + $0x38] sm:$0xff] }
 0x11d   : > { %v607_v58 = vpop.f32.mrf.mxu0  ;;  %v647_v60 = vpop.f32.mrf.mxu1 }
 0x11e   : > { %696 = vst [vmem:[#allocation2 + $0x10] sm:$0xff] %v670_v56  ;;  %v671_v62 = vadd.f32 %v607_v58, %v395_v53  ;;  %712 = vst [vmem:[#allocation2 + $0x58] sm:$0xff] %v686_v57  ;;  %v687_v63 = vadd.f32 %v647_v60, %v411_v55 }
 0x11f   : > { %v611_v0 = vpop.f32.mrf.mxu0  ;;  %v651_v2 = vpop.f32.mrf.mxu1 }
 0x120   : > { %697 = vst [vmem:[#allocation2 + $0x48] sm:$0xff] %v671_v62  ;;  %v672_v4 = vadd.f32 %v611_v0, %v396_v59  ;;  %713 = vst [vmem:[#allocation2 + $0xc8] sm:$0xff] %v687_v63  ;;  %v688_v5 = vadd.f32 %v651_v2, %v412_v61 }
 0x121   : > { %v613_v6 = vpop.f32.mrf.mxu0  ;;  %v653_v8 = vpop.f32.mrf.mxu1 }
 0x122   : > { %698 = vst [vmem:[#allocation2 + $0x60] sm:$0xff] %v672_v4  ;;  %v673_v10 = vadd.f32 %v613_v6, %v397_v1  ;;  %714 = vst [vmem:[#allocation2 + $0xa0] sm:$0xff] %v688_v5  ;;  %v689_v11 = vadd.f32 %v653_v8, %v413_v3 }
 0x123   : > { %v615_v12 = vpop.f32.mrf.mxu0  ;;  %v655_v14 = vpop.f32.mrf.mxu1 }
 0x124   : > { %699 = vst [vmem:[#allocation2 + $0x28] sm:$0xff] %v673_v10  ;;  %v674_v16 = vadd.f32 %v615_v12, %v398_v7  ;;  %715 = vst [vmem:[#allocation2 + $0x90] sm:$0xff] %v689_v11  ;;  %v690_v17 = vadd.f32 %v655_v14, %v414_v9 }
 0x125   : > { %v617_v18 = vpop.f32.mrf.mxu0  ;;  %v657_v20 = vpop.f32.mrf.mxu1 }
 0x126   : > { %700 = vst [vmem:[#allocation2 + $0x40] sm:$0xff] %v674_v16  ;;  %v675_v22 = vadd.f32 %v617_v18, %v399_v13  ;;  %716 = vst [vmem:[#allocation2 + $0x98] sm:$0xff] %v690_v17  ;;  %v691_v23 = vadd.f32 %v657_v20, %v415_v15 }
 0x127   : > { %v621_v24 = vpop.f32.mrf.mxu0  ;;  %v661_v26 = vpop.f32.mrf.mxu1 }
 0x128   : > { %701 = vst [vmem:[#allocation2 + $0x78] sm:$0xff] %v675_v22  ;;  %v676_v28 = vadd.f32 %v621_v24, %v400_v19  ;;  %717 = vst [vmem:[#allocation2 + $0x18] sm:$0xff] %v691_v23  ;;  %v692_v29 = vadd.f32 %v661_v26, %v416_v21 }
 0x129   : > { %v623_v30 = vpop.f32.mrf.mxu0  ;;  %v663_v32 = vpop.f32.mrf.mxu1 }
 0x12a   : > { %702 = vst [vmem:[#allocation2 + $0x80] sm:$0xff] %v676_v28  ;;  %v677_v33 = vadd.f32 %v623_v30, %v401_v25  ;;  %718 = vst [vmem:[#allocation2 + $0xc0] sm:$0xff] %v692_v29  ;;  %v693_v34 = vadd.f32 %v663_v32, %v417_v27 }
 0x12b   : > { %v625_v35 = vpop.f32.mrf.mxu0  ;;  %v665_v37 = vpop.f32.mrf.mxu1 }
 0x12c   : > { %703 = vst [vmem:[#allocation2 + $0xa8] sm:$0xff] %v677_v33  ;;  %v678_v38 = vadd.f32 %v625_v35, %v402_v31  ;;  %719 = vst [vmem:[#allocation2 + $0x68] sm:$0xff] %v693_v34 }
 0x12d   : > { %v627_v39 = vpop.f32.mrf.mxu0  ;;  %v666_v41 = vpop.f32.mrf.mxu1 }
 0x12e   : > { %704 = vst [vmem:[#allocation2 + $0x50] sm:$0xff] %v678_v38  ;;  %v679_v42 = vadd.f32 %v627_v39, %v403_v36 }
 0x12f   : > { %v631_v43 = vpop.f32.mrf.mxu0 }
 0x130   : > { %705 = vst [vmem:[#allocation2 + $0x30] sm:$0xff] %v679_v42  ;;  %v680_v45 = vadd.f32 %v631_v43, %v404_v40 }
 0x131   : > { %v633_v46 = vpop.f32.mrf.mxu0 }
 0x132   : > { %706 = vst [vmem:[#allocation2 + $0x88] sm:$0xff] %v680_v45  ;;  %v681_v48 = vadd.f32 %v633_v46, %v405_v44 }
 0x133   : > { %v635_v49 = vpop.f32.mrf.mxu0 }
 0x134   : > { %707 = vst [vmem:[#allocation2 + $0x70] sm:$0xff] %v681_v48  ;;  %v682_v51 = vadd.f32 %v635_v49, %v406_v47  ;;  %723 = sbr.rel (%p995_p11) target bundleno = 339 (0x153), region = 81 }
 0x135   : > { %v637_v52 = vpop.f32.mrf.mxu0 }
 0x136   : > { %708 = vst [vmem:[#allocation2 + $0x8] sm:$0xff] %v682_v51  ;;  %v683_v53 = vadd.f32 %v637_v52, %v407_v50 }
 0x138   : > { %709 = vst [vmem:[#allocation2 + $0x38] sm:$0xff] %v683_v53 }
 0x139   : > { %v752_v54 = vlaneseq  ;;  %v750_v56 = vld [vmem:[%s1368_s2] sm:$0x3]  ;;  %v724_v57 = vld [vmem:[#allocation2 + $0xb0] sm:$0xff]  ;;  %v727_v62 = vld [vmem:[#allocation2 + $0x48] sm:$0xff] }
 0x13a   : > { %v725_v59 = vld [vmem:[#allocation2] sm:$0xff]  ;;  %v726_v61 = vld [vmem:[#allocation2 + $0x10] sm:$0xff]  ;;  %v729_v2 = vld [vmem:[#allocation2 + $0x28] sm:$0xff] }
 0x13b   : > { %v753_v55 = vshrl.u32 %v752_v54, 7  ;;  %v728_v63 = vld [vmem:[#allocation2 + $0x60] sm:$0xff]  ;;  %v731_v4 = vld [vmem:[#allocation2 + $0x78] sm:$0xff]  ;;  %v733_v10 = vld [vmem:[#allocation2 + $0xa8] sm:$0xff] }
 0x13c   : > { %v730_v3 = vld [vmem:[#allocation2 + $0x40] sm:$0xff]  ;;  %v734_v11 = vld [vmem:[#allocation2 + $0x50] sm:$0xff]  ;;  %v736_v17 = vld [vmem:[#allocation2 + $0x88] sm:$0xff] }
 0x13d   : > { %v754_v58 = vsub.s32 0, %v753_v55  ;;  %v758_v60 = vsub.s32 1, %v753_v55  ;;  %v732_v9 = vld [vmem:[#allocation2 + $0x80] sm:$0xff]  ;;  %v735_v16 = vld [vmem:[#allocation2 + $0x30] sm:$0xff]  ;;  %v738_v23 = vld [vmem:[#allocation2 + $0x8] sm:$0xff] }
 0x13e   : > { %v737_v18 = vld [vmem:[#allocation2 + $0x70] sm:$0xff]  ;;  %v740_v33 = vld [vmem:[#allocation2 + $0x20] sm:$0xff]  ;;  %v741_v34 = vld [vmem:[#allocation2 + $0xb8] sm:$0xff] }
 0x13f   : > { %v1243_v0 = vrot.slane %v750_v56, %v754_v58  ;;  %v1245_v1 = vrot.slane %v750_v56, %v758_v60  ;;  %v739_v24 = vld [vmem:[#allocation2 + $0x38] sm:$0xff]  ;;  %v743_v40 = vld [vmem:[#allocation2 + $0xc8] sm:$0xff]  ;;  %v744_v41 = vld [vmem:[#allocation2 + $0xa0] sm:$0xff] }
 0x140   : > { %v742_v35 = vld [vmem:[#allocation2 + $0x58] sm:$0xff]  ;;  %v745_v42 = vld [vmem:[#allocation2 + $0x90] sm:$0xff] }
 0x141   : > { %v762_v5 = vadd.f32 %v1243_v0, %v724_v57  ;;  %v763_v6 = vadd.f32 %v1245_v1, %v725_v59  ;;  %v764_v7 = vadd.f32 %v1243_v0, %v726_v61  ;;  %v765_v8 = vadd.f32 %v1245_v1, %v727_v62  ;;  %v746_v47 = vld [vmem:[#allocation2 + $0x98] sm:$0xff]  ;;  %v748_v61 = vld [vmem:[#allocation2 + $0xc0] sm:$0xff]  ;;  %v749_v62 = vld [vmem:[#allocation2 + $0x68] sm:$0xff] }
 0x142   : > { %v766_v12 = vadd.f32 %v1243_v0, %v728_v63  ;;  %v767_v13 = vadd.f32 %v1245_v1, %v729_v2  ;;  %v768_v14 = vadd.f32 %v1243_v0, %v730_v3  ;;  %v769_v15 = vadd.f32 %v1245_v1, %v731_v4  ;;  %v747_v48 = vld [vmem:[#allocation2 + $0x18] sm:$0xff] }
 0x143   : > { %v788_v19 = vmax.f32 %v762_v5, 0.0  ;;  %v789_v20 = vmax.f32 %v763_v6, 0.0  ;;  %v790_v21 = vmax.f32 %v764_v7, 0.0  ;;  %v791_v22 = vmax.f32 %v765_v8, 0.0 }
 0x144   : > { %v792_v25 = vmax.f32 %v766_v12, 0.0  ;;  %v793_v26 = vmax.f32 %v767_v13, 0.0  ;;  %v794_v27 = vmax.f32 %v768_v14, 0.0  ;;  %v795_v28 = vmax.f32 %v769_v15, 0.0 }
 0x145   : > { %814 = vst [vmem:[%s1369_s3] sm:$0xff] %v788_v19  ;;  %815 = vst [vmem:[%s1369_s3 + $0x8] sm:$0xff] %v789_v20  ;;  %v770_v29 = vadd.f32 %v1243_v0, %v732_v9  ;;  %v771_v30 = vadd.f32 %v1245_v1, %v733_v10  ;;  %v772_v31 = vadd.f32 %v1243_v0, %v734_v11 }
 0x146   : > { %816 = vst [vmem:[%s1369_s3 + $0x10] sm:$0xff] %v790_v21  ;;  %817 = vst [vmem:[%s1369_s3 + $0x18] sm:$0xff] %v791_v22  ;;  %v773_v32 = vadd.f32 %v1245_v1, %v735_v16  ;;  %v774_v36 = vadd.f32 %v1243_v0, %v736_v17  ;;  %v775_v37 = vadd.f32 %v1245_v1, %v737_v18 }
 0x147   : > { %818 = vst [vmem:[%s1369_s3 + $0x20] sm:$0xff] %v792_v25  ;;  %819 = vst [vmem:[%s1369_s3 + $0x28] sm:$0xff] %v793_v26  ;;  %v776_v38 = vadd.f32 %v1243_v0, %v738_v23  ;;  %v777_v39 = vadd.f32 %v1245_v1, %v739_v24  ;;  %v796_v43 = vmax.f32 %v770_v29, 0.0  ;;  %v797_v44 = vmax.f32 %v771_v30, 0.0 }
 0x148   : > { %820 = vst [vmem:[%s1369_s3 + $0x30] sm:$0xff] %v794_v27  ;;  %821 = vst [vmem:[%s1369_s3 + $0x38] sm:$0xff] %v795_v28  ;;  %v798_v45 = vmax.f32 %v772_v31, 0.0  ;;  %v799_v46 = vmax.f32 %v773_v32, 0.0  ;;  %v800_v49 = vmax.f32 %v774_v36, 0.0  ;;  %v801_v50 = vmax.f32 %v775_v37, 0.0 }
 0x149   : > { %v802_v51 = vmax.f32 %v776_v38, 0.0  ;;  %v803_v52 = vmax.f32 %v777_v39, 0.0  ;;  %822 = vst [vmem:[%s1369_s3 + $0x40] sm:$0xff] %v796_v43  ;;  %823 = vst [vmem:[%s1369_s3 + $0x48] sm:$0xff] %v797_v44  ;;  %v778_v53 = vadd.f32 %v1243_v0, %v740_v33  ;;  %v779_v54 = vadd.f32 %v1245_v1, %v741_v34 }
 0x14a   : > { %824 = vst [vmem:[%s1369_s3 + $0x50] sm:$0xff] %v798_v45  ;;  %825 = vst [vmem:[%s1369_s3 + $0x58] sm:$0xff] %v799_v46  ;;  %v780_v55 = vadd.f32 %v1243_v0, %v742_v35  ;;  %v781_v56 = vadd.f32 %v1245_v1, %v743_v40  ;;  %v782_v57 = vadd.f32 %v1243_v0, %v744_v41 }
 0x14b   : > { %826 = vst [vmem:[%s1369_s3 + $0x60] sm:$0xff] %v800_v49  ;;  %827 = vst [vmem:[%s1369_s3 + $0x68] sm:$0xff] %v801_v50  ;;  %v783_v58 = vadd.f32 %v1245_v1, %v745_v42  ;;  %v784_v59 = vadd.f32 %v1243_v0, %v746_v47  ;;  %v785_v60 = vadd.f32 %v1245_v1, %v747_v48  ;;  %v804_v63 = vmax.f32 %v778_v53, 0.0 }
 0x14c   : > { %828 = vst [vmem:[%s1369_s3 + $0x70] sm:$0xff] %v802_v51  ;;  %829 = vst [vmem:[%s1369_s3 + $0x78] sm:$0xff] %v803_v52  ;;  %v805_v2 = vmax.f32 %v779_v54, 0.0  ;;  %v806_v3 = vmax.f32 %v780_v55, 0.0  ;;  %v807_v4 = vmax.f32 %v781_v56, 0.0  ;;  %v808_v5 = vmax.f32 %v782_v57, 0.0 }
 0x14d   : > { %v809_v6 = vmax.f32 %v783_v58, 0.0  ;;  %v810_v7 = vmax.f32 %v784_v59, 0.0  ;;  %v811_v8 = vmax.f32 %v785_v60, 0.0  ;;  %830 = vst [vmem:[%s1369_s3 + $0x80] sm:$0xff] %v804_v63  ;;  %v786_v9 = vadd.f32 %v1243_v0, %v748_v61 }
 0x14e   : > { %831 = vst [vmem:[%s1369_s3 + $0x88] sm:$0xff] %v805_v2  ;;  %832 = vst [vmem:[%s1369_s3 + $0x90] sm:$0xff] %v806_v3  ;;  %v787_v10 = vadd.f32 %v1245_v1, %v749_v62 }
 0x14f   : > { %833 = vst [vmem:[%s1369_s3 + $0x98] sm:$0xff] %v807_v4  ;;  %834 = vst [vmem:[%s1369_s3 + $0xa0] sm:$0xff] %v808_v5  ;;  %v812_v11 = vmax.f32 %v786_v9, 0.0 }
 0x150   : > { %835 = vst [vmem:[%s1369_s3 + $0xa8] sm:$0xff] %v809_v6  ;;  %836 = vst [vmem:[%s1369_s3 + $0xb0] sm:$0xff] %v810_v7  ;;  %v813_v0 = vmax.f32 %v787_v10, 0.0 }
 0x151   : > { %837 = vst [vmem:[%s1369_s3 + $0xb8] sm:$0xff] %v811_v8  ;;  %838 = vst [vmem:[%s1369_s3 + $0xc0] sm:$0xff] %v812_v11 }
 0x152   : > { %839 = vst [vmem:[%s1369_s3 + $0xc8] sm:$0xff] %v813_v0 }
 0x153 PF: > { %s13_s16 = sadd.s32 1, %s1130_s16   ;;  %s1370_s12 = smov %s1118_s13 }
 0x154   : > { %p10_p12 = scmp.ge.s32.totalorder %s13_s16, 21   ;;  %s1371_s13 = smov %s1189_s20 }
 0x155   : > { %s1372_s14 = smov %s1126_s15  ;;  %s1373_s15 = smov %s1375_s17 }
 0x156   :  { %12 = sbr.rel (!%p10_p12) target bundleno = 3 (0x3), region = 122 }

// kernel: alexnet_forward.14
= control target key start
LH: loop header
LB: loop body
LE: loop exit
PB: predicated region body
PF: predicated region fallthrough
CT: control target
= control target key end

     0   :  { %s1097_s14 = smov 127   ;;  %s1098_s2 = smov 126   ;;  %s2618_s0 = inlined_call_operand.vmem [shape: f32[104,256], index: 0, kind: input, shape index: {}]   ;;  %s2619_s1 = inlined_call_operand.vmem [shape: f32[104,256], index: 1, kind: output, shape index: {}]  }
   0x1   :  { %v12_v0 = vld [vmem:[%s2618_s0 + $0x20] sm:$0xff]  ;;  %v14_v2 = vld [vmem:[%s2618_s0 + $0x30] sm:$0xff]  ;;  %v9_v24 = vld [vmem:[%s2618_s0 + $0x8] sm:$0xff]  ;;  %s1100_s3 = smov 2  }
   0x2   :  { %v8_v1 = vld [vmem:[%s2618_s0] sm:$0xff]  ;;  %v1120_v3 = vmul.f32 %v12_v0, %v12_v0  ;;  %v10_v5 = vld [vmem:[%s2618_s0 + $0x10] sm:$0xff]  ;;  %v1131_v6 = vmul.f32 %v14_v2, %v14_v2  ;;  %v1201_v26 = vmul.f32 %v9_v24, %v9_v24  ;;  %v13_v28 = vld [vmem:[%s2618_s0 + $0x28] sm:$0xff]  ;;  %v60_v2 = vlaneseq }
   0x3   :  { %v1122_v4 = vmul.f32 %v8_v1, %v8_v1  ;;  %v1133_v7 = vmul.f32 %v10_v5, %v10_v5  ;;  %v18_v8 = vld [vmem:[%s2618_s0 + $0x50] sm:$0xff]  ;;  %v16_v9 = vld [vmem:[%s2618_s0 + $0x40] sm:$0xff]  ;;  %v11_v29 = vld [vmem:[%s2618_s0 + $0x18] sm:$0xff]  ;;  %v1215_v30 = vmul.f32 %v13_v28, %v13_v28 }
   0x4   :  { %67 = vrot.lane.b32.xlu1 %v1120_v3, %s1097_s14  ;;  %v1145_v10 = vmul.f32 %v18_v8, %v18_v8  ;;  %v1147_v11 = vmul.f32 %v16_v9, %v16_v9  ;;  %v22_v12 = vld [vmem:[%s2618_s0 + $0x70] sm:$0xff]  ;;  %v20_v13 = vld [vmem:[%s2618_s0 + $0x60] sm:$0xff]  ;;  %v1217_v31 = vmul.f32 %v11_v29, %v11_v29  ;;  %v17_v32 = vld [vmem:[%s2618_s0 + $0x48] sm:$0xff]  ;;  %v1381_v9 = vand.u32 127, %v60_v2 }
   0x5   :  { %63 = vrot.lane.b32.xlu0 %v1122_v4, %s1097_s14  ;;  %v1159_v14 = vmul.f32 %v22_v12, %v22_v12  ;;  %v1161_v15 = vmul.f32 %v20_v13, %v20_v13  ;;  %v26_v16 = vld [vmem:[%s2618_s0 + $0x90] sm:$0xff]  ;;  %v24_v17 = vld [vmem:[%s2618_s0 + $0x80] sm:$0xff]  ;;  %v15_v33 = vld [vmem:[%s2618_s0 + $0x38] sm:$0xff]  ;;  %v1229_v34 = vmul.f32 %v17_v32, %v17_v32 }
   0x6   :  { %v1173_v18 = vmul.f32 %v26_v16, %v26_v16  ;;  %v1175_v19 = vmul.f32 %v24_v17, %v24_v17  ;;  %v30_v20 = vld [vmem:[%s2618_s0 + $0xb0] sm:$0xff]  ;;  %v28_v21 = vld [vmem:[%s2618_s0 + $0xa0] sm:$0xff]  ;;  %v1231_v35 = vmul.f32 %v15_v33, %v15_v33  ;;  %v21_v36 = vld [vmem:[%s2618_s0 + $0x68] sm:$0xff]  ;;  %vm115_vm0 = vcmp.lt.s32.totalorder %v1381_v9, 127 }
   0x7   :  { %v1187_v22 = vmul.f32 %v30_v20, %v30_v20  ;;  %v1189_v23 = vmul.f32 %v28_v21, %v28_v21  ;;  %v32_v25 = vld [vmem:[%s2618_s0 + $0xc0] sm:$0xff]  ;;  %v19_v37 = vld [vmem:[%s2618_s0 + $0x58] sm:$0xff]  ;;  %v1243_v38 = vmul.f32 %v21_v36, %v21_v36  ;;  %v25_v40 = vld [vmem:[%s2618_s0 + $0x88] sm:$0xff]  ;;  %v1407_v24 = vadd.s32 128, %v1381_v9 }
   0x8   :  { %69 = vrot.lane.b32.xlu1 %v1131_v6, %s1097_s14  ;;  %v1203_v27 = vmul.f32 %v32_v25, %v32_v25  ;;  %v1245_v39 = vmul.f32 %v19_v37, %v19_v37  ;;  %v23_v41 = vld [vmem:[%s2618_s0 + $0x78] sm:$0xff]  ;;  %v1257_v42 = vmul.f32 %v25_v40, %v25_v40  ;;  %v29_v44 = vld [vmem:[%s2618_s0 + $0xa8] sm:$0xff]  ;;  %vm248_vm2 = vcmp.lt.s32.totalorder %v1381_v9, 126 }
   0x9   :  { %65 = vrot.lane.b32.xlu0 %v1133_v7, %s1097_s14  ;;  %2626 = vst [vmem:[#allocation2_spill] sm:$0xff] %v1187_v22  ;;  %v1259_v43 = vmul.f32 %v23_v41, %v23_v41  ;;  %v27_v45 = vld [vmem:[%s2618_s0 + $0x98] sm:$0xff]  ;;  %v1271_v46 = vmul.f32 %v29_v44, %v29_v44  ;;  %v33_v48 = vld [vmem:[%s2618_s0 + $0xc8] sm:$0xff]  ;;  %vm143_vm1 = vcmp.lt.s32.totalorder %v1407_v24, 255  ;;  %vm276_vm3 = vcmp.lt.s32.totalorder %v1407_v24, 254 }
   0xa   :  { %2627 = vst [vmem:[#allocation3_spill] sm:$0xff] %v1203_v27  ;;  %v1273_v47 = vmul.f32 %v27_v45, %v27_v45  ;;  %v31_v49 = vld [vmem:[%s2618_s0 + $0xb8] sm:$0xff]  ;;  %v1285_v50 = vmul.f32 %v33_v48, %v33_v48  ;;  %vm381_vm4 = vcmp.lt.s32.totalorder %v1381_v9, 1  ;;  %vm408_vm5 = vcmp.ge.s32.totalorder %v1381_v9, 1 }
   0xb   :  { %v1287_v51 = vmul.f32 %v31_v49, %v31_v49  ;;  %vm514_vm6 = vcmp.lt.s32.totalorder %v1381_v9, 2  ;;  %vm541_vm7 = vcmp.ge.s32.totalorder %v1381_v9, 2 }
   0xc   :  { %73 = vrot.lane.b32.xlu1 %v1145_v10, %s1097_s14 }
   0xd   :  { %71 = vrot.lane.b32.xlu0 %v1147_v11, %s1097_s14 }
  0x10   :  { %77 = vrot.lane.b32.xlu1 %v1159_v14, %s1097_s14 }
  0x11   :  { %75 = vrot.lane.b32.xlu0 %v1161_v15, %s1097_s14 }
  0x14   :  { %81 = vrot.lane.b32.xlu1 %v1173_v18, %s1097_s14 }
  0x15   :  { %79 = vrot.lane.b32.xlu0 %v1175_v19, %s1097_s14 }
  0x18   :  { %85 = vrot.lane.b32.xlu1 %v1187_v22, %s1097_s14 }
  0x19   :  { %83 = vrot.lane.b32.xlu0 %v1189_v23, %s1097_s14 }
  0x1c   :  { %89 = vrot.lane.b32.xlu1 %v1201_v26, %s1097_s14 }
  0x1d   :  { %87 = vrot.lane.b32.xlu0 %v1203_v27, %s1097_s14 }
  0x20   :  { %93 = vrot.lane.b32.xlu1 %v1215_v30, %s1097_s14 }
  0x21   :  { %91 = vrot.lane.b32.xlu0 %v1217_v31, %s1097_s14 }
  0x24   :  { %97 = vrot.lane.b32.xlu1 %v1229_v34, %s1097_s14 }
  0x25   :  { %95 = vrot.lane.b32.xlu0 %v1231_v35, %s1097_s14 }
  0x28   :  { %101 = vrot.lane.b32.xlu1 %v1243_v38, %s1097_s14 }
  0x29   :  { %99 = vrot.lane.b32.xlu0 %v1245_v39, %s1097_s14 }
  0x2c   :  { %105 = vrot.lane.b32.xlu1 %v1257_v42, %s1097_s14 }
  0x2d   :  { %103 = vrot.lane.b32.xlu0 %v1259_v43, %s1097_s14 }
  0x30   :  { %109 = vrot.lane.b32.xlu1 %v1271_v46, %s1097_s14 }
  0x31   :  { %107 = vrot.lane.b32.xlu0 %v1273_v47, %s1097_s14 }
  0x34   :  { %113 = vrot.lane.b32.xlu1 %v1285_v50, %s1097_s14 }
  0x35   :  { %111 = vrot.lane.b32.xlu0 %v1287_v51, %s1097_s14  ;;  %s1099_s14 = smov 1  }
  0x38   :  { %198 = vrot.lane.b32.xlu1 %v1133_v7, %s1098_s2 }
  0x39   :  { %196 = vrot.lane.b32.xlu0 %v1122_v4, %s1098_s2 }
  0x3c   :  { %202 = vrot.lane.b32.xlu1 %v1131_v6, %s1098_s2 }
  0x3d   :  { %200 = vrot.lane.b32.xlu0 %v1120_v3, %s1098_s2 }
  0x40   :  { %206 = vrot.lane.b32.xlu1 %v1145_v10, %s1098_s2 }
  0x41   :  { %204 = vrot.lane.b32.xlu0 %v1147_v11, %s1098_s2 }
  0x44   :  { %210 = vrot.lane.b32.xlu1 %v1159_v14, %s1098_s2 }
  0x45   :  { %208 = vrot.lane.b32.xlu0 %v1161_v15, %s1098_s2 }
  0x48   :  { %214 = vrot.lane.b32.xlu1 %v1173_v18, %s1098_s2 }
  0x49   :  { %212 = vrot.lane.b32.xlu0 %v1175_v19, %s1098_s2 }
  0x4c   :  { %218 = vrot.lane.b32.xlu1 %v1187_v22, %s1098_s2 }
  0x4d   :  { %216 = vrot.lane.b32.xlu0 %v1189_v23, %s1098_s2 }
  0x50   :  { %222 = vrot.lane.b32.xlu1 %v1201_v26, %s1098_s2 }
  0x51   :  { %220 = vrot.lane.b32.xlu0 %v1203_v27, %s1098_s2 }
  0x54   :  { %226 = vrot.lane.b32.xlu1 %v1215_v30, %s1098_s2 }
  0x55   :  { %224 = vrot.lane.b32.xlu0 %v1217_v31, %s1098_s2 }
  0x58   :  { %230 = vrot.lane.b32.xlu1 %v1229_v34, %s1098_s2 }
  0x59   :  { %228 = vrot.lane.b32.xlu0 %v1231_v35, %s1098_s2 }
  0x5c   :  { %234 = vrot.lane.b32.xlu1 %v1243_v38, %s1098_s2 }
  0x5d   :  { %232 = vrot.lane.b32.xlu0 %v1245_v39, %s1098_s2 }
  0x60   :  { %238 = vrot.lane.b32.xlu1 %v1257_v42, %s1098_s2 }
  0x61   :  { %236 = vrot.lane.b32.xlu0 %v1259_v43, %s1098_s2 }
  0x64   :  { %242 = vrot.lane.b32.xlu1 %v1271_v46, %s1098_s2 }
  0x65   :  { %240 = vrot.lane.b32.xlu0 %v1273_v47, %s1098_s2 }
  0x68   :  { %246 = vrot.lane.b32.xlu1 %v1285_v50, %s1098_s2 }
  0x69   :  { %244 = vrot.lane.b32.xlu0 %v1287_v51, %s1098_s2 }
  0x6c   :  { %331 = vrot.lane.b32.xlu1 %v1133_v7, %s1099_s14 }
  0x6d   :  { %329 = vrot.lane.b32.xlu0 %v1122_v4, %s1099_s14 }
  0x70   :  { %335 = vrot.lane.b32.xlu1 %v1131_v6, %s1099_s14 }
  0x71   :  { %333 = vrot.lane.b32.xlu0 %v1120_v3, %s1099_s14 }
  0x74   :  { %339 = vrot.lane.b32.xlu1 %v1145_v10, %s1099_s14 }
  0x75   :  { %337 = vrot.lane.b32.xlu0 %v1147_v11, %s1099_s14 }
  0x76   :  { %v1331_v52 = vpop.permute.xlu1 %67 }
  0x77   :  { %v1333_v53 = vpop.permute.xlu0 %63 }
  0x78   :  { %343 = vrot.lane.b32.xlu1 %v1159_v14, %s1099_s14 }
  0x79   :  { %341 = vrot.lane.b32.xlu0 %v1161_v15, %s1099_s14 }
  0x7a   :  { %v1339_v54 = vpop.permute.xlu1 %69 }
  0x7b   :  { %v1341_v55 = vpop.permute.xlu0 %65 }
  0x7c   :  { %347 = vrot.lane.b32.xlu1 %v1173_v18, %s1099_s14 }
  0x7d   :  { %345 = vrot.lane.b32.xlu0 %v1175_v19, %s1099_s14 }
  0x7e   :  { %v1347_v56 = vpop.permute.xlu1 %73 }
  0x7f   :  { %v1349_v57 = vpop.permute.xlu0 %71 }
  0x80   :  { %351 = vrot.lane.b32.xlu1 %v1187_v22, %s1099_s14 }
  0x81   :  { %349 = vrot.lane.b32.xlu0 %v1189_v23, %s1099_s14 }
  0x82   :  { %v78_v58 = vpop.permute.xlu1 %77 }
  0x83   :  { %v76_v59 = vpop.permute.xlu0 %75 }
  0x84   :  { %355 = vrot.lane.b32.xlu1 %v1201_v26, %s1099_s14 }
  0x85   :  { %353 = vrot.lane.b32.xlu0 %v1203_v27, %s1099_s14 }
  0x86   :  { %v82_v60 = vpop.permute.xlu1 %81 }
  0x87   :  { %v80_v61 = vpop.permute.xlu0 %79 }
  0x88   :  { %359 = vrot.lane.b32.xlu1 %v1215_v30, %s1099_s14 }
  0x89   :  { %357 = vrot.lane.b32.xlu0 %v1217_v31, %s1099_s14 }
  0x8a   :  { %v86_v62 = vpop.permute.xlu1 %85 }
  0x8b   :  { %v84_v63 = vpop.permute.xlu0 %83 }
  0x8c   :  { %363 = vrot.lane.b32.xlu1 %v1229_v34, %s1099_s14 }
  0x8d   :  { %361 = vrot.lane.b32.xlu0 %v1231_v35, %s1099_s14 }
  0x8e   :  { %v1367_v0 = vpop.permute.xlu1 %89 }
  0x8f   :  { %v88_v1 = vpop.permute.xlu0 %87 }
  0x90   :  { %367 = vrot.lane.b32.xlu1 %v1243_v38, %s1099_s14 }
  0x91   :  { %365 = vrot.lane.b32.xlu0 %v1245_v39, %s1099_s14 }
  0x92   :  { %v1373_v5 = vpop.permute.xlu1 %93 }
  0x93   :  { %v1375_v8 = vpop.permute.xlu0 %91 }
  0x94   :  { %371 = vrot.lane.b32.xlu1 %v1257_v42, %s1099_s14 }
  0x95   :  { %369 = vrot.lane.b32.xlu0 %v1259_v43, %s1099_s14 }
  0x96   :  { %v1383_v12 = vpop.permute.xlu1 %97 }
  0x97   :  { %v1385_v13 = vpop.permute.xlu0 %95 }
  0x98   :  { %375 = vrot.lane.b32.xlu1 %v1271_v46, %s1099_s14 }
  0x99   :  { %373 = vrot.lane.b32.xlu0 %v1273_v47, %s1099_s14 }
  0x9a   :  { %v102_v16 = vpop.permute.xlu1 %101 }
  0x9b   :  { %v1392_v17 = vpop.permute.xlu0 %99  ;;  %v1396_v20 = vsel %vm115_vm0, %v76_v59, %v102_v16  ;;  %v1400_v21 = vsel %vm115_vm0, %v102_v16, %v76_v59 }
  0x9c   :  { %379 = vrot.lane.b32.xlu1 %v1285_v50, %s1099_s14 }
  0x9d   :  { %377 = vrot.lane.b32.xlu0 %v1287_v51, %s1099_s14 }
  0x9e   :  { %v106_v25 = vpop.permute.xlu1 %105 }
  0x9f   :  { %v104_v28 = vpop.permute.xlu0 %103  ;;  %v1411_v29 = vsel %vm115_vm0, %v80_v61, %v106_v25  ;;  %v1415_v32 = vsel %vm115_vm0, %v106_v25, %v80_v61 }
  0xa0   :  { %v1419_v33 = vsel %vm115_vm0, %v78_v58, %v104_v28  ;;  %v1423_v36 = vsel %vm115_vm0, %v104_v28, %v78_v58  ;;  %464 = vrot.lane.b32.xlu1 %v1133_v7, %s1100_s3 }
  0xa1   :  { %462 = vrot.lane.b32.xlu0 %v1122_v4, %s1100_s3 }
  0xa2   :  { %v110_v37 = vpop.permute.xlu1 %109 }
  0xa3   :  { %v108_v40 = vpop.permute.xlu0 %107  ;;  %v1432_v41 = vsel %vm115_vm0, %v84_v63, %v110_v37  ;;  %v1436_v44 = vsel %vm115_vm0, %v110_v37, %v84_v63 }
  0xa4   :  { %v1440_v45 = vsel %vm115_vm0, %v82_v60, %v108_v40  ;;  %v138_v48 = vsel %vm115_vm0, %v108_v40, %v82_v60  ;;  %468 = vrot.lane.b32.xlu1 %v1131_v6, %s1100_s3 }
  0xa5   :  { %v1446_v49 = vsel %vm143_vm1, %v138_v48, 0.0  ;;  %466 = vrot.lane.b32.xlu0 %v1120_v3, %s1100_s3 }
  0xa6   :  { %2628 = vst [vmem:[#allocation4_spill] sm:$0xff] %v1446_v49  ;;  %v114_v58 = vpop.permute.xlu1 %113 }
  0xa7   :  { %v112_v59 = vpop.permute.xlu0 %111  ;;  %v1454_v61 = vsel %vm115_vm0, %v88_v1, %v114_v58  ;;  %v141_v63 = vsel %vm115_vm0, %v114_v58, %v88_v1 }
  0xa8   :  { %2629 = vst [vmem:[#allocation5_spill] sm:$0xff] %v1454_v61  ;;  %v1460_v60 = vsel %vm115_vm0, %v86_v62, %v112_v59  ;;  %v140_v2 = vsel %vm115_vm0, %v112_v59, %v86_v62  ;;  %v1466_v16 = vsel %vm143_vm1, %v141_v63, 0.0  ;;  %472 = vrot.lane.b32.xlu1 %v1145_v10, %s1100_s3 }
  0xa9   :  { %2630 = vst [vmem:[#allocation6_spill] sm:$0xff] %v1460_v60  ;;  %2631 = vst [vmem:[#allocation7_spill] sm:$0xff] %v1466_v16  ;;  %v1470_v25 = vsel %vm143_vm1, %v140_v2, 0.0  ;;  %470 = vrot.lane.b32.xlu0 %v1147_v11, %s1100_s3  ;;  %v116_v60 = vsel %vm115_vm0, %v1333_v53, %v1367_v0 }
  0xaa   :  { %2632 = vst [vmem:[#allocation8_spill] sm:$0xff] %v1470_v25  ;;  %v1476_v1 = vpop.permute.xlu1 %198  ;;  %v129_v25 = vsel %vm115_vm0, %v1367_v0, %v1333_v53  ;;  %v170_v53 = vadd.f32 %v116_v60, %v1122_v4  ;;  %v118_v0 = vsel %vm115_vm0, %v1331_v52, %v1373_v5 }
  0xab   :  { %v197_v28 = vpop.permute.xlu0 %196  ;;  %v145_v61 = vsel %vm143_vm1, %v129_v25, 0.0  ;;  %v117_v25 = vsel %vm115_vm0, %v1341_v55, %v1375_v8 }
  0xac   :  { %476 = vrot.lane.b32.xlu1 %v1159_v14, %s1100_s3 }
  0xad   :  { %474 = vrot.lane.b32.xlu0 %v1161_v15, %s1100_s3 }
  0xae   :  { %v1482_v62 = vpop.permute.xlu1 %202 }
  0xaf   :  { %v201_v37 = vpop.permute.xlu0 %200 }
  0xb0   :  { %480 = vrot.lane.b32.xlu1 %v1173_v18, %s1100_s3 }
  0xb1   :  { %478 = vrot.lane.b32.xlu0 %v1175_v19, %s1100_s3 }
  0xb2   :  { %v1488_v40 = vpop.permute.xlu1 %206 }
  0xb3   :  { %v1490_v48 = vpop.permute.xlu0 %204 }
  0xb4   :  { %484 = vrot.lane.b32.xlu1 %v1187_v22, %s1100_s3 }
  0xb5   :  { %482 = vrot.lane.b32.xlu0 %v1189_v23, %s1100_s3 }
  0xb6   :  { %v1496_v58 = vpop.permute.xlu1 %210 }
  0xb7   :  { %v1498_v59 = vpop.permute.xlu0 %208 }
  0xb8   :  { %488 = vrot.lane.b32.xlu1 %v1201_v26, %s1100_s3 }
  0xb9   :  { %486 = vrot.lane.b32.xlu0 %v1203_v27, %s1100_s3  ;;  %v131_v27 = vsel %vm115_vm0, %v1373_v5, %v1331_v52  ;;  %v120_v52 = vsel %vm115_vm0, %v1349_v57, %v1383_v12 }
  0xba   :  { %v1504_v63 = vpop.permute.xlu1 %214 }
  0xbb   :  { %2633 = vst [vmem:[#allocation9_spill] sm:$0xff] %v1504_v63  ;;  %v1506_v2 = vpop.permute.xlu0 %212  ;;  %v130_v63 = vsel %vm115_vm0, %v1375_v8, %v1341_v55  ;;  %v133_v55 = vsel %vm115_vm0, %v1383_v12, %v1349_v57 }
  0xbc   :  { %492 = vrot.lane.b32.xlu1 %v1215_v30, %s1100_s3  ;;  %v147_v4 = vsel %vm143_vm1, %v130_v63, 0.0  ;;  %v172_v63 = vadd.f32 %v117_v25, %v1133_v7 }
  0xbd   :  { %490 = vrot.lane.b32.xlu0 %v1217_v31, %s1100_s3  ;;  %v173_v12 = vadd.f32 %v147_v4, %v1217_v31 }
  0xbe   :  { %v1520_v22 = vpop.permute.xlu1 %218 }
  0xbf   :  { %2634 = vst [vmem:[#allocation10_spill] sm:$0xff] %v1520_v22  ;;  %v1522_v16 = vpop.permute.xlu0 %216  ;;  %v171_v22 = vadd.f32 %v145_v61, %v1201_v26  ;;  %v132_v26 = vsel %vm115_vm0, %v1385_v13, %v1339_v54  ;;  %v174_v61 = vadd.f32 %v118_v0, %v1120_v3  ;;  %v119_v3 = vsel %vm115_vm0, %v1339_v54, %v1385_v13 }
  0xc0   :  { %2635 = vst [vmem:[#allocation11_spill] sm:$0xff] %v1522_v16  ;;  %496 = vrot.lane.b32.xlu1 %v1229_v34, %s1100_s3  ;;  %v149_v16 = vsel %vm143_vm1, %v131_v27, 0.0  ;;  %v151_v0 = vsel %vm143_vm1, %v132_v26, 0.0 }
  0xc1   :  { %494 = vrot.lane.b32.xlu0 %v1231_v35, %s1100_s3  ;;  %v175_v57 = vadd.f32 %v149_v16, %v1215_v30  ;;  %v134_v30 = vsel %vm115_vm0, %v1392_v17, %v1347_v56  ;;  %v177_v26 = vadd.f32 %v151_v0, %v1231_v35 }
  0xc2   :  { %v223_v5 = vpop.permute.xlu1 %222 }
  0xc3   :  { %v1558_v60 = vpop.permute.xlu0 %220  ;;  %v249_v27 = vsel %vm248_vm2, %v197_v28, %v223_v5  ;;  %v262_v8 = vsel %vm248_vm2, %v223_v5, %v197_v28  ;;  %v153_v28 = vsel %vm143_vm1, %v133_v55, 0.0 }
  0xc4   :  { %2636 = vst [vmem:[#allocation12_spill] sm:$0xff] %v1558_v60  ;;  %v278_v60 = vsel %vm276_vm3, %v262_v8, 0.0  ;;  %v1576_v49 = vadd.f32 %v249_v27, %v170_v53  ;;  %500 = vrot.lane.b32.xlu1 %v1243_v38, %s1100_s3  ;;  %v178_v53 = vadd.f32 %v120_v52, %v1147_v11  ;;  %v157_v27 = vsel %vm143_vm1, %v1400_v21, 0.0 }
  0xc5   :  { %498 = vrot.lane.b32.xlu0 %v1245_v39, %s1100_s3  ;;  %v1588_v7 = vadd.f32 %v278_v60, %v171_v22  ;;  %v121_v8 = vsel %vm115_vm0, %v1347_v56, %v1392_v17  ;;  %v183_v0 = vadd.f32 %v157_v27, %v1243_v38 }
  0xc6   :  { %v227_v31 = vpop.permute.xlu1 %226 }
  0xc7   :  { %v225_v16 = vpop.permute.xlu0 %224  ;;  %v251_v54 = vsel %vm248_vm2, %v201_v37, %v227_v31  ;;  %v264_v22 = vsel %vm248_vm2, %v227_v31, %v201_v37  ;;  %v179_v37 = vadd.f32 %v153_v28, %v1229_v34  ;;  %v155_v34 = vsel %vm143_vm1, %v134_v30, 0.0 }
  0xc8   :  { %v250_v11 = vsel %vm248_vm2, %v1476_v1, %v225_v16  ;;  %v263_v13 = vsel %vm248_vm2, %v225_v16, %v1476_v1  ;;  %v282_v25 = vsel %vm276_vm3, %v264_v22, 0.0  ;;  %v1611_v4 = vadd.f32 %v251_v54, %v174_v61  ;;  %504 = vrot.lane.b32.xlu1 %v1257_v42, %s1100_s3 }
  0xc9   :  { %v280_v52 = vsel %vm276_vm3, %v263_v13, 0.0  ;;  %v1615_v5 = vadd.f32 %v250_v11, %v172_v63  ;;  %502 = vrot.lane.b32.xlu0 %v1259_v43, %s1100_s3  ;;  %v176_v1 = vadd.f32 %v119_v3, %v1131_v6  ;;  %v1623_v60 = vadd.f32 %v282_v25, %v175_v57 }
  0xca   :  { %v1625_v55 = vadd.f32 %v280_v52, %v173_v12  ;;  %v231_v61 = vpop.permute.xlu1 %230  ;;  %v181_v30 = vadd.f32 %v155_v34, %v1245_v39  ;;  %v161_v31 = vsel %vm143_vm1, %v1415_v32, 0.0  ;;  %v159_v16 = vsel %vm143_vm1, %v1423_v36, 0.0 }
  0xcb   :  { %v229_v6 = vpop.permute.xlu0 %228  ;;  %v253_v63 = vsel %vm248_vm2, %v1490_v48, %v231_v61  ;;  %v266_v35 = vsel %vm248_vm2, %v231_v61, %v1490_v48  ;;  %v182_v48 = vadd.f32 %v1396_v20, %v1161_v15  ;;  %v187_v25 = vadd.f32 %v161_v31, %v1257_v42  ;;  %v2640_v31 = vld [vmem:[#allocation3_spill] sm:$0xff] }
  0xcc   :  { %v252_v21 = vsel %vm248_vm2, %v1482_v62, %v229_v6  ;;  %v265_v56 = vsel %vm248_vm2, %v229_v6, %v1482_v62  ;;  %v286_v17 = vsel %vm276_vm3, %v266_v35, 0.0  ;;  %v1651_v57 = vadd.f32 %v253_v63, %v178_v53  ;;  %508 = vrot.lane.b32.xlu1 %v1271_v46, %s1100_s3  ;;  %v2637_v63 = vld [vmem:[#allocation4_spill] sm:$0xff] }
  0xcd   :  { %v284_v12 = vsel %vm276_vm3, %v265_v56, 0.0  ;;  %v1655_v3 = vadd.f32 %v252_v21, %v176_v1  ;;  %506 = vrot.lane.b32.xlu0 %v1273_v47, %s1100_s3  ;;  %v180_v62 = vadd.f32 %v121_v8, %v1145_v10  ;;  %v1664_v28 = vadd.f32 %v286_v17, %v179_v37  ;;  %v2638_v17 = vld [vmem:[#allocation11_spill] sm:$0xff] }
  0xce   :  { %v1666_v53 = vadd.f32 %v284_v12, %v177_v26  ;;  %v235_v54 = vpop.permute.xlu1 %234  ;;  %v184_v52 = vadd.f32 %v1419_v33, %v1159_v14  ;;  %v185_v37 = vadd.f32 %v159_v16, %v1259_v43  ;;  %v165_v1 = vsel %vm143_vm1, %v1436_v44, 0.0  ;;  %v2641_v16 = vld [vmem:[#allocation5_spill] sm:$0xff] }
  0xcf   :  { %v233_v15 = vpop.permute.xlu0 %232  ;;  %v255_v10 = vsel %vm248_vm2, %v1498_v59, %v235_v54  ;;  %v268_v38 = vsel %vm248_vm2, %v235_v54, %v1498_v59  ;;  %v186_v59 = vadd.f32 %v1411_v29, %v1175_v19  ;;  %v190_v61 = vadd.f32 %v1432_v41, %v1189_v23 }
  0xd0   :  { %v254_v39 = vsel %vm248_vm2, %v1488_v40, %v233_v15  ;;  %v267_v20 = vsel %vm248_vm2, %v233_v15, %v1488_v40  ;;  %v290_v32 = vsel %vm276_vm3, %v268_v38, 0.0  ;;  %v1690_v36 = vadd.f32 %v255_v10, %v182_v48  ;;  %512 = vrot.lane.b32.xlu1 %v1285_v50, %s1100_s3  ;;  %v2642_v15 = vld [vmem:[#allocation7_spill] sm:$0xff]  ;;  %v2643_v38 = vld [vmem:[#allocation2_spill] sm:$0xff] }
  0xd1   :  { %v288_v22 = vsel %vm276_vm3, %v267_v20, 0.0  ;;  %v1694_v11 = vadd.f32 %v254_v39, %v180_v62  ;;  %510 = vrot.lane.b32.xlu0 %v1287_v51, %s1100_s3  ;;  %v1702_v40 = vadd.f32 %v290_v32, %v183_v0  ;;  %v191_v6 = vadd.f32 %v165_v1, %v1271_v46  ;;  %v2639_v62 = vld [vmem:[#allocation9_spill] sm:$0xff]  ;;  %v2644_v39 = vld [vmem:[#allocation6_spill] sm:$0xff]  ;;  %v2645_v32 = vld [vmem:[#allocation8_spill] sm:$0xff] }
  0xd2   :  { %v1704_v13 = vadd.f32 %v288_v22, %v181_v30  ;;  %v239_v26 = vpop.permute.xlu1 %238  ;;  %v189_v35 = vadd.f32 %v2637_v63, %v1273_v47  ;;  %v194_v54 = vadd.f32 %v2641_v16, %v2640_v31  ;;  %v195_v10 = vadd.f32 %v2642_v15, %v1285_v50 }
  0xd3   :  { %v237_v27 = vpop.permute.xlu0 %236  ;;  %v257_v19 = vsel %vm248_vm2, %v1506_v2, %v239_v26  ;;  %v270_v29 = vsel %vm248_vm2, %v239_v26, %v1506_v2  ;;  %v192_v20 = vadd.f32 %v2644_v39, %v2643_v38  ;;  %v193_v22 = vadd.f32 %v2645_v32, %v1287_v51  ;;  %v2647_v26 = vld [vmem:[#allocation10_spill] sm:$0xff] }
  0xd4   :  { %v256_v14 = vsel %vm248_vm2, %v1496_v58, %v237_v27  ;;  %v269_v42 = vsel %vm248_vm2, %v237_v27, %v1496_v58  ;;  %v294_v43 = vsel %vm276_vm3, %v270_v29, 0.0  ;;  %v1727_v33 = vadd.f32 %v257_v19, %v186_v59 }
  0xd5   :  { %v292_v44 = vsel %vm276_vm3, %v269_v42, 0.0  ;;  %v1731_v8 = vadd.f32 %v256_v14, %v184_v52  ;;  %v1733_v34 = vadd.f32 %v294_v43, %v187_v25  ;;  %v188_v58 = vadd.f32 %v1440_v45, %v1173_v18  ;;  %v2646_v52 = vld [vmem:[#allocation12_spill] sm:$0xff] }
  0xd6   :  { %v1735_v2 = vadd.f32 %v292_v44, %v185_v37  ;;  %v243_v21 = vpop.permute.xlu1 %242 }
  0xd7   :  { %v241_v56 = vpop.permute.xlu0 %240  ;;  %v259_v12 = vsel %vm248_vm2, %v2638_v17, %v243_v21  ;;  %v272_v48 = vsel %vm248_vm2, %v243_v21, %v2638_v17 }
  0xd8   :  { %v258_v23 = vsel %vm248_vm2, %v2639_v62, %v241_v56  ;;  %v271_v18 = vsel %vm248_vm2, %v241_v56, %v2639_v62  ;;  %v298_v46 = vsel %vm276_vm3, %v272_v48, 0.0  ;;  %v1758_v47 = vadd.f32 %v259_v12, %v190_v61 }
  0xd9   :  { %v296_v41 = vsel %vm276_vm3, %v271_v18, 0.0  ;;  %v1762_v45 = vadd.f32 %v258_v23, %v188_v58  ;;  %v1764_v0 = vadd.f32 %v298_v46, %v191_v6 }
  0xda   :  { %v1766_v30 = vadd.f32 %v296_v41, %v189_v35  ;;  %v247_v59 = vpop.permute.xlu1 %246 }
  0xdb   :  { %v245_v25 = vpop.permute.xlu0 %244  ;;  %v261_v37 = vsel %vm248_vm2, %v2646_v52, %v247_v59  ;;  %v274_v1 = vsel %vm248_vm2, %v247_v59, %v2646_v52 }
  0xdc   :  { %v260_v50 = vsel %vm248_vm2, %v2647_v26, %v245_v25  ;;  %v273_v27 = vsel %vm248_vm2, %v245_v25, %v2647_v26  ;;  %v302_v51 = vsel %vm276_vm3, %v274_v1, 0.0  ;;  %v1790_v19 = vadd.f32 %v261_v37, %v194_v54 }
  0xdd   :  { %v300_v29 = vsel %vm276_vm3, %v273_v27, 0.0  ;;  %v1794_v14 = vadd.f32 %v260_v50, %v192_v20  ;;  %v1796_v42 = vadd.f32 %v302_v51, %v195_v10 }
  0xde   :  { %v1798_v43 = vadd.f32 %v300_v29, %v193_v22  ;;  %v332_v44 = vpop.permute.xlu1 %331 }
  0xdf   :  { %v330_v61 = vpop.permute.xlu0 %329 }
  0xe2   :  { %v336_v6 = vpop.permute.xlu1 %335 }
  0xe3   :  { %v334_v58 = vpop.permute.xlu0 %333 }
  0xe6   :  { %v340_v63 = vpop.permute.xlu1 %339 }
  0xe7   :  { %v338_v35 = vpop.permute.xlu0 %337 }
  0xea   :  { %v344_v21 = vpop.permute.xlu1 %343 }
  0xeb   :  { %v342_v56 = vpop.permute.xlu0 %341 }
  0xee   :  { %v1800_v17 = vpop.permute.xlu1 %347 }
  0xef   :  { %v346_v12 = vpop.permute.xlu0 %345 }
  0xf2   :  { %v1802_v48 = vpop.permute.xlu1 %351 }
  0xf3   :  { %v350_v24 = vpop.permute.xlu0 %349 }
  0xf6   :  { %v356_v62 = vpop.permute.xlu1 %355 }
  0xf7   :  { %v1806_v23 = vpop.permute.xlu0 %353  ;;  %v382_v18 = vsel %vm381_vm4, %v330_v61, %v356_v62  ;;  %v395_v46 = vsel %vm381_vm4, %v356_v62, %v330_v61 }
  0xf8   :  { %v410_v41 = vsel %vm408_vm5, %v395_v46, 0.0  ;;  %v1815_v31 = vadd.f32 %v382_v18, %v1588_v7 }
  0xf9   :  { %v1818_v16 = vadd.f32 %v410_v41, %v1576_v49 }
  0xfa   :  { %v360_v54 = vpop.permute.xlu1 %359 }
  0xfb   :  { %v358_v15 = vpop.permute.xlu0 %357  ;;  %v384_v10 = vsel %vm381_vm4, %v334_v58, %v360_v54  ;;  %v397_v38 = vsel %vm381_vm4, %v360_v54, %v334_v58 }
  0xfc   :  { %v383_v39 = vsel %vm381_vm4, %v332_v44, %v358_v15  ;;  %v396_v20 = vsel %vm381_vm4, %v358_v15, %v332_v44  ;;  %v414_v7 = vsel %vm408_vm5, %v397_v38, 0.0  ;;  %v1831_v49 = vadd.f32 %v384_v10, %v1623_v60 }
  0xfd   :  { %v412_v32 = vsel %vm408_vm5, %v396_v20, 0.0  ;;  %v1836_v22 = vadd.f32 %v383_v39, %v1625_v55  ;;  %v1839_v59 = vadd.f32 %v414_v7, %v1611_v4 }
  0xfe   :  { %v1842_v25 = vadd.f32 %v412_v32, %v1615_v5  ;;  %v364_v52 = vpop.permute.xlu1 %363 }
  0xff   :  { %v362_v37 = vpop.permute.xlu0 %361  ;;  %v386_v1 = vsel %vm381_vm4, %v338_v35, %v364_v52  ;;  %v399_v60 = vsel %vm381_vm4, %v364_v52, %v338_v35 }
 0x100   :  { %v385_v26 = vsel %vm381_vm4, %v336_v6, %v362_v37  ;;  %v398_v55 = vsel %vm381_vm4, %v362_v37, %v336_v6  ;;  %v418_v4 = vsel %vm408_vm5, %v399_v60, 0.0  ;;  %v1855_v5 = vadd.f32 %v386_v1, %v1664_v28 }
 0x101   :  { %v416_v50 = vsel %vm408_vm5, %v398_v55, 0.0  ;;  %v1860_v27 = vadd.f32 %v385_v26, %v1666_v53  ;;  %v1863_v51 = vadd.f32 %v418_v4, %v1651_v57 }
 0x102   :  { %v1866_v29 = vadd.f32 %v416_v50, %v1655_v3  ;;  %v368_v44 = vpop.permute.xlu1 %367 }
 0x103   :  { %v366_v61 = vpop.permute.xlu0 %365  ;;  %v388_v6 = vsel %vm381_vm4, %v342_v56, %v368_v44  ;;  %v401_v28 = vsel %vm381_vm4, %v368_v44, %v342_v56 }
 0x104   :  { %v387_v58 = vsel %vm381_vm4, %v340_v63, %v366_v61  ;;  %v400_v53 = vsel %vm381_vm4, %v366_v61, %v340_v63  ;;  %v422_v57 = vsel %vm408_vm5, %v401_v28, 0.0  ;;  %v1879_v3 = vadd.f32 %v388_v6, %v1702_v40 }
 0x105   :  { %v420_v35 = vsel %vm408_vm5, %v400_v53, 0.0  ;;  %v1884_v62 = vadd.f32 %v387_v58, %v1704_v13  ;;  %v1887_v56 = vadd.f32 %v422_v57, %v1690_v36 }
 0x106   :  { %v1890_v18 = vadd.f32 %v420_v35, %v1694_v11  ;;  %v372_v46 = vpop.permute.xlu1 %371 }
 0x107   :  { %v370_v63 = vpop.permute.xlu0 %369  ;;  %v390_v41 = vsel %vm381_vm4, %v346_v12, %v372_v46  ;;  %v403_v40 = vsel %vm381_vm4, %v372_v46, %v346_v12 }
 0x108   :  { %v389_v54 = vsel %vm381_vm4, %v344_v21, %v370_v63  ;;  %v402_v13 = vsel %vm381_vm4, %v370_v63, %v344_v21  ;;  %v426_v36 = vsel %vm408_vm5, %v403_v40, 0.0  ;;  %v1903_v11 = vadd.f32 %v390_v41, %v1733_v34 }
 0x109   :  { %v424_v15 = vsel %vm408_vm5, %v402_v13, 0.0  ;;  %v1908_v10 = vadd.f32 %v389_v54, %v1735_v2  ;;  %v1911_v12 = vadd.f32 %v426_v36, %v1727_v33 }
 0x10a   :  { %v1914_v38 = vadd.f32 %v424_v15, %v1731_v8  ;;  %v376_v39 = vpop.permute.xlu1 %375 }
 0x10b   :  { %v374_v21 = vpop.permute.xlu0 %373  ;;  %v392_v20 = vsel %vm381_vm4, %v350_v24, %v376_v39  ;;  %v405_v34 = vsel %vm381_vm4, %v376_v39, %v350_v24 }
 0x10c   :  { %v391_v7 = vsel %vm381_vm4, %v1800_v17, %v374_v21  ;;  %v404_v33 = vsel %vm381_vm4, %v374_v21, %v1800_v17  ;;  %v430_v8 = vsel %vm408_vm5, %v405_v34, 0.0  ;;  %v1929_v2 = vadd.f32 %v392_v20, %v1764_v0 }
 0x10d   :  { %v428_v32 = vsel %vm408_vm5, %v404_v33, 0.0  ;;  %v1934_v52 = vadd.f32 %v391_v7, %v1766_v30  ;;  %v1937_v24 = vadd.f32 %v430_v8, %v1758_v47 }
 0x10e   :  { %v1940_v37 = vadd.f32 %v428_v32, %v1762_v45  ;;  %v380_v1 = vpop.permute.xlu1 %379 }
 0x10f   :  { %v378_v17 = vpop.permute.xlu0 %377  ;;  %v394_v60 = vsel %vm381_vm4, %v1806_v23, %v380_v1  ;;  %v407_v0 = vsel %vm381_vm4, %v380_v1, %v1806_v23 }
 0x110   :  { %v393_v30 = vsel %vm381_vm4, %v1802_v48, %v378_v17  ;;  %v406_v47 = vsel %vm381_vm4, %v378_v17, %v1802_v48  ;;  %v434_v45 = vsel %vm408_vm5, %v407_v0, 0.0  ;;  %v1957_v26 = vadd.f32 %v394_v60, %v1796_v42 }
 0x111   :  { %v432_v55 = vsel %vm408_vm5, %v406_v47, 0.0  ;;  %v1962_v4 = vadd.f32 %v393_v30, %v1798_v43  ;;  %v1965_v23 = vadd.f32 %v434_v45, %v1790_v19 }
 0x112   :  { %v1968_v50 = vadd.f32 %v432_v55, %v1794_v14  ;;  %v465_v44 = vpop.permute.xlu1 %464 }
 0x113   :  { %v463_v48 = vpop.permute.xlu0 %462 }
 0x116   :  { %v469_v61 = vpop.permute.xlu1 %468 }
 0x117   :  { %v467_v6 = vpop.permute.xlu0 %466 }
 0x11a   :  { %v1970_v28 = vpop.permute.xlu1 %472 }
 0x11b   :  { %v471_v42 = vpop.permute.xlu0 %470 }
 0x11e   :  { %v1972_v58 = vpop.permute.xlu1 %476 }
 0x11f   :  { %v1974_v53 = vpop.permute.xlu0 %474 }
 0x122   :  { %v1976_v57 = vpop.permute.xlu1 %480 }
 0x123   :  { %v1978_v43 = vpop.permute.xlu0 %478 }
 0x126   :  { %v1980_v19 = vpop.permute.xlu1 %484 }
 0x127   :  { %v1982_v35 = vpop.permute.xlu0 %482 }
 0x12a   :  { %v489_v14 = vpop.permute.xlu1 %488 }
 0x12b   :  { %v1986_v46 = vpop.permute.xlu0 %486  ;;  %v515_v63 = vsel %vm514_vm6, %v463_v48, %v489_v14  ;;  %v528_v41 = vsel %vm514_vm6, %v489_v14, %v463_v48 }
 0x12c   :  { %v543_v40 = vsel %vm541_vm7, %v528_v41, 0.0  ;;  %v570_v54 = vadd.f32 %v515_v63, %v1815_v31 }
 0x12d   :  { %v569_v13 = vadd.f32 %v543_v40, %v1818_v16 }
 0x12e   :  { %v596_v36 = vmul.f32 2e-05, %v570_v54  ;;  %v493_v15 = vpop.permute.xlu1 %492 }
 0x12f   :  { %v491_v39 = vpop.permute.xlu0 %490  ;;  %v595_v21 = vmul.f32 2e-05, %v569_v13  ;;  %v517_v20 = vsel %vm514_vm6, %v467_v6, %v493_v15  ;;  %v530_v34 = vsel %vm514_vm6, %v493_v15, %v467_v6 }
 0x130   :  { %v516_v7 = vsel %vm514_vm6, %v465_v44, %v491_v39  ;;  %v2002_v33 = vadd.f32 1.0, %v596_v36  ;;  %v547_v31 = vsel %vm541_vm7, %v530_v34, 0.0  ;;  %v574_v16 = vadd.f32 %v517_v20, %v1831_v49 }
 0x131   :  { %v529_v8 = vsel %vm514_vm6, %v491_v39, %v465_v44  ;;  %v2009_v32 = vadd.f32 1.0, %v595_v21  ;;  %v573_v1 = vadd.f32 %v547_v31, %v1839_v59  ;;  %v572_v60 = vadd.f32 %v516_v7, %v1836_v22 }
 0x132   :  { %v545_v17 = vsel %vm541_vm7, %v529_v8, 0.0  ;;  %967 = vrsqrt.f32 %v2002_v33  ;;  %v497_v0 = vpop.permute.xlu1 %496  ;;  %v600_v49 = vmul.f32 2e-05, %v574_v16  ;;  %vm682_vm8 = vcmp.eq.f32.partialorder %v2002_v33, inf }
 0x133   :  { %v495_v30 = vpop.permute.xlu0 %494  ;;  %969 = vrsqrt.f32 %v2009_v32  ;;  %v599_v47 = vmul.f32 2e-05, %v573_v1  ;;  %v571_v45 = vadd.f32 %v545_v17, %v1842_v25  ;;  %v598_v55 = vmul.f32 2e-05, %v572_v60 }
 0x134   :  { %v519_v44 = vsel %vm514_vm6, %v471_v42, %v497_v0  ;;  %v532_v59 = vsel %vm514_vm6, %v497_v0, %v471_v42  ;;  %v531_v22 = vsel %vm514_vm6, %v495_v30, %v469_v61  ;;  %v2026_v6 = vadd.f32 1.0, %v600_v49 }
 0x135   :  { %v2024_v48 = vadd.f32 1.0, %v599_v47  ;;  %v597_v14 = vmul.f32 2e-05, %v571_v45  ;;  %v2028_v63 = vadd.f32 1.0, %v598_v55  ;;  %v578_v41 = vadd.f32 %v519_v44, %v1855_v5 }
 0x136   :  { %v518_v25 = vsel %vm514_vm6, %v469_v61, %v495_v30  ;;  %v551_v42 = vsel %vm541_vm7, %v532_v59, 0.0  ;;  %v549_v40 = vsel %vm541_vm7, %v531_v22, 0.0  ;;  %vm684_vm9 = vcmp.eq.f32.partialorder %v2002_v33, 0.0  ;;  %v501_v34 = vpop.permute.xlu1 %500 }
 0x137   :  { %971 = vrsqrt.f32 %v2024_v48  ;;  %v2039_v54 = vadd.f32 1.0, %v597_v14  ;;  %v576_v13 = vadd.f32 %v518_v25, %v1860_v27  ;;  %v577_v5 = vadd.f32 %v551_v42, %v1863_v51  ;;  %v499_v55 = vpop.permute.xlu0 %498 }
 0x138   :  { %973 = vrsqrt.f32 %v2026_v6  ;;  %v604_v36 = vmul.f32 2e-05, %v578_v41  ;;  %v575_v61 = vadd.f32 %v549_v40, %v1866_v29  ;;  %v685_v15 = vand.u32 2147483648, %v2002_v33 }
 0x139   :  { %975 = vrsqrt.f32 %v2028_v63  ;;  %v603_v39 = vmul.f32 2e-05, %v577_v5  ;;  %vm675_vm10 = vcmp.eq.f32.partialorder %v2009_v32, inf  ;;  %vm677_vm11 = vcmp.eq.f32.partialorder %v2009_v32, 0.0 }
 0x13a   :  { %977 = vrsqrt.f32 %v2039_v54  ;;  %v2049_v21 = vadd.f32 1.0, %v604_v36  ;;  %v601_v20 = vmul.f32 2e-05, %v575_v61  ;;  %v678_v27 = vand.u32 2147483648, %v2009_v32 }
 0x13b   :  { %v602_v51 = vmul.f32 2e-05, %v576_v13  ;;  %vm703_vm12 = vcmp.eq.f32.partialorder %v2024_v48, inf  ;;  %v706_v7 = vand.u32 2147483648, %v2024_v48  ;;  %v2058_v31 = vadd.f32 1.0, %v603_v39 }
 0x13c   :  { %979 = vrsqrt.f32 %v2049_v21  ;;  %vm705_vm13 = vcmp.eq.f32.partialorder %v2024_v48, 0.0  ;;  %vm710_vm14 = vcmp.eq.f32.partialorder %v2026_v6, inf  ;;  %v2067_v1 = vadd.f32 1.0, %v601_v20 }
 0x13d   :  { %v2069_v17 = vadd.f32 1.0, %v602_v51  ;;  %v521_v60 = vsel %vm514_vm6, %v1974_v53, %v501_v34  ;;  %vm712_vm15 = vcmp.eq.f32.partialorder %v2026_v6, 0.0  ;;  %v713_v30 = vand.u32 2147483648, %v2026_v6 }
 0x13e   :  { %vm696_vm0 = vcmp.eq.f32.partialorder %v2028_v63, inf  ;;  %981 = vrsqrt.f32 %v2058_v31  ;;  %vm698_vm1 = vcmp.eq.f32.partialorder %v2028_v63, 0.0  ;;  %v699_v49 = vand.u32 2147483648, %v2028_v63 }
 0x13f   :  { %v2054_v29 = vpop.eup %967  ;;  %983 = vrsqrt.f32 %v2067_v1  ;;  %v534_v45 = vsel %vm514_vm6, %v501_v34, %v1974_v53  ;;  %v582_v22 = vadd.f32 %v521_v60, %v1879_v3  ;;  %vm689_vm2 = vcmp.eq.f32.partialorder %v2039_v54, inf }
 0x140   :  { %v2061_v16 = vpop.eup %969  ;;  %v681_v8 = vmul.f32 %v2054_v29, %v2002_v33  ;;  %985 = vrsqrt.f32 %v2069_v17  ;;  %vm691_vm3 = vcmp.eq.f32.partialorder %v2039_v54, 0.0  ;;  %v692_v41 = vand.u32 2147483648, %v2039_v54 }
 0x141   :  { %v674_v0 = vmul.f32 %v2061_v16, %v2009_v32  ;;  %v520_v3 = vsel %vm514_vm6, %v1970_v28, %v499_v55  ;;  %vm738_vm4 = vcmp.eq.f32.partialorder %v2049_v21, inf  ;;  %v741_v42 = vand.u32 2147483648, %v2049_v21 }
 0x142   :  { %v683_v47 = vsel %vm682_vm8, %v2002_v33, %v681_v8  ;;  %v555_v33 = vsel %vm541_vm7, %v534_v45, 0.0  ;;  %v533_v13 = vsel %vm514_vm6, %v499_v55, %v1970_v28  ;;  %v734_v61 = vand.u32 2147483648, %v2058_v31 }
 0x143   :  { %v676_v44 = vsel %vm675_vm10, %v2009_v32, %v674_v0  ;;  %v686_v59 = vsel %vm684_vm9, %v685_v15, %v683_v47  ;;  %v581_v40 = vadd.f32 %v555_v33, %v1887_v56  ;;  %vm740_vm5 = vcmp.eq.f32.partialorder %v2049_v21, 0.0 }
 0x144   :  { %v679_v14 = vsel %vm677_vm11, %v678_v27, %v676_v44  ;;  %987 = vrsqrt.f32 %v686_v59  ;;  %v2100_v53 = vpop.eup %971  ;;  %v608_v15 = vmul.f32 2e-05, %v582_v22  ;;  %v553_v39 = vsel %vm541_vm7, %v533_v13, 0.0  ;;  %v505_v22 = vpop.permute.xlu1 %504 }
 0x145   :  { %989 = vrsqrt.f32 %v679_v14  ;;  %v2108_v25 = vpop.eup %973  ;;  %v702_v32 = vmul.f32 %v2100_v53, %v2024_v48  ;;  %vm731_vm8 = vcmp.eq.f32.partialorder %v2058_v31, inf  ;;  %v607_v20 = vmul.f32 2e-05, %v581_v40 }
 0x146   :  { %v2118_v5 = vpop.eup %975  ;;  %v709_v36 = vmul.f32 %v2108_v25, %v2026_v6  ;;  %v580_v34 = vadd.f32 %v520_v3, %v1884_v62  ;;  %vm733_vm9 = vcmp.eq.f32.partialorder %v2058_v31, 0.0  ;;  %vm717_vm10 = vcmp.eq.f32.partialorder %v2067_v1, inf }
 0x147   :  { %v704_v56 = vsel %vm703_vm12, %v2024_v48, %v702_v32  ;;  %v695_v28 = vmul.f32 %v2118_v5, %v2028_v63  ;;  %v2133_v27 = vpop.eup %977  ;;  %v579_v60 = vadd.f32 %v553_v39, %v1890_v18  ;;  %v2152_v47 = vadd.f32 1.0, %v607_v20 }
 0x148   :  { %v707_v51 = vsel %vm705_vm13, %v706_v7, %v704_v56  ;;  %v711_v8 = vsel %vm710_vm14, %v2026_v6, %v709_v36  ;;  %v688_v62 = vmul.f32 %v2133_v27, %v2039_v54  ;;  %v2154_v45 = vadd.f32 1.0, %v608_v15 }
 0x149   :  { %v714_v0 = vsel %vm712_vm15, %v713_v30, %v711_v8  ;;  %991 = vrsqrt.f32 %v707_v51  ;;  %v697_v48 = vsel %vm696_vm0, %v2028_v63, %v695_v28  ;;  %v2156_v18 = vpop.eup %979  ;;  %vm719_vm11 = vcmp.eq.f32.partialorder %v2067_v1, 0.0 }
 0x14a   :  { %993 = vrsqrt.f32 %v714_v0  ;;  %v700_v7 = vsel %vm698_vm1, %v699_v49, %v697_v48  ;;  %v690_v6 = vsel %vm689_vm2, %v2039_v54, %v688_v62  ;;  %v606_v30 = vmul.f32 2e-05, %v580_v34  ;;  %v503_v0 = vpop.permute.xlu0 %502 }
 0x14b   :  { %995 = vrsqrt.f32 %v700_v7  ;;  %v693_v55 = vsel %vm691_vm3, %v692_v41, %v690_v6  ;;  %v737_v63 = vmul.f32 %v2156_v18, %v2049_v21  ;;  %v720_v49 = vand.u32 2147483648, %v2067_v1  ;;  %v2168_v44 = vpop.eup %981 }
 0x14c   :  { %997 = vrsqrt.f32 %v2152_v47  ;;  %vm724_vm12 = vcmp.eq.f32.partialorder %v2069_v17, inf  ;;  %vm726_vm13 = vcmp.eq.f32.partialorder %v2069_v17, 0.0  ;;  %v605_v59 = vmul.f32 2e-05, %v579_v60  ;;  %v2172_v14 = vpop.eup %983 }
 0x14d   :  { %999 = vrsqrt.f32 %v693_v55  ;;  %v730_v54 = vmul.f32 %v2168_v44, %v2058_v31  ;;  %v739_v41 = vsel %vm738_vm4, %v2049_v21, %v737_v63  ;;  %v727_v33 = vand.u32 2147483648, %v2069_v17  ;;  %v2181_v3 = vpop.eup %985 }
 0x14e   :  { %1001 = vrsqrt.f32 %v2154_v45  ;;  %v742_v32 = vsel %vm740_vm5, %v741_v42, %v739_v41  ;;  %v716_v40 = vmul.f32 %v2172_v14, %v2067_v1  ;;  %v2187_v13 = vadd.f32 1.0, %v605_v59 }
 0x14f   :  { %v2189_v36 = vadd.f32 1.0, %v606_v30  ;;  %v732_v39 = vsel %vm731_vm8, %v2058_v31, %v730_v54  ;;  %1003 = vrsqrt.f32 %v742_v32  ;;  %v723_v56 = vmul.f32 %v2181_v3, %v2069_v17 }
 0x150   :  { %v536_v21 = vsel %vm514_vm6, %v505_v22, %v1978_v43  ;;  %v735_v20 = vsel %vm733_vm9, %v734_v61, %v732_v39  ;;  %v718_v34 = vsel %vm717_vm10, %v2067_v1, %v716_v40  ;;  %1005 = vrsqrt.f32 %v2187_v13  ;;  %v1072_v1 = vld [vmem:[%s2618_s0] sm:$0xff] }
 0x151   :  { %v988_v15 = vpop.eup %987  ;;  %1007 = vrsqrt.f32 %v735_v20  ;;  %v721_v8 = vsel %vm719_vm11, %v720_v49, %v718_v34  ;;  %v725_v60 = vsel %vm724_vm12, %v2069_v17, %v723_v56  ;;  %vm766_vm14 = vcmp.eq.f32.partialorder %v2154_v45, inf }
 0x152   :  { %v990_v42 = vpop.eup %989  ;;  %v882_v28 = vmul.f32 %v988_v15, %v2054_v29  ;;  %v1071_v29 = vld [vmem:[%s2618_s0 + $0x8] sm:$0xff]  ;;  %v728_v61 = vsel %vm726_vm13, %v727_v33, %v725_v60  ;;  %1009 = vrsqrt.f32 %v721_v8  ;;  %v559_v17 = vsel %vm541_vm7, %v536_v21, 0.0 }
 0x153   :  { %v881_v51 = vmul.f32 %v990_v42, %v2061_v16  ;;  %v523_v16 = vsel %vm514_vm6, %v1978_v43, %v505_v22  ;;  %1011 = vrsqrt.f32 %v728_v61  ;;  %vm768_vm15 = vcmp.eq.f32.partialorder %v2154_v45, 0.0 }
 0x154   :  { %v908_v31 = vmul.f32 %v1071_v29, %v882_v28  ;;  %1013 = vrsqrt.f32 %v2189_v36  ;;  %v585_v43 = vadd.f32 %v559_v17, %v1911_v12  ;;  %v586_v7 = vadd.f32 %v523_v16, %v1903_v11  ;;  %v1075_v28 = vld [vmem:[%s2618_s0 + $0x18] sm:$0xff]  ;;  %v1076_v29 = vld [vmem:[%s2618_s0 + $0x10] sm:$0xff] }
 0x155   :  { %v907_v62 = vmul.f32 %v1072_v1, %v881_v51  ;;  %v522_v6 = vsel %vm514_vm6, %v1972_v58, %v503_v0  ;;  %v535_v30 = vsel %vm514_vm6, %v503_v0, %v1972_v58  ;;  %v769_v49 = vand.u32 2147483648, %v2154_v45  ;;  %v1073_v58 = vld [vmem:[%s2618_s0 + $0x20] sm:$0xff] }
 0x156   :  { %934 = vst [vmem:[%s2619_s1 + $0x8] sm:$0xff] %v908_v31  ;;  %v992_v48 = vpop.eup %991  ;;  %v557_v59 = vsel %vm541_vm7, %v535_v30, 0.0  ;;  %v584_v12 = vadd.f32 %v522_v6, %v1908_v10  ;;  %v611_v54 = vmul.f32 2e-05, %v585_v43  ;;  %v612_v41 = vmul.f32 2e-05, %v586_v7 }
 0x157   :  { %933 = vst [vmem:[%s2619_s1] sm:$0xff] %v907_v62  ;;  %v994_v55 = vpop.eup %993  ;;  %v885_v63 = vmul.f32 %v992_v48, %v2100_v53  ;;  %v583_v33 = vadd.f32 %v557_v59, %v1914_v38  ;;  %vm759_vm0 = vcmp.eq.f32.partialorder %v2152_v47, inf  ;;  %vm761_vm1 = vcmp.eq.f32.partialorder %v2152_v47, 0.0  ;;  %v509_v62 = vpop.permute.xlu1 %508  ;;  %v1077_v30 = vld [vmem:[%s2618_s0 + $0x48] sm:$0xff] }
 0x158   :  { %v996_v22 = vpop.eup %995  ;;  %v886_v11 = vmul.f32 %v994_v55, %v2108_v25  ;;  %v610_v15 = vmul.f32 2e-05, %v584_v12  ;;  %v1074_v25 = vld [vmem:[%s2618_s0 + $0x28] sm:$0xff]  ;;  %v2261_v56 = vadd.f32 1.0, %v611_v54  ;;  %v2263_v21 = vadd.f32 1.0, %v612_v41  ;;  %v1078_v12 = vld [vmem:[%s2618_s0 + $0x40] sm:$0xff] }
 0x159   :  { %v2249_v32 = vpop.eup %997  ;;  %v911_v53 = vmul.f32 %v1073_v58, %v885_v63  ;;  %v884_v40 = vmul.f32 %v996_v22, %v2118_v5  ;;  %v762_v34 = vand.u32 2147483648, %v2152_v47  ;;  %vm752_vm2 = vcmp.eq.f32.partialorder %v2189_v36, inf  ;;  %v1079_v41 = vld [vmem:[%s2618_s0 + $0x30] sm:$0xff] }
 0x15a   :  { %v1000_v10 = vpop.eup %999  ;;  %v912_v39 = vmul.f32 %v1074_v25, %v886_v11  ;;  %v758_v38 = vmul.f32 %v2249_v32, %v2152_v47  ;;  %1015 = vrsqrt.f32 %v2261_v56  ;;  %v609_v8 = vmul.f32 2e-05, %v583_v33 }
 0x15b   :  { %v2265_v42 = vpop.eup %1001  ;;  %937 = vst [vmem:[%s2619_s1 + $0x20] sm:$0xff] %v911_v53  ;;  %v883_v5 = vmul.f32 %v1000_v10, %v2133_v27  ;;  %v910_v20 = vmul.f32 %v1075_v28, %v884_v40  ;;  %1017 = vrsqrt.f32 %v2263_v21  ;;  %vm745_vm3 = vcmp.eq.f32.partialorder %v2187_v13, inf  ;;  %v507_v53 = vpop.permute.xlu0 %506 }
 0x15c   :  { %938 = vst [vmem:[%s2619_s1 + $0x28] sm:$0xff] %v912_v39  ;;  %v760_v51 = vsel %vm759_vm0, %v2152_v47, %v758_v38  ;;  %v765_v27 = vmul.f32 %v2265_v42, %v2154_v45  ;;  %v1004_v60 = vpop.eup %1003  ;;  %v2293_v47 = vadd.f32 1.0, %v610_v15  ;;  %vm747_vm4 = vcmp.eq.f32.partialorder %v2187_v13, 0.0  ;;  %v513_v10 = vpop.permute.xlu1 %512 }
 0x15d   :  { %v909_v31 = vmul.f32 %v1076_v29, %v883_v5  ;;  %936 = vst [vmem:[%s2619_s1 + $0x18] sm:$0xff] %v910_v20  ;;  %v763_v61 = vsel %vm761_vm1, %v762_v34, %v760_v51  ;;  %v2295_v16 = vpop.eup %1005  ;;  %v890_v0 = vmul.f32 %v1004_v60, %v2156_v18  ;;  %v748_v18 = vand.u32 2147483648, %v2187_v13 }
 0x15e   :  { %v767_v1 = vsel %vm766_vm14, %v2154_v45, %v765_v27  ;;  %1019 = vrsqrt.f32 %v763_v61  ;;  %v1008_v17 = vpop.eup %1007  ;;  %v744_v43 = vmul.f32 %v2295_v16, %v2187_v13  ;;  %vm754_vm5 = vcmp.eq.f32.partialorder %v2189_v36, 0.0 }
 0x15f   :  { %935 = vst [vmem:[%s2619_s1 + $0x10] sm:$0xff] %v909_v31  ;;  %v770_v48 = vsel %vm768_vm15, %v769_v49, %v767_v1  ;;  %v1010_v7 = vpop.eup %1009  ;;  %v889_v6 = vmul.f32 %v1008_v17, %v2168_v44  ;;  %v916_v55 = vmul.f32 %v1077_v30, %v890_v0  ;;  %v2320_v59 = vadd.f32 1.0, %v609_v8 }
 0x160   :  { %1021 = vrsqrt.f32 %v770_v48  ;;  %v1012_v45 = vpop.eup %1011  ;;  %v887_v63 = vmul.f32 %v1010_v7, %v2172_v14  ;;  %v746_v49 = vsel %vm745_vm3, %v2187_v13, %v744_v43  ;;  %v538_v54 = vsel %vm514_vm6, %v509_v62, %v1982_v35  ;;  %v1080_v13 = vld [vmem:[%s2618_s0 + $0x38] sm:$0xff] }
 0x161   :  { %1023 = vrsqrt.f32 %v2293_v47  ;;  %v2323_v44 = vpop.eup %1013  ;;  %v915_v22 = vmul.f32 %v1078_v12, %v889_v6  ;;  %942 = vst [vmem:[%s2619_s1 + $0x48] sm:$0xff] %v916_v55  ;;  %v888_v14 = vmul.f32 %v1012_v45, %v2181_v3  ;;  %v749_v11 = vsel %vm747_vm4, %v748_v18, %v746_v49  ;;  %v1081_v45 = vld [vmem:[%s2618_s0 + $0x60] sm:$0xff]  ;;  %v1082_v12 = vld [vmem:[%s2618_s0 + $0x68] sm:$0xff] }
 0x162   :  { %v913_v33 = vmul.f32 %v1079_v41, %v887_v63  ;;  %v751_v58 = vmul.f32 %v2323_v44, %v2189_v36  ;;  %1025 = vrsqrt.f32 %v749_v11  ;;  %v525_v3 = vsel %vm514_vm6, %v1982_v35, %v509_v62 }
 0x163   :  { %941 = vst [vmem:[%s2619_s1 + $0x40] sm:$0xff] %v915_v22  ;;  %v914_v40 = vmul.f32 %v1080_v13, %v888_v14  ;;  %v755_v15 = vand.u32 2147483648, %v2189_v36  ;;  %vm787_vm8 = vcmp.eq.f32.partialorder %v2261_v56, inf  ;;  %1027 = vrsqrt.f32 %v2320_v59 }
 0x164   :  { %939 = vst [vmem:[%s2619_s1 + $0x30] sm:$0xff] %v913_v33  ;;  %v753_v35 = vsel %vm752_vm2, %v2189_v36, %v751_v58  ;;  %vm789_vm9 = vcmp.eq.f32.partialorder %v2261_v56, 0.0  ;;  %v790_v25 = vand.u32 2147483648, %v2261_v56  ;;  %v563_v39 = vsel %vm541_vm7, %v538_v54, 0.0 }
 0x165   :  { %940 = vst [vmem:[%s2619_s1 + $0x38] sm:$0xff] %v914_v40  ;;  %v756_v38 = vsel %vm754_vm5, %v755_v15, %v753_v35  ;;  %v589_v5 = vadd.f32 %v563_v39, %v1937_v24  ;;  %v590_v28 = vadd.f32 %v525_v3, %v1929_v2  ;;  %v524_v20 = vsel %vm514_vm6, %v1976_v57, %v507_v53 }
 0x166   :  { %1029 = vrsqrt.f32 %v756_v38  ;;  %v537_v34 = vsel %vm514_vm6, %v507_v53, %v1976_v57  ;;  %v588_v51 = vadd.f32 %v524_v20, %v1934_v52  ;;  %v527_v36 = vsel %vm514_vm6, %v1986_v46, %v513_v10  ;;  %v511_v53 = vpop.permute.xlu0 %510 }
 0x167   :  { %v615_v27 = vmul.f32 2e-05, %v589_v5  ;;  %v616_v8 = vmul.f32 2e-05, %v590_v28  ;;  %v561_v2 = vsel %vm541_vm7, %v537_v34, 0.0  ;;  %v540_v24 = vsel %vm514_vm6, %v513_v10, %v1986_v46  ;;  %v2386_v60 = vpop.eup %1015  ;;  %v1084_v28 = vld [vmem:[%s2618_s0 + $0x58] sm:$0xff] }
 0x168   :  { %v587_v29 = vadd.f32 %v561_v2, %v1940_v37  ;;  %v614_v57 = vmul.f32 2e-05, %v588_v51  ;;  %v567_v52 = vsel %vm541_vm7, %v540_v24, 0.0  ;;  %v594_v31 = vadd.f32 %v527_v36, %v1957_v26  ;;  %v2392_v61 = vpop.eup %1017 }
 0x169   :  { %v786_v0 = vmul.f32 %v2386_v60, %v2261_v56  ;;  %v2396_v1 = vadd.f32 1.0, %v615_v27  ;;  %v2398_v62 = vadd.f32 1.0, %v616_v8  ;;  %v593_v46 = vadd.f32 %v567_v52, %v1965_v23 }
 0x16a   :  { %v793_v37 = vmul.f32 %v2392_v61, %v2263_v21  ;;  %vm794_vm10 = vcmp.eq.f32.partialorder %v2263_v21, inf  ;;  %vm796_vm11 = vcmp.eq.f32.partialorder %v2263_v21, 0.0  ;;  %v797_v26 = vand.u32 2147483648, %v2263_v21 }
 0x16b   :  { %v1020_v17 = vpop.eup %1019  ;;  %v788_v43 = vsel %vm787_vm8, %v2261_v56, %v786_v0  ;;  %1031 = vrsqrt.f32 %v2396_v1  ;;  %v613_v18 = vmul.f32 2e-05, %v587_v29  ;;  %v2415_v30 = vadd.f32 1.0, %v614_v57 }
 0x16c   :  { %v893_v48 = vmul.f32 %v1020_v17, %v2249_v32  ;;  %v791_v7 = vsel %vm789_vm9, %v790_v25, %v788_v43  ;;  %v795_v6 = vsel %vm794_vm10, %v2263_v21, %v793_v37  ;;  %1033 = vrsqrt.f32 %v2398_v62 }
 0x16d   :  { %v1022_v23 = vpop.eup %1021  ;;  %v798_v49 = vsel %vm796_vm11, %v797_v26, %v795_v6  ;;  %1035 = vrsqrt.f32 %v791_v7  ;;  %vm780_vm12 = vcmp.eq.f32.partialorder %v2293_v47, inf  ;;  %vm782_vm13 = vcmp.eq.f32.partialorder %v2293_v47, 0.0  ;;  %v1085_v26 = vld [vmem:[%s2618_s0 + $0x80] sm:$0xff] }
 0x16e   :  { %v2417_v55 = vpop.eup %1023  ;;  %v894_v32 = vmul.f32 %v1022_v23, %v2265_v42  ;;  %v919_v63 = vmul.f32 %v1081_v45, %v893_v48  ;;  %1037 = vrsqrt.f32 %v798_v49  ;;  %v783_v42 = vand.u32 2147483648, %v2293_v47 }
 0x16f   :  { %v779_v56 = vmul.f32 %v2417_v55, %v2293_v47  ;;  %v1026_v21 = vpop.eup %1025  ;;  %v2434_v14 = vadd.f32 1.0, %v613_v18  ;;  %1039 = vrsqrt.f32 %v2415_v30  ;;  %v620_v33 = vmul.f32 2e-05, %v594_v31 }
 0x170   :  { %v920_v22 = vmul.f32 %v1082_v12, %v894_v32  ;;  %945 = vst [vmem:[%s2619_s1 + $0x60] sm:$0xff] %v919_v63  ;;  %v2436_v11 = vpop.eup %1027  ;;  %v891_v54 = vmul.f32 %v1026_v21, %v2295_v16  ;;  %v1083_v16 = vld [vmem:[%s2618_s0 + $0x50] sm:$0xff]  ;;  %vm773_vm14 = vcmp.eq.f32.partialorder %v2320_v59, inf  ;;  %vm775_vm15 = vcmp.eq.f32.partialorder %v2320_v59, 0.0  ;;  %v1087_v12 = vld [vmem:[%s2618_s0 + $0x78] sm:$0xff] }
 0x171   :  { %v781_v41 = vsel %vm780_vm12, %v2293_v47, %v779_v56  ;;  %v772_v58 = vmul.f32 %v2436_v11, %v2320_v59  ;;  %1041 = vrsqrt.f32 %v2434_v14  ;;  %v776_v47 = vand.u32 2147483648, %v2320_v59 }
 0x172   :  { %946 = vst [vmem:[%s2619_s1 + $0x68] sm:$0xff] %v920_v22  ;;  %v784_v3 = vsel %vm782_vm13, %v783_v42, %v781_v41  ;;  %v917_v13 = vmul.f32 %v1083_v16, %v891_v54  ;;  %v619_v10 = vmul.f32 2e-05, %v593_v46  ;;  %v2458_v39 = vadd.f32 1.0, %v620_v33 }
 0x173   :  { %1043 = vrsqrt.f32 %v784_v3  ;;  %v1030_v40 = vpop.eup %1029  ;;  %v774_v15 = vsel %vm773_vm14, %v2320_v59, %v772_v58  ;;  %v526_v38 = vsel %vm514_vm6, %v1980_v19, %v511_v53  ;;  %v539_v59 = vsel %vm514_vm6, %v511_v53, %v1980_v19 }
 0x174   :  { %v892_v35 = vmul.f32 %v1030_v40, %v2323_v44  ;;  %943 = vst [vmem:[%s2619_s1 + $0x50] sm:$0xff] %v917_v13  ;;  %v777_v25 = vsel %vm775_vm15, %v776_v47, %v774_v15  ;;  %v2463_v5 = vadd.f32 1.0, %v619_v10  ;;  %v592_v44 = vadd.f32 %v526_v38, %v1962_v4 }
 0x175   :  { %1045 = vrsqrt.f32 %v777_v25  ;;  %vm815_vm0 = vcmp.eq.f32.partialorder %v2396_v1, inf  ;;  %v565_v4 = vsel %vm541_vm7, %v539_v59, 0.0  ;;  %vm817_vm6 = vcmp.eq.f32.partialorder %v2396_v1, 0.0 }
 0x176   :  { %v918_v20 = vmul.f32 %v1084_v28, %v892_v35  ;;  %1047 = vrsqrt.f32 %v2458_v39  ;;  %v618_v19 = vmul.f32 2e-05, %v592_v44  ;;  %v818_v27 = vand.u32 2147483648, %v2396_v1  ;;  %v1089_v44 = vld [vmem:[%s2618_s0 + $0xa0] sm:$0xff] }
 0x177   :  { %1049 = vrsqrt.f32 %v2463_v5  ;;  %v591_v8 = vadd.f32 %v565_v4, %v1968_v50  ;;  %vm822_vm1 = vcmp.eq.f32.partialorder %v2398_v62, inf  ;;  %vm824_vm7 = vcmp.eq.f32.partialorder %v2398_v62, 0.0 }
 0x178   :  { %v2474_v34 = vpop.eup %1031  ;;  %944 = vst [vmem:[%s2619_s1 + $0x58] sm:$0xff] %v918_v20  ;;  %v2493_v9 = vadd.f32 1.0, %v618_v19  ;;  %v825_v31 = vand.u32 2147483648, %v2398_v62  ;;  %vm808_vm2 = vcmp.eq.f32.partialorder %v2415_v30, inf  ;;  %vm801_vm3 = vcmp.eq.f32.partialorder %v2434_v14, inf }
 0x179   :  { %v2482_v51 = vpop.eup %1033  ;;  %v814_v36 = vmul.f32 %v2474_v34, %v2396_v1  ;;  %v617_v0 = vmul.f32 2e-05, %v591_v8  ;;  %v811_v6 = vand.u32 2147483648, %v2415_v30  ;;  %v804_v45 = vand.u32 2147483648, %v2434_v14 }
 0x17a   :  { %v1036_v2 = vpop.eup %1035  ;;  %v821_v24 = vmul.f32 %v2482_v51, %v2398_v62  ;;  %1051 = vrsqrt.f32 %v2493_v9  ;;  %vm810_vm4 = vcmp.eq.f32.partialorder %v2415_v30, 0.0  ;;  %vm803_vm5 = vcmp.eq.f32.partialorder %v2434_v14, 0.0 }
 0x17b   :  { %v1038_v29 = vpop.eup %1037  ;;  %v897_v57 = vmul.f32 %v1036_v2, %v2386_v60  ;;  %v816_v52 = vsel %vm815_vm0, %v2396_v1, %v814_v36  ;;  %v2506_v1 = vadd.f32 1.0, %v617_v0  ;;  %vm850_vm8 = vcmp.eq.f32.partialorder %v2458_v39, inf }
 0x17c   :  { %v898_v50 = vmul.f32 %v1038_v29, %v2392_v61  ;;  %v819_v46 = vsel %vm817_vm6, %v818_v27, %v816_v52  ;;  %v823_v17 = vsel %vm822_vm1, %v2398_v62, %v821_v24  ;;  %v2501_v37 = vpop.eup %1039  ;;  %v1086_v61 = vld [vmem:[%s2618_s0 + $0x88] sm:$0xff]  ;;  %v853_v3 = vand.u32 2147483648, %v2458_v39  ;;  %v1091_v29 = vld [vmem:[%s2618_s0 + $0x98] sm:$0xff]  ;;  %v1092_v52 = vld [vmem:[%s2618_s0 + $0x90] sm:$0xff] }
 0x17d   :  { %v923_v48 = vmul.f32 %v1085_v26, %v897_v57  ;;  %v826_v60 = vsel %vm824_vm7, %v825_v31, %v823_v17  ;;  %1053 = vrsqrt.f32 %v819_v46  ;;  %v807_v18 = vmul.f32 %v2501_v37, %v2415_v30 }
 0x17e   :  { %v2508_v43 = vpop.eup %1041  ;;  %v924_v62 = vmul.f32 %v1086_v61, %v898_v50  ;;  %1055 = vrsqrt.f32 %v826_v60  ;;  %vm843_vm9 = vcmp.eq.f32.partialorder %v2463_v5, inf  ;;  %vm852_vm10 = vcmp.eq.f32.partialorder %v2458_v39, 0.0 }
 0x17f   :  { %949 = vst [vmem:[%s2619_s1 + $0x80] sm:$0xff] %v923_v48  ;;  %v800_v7 = vmul.f32 %v2508_v43, %v2434_v14  ;;  %1057 = vrsqrt.f32 %v2506_v1  ;;  %v809_v63 = vsel %vm808_vm2, %v2415_v30, %v807_v18  ;;  %vm845_vm11 = vcmp.eq.f32.partialorder %v2463_v5, 0.0  ;;  %v1094_v48 = vld [vmem:[%s2618_s0 + $0xc0] sm:$0xff] }
 0x180   :  { %v1044_v23 = vpop.eup %1043  ;;  %950 = vst [vmem:[%s2619_s1 + $0x88] sm:$0xff] %v924_v62  ;;  %v812_v56 = vsel %vm810_vm4, %v811_v6, %v809_v63  ;;  %vm836_vm12 = vcmp.eq.f32.partialorder %v2493_v9, inf  ;;  %vm838_vm13 = vcmp.eq.f32.partialorder %v2493_v9, 0.0  ;;  %vm829_vm14 = vcmp.eq.f32.partialorder %v2506_v1, inf  ;;  %v1095_v62 = vld [vmem:[%s2618_s0 + $0xb8] sm:$0xff] }
 0x181   :  { %v896_v32 = vmul.f32 %v1044_v23, %v2417_v55  ;;  %v802_v49 = vsel %vm801_vm3, %v2434_v14, %v800_v7  ;;  %1059 = vrsqrt.f32 %v812_v56  ;;  %v1088_v14 = vld [vmem:[%s2618_s0 + $0x70] sm:$0xff]  ;;  %vm831_vm15 = vcmp.eq.f32.partialorder %v2506_v1, 0.0 }
 0x182   :  { %v1046_v21 = vpop.eup %1045  ;;  %v805_v42 = vsel %vm803_vm5, %v804_v45, %v802_v49  ;;  %v1096_v7 = vld [vmem:[%s2618_s0 + $0xb0] sm:$0xff] }
 0x183   :  { %v922_v22 = vmul.f32 %v1087_v12, %v896_v32  ;;  %v1048_v55 = vpop.eup %1047  ;;  %v895_v54 = vmul.f32 %v1046_v21, %v2436_v11  ;;  %1061 = vrsqrt.f32 %v805_v42  ;;  %v846_v11 = vand.u32 2147483648, %v2463_v5 }
 0x184   :  { %v1050_v41 = vpop.eup %1049  ;;  %v849_v30 = vmul.f32 %v1048_v55, %v2458_v39 }
 0x185   :  { %948 = vst [vmem:[%s2619_s1 + $0x78] sm:$0xff] %v922_v22  ;;  %v921_v33 = vmul.f32 %v1088_v14, %v895_v54  ;;  %v842_v58 = vmul.f32 %v1050_v41, %v2463_v5 }
 0x186   :  { %v851_v53 = vsel %vm850_vm8, %v2458_v39, %v849_v30  ;;  %v839_v39 = vand.u32 2147483648, %v2493_v9 }
 0x187   :  { %947 = vst [vmem:[%s2619_s1 + $0x70] sm:$0xff] %v921_v33  ;;  %v844_v16 = vsel %vm843_vm9, %v2463_v5, %v842_v58  ;;  %v854_v13 = vsel %vm852_vm10, %v853_v3, %v851_v53  ;;  %v1052_v40 = vpop.eup %1051 }
 0x188   :  { %v847_v47 = vsel %vm845_vm11, %v846_v11, %v844_v16  ;;  %1063 = vrsqrt.f32 %v854_v13  ;;  %v835_v10 = vmul.f32 %v1052_v40, %v2493_v9 }
 0x189   :  { %1065 = vrsqrt.f32 %v847_v47 }
 0x18a   :  { %v1054_v15 = vpop.eup %1053  ;;  %v837_v5 = vsel %vm836_vm12, %v2493_v9, %v835_v10 }
 0x18b   :  { %v1056_v35 = vpop.eup %1055  ;;  %v901_v25 = vmul.f32 %v1054_v15, %v2474_v34  ;;  %v840_v4 = vsel %vm838_vm13, %v839_v39, %v837_v5  ;;  %v1090_v34 = vld [vmem:[%s2618_s0 + $0xa8] sm:$0xff] }
 0x18c   :  { %v1058_v38 = vpop.eup %1057  ;;  %v902_v59 = vmul.f32 %v1056_v35, %v2482_v51  ;;  %v832_v51 = vand.u32 2147483648, %v2506_v1  ;;  %1067 = vrsqrt.f32 %v840_v4 }
 0x18d   :  { %v927_v28 = vmul.f32 %v1089_v44, %v901_v25  ;;  %v828_v20 = vmul.f32 %v1058_v38, %v2506_v1 }
 0x18e   :  { %v928_v19 = vmul.f32 %v1090_v34, %v902_v59  ;;  %v1060_v36 = vpop.eup %1059 }
 0x18f   :  { %953 = vst [vmem:[%s2619_s1 + $0xa0] sm:$0xff] %v927_v28  ;;  %v830_v27 = vsel %vm829_vm14, %v2506_v1, %v828_v20  ;;  %v900_v2 = vmul.f32 %v1060_v36, %v2501_v37  ;;  %v1093_v37 = vld [vmem:[%s2618_s0 + $0xc8] sm:$0xff] }
 0x190   :  { %v1062_v8 = vpop.eup %1061  ;;  %954 = vst [vmem:[%s2619_s1 + $0xa8] sm:$0xff] %v928_v19  ;;  %v833_v24 = vsel %vm831_vm15, %v832_v51, %v830_v27 }
 0x191   :  { %v899_v9 = vmul.f32 %v1062_v8, %v2508_v43  ;;  %1069 = vrsqrt.f32 %v833_v24  ;;  %v926_v57 = vmul.f32 %v1091_v29, %v900_v2 }
 0x193   :  { %v925_v31 = vmul.f32 %v1092_v52, %v899_v9  ;;  %952 = vst [vmem:[%s2619_s1 + $0x98] sm:$0xff] %v926_v57 }
 0x195   :  { %v1064_v0 = vpop.eup %1063  ;;  %951 = vst [vmem:[%s2619_s1 + $0x90] sm:$0xff] %v925_v31 }
 0x196   :  { %v1066_v50 = vpop.eup %1065  ;;  %v906_v46 = vmul.f32 %v1064_v0, %v1048_v55 }
 0x197   :  { %v905_v17 = vmul.f32 %v1066_v50, %v1050_v41 }
 0x198   :  { %v932_v26 = vmul.f32 %v1093_v37, %v906_v46 }
 0x199   :  { %v931_v60 = vmul.f32 %v1094_v48, %v905_v17  ;;  %v1068_v1 = vpop.eup %1067 }
 0x19a   :  { %958 = vst [vmem:[%s2619_s1 + $0xc8] sm:$0xff] %v932_v26  ;;  %v904_v43 = vmul.f32 %v1068_v1, %v1052_v40 }
 0x19b   :  { %957 = vst [vmem:[%s2619_s1 + $0xc0] sm:$0xff] %v931_v60 }
 0x19c   :  { %v930_v18 = vmul.f32 %v1095_v62, %v904_v43 }
 0x19e   :  { %v1070_v61 = vpop.eup %1069  ;;  %956 = vst [vmem:[%s2619_s1 + $0xb8] sm:$0xff] %v930_v18 }
 0x19f   :  { %v903_v23 = vmul.f32 %v1070_v61, %v1058_v38 }
 0x1a1   :  { %v929_v6 = vmul.f32 %v1096_v7, %v903_v23 }
 0x1a3   :  { %955 = vst [vmem:[%s2619_s1 + $0xb0] sm:$0xff] %v929_v6 }

// kernel: alexnet_forward.15
= control target key start
LH: loop header
LB: loop body
LE: loop exit
PB: predicated region body
PF: predicated region fallthrough
CT: control target
= control target key end

     0   :  { %s1613_s12 = smov 0   ;;  %s1615_s13 = smov 0   ;;  %s1801_s0 = inlined_call_operand.vmem [shape: bf16[24,2304], index: 0, kind: input, shape index: {}]   ;;  %s1802_s1 = inlined_call_operand.vmem [shape: bf16[2304,384], index: 1, kind: input, shape index: {}]   ;;  %s1803_s2 = inlined_call_operand.vmem [shape: f32[1,384], index: 2, kind: input, shape index: {}]   ;;  %s1804_s3 = inlined_call_operand.vmem [shape: f32[24,384], index: 3, kind: output, shape index: {}]  }
   0x1   :  { %s1617_s14 = smov 0   ;;  %s1619_s15 = smov 0  }
   0x2   :  { %s1621_s16 = smov 0  }
   0x3 LB: > { %s25_s17 = sadd.s32 1, %s1585_s15  ;;  %p48_p1 = scmp.ne.s32.totalorder %s1577_s13, %s1573_s12  ;;  %s1589_s16 = sphi %s1621_s16, %s13_s16   ;;  %s1585_s15 = sphi %s1619_s15, %s1808_s15   ;;  %s1581_s14 = sphi %s1617_s14, %s1807_s14   ;;  %s1577_s13 = sphi %s1615_s13, %s1806_s13   ;;  %s1573_s12 = sphi %s1613_s12, %s1805_s12  }
   0x4   : > { %p26_p0 = scmp.ge.s32.totalorder %s25_s17, 6  ;;  %p49_p2 = scmp.eq.s32.totalorder %s1589_s16, 0 }
   0x5   : > { %s41_s19 = sadd.s32 1, %s1577_s13  ;;  %p1250_p5 = scmp.ge.s32.totalorder %s1589_s16, 6 }
   0x6   : > { %s1810_s17 = smov (%p26_p0, %s25_s17), 0  ;;  %p50_p3 = por %p49_p2, %p48_p1 }
   0x7   : > { %s37_s18 = ssub.s32 %s1585_s15, %s1810_s17  ;;  %164 = sbr.rel (%p1250_p5) target bundleno = 20 (0x14), region = 20 }
   0x8   : > { %p39_p4 = scmp.eq.s32.totalorder %s37_s18, 0 }
   0xa   : > { %s1648_s20 = scalar_select %p39_p4, %s1577_s13, %s41_s19  }
   0xc   : > { %167 = sbr.rel (!%p50_p3) target bundleno = 20 (0x14), region = 24  ;;  %s169_s21 = sand.u32 (%p50_p3), 1, %s1577_s13  }
   0xd   : > { %s1344_s22 = smul.u32 (%p50_p3), 12, %s1585_s15 }
   0xe   : > { %s1403_s23 = smul.u32 (%p50_p3), 36, %s169_s21 }
   0xf   : > { %s177_s26 = scalar_lea.vmem (%p50_p3), %s1801_s0, %s1344_s22 }
  0x10   : > { %v192_v0 = vld [vmem:[%s177_s26] sm:$0xff] (%p50_p3)  ;;  %v194_v1 = vld [vmem:[%s177_s26 + $0x48] sm:$0xff] (%p50_p3)  ;;  %v196_v2 = vld [vmem:[%s177_s26 + $0x90] sm:$0xff] (%p50_p3)  ;;  %s171_s27 = scalar_lea.vmem (%p50_p3), [#allocation3], %s1403_s23 }
  0x11   : > { %193 = vst [vmem:[%s171_s27] sm:$0xff] %v192_v0  ;;  %195 = vst [vmem:[%s171_s27 + $0xc] sm:$0xff] %v194_v1  ;;  %v1252_v3 = vld [vmem:[%s177_s26 + $0x8] sm:$0xf]  ;;  %v1254_v4 = vld [vmem:[%s177_s26 + $0x50] sm:$0xf] }
  0x12   : > { %197 = vst [vmem:[%s171_s27 + $0x18] sm:$0xff] %v196_v2  ;;  %v1256_v5 = vld [vmem:[%s177_s26 + $0x98] sm:$0xf]  ;;  %1253 = vst [vmem:[%s171_s27 + $0x8] sm:$0xf] %v1252_v3 }
  0x13   : > { %1255 = vst [vmem:[%s171_s27 + $0x14] sm:$0xf] %v1254_v4  ;;  %1257 = vst [vmem:[%s171_s27 + $0x20] sm:$0xf] %v1256_v5 }
  0x14 PF: > { %p1258_p6 = scmp.ge.s32.totalorder %s1589_s16, 1  ;;  %p231_p7 = scmp.lt.s32.totalorder %s1589_s16, 7 }
  0x16   : > { %p232_p8 = pnand %p1258_p6, %p231_p7 }
  0x17   : > { %s238_s28 = sand.u32 (!%p232_p8), 1, %s1573_s12   ;;  %s282_s29 = smul.u32 (!%p232_p8), 48, %s1581_s14 }
  0x18   : > { %235 = sbr.rel (%p232_p8) target bundleno = 358 (0x166), region = 54  ;;  %p1260_p10 = scmp.ne.s32.totalorder (!%p232_p8), %s1581_s14, 0 }
  0x19   : > { %s1404_s30 = smul.u32 (!%p232_p8), 36, %s238_s28  ;;  %p284_p9 = scmp.lt.s32.totalorder (!%p232_p8), %s282_s29, 287 }
  0x1b   : > { %s1665_s8 = scalar_lea.vmem (!%p232_p8), [#allocation3], %s1404_s30 }
  0x1d   : > { %s1812_s29 = smov (!%p284_p9, %s282_s29), 287  ;;  %315 = sbr.rel (%p1260_p10) target bundleno = 40 (0x28), region = 62 }
  0x1e   : > { %s1405_s4 = smul.u32 12, %s1812_s29 }
  0x20   : > { %s1663_s7 = scalar_lea.vmem %s1802_s1, %s1405_s4 }
  0x22   : > { %v1591_v6 = vmov 0.0  }
  0x23   : > { %316 = vst [vmem:[#allocation2 + $0x30] sm:$0xff] %v1591_v6  ;;  %317 = vst [vmem:[#allocation2] sm:$0xff] %v1591_v6 }
  0x24   : > { %318 = vst [vmem:[#allocation2 + $0x18] sm:$0xff] %v1591_v6  ;;  %319 = vst [vmem:[#allocation2 + $0x10] sm:$0xff] %v1591_v6 }
  0x25   : > { %320 = vst [vmem:[#allocation2 + $0x20] sm:$0xff] %v1591_v6  ;;  %321 = vst [vmem:[#allocation2 + $0x28] sm:$0xff] %v1591_v6 }
  0x26   : > { %322 = vst [vmem:[#allocation2 + $0x40] sm:$0xff] %v1591_v6  ;;  %323 = vst [vmem:[#allocation2 + $0x38] sm:$0xff] %v1591_v6 }
  0x27   : > { %324 = vst [vmem:[#allocation2 + $0x8] sm:$0xff] %v1591_v6 }
  0x28 PF: > { %v1448_v7 = vld [vmem:[%s1663_s7 + $0xac] ss:$12 sps:$4 sm:$0xff]   ;;  %v1450_v8 = vld [vmem:[%s1663_s7 + $0xa8] ss:$12 sps:$4 sm:$0xff]   ;;  %v1592_v9 = vmov 0   ;;  %p1339_p11 = scmp.ne.s32.totalorder %s1581_s14, 5 }
  0x29   : > { %930 = vmatprep.mubr.bf16.mxu1 %v1592_v9  ;;  %847 = vmatprep.subr.bf16.mxu0 %v1448_v7  ;;  %v1451_v10 = vld [vmem:[%s1663_s7 + $0x94] ss:$12 sps:$4 sm:$0xff]   ;;  %v1453_v11 = vld [vmem:[%s1663_s7 + $0x90] ss:$12 sps:$4 sm:$0xff]   ;;  %v1456_v13 = vld [vmem:[%s1663_s7 + $0x78] ss:$12 sps:$4 sm:$0xff]  }
  0x2a   : > { %848 = vmatpush1.bf16.msra.mxu0 %v1450_v8  ;;  %v1454_v12 = vld [vmem:[%s1663_s7 + $0x7c] ss:$12 sps:$4 sm:$0xff]   ;;  %v1457_v14 = vld [vmem:[%s1663_s7 + $0x64] ss:$12 sps:$4 sm:$0xff]   ;;  %v1465_v15 = vld [vmem:[%s1663_s7 + $0x22c] ss:$12 sps:$4 sm:$0xff]  }
  0x2b   : > { %849 = vmatprep.subr.bf16.mxu0 %v1451_v10  ;;  %v1468_v16 = vld [vmem:[%s1663_s7 + $0x228] ss:$12 sps:$4 sm:$0xff]   ;;  %898 = vmatprep.subr.bf16.mxu1 %v1465_v15  ;;  %v1459_v17 = vld [vmem:[%s1663_s7 + $0x60] ss:$12 sps:$4 sm:$0xff]   ;;  %v1474_v19 = vld [vmem:[%s1663_s7 + $0x210] ss:$12 sps:$4 sm:$0xff]  }
  0x2c   : > { %899 = vmatpush1.bf16.msra.mxu1 %v1468_v16  ;;  %v1471_v18 = vld [vmem:[%s1663_s7 + $0x214] ss:$12 sps:$4 sm:$0xff]   ;;  %v1460_v20 = vld [vmem:[%s1663_s7 + $0x4c] ss:$12 sps:$4 sm:$0xff]   ;;  %v1477_v21 = vld [vmem:[%s1663_s7 + $0x1fc] ss:$12 sps:$4 sm:$0xff]  }
  0x2d   : > { %900 = vmatprep.subr.bf16.mxu1 %v1471_v18  ;;  %v1462_v22 = vld [vmem:[%s1663_s7 + $0x48] ss:$12 sps:$4 sm:$0xff]   ;;  %v1480_v23 = vld [vmem:[%s1663_s7 + $0x1f8] ss:$12 sps:$4 sm:$0xff]   ;;  %v1467_v26 = vld [vmem:[%s1663_s7 + $0x30] ss:$12 sps:$4 sm:$0xff]  }
  0x2e   : > { %850 = vmatpush1.bf16.msra.mxu0 %v1453_v11  ;;  %v1463_v24 = vld [vmem:[%s1663_s7 + $0x34] ss:$12 sps:$4 sm:$0xff]   ;;  %v1483_v25 = vld [vmem:[%s1663_s7 + $0x1e4] ss:$12 sps:$4 sm:$0xff]   ;;  %v1469_v27 = vld [vmem:[%s1663_s7 + $0x1c] ss:$12 sps:$4 sm:$0xff]  }
  0x2f   : > { %851 = vmatprep.subr.bf16.mxu0 %v1454_v12  ;;  %v1486_v28 = vld [vmem:[%s1663_s7 + $0x1e0] ss:$12 sps:$4 sm:$0xff]   ;;  %v1473_v30 = vld [vmem:[%s1663_s7 + $0x18] ss:$12 sps:$4 sm:$0xff]   ;;  %v1492_v31 = vld [vmem:[%s1663_s7 + $0x1c8] ss:$12 sps:$4 sm:$0xff]  }
  0x30   : > { %901 = vmatpush1.bf16.msra.mxu1 %v1474_v19  ;;  %v1489_v29 = vld [vmem:[%s1663_s7 + $0x1cc] ss:$12 sps:$4 sm:$0xff]   ;;  %v1475_v32 = vld [vmem:[%s1663_s7 + $0x4] ss:$12 sps:$4 sm:$0xff]   ;;  %v1495_v33 = vld [vmem:[%s1663_s7 + $0x1b4] ss:$12 sps:$4 sm:$0xff]  }
  0x31   : > { %902 = vmatprep.subr.bf16.mxu1 %v1477_v21  ;;  %v1479_v34 = vld [vmem:[%s1663_s7] ss:$12 sps:$4 sm:$0xff]   ;;  %v1498_v36 = vld [vmem:[%s1663_s7 + $0x1b0] ss:$12 sps:$4 sm:$0xff]   ;;  %v1485_v38 = vld [vmem:[%s1663_s7 + $0x168] ss:$12 sps:$4 sm:$0xff]  }
  0x32   : > { %852 = vmatpush1.bf16.msra.mxu0 %v1456_v13  ;;  %v1481_v35 = vld [vmem:[%s1663_s7 + $0x16c] ss:$12 sps:$4 sm:$0xff]   ;;  %v1501_v37 = vld [vmem:[%s1663_s7 + $0x19c] ss:$12 sps:$4 sm:$0xff]   ;;  %v1487_v39 = vld [vmem:[%s1663_s7 + $0x154] ss:$12 sps:$4 sm:$0xff]  }
  0x33   : > { %853 = vmatprep.subr.bf16.mxu0 %v1457_v14  ;;  %v1504_v40 = vld [vmem:[%s1663_s7 + $0x198] ss:$12 sps:$4 sm:$0xff]   ;;  %v1491_v42 = vld [vmem:[%s1663_s7 + $0x150] ss:$12 sps:$4 sm:$0xff]   ;;  %v1510_v44 = vld [vmem:[%s1663_s7 + $0x180] ss:$12 sps:$4 sm:$0xff]  }
  0x34   : > { %903 = vmatpush1.bf16.msra.mxu1 %v1480_v23  ;;  %v1507_v41 = vld [vmem:[%s1663_s7 + $0x184] ss:$12 sps:$4 sm:$0xff]   ;;  %v1493_v43 = vld [vmem:[%s1663_s7 + $0x13c] ss:$12 sps:$4 sm:$0xff]   ;;  %v1503_v52 = vld [vmem:[%s1663_s7 + $0x120] ss:$12 sps:$4 sm:$0xff]  }
  0x35   : > { %904 = vmatprep.subr.bf16.mxu1 %v1483_v25  ;;  %v1513_v45 = vld [vmem:[%s1663_s7 + $0x170] ss:$12 sps:$4 sm:$0xff]   ;;  %v1497_v46 = vld [vmem:[%s1663_s7 + $0x138] ss:$12 sps:$4 sm:$0xff]   ;;  %v1524_v55 = vld [vmem:[%s1663_s7 + $0x140] ss:$12 sps:$4 sm:$0xff]  }
  0x36   : > { %854 = vmatpush1.bf16.msra.mxu0 %v1459_v17  ;;  %v1709_v47 = vld [vmem:[%s1665_s8 + $0x8] ss:$12 sps:$4 sm:$0xff]   ;;  %v1519_v50 = vld [vmem:[%s1663_s7 + $0x158] ss:$12 sps:$4 sm:$0xff]   ;;  %v1727_v61 = vld [vmem:[%s1665_s8 + $0x20] ss:$0 sps:$4 sm:$0xff]  }
  0x37   : > { %855 = vmatprep.subr.bf16.mxu0 %v1460_v20  ;;  %v1499_v48 = vld [vmem:[%s1663_s7 + $0x124] ss:$12 sps:$4 sm:$0xff]   ;;  %v1505_v53 = vld [vmem:[%s1663_s7 + $0x10c] ss:$12 sps:$4 sm:$0xff]   ;;  %v1509_v56 = vld [vmem:[%s1663_s7 + $0x108] ss:$12 sps:$4 sm:$0xff]  }
  0x38   : > { %905 = vmatpush1.bf16.msra.mxu1 %v1486_v28  ;;  %v1516_v49 = vld [vmem:[%s1663_s7 + $0xb0] ss:$12 sps:$4 sm:$0xff]   ;;  %v1521_v54 = vld [vmem:[%s1663_s7 + $0x98] ss:$12 sps:$4 sm:$0xff]   ;;  %v1511_v57 = vld [vmem:[%s1663_s7 + $0xf4] ss:$12 sps:$4 sm:$0xff]  }
  0x39   : > { %906 = vmatprep.subr.bf16.mxu1 %v1489_v29  ;;  %v1529_v51 = vld [vmem:[%s1665_s8 + $0x4] ss:$12 sps:$4 sm:$0xff]   ;;  %v1530_v59 = vld [vmem:[%s1663_s7 + $0x128] ss:$12 sps:$4 sm:$0xff]  }
  0x3a   : > { %856 = vmatpush1.bf16.msra.mxu0 %v1462_v22  ;;  %879 = vmatprep.mubr.bf16.mxu0 %v1529_v51  ;;  %v1526_v58 = vld [vmem:[%s1663_s7 + $0x80] ss:$12 sps:$4 sm:$0xff]   ;;  %v1514_v60 = vld [vmem:[%s1663_s7 + $0xf0] ss:$12 sps:$4 sm:$0xff]   ;;  %v1532_v63 = vld [vmem:[%s1663_s7 + $0x68] ss:$12 sps:$4 sm:$0xff]  }
  0x3b   : > { %857 = vmatprep.subr.bf16.mxu0 %v1463_v24  ;;  %v1517_v62 = vld [vmem:[%s1663_s7 + $0xdc] ss:$12 sps:$4 sm:$0xff]   ;;  %v1520_v1 = vld [vmem:[%s1663_s7 + $0xd8] ss:$12 sps:$4 sm:$0xff]   ;;  %v1525_v5 = vld [vmem:[%s1663_s7 + $0xc0] ss:$12 sps:$4 sm:$0xff]  }
  0x3c   : > { %907 = vmatpush1.bf16.msra.mxu1 %v1492_v31  ;;  %v1533_v0 = vld [vmem:[%s1663_s7 + $0x110] ss:$12 sps:$4 sm:$0xff]   ;;  %v1536_v4 = vld [vmem:[%s1663_s7 + $0xf8] ss:$12 sps:$4 sm:$0xff]   ;;  %v1540_v8 = vld [vmem:[%s1663_s7 + $0xe0] ss:$12 sps:$4 sm:$0xff]  }
  0x3d   : > { %908 = vmatprep.subr.bf16.mxu1 %v1495_v33  ;;  %v1522_v2 = vld [vmem:[%s1663_s7 + $0xc4] ss:$12 sps:$4 sm:$0xff]   ;;  %v1527_v10 = vld [vmem:[%s1665_s8] ss:$12 sps:$4 sm:$0xff]  }
  0x3e   : > { %858 = vmatpush1.bf16.msra.mxu0 %v1467_v26  ;;  %v1535_v3 = vld [vmem:[%s1663_s7 + $0x50] ss:$12 sps:$4 sm:$0xff]   ;;  %v1538_v6 = vld [vmem:[%s1663_s7 + $0x38] ss:$12 sps:$4 sm:$0xff]   ;;  %v1542_v11 = vld [vmem:[%s1663_s7 + $0x20] ss:$12 sps:$4 sm:$0xff]  }
  0x3f   : > { %859 = vmatprep.subr.bf16.mxu0 %v1469_v27  ;;  %v1531_v7 = vld [vmem:[%s1663_s7 + $0x230] ss:$12 sps:$4 sm:$0xff]   ;;  %v1534_v12 = vld [vmem:[%s1663_s7 + $0x218] ss:$12 sps:$4 sm:$0xff]   ;;  %v1545_v14 = vld [vmem:[%s1663_s7 + $0xc8] ss:$12 sps:$4 sm:$0xff]  }
  0x40   : > { %909 = vmatpush1.bf16.msra.mxu1 %v1498_v36  ;;  %v1547_v15 = vld [vmem:[%s1663_s7 + $0x8] ss:$12 sps:$4 sm:$0xff]   ;;  %v1537_v16 = vld [vmem:[%s1663_s7 + $0x200] ss:$12 sps:$4 sm:$0xff]   ;;  %v1546_v19 = vld [vmem:[%s1663_s7 + $0x1d0] ss:$12 sps:$4 sm:$0xff]  }
  0x41   : > { %910 = vmatprep.subr.bf16.mxu1 %v1501_v37  ;;  %v1541_v18 = vld [vmem:[%s1663_s7 + $0x1e8] ss:$12 sps:$4 sm:$0xff]   ;;  %v1548_v20 = vld [vmem:[%s1663_s7 + $0x1b8] ss:$12 sps:$4 sm:$0xff]   ;;  %v1549_v21 = vld [vmem:[%s1663_s7 + $0x1a0] ss:$12 sps:$4 sm:$0xff]  }
  0x42   : > { %860 = vmatpush1.bf16.msra.mxu0 %v1473_v30  ;;  %v1550_v22 = vld [vmem:[%s1663_s7 + $0x188] ss:$12 sps:$4 sm:$0xff]  }
  0x43   : > { %861 = vmatprep.subr.bf16.mxu0 %v1475_v32  ;;  %v325_v31 = vld [vmem:[#allocation2 + $0x30] sm:$0xff] }
  0x44   : > { %911 = vmatpush1.bf16.msra.mxu1 %v1504_v40 }
  0x45   : > { %912 = vmatprep.subr.bf16.mxu1 %v1507_v41 }
  0x46   : > { %862 = vmatpush1.bf16.msra.mxu0 %v1479_v34  ;;  %v326_v34 = vld [vmem:[#allocation2] sm:$0xff] }
  0x47   : > { %863 = vmatprep.subr.bf16.mxu0 %v1481_v35 }
  0x48   : > { %913 = vmatpush1.bf16.msra.mxu1 %v1510_v44 }
  0x49   : > { %1345 = vmatprep.subr.bf16.mxu1 %v1513_v45 }
  0x4a   : > { %864 = vmatpush2.bf16.msra.mxu0 %v1485_v38  ;;  %v328_v38 = vld [vmem:[#allocation2 + $0x10] sm:$0xff] }
  0x4b   : > { %865 = vmatprep.subr.bf16.mxu0 %v1487_v39  ;;  %931 = vmatmul.mubr.bf16.vlgmr.msra.gmra.mxu1 %v1709_v47 }
  0x4c   : > { %1346 = vmatpush3.bf16.msra.mxu1 %v1516_v49  ;;  %940 = vmatprep.mubr.bf16.mxu1 %v1592_v9  ;;  %v338_v9 = vld [vmem:[%s1665_s8 + $0x18] sm:$0xff] }
  0x4d   : > { %1347 = vmatprep.subr.bf16.mxu1 %v1519_v50  ;;  %v1265_v13 = vcombine.high %v338_v9, %v338_v9  ;;  %v1264_v17 = vcombine.low %v338_v9, %v338_v9 }
  0x4e   : > { %866 = vmatpush2.bf16.msra.mxu0 %v1491_v42  ;;  %v329_v42 = vld [vmem:[#allocation2 + $0x20] sm:$0xff] }
  0x4f   : > { %867 = vmatprep.subr.bf16.mxu0 %v1493_v43 }
  0x50   : > { %1348 = vmatpush3.bf16.msra.mxu1 %v1521_v54 }
  0x51   : > { %1349 = vmatprep.subr.bf16.mxu1 %v1524_v55 }
  0x52   : > { %868 = vmatpush2.bf16.msra.mxu0 %v1497_v46  ;;  %v331_v46 = vld [vmem:[#allocation2 + $0x40] sm:$0xff] }
  0x53   : > { %869 = vmatprep.subr.bf16.mxu0 %v1499_v48  ;;  %941 = vmatmul.mubr.bf16.gmra.mxu1 %v1727_v61 }
  0x54   : > { %1350 = vmatpush3.bf16.msra.mxu1 %v1526_v58  ;;  %981 = vmatprep.mubr.bf16.mxu1 %v1529_v51  ;;  %v332_v51 = vld [vmem:[#allocation2 + $0x38] sm:$0xff] }
  0x55   : > { %1351 = vmatprep.subr.bf16.mxu1 %v1530_v59 }
  0x56   : > { %870 = vmatpush2.bf16.msra.mxu0 %v1503_v52 }
  0x57   : > { %871 = vmatprep.subr.bf16.mxu0 %v1505_v53 }
  0x58   : > { %1352 = vmatpush3.bf16.msra.mxu1 %v1532_v63 }
  0x59   : > { %1353 = vmatprep.subr.bf16.mxu1 %v1533_v0 }
  0x5a   : > { %872 = vmatpush2.bf16.msra.mxu0 %v1509_v56 }
  0x5b   : > { %873 = vmatprep.subr.bf16.mxu0 %v1511_v57 }
  0x5c   : > { %1354 = vmatpush3.bf16.msra.mxu1 %v1535_v3 }
  0x5d   : > { %1355 = vmatprep.subr.bf16.mxu1 %v1536_v4 }
  0x5e   : > { %874 = vmatpush2.bf16.msra.mxu0 %v1514_v60 }
  0x5f   : > { %875 = vmatprep.subr.bf16.mxu0 %v1517_v62 }
  0x60   : > { %1356 = vmatpush3.bf16.msra.mxu1 %v1538_v6  ;;  %v327_v6 = vld [vmem:[#allocation2 + $0x18] sm:$0xff] }
  0x61   : > { %1357 = vmatprep.subr.bf16.mxu1 %v1540_v8 }
  0x62   : > { %876 = vmatpush2.bf16.msra.mxu0 %v1520_v1 }
  0x63   : > { %877 = vmatprep.subr.bf16.mxu0 %v1522_v2  ;;  %v333_v2 = vld [vmem:[#allocation2 + $0x8] sm:$0xff] }
  0x64   : > { %1358 = vmatpush3.bf16.msra.mxu1 %v1542_v11 }
  0x65   : > { %1359 = vmatprep.subr.bf16.mxu1 %v1545_v14 }
  0x66   : > { %878 = vmatpush2.bf16.msra.mxu0 %v1525_v5 }
  0x67   : > { %1383 = vmatprep.subr.bf16.mxu0 %v1531_v7 }
  0x68   : > { %1360 = vmatpush3.bf16.msra.mxu1 %v1547_v15 }
  0x69   : > { %880 = vmatmul.mubr.bf16.vlgmr.msra.gmra.mxu0 %v1527_v10 }
  0x6a   : > { %1384 = vmatpush3.bf16.msra.mxu0 %v1531_v7  ;;  %889 = vmatprep.mubr.bf16.mxu0 %v1265_v13 }
  0x6b   : > { %1385 = vmatprep.subr.bf16.mxu0 %v1534_v12  ;;  %982 = vmatmul.mubr.bf16.vlgmr.msra.gmra.mxu1 %v1527_v10 }
  0x6c   : > { %989 = vmatprep.mubr.bf16.mxu1 %v1265_v13  ;;  %v330_v13 = vld [vmem:[#allocation2 + $0x28] sm:$0xff] }
  0x6e   : > { %1386 = vmatpush3.bf16.msra.mxu0 %v1534_v12 }
  0x6f   : > { %1387 = vmatprep.subr.bf16.mxu0 %v1537_v16 }
  0x71   : > { %890 = vmatmul.mubr.bf16.gmra.mxu0 %v1264_v17 }
  0x72   : > { %1388 = vmatpush3.bf16.msra.mxu0 %v1537_v16  ;;  %1399 = vmatprep.mubr.bf16.mxu0 %v1709_v47 }
  0x73   : > { %1389 = vmatprep.subr.bf16.mxu0 %v1541_v18  ;;  %990 = vmatmul.mubr.bf16.gmra.mxu1 %v1264_v17 }
  0x76   : > { %1390 = vmatpush3.bf16.msra.mxu0 %v1541_v18 }
  0x77   : > { %1391 = vmatprep.subr.bf16.mxu0 %v1546_v19 }
  0x7a   : > { %1392 = vmatpush3.bf16.msra.mxu0 %v1546_v19 }
  0x7b   : > { %1393 = vmatprep.subr.bf16.mxu0 %v1548_v20 }
  0x7e   : > { %1394 = vmatpush3.bf16.msra.mxu0 %v1548_v20 }
  0x7f   : > { %1395 = vmatprep.subr.bf16.mxu0 %v1549_v21 }
  0x82   : > { %1396 = vmatpush3.bf16.msra.mxu0 %v1549_v21 }
  0x83   : > { %1397 = vmatprep.subr.bf16.mxu0 %v1550_v22 }
  0x86   : > { %1398 = vmatpush3.bf16.msra.mxu0 %v1550_v22 }
  0x89   : > { %1400 = vmatmul.mubr.bf16.vlgmr.msra.gmra.mxu0 %v1727_v61 }
 0x10b   : > { %v932_v23 = vpop.f32.mrf.mxu1 }
 0x10d   : > { %v934_v24 = vpop.f32.mrf.mxu1 }
 0x10f   : > { %v936_v25 = vpop.f32.mrf.mxu1 }
 0x111   : > { %v938_v26 = vpop.f32.mrf.mxu1 }
 0x113   : > { %v942_v27 = vpop.f32.mrf.mxu1 }
 0x115   : > { %v944_v28 = vpop.f32.mrf.mxu1 }
 0x117   : > { %v946_v29 = vpop.f32.mrf.mxu1 }
 0x119   : > { %v947_v30 = vpop.f32.mrf.mxu1 }
 0x129   : > { %v881_v32 = vpop.f32.mrf.mxu0 }
 0x12a   : > { %v933_v33 = vadd.f32 %v932_v23, %v881_v32 }
 0x12b   : > { %v883_v35 = vpop.f32.mrf.mxu0  ;;  %v1361_v48 = vpop.f32.mrf.mxu1 }
 0x12c   : > { %v1045_v36 = vadd.f32 %v933_v33, %v325_v31  ;;  %v935_v37 = vadd.f32 %v934_v24, %v883_v35 }
 0x12d   : > { %v885_v39 = vpop.f32.mrf.mxu0  ;;  %v1362_v53 = vpop.f32.mrf.mxu1 }
 0x12e   : > { %1054 = vst [vmem:[#allocation2 + $0x30] sm:$0xff] %v1045_v36  ;;  %v1046_v40 = vadd.f32 %v935_v37, %v326_v34  ;;  %v937_v41 = vadd.f32 %v936_v25, %v885_v39  ;;  %v1363_v4 = vadd.f32 %v1362_v53, %v1361_v48 }
 0x12f   : > { %v887_v43 = vpop.f32.mrf.mxu0  ;;  %v1364_v57 = vpop.f32.mrf.mxu1 }
 0x130   : > { %1055 = vst [vmem:[#allocation2] sm:$0xff] %v1046_v40  ;;  %v1048_v44 = vadd.f32 %v937_v41, %v328_v38  ;;  %v939_v45 = vadd.f32 %v938_v26, %v887_v43 }
 0x131   : > { %v891_v47 = vpop.f32.mrf.mxu0  ;;  %v1365_v60 = vpop.f32.mrf.mxu1 }
 0x132   : > { %1057 = vst [vmem:[#allocation2 + $0x10] sm:$0xff] %v1048_v44  ;;  %v1049_v49 = vadd.f32 %v939_v45, %v329_v42  ;;  %v943_v50 = vadd.f32 %v942_v27, %v891_v47  ;;  %v1366_v11 = vadd.f32 %v1365_v60, %v1364_v57 }
 0x133   : > { %v893_v52 = vpop.f32.mrf.mxu0  ;;  %v1367_v61 = vpop.f32.mrf.mxu1 }
 0x134   : > { %1058 = vst [vmem:[#allocation2 + $0x20] sm:$0xff] %v1049_v49  ;;  %v1051_v54 = vadd.f32 %v943_v50, %v331_v46  ;;  %v945_v55 = vadd.f32 %v944_v28, %v893_v52 }
 0x135   : > { %v895_v56 = vpop.f32.mrf.mxu0  ;;  %v1368_v62 = vpop.f32.mrf.mxu1 }
 0x136   : > { %1060 = vst [vmem:[#allocation2 + $0x40] sm:$0xff] %v1051_v54  ;;  %v1052_v58 = vadd.f32 %v945_v55, %v332_v51  ;;  %v1369_v1 = vadd.f32 %v1368_v62, %v1367_v61 }
 0x137   : > { %v896_v59 = vpop.f32.mrf.mxu0  ;;  %v1370_v63 = vpop.f32.mrf.mxu1 }
 0x138   : > { %1061 = vst [vmem:[#allocation2 + $0x38] sm:$0xff] %v1052_v58 }
 0x139   : > { %v1371_v0 = vpop.f32.mrf.mxu1 }
 0x149   : > { %v1401_v3 = vpop.f32.mrf.mxu0 }
 0x14a   : > { %v1040_v5 = vadd.f32 %v1401_v3, %v1369_v1 }
 0x14b   : > { %v1031_v7 = vpop.f32.mrf.mxu0 }
 0x14c   : > { %v1053_v8 = vadd.f32 %v1040_v5, %v333_v2  ;;  %v1032_v9 = vadd.f32 %v1363_v4, %v1031_v7 }
 0x14d   : > { %v1402_v10 = vpop.f32.mrf.mxu0 }
 0x14e   : > { %1062 = vst [vmem:[#allocation2 + $0x8] sm:$0xff] %v1053_v8  ;;  %v1047_v12 = vadd.f32 %v1032_v9, %v327_v6 }
 0x14f   : > { %v1034_v14 = vpop.f32.mrf.mxu0 }
 0x150   : > { %1056 = vst [vmem:[#allocation2 + $0x18] sm:$0xff] %v1047_v12  ;;  %v1035_v15 = vadd.f32 %v1366_v11, %v1034_v14  ;;  %1066 = sbr.rel (%p1339_p11) target bundleno = 358 (0x166), region = 66 }
 0x152   : > { %v1050_v16 = vadd.f32 %v1035_v15, %v330_v13 }
 0x154   : > { %1059 = vst [vmem:[#allocation2 + $0x28] sm:$0xff] %v1050_v16 }
 0x155   : > { %v1078_v17 = vlaneseq  ;;  %v1076_v19 = vld [vmem:[%s1803_s2] sm:$0x7]  ;;  %v1067_v20 = vld [vmem:[#allocation2 + $0x30] sm:$0xff]  ;;  %v1074_v33 = vld [vmem:[#allocation2 + $0x38] sm:$0xff] }
 0x156   : > { %v1068_v22 = vld [vmem:[#allocation2] sm:$0xff]  ;;  %v1070_v26 = vld [vmem:[#allocation2 + $0x10] sm:$0xff]  ;;  %v1075_v42 = vld [vmem:[#allocation2 + $0x8] sm:$0xff] }
 0x157   : > { %v1079_v18 = vshrl.u32 %v1078_v17, 7  ;;  %v1069_v25 = vld [vmem:[#allocation2 + $0x18] sm:$0xff]  ;;  %v1071_v27 = vld [vmem:[#allocation2 + $0x20] sm:$0xff] }
 0x158   : > { %v1073_v32 = vld [vmem:[#allocation2 + $0x40] sm:$0xff] }
 0x159   : > { %v1080_v21 = vsub.s32 0, %v1079_v18  ;;  %v1084_v23 = vsub.s32 1, %v1079_v18  ;;  %v1088_v24 = vsub.s32 2, %v1079_v18 }
 0x15b   : > { %v1081_v28 = vrot.slane %v1076_v19, %v1080_v21  ;;  %v1085_v29 = vrot.slane %v1076_v19, %v1084_v23  ;;  %v1089_v30 = vrot.slane %v1076_v19, %v1088_v24  ;;  %v1072_v31 = vld [vmem:[#allocation2 + $0x28] sm:$0xff] }
 0x15d   : > { %v1093_v34 = vadd.f32 %v1081_v28, %v1067_v20  ;;  %v1094_v35 = vadd.f32 %v1085_v29, %v1068_v22  ;;  %v1095_v36 = vadd.f32 %v1089_v30, %v1069_v25  ;;  %v1096_v37 = vadd.f32 %v1081_v28, %v1070_v26 }
 0x15e   : > { %v1097_v38 = vadd.f32 %v1085_v29, %v1071_v27  ;;  %v1098_v39 = vadd.f32 %v1089_v30, %v1072_v31  ;;  %v1099_v40 = vadd.f32 %v1081_v28, %v1073_v32  ;;  %v1100_v41 = vadd.f32 %v1085_v29, %v1074_v33 }
 0x15f   : > { %v1102_v43 = vmax.f32 %v1093_v34, 0.0  ;;  %v1103_v44 = vmax.f32 %v1094_v35, 0.0  ;;  %v1104_v45 = vmax.f32 %v1095_v36, 0.0  ;;  %v1105_v46 = vmax.f32 %v1096_v37, 0.0 }
 0x160   : > { %v1106_v47 = vmax.f32 %v1097_v38, 0.0  ;;  %v1107_v48 = vmax.f32 %v1098_v39, 0.0  ;;  %v1108_v49 = vmax.f32 %v1099_v40, 0.0  ;;  %v1109_v50 = vmax.f32 %v1100_v41, 0.0 }
 0x161   : > { %1111 = vst [vmem:[%s1804_s3] sm:$0xff] %v1102_v43  ;;  %1112 = vst [vmem:[%s1804_s3 + $0x8] sm:$0xff] %v1103_v44  ;;  %v1101_v51 = vadd.f32 %v1089_v30, %v1075_v42 }
 0x162   : > { %1113 = vst [vmem:[%s1804_s3 + $0x10] sm:$0xff] %v1104_v45  ;;  %1114 = vst [vmem:[%s1804_s3 + $0x18] sm:$0xff] %v1105_v46 }
 0x163   : > { %1115 = vst [vmem:[%s1804_s3 + $0x20] sm:$0xff] %v1106_v47  ;;  %1116 = vst [vmem:[%s1804_s3 + $0x28] sm:$0xff] %v1107_v48  ;;  %v1110_v52 = vmax.f32 %v1101_v51, 0.0 }
 0x164   : > { %1117 = vst [vmem:[%s1804_s3 + $0x30] sm:$0xff] %v1108_v49  ;;  %1118 = vst [vmem:[%s1804_s3 + $0x38] sm:$0xff] %v1109_v50 }
 0x165   : > { %1119 = vst [vmem:[%s1804_s3 + $0x40] sm:$0xff] %v1110_v52 }
 0x166 PF: > { %s13_s16 = sadd.s32 1, %s1589_s16   ;;  %s1805_s12 = smov %s1577_s13 }
 0x167   : > { %p10_p12 = scmp.ge.s32.totalorder %s13_s16, 8   ;;  %s1806_s13 = smov %s1648_s20 }
 0x168   : > { %s1807_s14 = smov %s1585_s15  ;;  %s1808_s15 = smov %s1810_s17 }
 0x169   :  { %12 = sbr.rel (!%p10_p12) target bundleno = 3 (0x3), region = 113 }

// kernel: alexnet_forward.16
= control target key start
LH: loop header
LB: loop body
LE: loop exit
PB: predicated region body
PF: predicated region fallthrough
CT: control target
= control target key end

     0   :  { %s1613_s12 = smov 0   ;;  %s1615_s13 = smov 0   ;;  %s1801_s0 = inlined_call_operand.vmem [shape: bf16[24,3456], index: 0, kind: input, shape index: {}]   ;;  %s1802_s1 = inlined_call_operand.vmem [shape: bf16[3456,384], index: 1, kind: input, shape index: {}]   ;;  %s1803_s2 = inlined_call_operand.vmem [shape: f32[1,384], index: 2, kind: input, shape index: {}]   ;;  %s1804_s3 = inlined_call_operand.vmem [shape: f32[24,384], index: 3, kind: output, shape index: {}]  }
   0x1   :  { %s1617_s14 = smov 0   ;;  %s1619_s15 = smov 0  }
   0x2   :  { %s1621_s16 = smov 0  }
   0x3 LB: > { %s25_s17 = sadd.s32 1, %s1585_s15  ;;  %p48_p1 = scmp.ne.s32.totalorder %s1577_s13, %s1573_s12  ;;  %s1589_s16 = sphi %s1621_s16, %s13_s16   ;;  %s1585_s15 = sphi %s1619_s15, %s1808_s15   ;;  %s1581_s14 = sphi %s1617_s14, %s1807_s14   ;;  %s1577_s13 = sphi %s1615_s13, %s1806_s13   ;;  %s1573_s12 = sphi %s1613_s12, %s1805_s12  }
   0x4   : > { %p26_p0 = scmp.ge.s32.totalorder %s25_s17, 9  ;;  %p49_p2 = scmp.eq.s32.totalorder %s1589_s16, 0 }
   0x5   : > { %s41_s19 = sadd.s32 1, %s1577_s13  ;;  %p1250_p5 = scmp.ge.s32.totalorder %s1589_s16, 9 }
   0x6   : > { %s1810_s17 = smov (%p26_p0, %s25_s17), 0  ;;  %p50_p3 = por %p49_p2, %p48_p1 }
   0x7   : > { %s37_s18 = ssub.s32 %s1585_s15, %s1810_s17  ;;  %164 = sbr.rel (%p1250_p5) target bundleno = 20 (0x14), region = 20 }
   0x8   : > { %p39_p4 = scmp.eq.s32.totalorder %s37_s18, 0 }
   0xa   : > { %s1648_s20 = scalar_select %p39_p4, %s1577_s13, %s41_s19  }
   0xc   : > { %167 = sbr.rel (!%p50_p3) target bundleno = 20 (0x14), region = 24  ;;  %s169_s21 = sand.u32 (%p50_p3), 1, %s1577_s13  }
   0xd   : > { %s1344_s22 = smul.u32 (%p50_p3), 12, %s1585_s15 }
   0xe   : > { %s1403_s23 = smul.u32 (%p50_p3), 36, %s169_s21 }
   0xf   : > { %s177_s26 = scalar_lea.vmem (%p50_p3), %s1801_s0, %s1344_s22 }
  0x10   : > { %v192_v0 = vld [vmem:[%s177_s26] sm:$0xff] (%p50_p3)  ;;  %v194_v1 = vld [vmem:[%s177_s26 + $0x6c] sm:$0xff] (%p50_p3)  ;;  %v196_v2 = vld [vmem:[%s177_s26 + $0xd8] sm:$0xff] (%p50_p3)  ;;  %s171_s27 = scalar_lea.vmem (%p50_p3), [#allocation3], %s1403_s23 }
  0x11   : > { %193 = vst [vmem:[%s171_s27] sm:$0xff] %v192_v0  ;;  %195 = vst [vmem:[%s171_s27 + $0xc] sm:$0xff] %v194_v1  ;;  %v1252_v3 = vld [vmem:[%s177_s26 + $0x8] sm:$0xf]  ;;  %v1254_v4 = vld [vmem:[%s177_s26 + $0x74] sm:$0xf] }
  0x12   : > { %197 = vst [vmem:[%s171_s27 + $0x18] sm:$0xff] %v196_v2  ;;  %v1256_v5 = vld [vmem:[%s177_s26 + $0xe0] sm:$0xf]  ;;  %1253 = vst [vmem:[%s171_s27 + $0x8] sm:$0xf] %v1252_v3 }
  0x13   : > { %1255 = vst [vmem:[%s171_s27 + $0x14] sm:$0xf] %v1254_v4  ;;  %1257 = vst [vmem:[%s171_s27 + $0x20] sm:$0xf] %v1256_v5 }
  0x14 PF: > { %p1258_p6 = scmp.ge.s32.totalorder %s1589_s16, 1  ;;  %p231_p7 = scmp.lt.s32.totalorder %s1589_s16, 10 }
  0x16   : > { %p232_p8 = pnand %p1258_p6, %p231_p7 }
  0x17   : > { %s238_s28 = sand.u32 (!%p232_p8), 1, %s1573_s12   ;;  %s282_s29 = smul.u32 (!%p232_p8), 48, %s1581_s14 }
  0x18   : > { %235 = sbr.rel (%p232_p8) target bundleno = 358 (0x166), region = 54  ;;  %p1260_p10 = scmp.ne.s32.totalorder (!%p232_p8), %s1581_s14, 0 }
  0x19   : > { %s1404_s30 = smul.u32 (!%p232_p8), 36, %s238_s28  ;;  %p284_p9 = scmp.lt.s32.totalorder (!%p232_p8), %s282_s29, 431 }
  0x1b   : > { %s1665_s8 = scalar_lea.vmem (!%p232_p8), [#allocation3], %s1404_s30 }
  0x1d   : > { %s1812_s29 = smov (!%p284_p9, %s282_s29), 431  ;;  %315 = sbr.rel (%p1260_p10) target bundleno = 40 (0x28), region = 62 }
  0x1e   : > { %s1405_s4 = smul.u32 12, %s1812_s29 }
  0x20   : > { %s1663_s7 = scalar_lea.vmem %s1802_s1, %s1405_s4 }
  0x22   : > { %v1591_v6 = vmov 0.0  }
  0x23   : > { %316 = vst [vmem:[#allocation2 + $0x30] sm:$0xff] %v1591_v6  ;;  %317 = vst [vmem:[#allocation2] sm:$0xff] %v1591_v6 }
  0x24   : > { %318 = vst [vmem:[#allocation2 + $0x18] sm:$0xff] %v1591_v6  ;;  %319 = vst [vmem:[#allocation2 + $0x10] sm:$0xff] %v1591_v6 }
  0x25   : > { %320 = vst [vmem:[#allocation2 + $0x20] sm:$0xff] %v1591_v6  ;;  %321 = vst [vmem:[#allocation2 + $0x28] sm:$0xff] %v1591_v6 }
  0x26   : > { %322 = vst [vmem:[#allocation2 + $0x40] sm:$0xff] %v1591_v6  ;;  %323 = vst [vmem:[#allocation2 + $0x38] sm:$0xff] %v1591_v6 }
  0x27   : > { %324 = vst [vmem:[#allocation2 + $0x8] sm:$0xff] %v1591_v6 }
  0x28 PF: > { %v1448_v7 = vld [vmem:[%s1663_s7 + $0xac] ss:$12 sps:$4 sm:$0xff]   ;;  %v1450_v8 = vld [vmem:[%s1663_s7 + $0xa8] ss:$12 sps:$4 sm:$0xff]   ;;  %v1592_v9 = vmov 0   ;;  %p1339_p11 = scmp.ne.s32.totalorder %s1581_s14, 8 }
  0x29   : > { %930 = vmatprep.mubr.bf16.mxu1 %v1592_v9  ;;  %847 = vmatprep.subr.bf16.mxu0 %v1448_v7  ;;  %v1451_v10 = vld [vmem:[%s1663_s7 + $0x94] ss:$12 sps:$4 sm:$0xff]   ;;  %v1453_v11 = vld [vmem:[%s1663_s7 + $0x90] ss:$12 sps:$4 sm:$0xff]   ;;  %v1456_v13 = vld [vmem:[%s1663_s7 + $0x78] ss:$12 sps:$4 sm:$0xff]  }
  0x2a   : > { %848 = vmatpush1.bf16.msra.mxu0 %v1450_v8  ;;  %v1454_v12 = vld [vmem:[%s1663_s7 + $0x7c] ss:$12 sps:$4 sm:$0xff]   ;;  %v1457_v14 = vld [vmem:[%s1663_s7 + $0x64] ss:$12 sps:$4 sm:$0xff]   ;;  %v1465_v15 = vld [vmem:[%s1663_s7 + $0x22c] ss:$12 sps:$4 sm:$0xff]  }
  0x2b   : > { %849 = vmatprep.subr.bf16.mxu0 %v1451_v10  ;;  %v1468_v16 = vld [vmem:[%s1663_s7 + $0x228] ss:$12 sps:$4 sm:$0xff]   ;;  %898 = vmatprep.subr.bf16.mxu1 %v1465_v15  ;;  %v1459_v17 = vld [vmem:[%s1663_s7 + $0x60] ss:$12 sps:$4 sm:$0xff]   ;;  %v1474_v19 = vld [vmem:[%s1663_s7 + $0x210] ss:$12 sps:$4 sm:$0xff]  }
  0x2c   : > { %899 = vmatpush1.bf16.msra.mxu1 %v1468_v16  ;;  %v1471_v18 = vld [vmem:[%s1663_s7 + $0x214] ss:$12 sps:$4 sm:$0xff]   ;;  %v1460_v20 = vld [vmem:[%s1663_s7 + $0x4c] ss:$12 sps:$4 sm:$0xff]   ;;  %v1477_v21 = vld [vmem:[%s1663_s7 + $0x1fc] ss:$12 sps:$4 sm:$0xff]  }
  0x2d   : > { %900 = vmatprep.subr.bf16.mxu1 %v1471_v18  ;;  %v1462_v22 = vld [vmem:[%s1663_s7 + $0x48] ss:$12 sps:$4 sm:$0xff]   ;;  %v1480_v23 = vld [vmem:[%s1663_s7 + $0x1f8] ss:$12 sps:$4 sm:$0xff]   ;;  %v1467_v26 = vld [vmem:[%s1663_s7 + $0x30] ss:$12 sps:$4 sm:$0xff]  }
  0x2e   : > { %850 = vmatpush1.bf16.msra.mxu0 %v1453_v11  ;;  %v1463_v24 = vld [vmem:[%s1663_s7 + $0x34] ss:$12 sps:$4 sm:$0xff]   ;;  %v1483_v25 = vld [vmem:[%s1663_s7 + $0x1e4] ss:$12 sps:$4 sm:$0xff]   ;;  %v1469_v27 = vld [vmem:[%s1663_s7 + $0x1c] ss:$12 sps:$4 sm:$0xff]  }
  0x2f   : > { %851 = vmatprep.subr.bf16.mxu0 %v1454_v12  ;;  %v1486_v28 = vld [vmem:[%s1663_s7 + $0x1e0] ss:$12 sps:$4 sm:$0xff]   ;;  %v1473_v30 = vld [vmem:[%s1663_s7 + $0x18] ss:$12 sps:$4 sm:$0xff]   ;;  %v1492_v31 = vld [vmem:[%s1663_s7 + $0x1c8] ss:$12 sps:$4 sm:$0xff]  }
  0x30   : > { %901 = vmatpush1.bf16.msra.mxu1 %v1474_v19  ;;  %v1489_v29 = vld [vmem:[%s1663_s7 + $0x1cc] ss:$12 sps:$4 sm:$0xff]   ;;  %v1475_v32 = vld [vmem:[%s1663_s7 + $0x4] ss:$12 sps:$4 sm:$0xff]   ;;  %v1495_v33 = vld [vmem:[%s1663_s7 + $0x1b4] ss:$12 sps:$4 sm:$0xff]  }
  0x31   : > { %902 = vmatprep.subr.bf16.mxu1 %v1477_v21  ;;  %v1479_v34 = vld [vmem:[%s1663_s7] ss:$12 sps:$4 sm:$0xff]   ;;  %v1498_v36 = vld [vmem:[%s1663_s7 + $0x1b0] ss:$12 sps:$4 sm:$0xff]   ;;  %v1485_v38 = vld [vmem:[%s1663_s7 + $0x168] ss:$12 sps:$4 sm:$0xff]  }
  0x32   : > { %852 = vmatpush1.bf16.msra.mxu0 %v1456_v13  ;;  %v1481_v35 = vld [vmem:[%s1663_s7 + $0x16c] ss:$12 sps:$4 sm:$0xff]   ;;  %v1501_v37 = vld [vmem:[%s1663_s7 + $0x19c] ss:$12 sps:$4 sm:$0xff]   ;;  %v1487_v39 = vld [vmem:[%s1663_s7 + $0x154] ss:$12 sps:$4 sm:$0xff]  }
  0x33   : > { %853 = vmatprep.subr.bf16.mxu0 %v1457_v14  ;;  %v1504_v40 = vld [vmem:[%s1663_s7 + $0x198] ss:$12 sps:$4 sm:$0xff]   ;;  %v1491_v42 = vld [vmem:[%s1663_s7 + $0x150] ss:$12 sps:$4 sm:$0xff]   ;;  %v1510_v44 = vld [vmem:[%s1663_s7 + $0x180] ss:$12 sps:$4 sm:$0xff]  }
  0x34   : > { %903 = vmatpush1.bf16.msra.mxu1 %v1480_v23  ;;  %v1507_v41 = vld [vmem:[%s1663_s7 + $0x184] ss:$12 sps:$4 sm:$0xff]   ;;  %v1493_v43 = vld [vmem:[%s1663_s7 + $0x13c] ss:$12 sps:$4 sm:$0xff]   ;;  %v1503_v52 = vld [vmem:[%s1663_s7 + $0x120] ss:$12 sps:$4 sm:$0xff]  }
  0x35   : > { %904 = vmatprep.subr.bf16.mxu1 %v1483_v25  ;;  %v1513_v45 = vld [vmem:[%s1663_s7 + $0x170] ss:$12 sps:$4 sm:$0xff]   ;;  %v1497_v46 = vld [vmem:[%s1663_s7 + $0x138] ss:$12 sps:$4 sm:$0xff]   ;;  %v1524_v55 = vld [vmem:[%s1663_s7 + $0x140] ss:$12 sps:$4 sm:$0xff]  }
  0x36   : > { %854 = vmatpush1.bf16.msra.mxu0 %v1459_v17  ;;  %v1709_v47 = vld [vmem:[%s1665_s8 + $0x8] ss:$12 sps:$4 sm:$0xff]   ;;  %v1519_v50 = vld [vmem:[%s1663_s7 + $0x158] ss:$12 sps:$4 sm:$0xff]   ;;  %v1727_v61 = vld [vmem:[%s1665_s8 + $0x20] ss:$0 sps:$4 sm:$0xff]  }
  0x37   : > { %855 = vmatprep.subr.bf16.mxu0 %v1460_v20  ;;  %v1499_v48 = vld [vmem:[%s1663_s7 + $0x124] ss:$12 sps:$4 sm:$0xff]   ;;  %v1505_v53 = vld [vmem:[%s1663_s7 + $0x10c] ss:$12 sps:$4 sm:$0xff]   ;;  %v1509_v56 = vld [vmem:[%s1663_s7 + $0x108] ss:$12 sps:$4 sm:$0xff]  }
  0x38   : > { %905 = vmatpush1.bf16.msra.mxu1 %v1486_v28  ;;  %v1516_v49 = vld [vmem:[%s1663_s7 + $0xb0] ss:$12 sps:$4 sm:$0xff]   ;;  %v1521_v54 = vld [vmem:[%s1663_s7 + $0x98] ss:$12 sps:$4 sm:$0xff]   ;;  %v1511_v57 = vld [vmem:[%s1663_s7 + $0xf4] ss:$12 sps:$4 sm:$0xff]  }
  0x39   : > { %906 = vmatprep.subr.bf16.mxu1 %v1489_v29  ;;  %v1529_v51 = vld [vmem:[%s1665_s8 + $0x4] ss:$12 sps:$4 sm:$0xff]   ;;  %v1530_v59 = vld [vmem:[%s1663_s7 + $0x128] ss:$12 sps:$4 sm:$0xff]  }
  0x3a   : > { %856 = vmatpush1.bf16.msra.mxu0 %v1462_v22  ;;  %879 = vmatprep.mubr.bf16.mxu0 %v1529_v51  ;;  %v1526_v58 = vld [vmem:[%s1663_s7 + $0x80] ss:$12 sps:$4 sm:$0xff]   ;;  %v1514_v60 = vld [vmem:[%s1663_s7 + $0xf0] ss:$12 sps:$4 sm:$0xff]   ;;  %v1532_v63 = vld [vmem:[%s1663_s7 + $0x68] ss:$12 sps:$4 sm:$0xff]  }
  0x3b   : > { %857 = vmatprep.subr.bf16.mxu0 %v1463_v24  ;;  %v1517_v62 = vld [vmem:[%s1663_s7 + $0xdc] ss:$12 sps:$4 sm:$0xff]   ;;  %v1520_v1 = vld [vmem:[%s1663_s7 + $0xd8] ss:$12 sps:$4 sm:$0xff]   ;;  %v1525_v5 = vld [vmem:[%s1663_s7 + $0xc0] ss:$12 sps:$4 sm:$0xff]  }
  0x3c   : > { %907 = vmatpush1.bf16.msra.mxu1 %v1492_v31  ;;  %v1533_v0 = vld [vmem:[%s1663_s7 + $0x110] ss:$12 sps:$4 sm:$0xff]   ;;  %v1536_v4 = vld [vmem:[%s1663_s7 + $0xf8] ss:$12 sps:$4 sm:$0xff]   ;;  %v1540_v8 = vld [vmem:[%s1663_s7 + $0xe0] ss:$12 sps:$4 sm:$0xff]  }
  0x3d   : > { %908 = vmatprep.subr.bf16.mxu1 %v1495_v33  ;;  %v1522_v2 = vld [vmem:[%s1663_s7 + $0xc4] ss:$12 sps:$4 sm:$0xff]   ;;  %v1527_v10 = vld [vmem:[%s1665_s8] ss:$12 sps:$4 sm:$0xff]  }
  0x3e   : > { %858 = vmatpush1.bf16.msra.mxu0 %v1467_v26  ;;  %v1535_v3 = vld [vmem:[%s1663_s7 + $0x50] ss:$12 sps:$4 sm:$0xff]   ;;  %v1538_v6 = vld [vmem:[%s1663_s7 + $0x38] ss:$12 sps:$4 sm:$0xff]   ;;  %v1542_v11 = vld [vmem:[%s1663_s7 + $0x20] ss:$12 sps:$4 sm:$0xff]  }
  0x3f   : > { %859 = vmatprep.subr.bf16.mxu0 %v1469_v27  ;;  %v1531_v7 = vld [vmem:[%s1663_s7 + $0x230] ss:$12 sps:$4 sm:$0xff]   ;;  %v1534_v12 = vld [vmem:[%s1663_s7 + $0x218] ss:$12 sps:$4 sm:$0xff]   ;;  %v1545_v14 = vld [vmem:[%s1663_s7 + $0xc8] ss:$12 sps:$4 sm:$0xff]  }
  0x40   : > { %909 = vmatpush1.bf16.msra.mxu1 %v1498_v36  ;;  %v1547_v15 = vld [vmem:[%s1663_s7 + $0x8] ss:$12 sps:$4 sm:$0xff]   ;;  %v1537_v16 = vld [vmem:[%s1663_s7 + $0x200] ss:$12 sps:$4 sm:$0xff]   ;;  %v1546_v19 = vld [vmem:[%s1663_s7 + $0x1d0] ss:$12 sps:$4 sm:$0xff]  }
  0x41   : > { %910 = vmatprep.subr.bf16.mxu1 %v1501_v37  ;;  %v1541_v18 = vld [vmem:[%s1663_s7 + $0x1e8] ss:$12 sps:$4 sm:$0xff]   ;;  %v1548_v20 = vld [vmem:[%s1663_s7 + $0x1b8] ss:$12 sps:$4 sm:$0xff]   ;;  %v1549_v21 = vld [vmem:[%s1663_s7 + $0x1a0] ss:$12 sps:$4 sm:$0xff]  }
  0x42   : > { %860 = vmatpush1.bf16.msra.mxu0 %v1473_v30  ;;  %v1550_v22 = vld [vmem:[%s1663_s7 + $0x188] ss:$12 sps:$4 sm:$0xff]  }
  0x43   : > { %861 = vmatprep.subr.bf16.mxu0 %v1475_v32  ;;  %v325_v31 = vld [vmem:[#allocation2 + $0x30] sm:$0xff] }
  0x44   : > { %911 = vmatpush1.bf16.msra.mxu1 %v1504_v40 }
  0x45   : > { %912 = vmatprep.subr.bf16.mxu1 %v1507_v41 }
  0x46   : > { %862 = vmatpush1.bf16.msra.mxu0 %v1479_v34  ;;  %v326_v34 = vld [vmem:[#allocation2] sm:$0xff] }
  0x47   : > { %863 = vmatprep.subr.bf16.mxu0 %v1481_v35 }
  0x48   : > { %913 = vmatpush1.bf16.msra.mxu1 %v1510_v44 }
  0x49   : > { %1345 = vmatprep.subr.bf16.mxu1 %v1513_v45 }
  0x4a   : > { %864 = vmatpush2.bf16.msra.mxu0 %v1485_v38  ;;  %v328_v38 = vld [vmem:[#allocation2 + $0x10] sm:$0xff] }
  0x4b   : > { %865 = vmatprep.subr.bf16.mxu0 %v1487_v39  ;;  %931 = vmatmul.mubr.bf16.vlgmr.msra.gmra.mxu1 %v1709_v47 }
  0x4c   : > { %1346 = vmatpush3.bf16.msra.mxu1 %v1516_v49  ;;  %940 = vmatprep.mubr.bf16.mxu1 %v1592_v9  ;;  %v338_v9 = vld [vmem:[%s1665_s8 + $0x18] sm:$0xff] }
  0x4d   : > { %1347 = vmatprep.subr.bf16.mxu1 %v1519_v50  ;;  %v1265_v13 = vcombine.high %v338_v9, %v338_v9  ;;  %v1264_v17 = vcombine.low %v338_v9, %v338_v9 }
  0x4e   : > { %866 = vmatpush2.bf16.msra.mxu0 %v1491_v42  ;;  %v329_v42 = vld [vmem:[#allocation2 + $0x20] sm:$0xff] }
  0x4f   : > { %867 = vmatprep.subr.bf16.mxu0 %v1493_v43 }
  0x50   : > { %1348 = vmatpush3.bf16.msra.mxu1 %v1521_v54 }
  0x51   : > { %1349 = vmatprep.subr.bf16.mxu1 %v1524_v55 }
  0x52   : > { %868 = vmatpush2.bf16.msra.mxu0 %v1497_v46  ;;  %v331_v46 = vld [vmem:[#allocation2 + $0x40] sm:$0xff] }
  0x53   : > { %869 = vmatprep.subr.bf16.mxu0 %v1499_v48  ;;  %941 = vmatmul.mubr.bf16.gmra.mxu1 %v1727_v61 }
  0x54   : > { %1350 = vmatpush3.bf16.msra.mxu1 %v1526_v58  ;;  %981 = vmatprep.mubr.bf16.mxu1 %v1529_v51  ;;  %v332_v51 = vld [vmem:[#allocation2 + $0x38] sm:$0xff] }
  0x55   : > { %1351 = vmatprep.subr.bf16.mxu1 %v1530_v59 }
  0x56   : > { %870 = vmatpush2.bf16.msra.mxu0 %v1503_v52 }
  0x57   : > { %871 = vmatprep.subr.bf16.mxu0 %v1505_v53 }
  0x58   : > { %1352 = vmatpush3.bf16.msra.mxu1 %v1532_v63 }
  0x59   : > { %1353 = vmatprep.subr.bf16.mxu1 %v1533_v0 }
  0x5a   : > { %872 = vmatpush2.bf16.msra.mxu0 %v1509_v56 }
  0x5b   : > { %873 = vmatprep.subr.bf16.mxu0 %v1511_v57 }
  0x5c   : > { %1354 = vmatpush3.bf16.msra.mxu1 %v1535_v3 }
  0x5d   : > { %1355 = vmatprep.subr.bf16.mxu1 %v1536_v4 }
  0x5e   : > { %874 = vmatpush2.bf16.msra.mxu0 %v1514_v60 }
  0x5f   : > { %875 = vmatprep.subr.bf16.mxu0 %v1517_v62 }
  0x60   : > { %1356 = vmatpush3.bf16.msra.mxu1 %v1538_v6  ;;  %v327_v6 = vld [vmem:[#allocation2 + $0x18] sm:$0xff] }
  0x61   : > { %1357 = vmatprep.subr.bf16.mxu1 %v1540_v8 }
  0x62   : > { %876 = vmatpush2.bf16.msra.mxu0 %v1520_v1 }
  0x63   : > { %877 = vmatprep.subr.bf16.mxu0 %v1522_v2  ;;  %v333_v2 = vld [vmem:[#allocation2 + $0x8] sm:$0xff] }
  0x64   : > { %1358 = vmatpush3.bf16.msra.mxu1 %v1542_v11 }
  0x65   : > { %1359 = vmatprep.subr.bf16.mxu1 %v1545_v14 }
  0x66   : > { %878 = vmatpush2.bf16.msra.mxu0 %v1525_v5 }
  0x67   : > { %1383 = vmatprep.subr.bf16.mxu0 %v1531_v7 }
  0x68   : > { %1360 = vmatpush3.bf16.msra.mxu1 %v1547_v15 }
  0x69   : > { %880 = vmatmul.mubr.bf16.vlgmr.msra.gmra.mxu0 %v1527_v10 }
  0x6a   : > { %1384 = vmatpush3.bf16.msra.mxu0 %v1531_v7  ;;  %889 = vmatprep.mubr.bf16.mxu0 %v1265_v13 }
  0x6b   : > { %1385 = vmatprep.subr.bf16.mxu0 %v1534_v12  ;;  %982 = vmatmul.mubr.bf16.vlgmr.msra.gmra.mxu1 %v1527_v10 }
  0x6c   : > { %989 = vmatprep.mubr.bf16.mxu1 %v1265_v13  ;;  %v330_v13 = vld [vmem:[#allocation2 + $0x28] sm:$0xff] }
  0x6e   : > { %1386 = vmatpush3.bf16.msra.mxu0 %v1534_v12 }
  0x6f   : > { %1387 = vmatprep.subr.bf16.mxu0 %v1537_v16 }
  0x71   : > { %890 = vmatmul.mubr.bf16.gmra.mxu0 %v1264_v17 }
  0x72   : > { %1388 = vmatpush3.bf16.msra.mxu0 %v1537_v16  ;;  %1399 = vmatprep.mubr.bf16.mxu0 %v1709_v47 }
  0x73   : > { %1389 = vmatprep.subr.bf16.mxu0 %v1541_v18  ;;  %990 = vmatmul.mubr.bf16.gmra.mxu1 %v1264_v17 }
  0x76   : > { %1390 = vmatpush3.bf16.msra.mxu0 %v1541_v18 }
  0x77   : > { %1391 = vmatprep.subr.bf16.mxu0 %v1546_v19 }
  0x7a   : > { %1392 = vmatpush3.bf16.msra.mxu0 %v1546_v19 }
  0x7b   : > { %1393 = vmatprep.subr.bf16.mxu0 %v1548_v20 }
  0x7e   : > { %1394 = vmatpush3.bf16.msra.mxu0 %v1548_v20 }
  0x7f   : > { %1395 = vmatprep.subr.bf16.mxu0 %v1549_v21 }
  0x82   : > { %1396 = vmatpush3.bf16.msra.mxu0 %v1549_v21 }
  0x83   : > { %1397 = vmatprep.subr.bf16.mxu0 %v1550_v22 }
  0x86   : > { %1398 = vmatpush3.bf16.msra.mxu0 %v1550_v22 }
  0x89   : > { %1400 = vmatmul.mubr.bf16.vlgmr.msra.gmra.mxu0 %v1727_v61 }
 0x10b   : > { %v932_v23 = vpop.f32.mrf.mxu1 }
 0x10d   : > { %v934_v24 = vpop.f32.mrf.mxu1 }
 0x10f   : > { %v936_v25 = vpop.f32.mrf.mxu1 }
 0x111   : > { %v938_v26 = vpop.f32.mrf.mxu1 }
 0x113   : > { %v942_v27 = vpop.f32.mrf.mxu1 }
 0x115   : > { %v944_v28 = vpop.f32.mrf.mxu1 }
 0x117   : > { %v946_v29 = vpop.f32.mrf.mxu1 }
 0x119   : > { %v947_v30 = vpop.f32.mrf.mxu1 }
 0x129   : > { %v881_v32 = vpop.f32.mrf.mxu0 }
 0x12a   : > { %v933_v33 = vadd.f32 %v932_v23, %v881_v32 }
 0x12b   : > { %v883_v35 = vpop.f32.mrf.mxu0  ;;  %v1361_v48 = vpop.f32.mrf.mxu1 }
 0x12c   : > { %v1045_v36 = vadd.f32 %v933_v33, %v325_v31  ;;  %v935_v37 = vadd.f32 %v934_v24, %v883_v35 }
 0x12d   : > { %v885_v39 = vpop.f32.mrf.mxu0  ;;  %v1362_v53 = vpop.f32.mrf.mxu1 }
 0x12e   : > { %1054 = vst [vmem:[#allocation2 + $0x30] sm:$0xff] %v1045_v36  ;;  %v1046_v40 = vadd.f32 %v935_v37, %v326_v34  ;;  %v937_v41 = vadd.f32 %v936_v25, %v885_v39  ;;  %v1363_v4 = vadd.f32 %v1362_v53, %v1361_v48 }
 0x12f   : > { %v887_v43 = vpop.f32.mrf.mxu0  ;;  %v1364_v57 = vpop.f32.mrf.mxu1 }
 0x130   : > { %1055 = vst [vmem:[#allocation2] sm:$0xff] %v1046_v40  ;;  %v1048_v44 = vadd.f32 %v937_v41, %v328_v38  ;;  %v939_v45 = vadd.f32 %v938_v26, %v887_v43 }
 0x131   : > { %v891_v47 = vpop.f32.mrf.mxu0  ;;  %v1365_v60 = vpop.f32.mrf.mxu1 }
 0x132   : > { %1057 = vst [vmem:[#allocation2 + $0x10] sm:$0xff] %v1048_v44  ;;  %v1049_v49 = vadd.f32 %v939_v45, %v329_v42  ;;  %v943_v50 = vadd.f32 %v942_v27, %v891_v47  ;;  %v1366_v11 = vadd.f32 %v1365_v60, %v1364_v57 }
 0x133   : > { %v893_v52 = vpop.f32.mrf.mxu0  ;;  %v1367_v61 = vpop.f32.mrf.mxu1 }
 0x134   : > { %1058 = vst [vmem:[#allocation2 + $0x20] sm:$0xff] %v1049_v49  ;;  %v1051_v54 = vadd.f32 %v943_v50, %v331_v46  ;;  %v945_v55 = vadd.f32 %v944_v28, %v893_v52 }
 0x135   : > { %v895_v56 = vpop.f32.mrf.mxu0  ;;  %v1368_v62 = vpop.f32.mrf.mxu1 }
 0x136   : > { %1060 = vst [vmem:[#allocation2 + $0x40] sm:$0xff] %v1051_v54  ;;  %v1052_v58 = vadd.f32 %v945_v55, %v332_v51  ;;  %v1369_v1 = vadd.f32 %v1368_v62, %v1367_v61 }
 0x137   : > { %v896_v59 = vpop.f32.mrf.mxu0  ;;  %v1370_v63 = vpop.f32.mrf.mxu1 }
 0x138   : > { %1061 = vst [vmem:[#allocation2 + $0x38] sm:$0xff] %v1052_v58 }
 0x139   : > { %v1371_v0 = vpop.f32.mrf.mxu1 }
 0x149   : > { %v1401_v3 = vpop.f32.mrf.mxu0 }
 0x14a   : > { %v1040_v5 = vadd.f32 %v1401_v3, %v1369_v1 }
 0x14b   : > { %v1031_v7 = vpop.f32.mrf.mxu0 }
 0x14c   : > { %v1053_v8 = vadd.f32 %v1040_v5, %v333_v2  ;;  %v1032_v9 = vadd.f32 %v1363_v4, %v1031_v7 }
 0x14d   : > { %v1402_v10 = vpop.f32.mrf.mxu0 }
 0x14e   : > { %1062 = vst [vmem:[#allocation2 + $0x8] sm:$0xff] %v1053_v8  ;;  %v1047_v12 = vadd.f32 %v1032_v9, %v327_v6 }
 0x14f   : > { %v1034_v14 = vpop.f32.mrf.mxu0 }
 0x150   : > { %1056 = vst [vmem:[#allocation2 + $0x18] sm:$0xff] %v1047_v12  ;;  %v1035_v15 = vadd.f32 %v1366_v11, %v1034_v14  ;;  %1066 = sbr.rel (%p1339_p11) target bundleno = 358 (0x166), region = 66 }
 0x152   : > { %v1050_v16 = vadd.f32 %v1035_v15, %v330_v13 }
 0x154   : > { %1059 = vst [vmem:[#allocation2 + $0x28] sm:$0xff] %v1050_v16 }
 0x155   : > { %v1078_v17 = vlaneseq  ;;  %v1076_v19 = vld [vmem:[%s1803_s2] sm:$0x7]  ;;  %v1067_v20 = vld [vmem:[#allocation2 + $0x30] sm:$0xff]  ;;  %v1074_v33 = vld [vmem:[#allocation2 + $0x38] sm:$0xff] }
 0x156   : > { %v1068_v22 = vld [vmem:[#allocation2] sm:$0xff]  ;;  %v1070_v26 = vld [vmem:[#allocation2 + $0x10] sm:$0xff]  ;;  %v1075_v42 = vld [vmem:[#allocation2 + $0x8] sm:$0xff] }
 0x157   : > { %v1079_v18 = vshrl.u32 %v1078_v17, 7  ;;  %v1069_v25 = vld [vmem:[#allocation2 + $0x18] sm:$0xff]  ;;  %v1071_v27 = vld [vmem:[#allocation2 + $0x20] sm:$0xff] }
 0x158   : > { %v1073_v32 = vld [vmem:[#allocation2 + $0x40] sm:$0xff] }
 0x159   : > { %v1080_v21 = vsub.s32 0, %v1079_v18  ;;  %v1084_v23 = vsub.s32 1, %v1079_v18  ;;  %v1088_v24 = vsub.s32 2, %v1079_v18 }
 0x15b   : > { %v1081_v28 = vrot.slane %v1076_v19, %v1080_v21  ;;  %v1085_v29 = vrot.slane %v1076_v19, %v1084_v23  ;;  %v1089_v30 = vrot.slane %v1076_v19, %v1088_v24  ;;  %v1072_v31 = vld [vmem:[#allocation2 + $0x28] sm:$0xff] }
 0x15d   : > { %v1093_v34 = vadd.f32 %v1081_v28, %v1067_v20  ;;  %v1094_v35 = vadd.f32 %v1085_v29, %v1068_v22  ;;  %v1095_v36 = vadd.f32 %v1089_v30, %v1069_v25  ;;  %v1096_v37 = vadd.f32 %v1081_v28, %v1070_v26 }
 0x15e   : > { %v1097_v38 = vadd.f32 %v1085_v29, %v1071_v27  ;;  %v1098_v39 = vadd.f32 %v1089_v30, %v1072_v31  ;;  %v1099_v40 = vadd.f32 %v1081_v28, %v1073_v32  ;;  %v1100_v41 = vadd.f32 %v1085_v29, %v1074_v33 }
 0x15f   : > { %v1102_v43 = vmax.f32 %v1093_v34, 0.0  ;;  %v1103_v44 = vmax.f32 %v1094_v35, 0.0  ;;  %v1104_v45 = vmax.f32 %v1095_v36, 0.0  ;;  %v1105_v46 = vmax.f32 %v1096_v37, 0.0 }
 0x160   : > { %v1106_v47 = vmax.f32 %v1097_v38, 0.0  ;;  %v1107_v48 = vmax.f32 %v1098_v39, 0.0  ;;  %v1108_v49 = vmax.f32 %v1099_v40, 0.0  ;;  %v1109_v50 = vmax.f32 %v1100_v41, 0.0 }
 0x161   : > { %1111 = vst [vmem:[%s1804_s3] sm:$0xff] %v1102_v43  ;;  %1112 = vst [vmem:[%s1804_s3 + $0x8] sm:$0xff] %v1103_v44  ;;  %v1101_v51 = vadd.f32 %v1089_v30, %v1075_v42 }
 0x162   : > { %1113 = vst [vmem:[%s1804_s3 + $0x10] sm:$0xff] %v1104_v45  ;;  %1114 = vst [vmem:[%s1804_s3 + $0x18] sm:$0xff] %v1105_v46 }
 0x163   : > { %1115 = vst [vmem:[%s1804_s3 + $0x20] sm:$0xff] %v1106_v47  ;;  %1116 = vst [vmem:[%s1804_s3 + $0x28] sm:$0xff] %v1107_v48  ;;  %v1110_v52 = vmax.f32 %v1101_v51, 0.0 }
 0x164   : > { %1117 = vst [vmem:[%s1804_s3 + $0x30] sm:$0xff] %v1108_v49  ;;  %1118 = vst [vmem:[%s1804_s3 + $0x38] sm:$0xff] %v1109_v50 }
 0x165   : > { %1119 = vst [vmem:[%s1804_s3 + $0x40] sm:$0xff] %v1110_v52 }
 0x166 PF: > { %s13_s16 = sadd.s32 1, %s1589_s16   ;;  %s1805_s12 = smov %s1577_s13 }
 0x167   : > { %p10_p12 = scmp.ge.s32.totalorder %s13_s16, 11   ;;  %s1806_s13 = smov %s1648_s20 }
 0x168   : > { %s1807_s14 = smov %s1585_s15  ;;  %s1808_s15 = smov %s1810_s17 }
 0x169   :  { %12 = sbr.rel (!%p10_p12) target bundleno = 3 (0x3), region = 113 }

// kernel: alexnet_forward.17
= control target key start
LH: loop header
LB: loop body
LE: loop exit
PB: predicated region body
PF: predicated region fallthrough
CT: control target
= control target key end

     0   :  { %s1191_s12 = smov 0   ;;  %s1193_s13 = smov 0   ;;  %s1338_s0 = inlined_call_operand.vmem [shape: bf16[24,3456], index: 0, kind: input, shape index: {}]   ;;  %s1339_s1 = inlined_call_operand.vmem [shape: bf16[3456,256], index: 1, kind: input, shape index: {}]   ;;  %s1340_s2 = inlined_call_operand.vmem [shape: f32[1,256], index: 2, kind: input, shape index: {}]   ;;  %s1341_s3 = inlined_call_operand.vmem [shape: f32[24,256], index: 3, kind: output, shape index: {}]  }
   0x1   :  { %s1195_s14 = smov 0   ;;  %s1197_s15 = smov 0  }
   0x2   :  { %s1199_s16 = smov 0  }
   0x3 LB: > { %s25_s17 = sadd.s32 1, %s1163_s15  ;;  %p48_p1 = scmp.ne.s32.totalorder %s1155_s13, %s1151_s12  ;;  %s1167_s16 = sphi %s1199_s16, %s13_s16   ;;  %s1163_s15 = sphi %s1197_s15, %s1345_s15   ;;  %s1159_s14 = sphi %s1195_s14, %s1344_s14   ;;  %s1155_s13 = sphi %s1193_s13, %s1343_s13   ;;  %s1151_s12 = sphi %s1191_s12, %s1342_s12  }
   0x4   : > { %p26_p0 = scmp.ge.s32.totalorder %s25_s17, 9  ;;  %p49_p2 = scmp.eq.s32.totalorder %s1167_s16, 0 }
   0x5   : > { %s41_s19 = sadd.s32 1, %s1155_s13  ;;  %p933_p5 = scmp.ge.s32.totalorder %s1167_s16, 9 }
   0x6   : > { %s1347_s17 = smov (%p26_p0, %s25_s17), 0  ;;  %p50_p3 = por %p49_p2, %p48_p1 }
   0x7   : > { %s37_s18 = ssub.s32 %s1163_s15, %s1347_s17  ;;  %164 = sbr.rel (%p933_p5) target bundleno = 20 (0x14), region = 20 }
   0x8   : > { %p39_p4 = scmp.eq.s32.totalorder %s37_s18, 0 }
   0xa   : > { %s1226_s20 = scalar_select %p39_p4, %s1155_s13, %s41_s19  }
   0xc   : > { %167 = sbr.rel (!%p50_p3) target bundleno = 20 (0x14), region = 24  ;;  %s169_s21 = sand.u32 (%p50_p3), 1, %s1155_s13  }
   0xd   : > { %s1004_s22 = smul.u32 (%p50_p3), 12, %s1163_s15 }
   0xe   : > { %s1006_s23 = smul.u32 (%p50_p3), 36, %s169_s21 }
   0xf   : > { %s177_s26 = scalar_lea.vmem (%p50_p3), %s1338_s0, %s1004_s22 }
  0x10   : > { %v192_v0 = vld [vmem:[%s177_s26] sm:$0xff] (%p50_p3)  ;;  %v194_v1 = vld [vmem:[%s177_s26 + $0x6c] sm:$0xff] (%p50_p3)  ;;  %v196_v2 = vld [vmem:[%s177_s26 + $0xd8] sm:$0xff] (%p50_p3)  ;;  %s171_s27 = scalar_lea.vmem (%p50_p3), [#allocation3], %s1006_s23 }
  0x11   : > { %193 = vst [vmem:[%s171_s27] sm:$0xff] %v192_v0  ;;  %195 = vst [vmem:[%s171_s27 + $0xc] sm:$0xff] %v194_v1  ;;  %v935_v3 = vld [vmem:[%s177_s26 + $0x8] sm:$0xf]  ;;  %v937_v4 = vld [vmem:[%s177_s26 + $0x74] sm:$0xf] }
  0x12   : > { %197 = vst [vmem:[%s171_s27 + $0x18] sm:$0xff] %v196_v2  ;;  %v939_v5 = vld [vmem:[%s177_s26 + $0xe0] sm:$0xf]  ;;  %936 = vst [vmem:[%s171_s27 + $0x8] sm:$0xf] %v935_v3 }
  0x13   : > { %938 = vst [vmem:[%s171_s27 + $0x14] sm:$0xf] %v937_v4  ;;  %940 = vst [vmem:[%s171_s27 + $0x20] sm:$0xf] %v939_v5 }
  0x14 PF: > { %p941_p6 = scmp.ge.s32.totalorder %s1167_s16, 1  ;;  %p231_p7 = scmp.lt.s32.totalorder %s1167_s16, 10 }
  0x16   : > { %p232_p8 = pnand %p941_p6, %p231_p7 }
  0x17   : > { %s238_s28 = sand.u32 (!%p232_p8), 1, %s1151_s12   ;;  %s282_s29 = smul.u32 (!%p232_p8), 48, %s1159_s14 }
  0x18   : > { %235 = sbr.rel (%p232_p8) target bundleno = 326 (0x146), region = 54  ;;  %p944_p10 = scmp.ne.s32.totalorder (!%p232_p8), %s1159_s14, 0 }
  0x19   : > { %s1007_s30 = smul.u32 (!%p232_p8), 36, %s238_s28  ;;  %p284_p9 = scmp.lt.s32.totalorder (!%p232_p8), %s282_s29, 431 }
  0x1b   : > { %s1243_s8 = scalar_lea.vmem (!%p232_p8), [#allocation3], %s1007_s30 }
  0x1d   : > { %s1349_s29 = smov (!%p284_p9, %s282_s29), 431  ;;  %315 = sbr.rel (%p944_p10) target bundleno = 38 (0x26), region = 62 }
  0x1e   : > { %s1005_s4 = sshll.u32 %s1349_s29, 3 }
  0x1f   : > { %s1241_s7 = scalar_lea.vmem %s1339_s1, %s1005_s4 }
  0x22   : > { %v1169_v6 = vmov 0.0  }
  0x23   : > { %316 = vst [vmem:[#allocation2 + $0x28] sm:$0xff] %v1169_v6  ;;  %317 = vst [vmem:[#allocation2 + $0x10] sm:$0xff] %v1169_v6 }
  0x24   : > { %318 = vst [vmem:[#allocation2 + $0x8] sm:$0xff] %v1169_v6  ;;  %319 = vst [vmem:[#allocation2] sm:$0xff] %v1169_v6 }
  0x25   : > { %320 = vst [vmem:[#allocation2 + $0x18] sm:$0xff] %v1169_v6  ;;  %321 = vst [vmem:[#allocation2 + $0x20] sm:$0xff] %v1169_v6 }
  0x26 PF: > { %v1050_v7 = vld [vmem:[%s1241_s7 + $0x74] ss:$8 sps:$4 sm:$0xff]   ;;  %v1052_v8 = vld [vmem:[%s1241_s7 + $0x70] ss:$8 sps:$4 sm:$0xff]   ;;  %v1170_v9 = vmov 0   ;;  %p999_p11 = scmp.ne.s32.totalorder %s1159_s14, 8 }
  0x27   : > { %732 = vmatprep.mubr.bf16.mxu1 %v1170_v9  ;;  %649 = vmatprep.subr.bf16.mxu0 %v1050_v7  ;;  %v1053_v10 = vld [vmem:[%s1241_s7 + $0x64] ss:$8 sps:$4 sm:$0xff]   ;;  %v1055_v11 = vld [vmem:[%s1241_s7 + $0x60] ss:$8 sps:$4 sm:$0xff]   ;;  %v1056_v12 = vld [vmem:[%s1241_s7 + $0x54] ss:$8 sps:$4 sm:$0xff]  }
  0x28   : > { %650 = vmatpush1.bf16.msra.mxu0 %v1052_v8  ;;  %v1058_v13 = vld [vmem:[%s1241_s7 + $0x50] ss:$8 sps:$4 sm:$0xff]   ;;  %v1059_v14 = vld [vmem:[%s1241_s7 + $0x44] ss:$8 sps:$4 sm:$0xff]   ;;  %v1071_v15 = vld [vmem:[%s1241_s7 + $0x174] ss:$8 sps:$4 sm:$0xff]  }
  0x29   : > { %651 = vmatprep.subr.bf16.mxu0 %v1053_v10  ;;  %v1073_v16 = vld [vmem:[%s1241_s7 + $0x170] ss:$8 sps:$4 sm:$0xff]   ;;  %v1061_v17 = vld [vmem:[%s1241_s7 + $0x40] ss:$8 sps:$4 sm:$0xff]   ;;  %v1062_v18 = vld [vmem:[%s1241_s7 + $0x34] ss:$8 sps:$4 sm:$0xff]   ;;  %700 = vmatprep.subr.bf16.mxu1 %v1071_v15 }
  0x2a   : > { %v1077_v19 = vld [vmem:[%s1241_s7 + $0x164] ss:$8 sps:$4 sm:$0xff]   ;;  %701 = vmatpush1.bf16.msra.mxu1 %v1073_v16  ;;  %v1079_v20 = vld [vmem:[%s1241_s7 + $0x160] ss:$8 sps:$4 sm:$0xff]   ;;  %v1064_v21 = vld [vmem:[%s1241_s7 + $0x30] ss:$8 sps:$4 sm:$0xff]  }
  0x2b   : > { %702 = vmatprep.subr.bf16.mxu1 %v1077_v19  ;;  %v1083_v22 = vld [vmem:[%s1241_s7 + $0x154] ss:$8 sps:$4 sm:$0xff]   ;;  %v1065_v23 = vld [vmem:[%s1241_s7 + $0x24] ss:$8 sps:$4 sm:$0xff]   ;;  %v1085_v24 = vld [vmem:[%s1241_s7 + $0x150] ss:$8 sps:$4 sm:$0xff]  }
  0x2c   : > { %652 = vmatpush1.bf16.msra.mxu0 %v1055_v11  ;;  %v1089_v25 = vld [vmem:[%s1241_s7 + $0x144] ss:$8 sps:$4 sm:$0xff]   ;;  %v1067_v26 = vld [vmem:[%s1241_s7 + $0x20] ss:$8 sps:$4 sm:$0xff]   ;;  %v1068_v27 = vld [vmem:[%s1241_s7 + $0x14] ss:$8 sps:$4 sm:$0xff]  }
  0x2d   : > { %653 = vmatprep.subr.bf16.mxu0 %v1056_v12  ;;  %v1091_v28 = vld [vmem:[%s1241_s7 + $0x140] ss:$8 sps:$4 sm:$0xff]   ;;  %v1095_v29 = vld [vmem:[%s1241_s7 + $0x134] ss:$8 sps:$4 sm:$0xff]   ;;  %v1070_v30 = vld [vmem:[%s1241_s7 + $0x10] ss:$8 sps:$4 sm:$0xff]  }
  0x2e   : > { %703 = vmatpush1.bf16.msra.mxu1 %v1079_v20  ;;  %v1074_v31 = vld [vmem:[%s1241_s7 + $0x4] ss:$8 sps:$4 sm:$0xff]   ;;  %v1097_v32 = vld [vmem:[%s1241_s7 + $0x130] ss:$8 sps:$4 sm:$0xff]   ;;  %v1076_v34 = vld [vmem:[%s1241_s7] ss:$8 sps:$4 sm:$0xff]  }
  0x2f   : > { %704 = vmatprep.subr.bf16.mxu1 %v1083_v22  ;;  %v1101_v33 = vld [vmem:[%s1241_s7 + $0x124] ss:$8 sps:$4 sm:$0xff]   ;;  %v1080_v35 = vld [vmem:[%s1241_s7 + $0xf4] ss:$8 sps:$4 sm:$0xff]   ;;  %v1103_v36 = vld [vmem:[%s1241_s7 + $0x120] ss:$8 sps:$4 sm:$0xff]  }
  0x30   : > { %654 = vmatpush1.bf16.msra.mxu0 %v1058_v13  ;;  %v1107_v37 = vld [vmem:[%s1241_s7 + $0x114] ss:$8 sps:$4 sm:$0xff]   ;;  %v1082_v38 = vld [vmem:[%s1241_s7 + $0xf0] ss:$8 sps:$4 sm:$0xff]   ;;  %v1086_v39 = vld [vmem:[%s1241_s7 + $0xe4] ss:$8 sps:$4 sm:$0xff]  }
  0x31   : > { %655 = vmatprep.subr.bf16.mxu0 %v1059_v14  ;;  %v1109_v40 = vld [vmem:[%s1241_s7 + $0x110] ss:$8 sps:$4 sm:$0xff]   ;;  %v1113_v41 = vld [vmem:[%s1241_s7 + $0x104] ss:$8 sps:$4 sm:$0xff]   ;;  %v1088_v43 = vld [vmem:[%s1241_s7 + $0xe0] ss:$8 sps:$4 sm:$0xff]  }
  0x32   : > { %705 = vmatpush1.bf16.msra.mxu1 %v1085_v24  ;;  %v1125_v42 = vld [vmem:[%s1243_s8 + $0x4] ss:$12 sps:$4 sm:$0xff]   ;;  %v1119_v48 = vld [vmem:[%s1243_s8 + $0x8] ss:$12 sps:$4 sm:$0xff]   ;;  %v1126_v53 = vld [vmem:[%s1243_s8 + $0x20] ss:$0 sps:$4 sm:$0xff]  }
  0x33   : > { %706 = vmatprep.subr.bf16.mxu1 %v1089_v25  ;;  %v1092_v44 = vld [vmem:[%s1241_s7 + $0xd4] ss:$8 sps:$4 sm:$0xff]   ;;  %681 = vmatprep.mubr.bf16.mxu0 %v1125_v42  ;;  %v1115_v45 = vld [vmem:[%s1241_s7 + $0x100] ss:$8 sps:$4 sm:$0xff]   ;;  %v1094_v46 = vld [vmem:[%s1241_s7 + $0xd0] ss:$8 sps:$4 sm:$0xff]  }
  0x34   : > { %656 = vmatpush1.bf16.msra.mxu0 %v1061_v17  ;;  %v1098_v47 = vld [vmem:[%s1241_s7 + $0xc4] ss:$8 sps:$4 sm:$0xff]   ;;  %v1100_v49 = vld [vmem:[%s1241_s7 + $0xc0] ss:$8 sps:$4 sm:$0xff]   ;;  %v1104_v50 = vld [vmem:[%s1241_s7 + $0xb4] ss:$8 sps:$4 sm:$0xff]  }
  0x35   : > { %657 = vmatprep.subr.bf16.mxu0 %v1062_v18  ;;  %v1106_v51 = vld [vmem:[%s1241_s7 + $0xb0] ss:$8 sps:$4 sm:$0xff]   ;;  %v1110_v52 = vld [vmem:[%s1241_s7 + $0xa4] ss:$8 sps:$4 sm:$0xff]   ;;  %v1112_v54 = vld [vmem:[%s1241_s7 + $0xa0] ss:$8 sps:$4 sm:$0xff]  }
  0x36   : > { %707 = vmatpush1.bf16.msra.mxu1 %v1091_v28  ;;  %v1116_v55 = vld [vmem:[%s1241_s7 + $0x94] ss:$8 sps:$4 sm:$0xff]   ;;  %v1118_v56 = vld [vmem:[%s1241_s7 + $0x90] ss:$8 sps:$4 sm:$0xff]   ;;  %v1120_v57 = vld [vmem:[%s1241_s7 + $0x84] ss:$8 sps:$4 sm:$0xff]  }
  0x37   : > { %708 = vmatprep.subr.bf16.mxu1 %v1095_v29  ;;  %v1122_v58 = vld [vmem:[%s1241_s7 + $0x80] ss:$8 sps:$4 sm:$0xff]   ;;  %v323_v10 = vld [vmem:[#allocation2 + $0x10] sm:$0xff]  ;;  %v326_v22 = vld [vmem:[#allocation2 + $0x18] sm:$0xff] }
  0x38   : > { %658 = vmatpush1.bf16.msra.mxu0 %v1064_v21  ;;  %v332_v59 = vld [vmem:[%s1243_s8 + $0x18] sm:$0xff]  ;;  %v1123_v60 = vld [vmem:[%s1243_s8] ss:$12 sps:$4 sm:$0xff]  }
  0x39   : > { %659 = vmatprep.subr.bf16.mxu0 %v1065_v23  ;;  %v949_v61 = vcombine.high %v332_v59, %v332_v59  ;;  %v948_v62 = vcombine.low %v332_v59, %v332_v59  ;;  %v322_v7 = vld [vmem:[#allocation2 + $0x28] sm:$0xff]  ;;  %v325_v18 = vld [vmem:[#allocation2] sm:$0xff] }
  0x3a   : > { %709 = vmatpush1.bf16.msra.mxu1 %v1097_v32  ;;  %v324_v14 = vld [vmem:[#allocation2 + $0x8] sm:$0xff] }
  0x3b   : > { %710 = vmatprep.subr.bf16.mxu1 %v1101_v33 }
  0x3c   : > { %660 = vmatpush1.bf16.msra.mxu0 %v1067_v26  ;;  %v327_v26 = vld [vmem:[#allocation2 + $0x20] sm:$0xff] }
  0x3d   : > { %661 = vmatprep.subr.bf16.mxu0 %v1068_v27 }
  0x3e   : > { %711 = vmatpush1.bf16.msra.mxu1 %v1103_v36 }
  0x3f   : > { %712 = vmatprep.subr.bf16.mxu1 %v1107_v37 }
  0x40   : > { %662 = vmatpush1.bf16.msra.mxu0 %v1070_v30 }
  0x41   : > { %663 = vmatprep.subr.bf16.mxu0 %v1074_v31 }
  0x42   : > { %713 = vmatpush1.bf16.msra.mxu1 %v1109_v40 }
  0x43   : > { %714 = vmatprep.subr.bf16.mxu1 %v1113_v41 }
  0x44   : > { %664 = vmatpush1.bf16.msra.mxu0 %v1076_v34 }
  0x45   : > { %665 = vmatprep.subr.bf16.mxu0 %v1080_v35 }
  0x46   : > { %715 = vmatpush1.bf16.msra.mxu1 %v1115_v45 }
  0x48   : > { %666 = vmatpush2.bf16.msra.mxu0 %v1082_v38 }
  0x49   : > { %667 = vmatprep.subr.bf16.mxu0 %v1086_v39  ;;  %733 = vmatmul.mubr.bf16.vlgmr.msra.gmra.mxu1 %v1119_v48 }
  0x4a   : > { %742 = vmatprep.mubr.bf16.mxu1 %v1170_v9 }
  0x4c   : > { %668 = vmatpush2.bf16.msra.mxu0 %v1088_v43 }
  0x4d   : > { %669 = vmatprep.subr.bf16.mxu0 %v1092_v44 }
  0x50   : > { %670 = vmatpush2.bf16.msra.mxu0 %v1094_v46 }
  0x51   : > { %671 = vmatprep.subr.bf16.mxu0 %v1098_v47  ;;  %743 = vmatmul.mubr.bf16.gmra.mxu1 %v1126_v53 }
  0x54   : > { %672 = vmatpush2.bf16.msra.mxu0 %v1100_v49 }
  0x55   : > { %673 = vmatprep.subr.bf16.mxu0 %v1104_v50 }
  0x58   : > { %674 = vmatpush2.bf16.msra.mxu0 %v1106_v51 }
  0x59   : > { %675 = vmatprep.subr.bf16.mxu0 %v1110_v52 }
  0x5c   : > { %676 = vmatpush2.bf16.msra.mxu0 %v1112_v54 }
  0x5d   : > { %677 = vmatprep.subr.bf16.mxu0 %v1116_v55 }
  0x60   : > { %678 = vmatpush2.bf16.msra.mxu0 %v1118_v56 }
  0x61   : > { %679 = vmatprep.subr.bf16.mxu0 %v1120_v57 }
  0x64   : > { %680 = vmatpush2.bf16.msra.mxu0 %v1122_v58 }
  0x67   : > { %682 = vmatmul.mubr.bf16.vlgmr.msra.gmra.mxu0 %v1123_v60 }
  0x68   : > { %691 = vmatprep.mubr.bf16.mxu0 %v949_v61 }
  0x6f   : > { %692 = vmatmul.mubr.bf16.gmra.mxu0 %v948_v62 }
 0x109   : > { %v734_v63 = vpop.f32.mrf.mxu1 }
 0x10b   : > { %v736_v0 = vpop.f32.mrf.mxu1 }
 0x10d   : > { %v738_v1 = vpop.f32.mrf.mxu1 }
 0x10f   : > { %v740_v2 = vpop.f32.mrf.mxu1 }
 0x111   : > { %v744_v3 = vpop.f32.mrf.mxu1 }
 0x113   : > { %v746_v4 = vpop.f32.mrf.mxu1 }
 0x115   : > { %v748_v5 = vpop.f32.mrf.mxu1 }
 0x117   : > { %v749_v6 = vpop.f32.mrf.mxu1 }
 0x127   : > { %v683_v8 = vpop.f32.mrf.mxu0 }
 0x128   : > { %v735_v9 = vadd.f32 %v734_v63, %v683_v8 }
 0x129   : > { %v685_v11 = vpop.f32.mrf.mxu0 }
 0x12a   : > { %v751_v12 = vadd.f32 %v735_v9, %v322_v7  ;;  %v737_v13 = vadd.f32 %v736_v0, %v685_v11 }
 0x12b   : > { %v687_v15 = vpop.f32.mrf.mxu0 }
 0x12c   : > { %757 = vst [vmem:[#allocation2 + $0x28] sm:$0xff] %v751_v12  ;;  %v752_v16 = vadd.f32 %v737_v13, %v323_v10  ;;  %v739_v17 = vadd.f32 %v738_v1, %v687_v15 }
 0x12d   : > { %v689_v19 = vpop.f32.mrf.mxu0 }
 0x12e   : > { %758 = vst [vmem:[#allocation2 + $0x10] sm:$0xff] %v752_v16  ;;  %v753_v20 = vadd.f32 %v739_v17, %v324_v14  ;;  %v741_v21 = vadd.f32 %v740_v2, %v689_v19 }
 0x12f   : > { %v693_v23 = vpop.f32.mrf.mxu0 }
 0x130   : > { %759 = vst [vmem:[#allocation2 + $0x8] sm:$0xff] %v753_v20  ;;  %v754_v24 = vadd.f32 %v741_v21, %v325_v18  ;;  %v745_v25 = vadd.f32 %v744_v3, %v693_v23 }
 0x131   : > { %v695_v27 = vpop.f32.mrf.mxu0 }
 0x132   : > { %760 = vst [vmem:[#allocation2] sm:$0xff] %v754_v24  ;;  %v755_v28 = vadd.f32 %v745_v25, %v326_v22  ;;  %v747_v29 = vadd.f32 %v746_v4, %v695_v27  ;;  %766 = sbr.rel (%p999_p11) target bundleno = 326 (0x146), region = 66 }
 0x133   : > { %v697_v30 = vpop.f32.mrf.mxu0 }
 0x134   : > { %761 = vst [vmem:[#allocation2 + $0x18] sm:$0xff] %v755_v28  ;;  %v756_v31 = vadd.f32 %v747_v29, %v327_v26 }
 0x135   : > { %v698_v32 = vpop.f32.mrf.mxu0 }
 0x136   : > { %762 = vst [vmem:[#allocation2 + $0x20] sm:$0xff] %v756_v31 }
 0x137   : > { %v775_v33 = vlaneseq  ;;  %v773_v35 = vld [vmem:[%s1340_s2] sm:$0x3]  ;;  %v767_v36 = vld [vmem:[#allocation2 + $0x28] sm:$0xff]  ;;  %v768_v39 = vld [vmem:[#allocation2 + $0x10] sm:$0xff] }
 0x138   : > { %v769_v40 = vld [vmem:[#allocation2 + $0x8] sm:$0xff] }
 0x139   : > { %v776_v34 = vshrl.u32 %v775_v33, 7  ;;  %v770_v41 = vld [vmem:[#allocation2] sm:$0xff] }
 0x13b   : > { %v777_v37 = vsub.s32 0, %v776_v34  ;;  %v781_v38 = vsub.s32 1, %v776_v34  ;;  %v771_v44 = vld [vmem:[#allocation2 + $0x18] sm:$0xff] }
 0x13d   : > { %v778_v42 = vrot.slane %v773_v35, %v777_v37  ;;  %v782_v43 = vrot.slane %v773_v35, %v781_v38  ;;  %v772_v45 = vld [vmem:[#allocation2 + $0x20] sm:$0xff] }
 0x13f   : > { %v785_v46 = vadd.f32 %v778_v42, %v767_v36  ;;  %v786_v47 = vadd.f32 %v782_v43, %v768_v39  ;;  %v787_v48 = vadd.f32 %v778_v42, %v769_v40  ;;  %v788_v49 = vadd.f32 %v782_v43, %v770_v41 }
 0x140   : > { %v789_v50 = vadd.f32 %v778_v42, %v771_v44  ;;  %v790_v51 = vadd.f32 %v782_v43, %v772_v45 }
 0x141   : > { %v791_v52 = vmax.f32 %v785_v46, 0.0  ;;  %v792_v53 = vmax.f32 %v786_v47, 0.0  ;;  %v793_v54 = vmax.f32 %v787_v48, 0.0  ;;  %v794_v55 = vmax.f32 %v788_v49, 0.0 }
 0x142   : > { %v795_v56 = vmax.f32 %v789_v50, 0.0  ;;  %v796_v57 = vmax.f32 %v790_v51, 0.0 }
 0x143   : > { %797 = vst [vmem:[%s1341_s3] sm:$0xff] %v791_v52  ;;  %798 = vst [vmem:[%s1341_s3 + $0x8] sm:$0xff] %v792_v53 }
 0x144   : > { %799 = vst [vmem:[%s1341_s3 + $0x10] sm:$0xff] %v793_v54  ;;  %800 = vst [vmem:[%s1341_s3 + $0x18] sm:$0xff] %v794_v55 }
 0x145   : > { %801 = vst [vmem:[%s1341_s3 + $0x20] sm:$0xff] %v795_v56  ;;  %802 = vst [vmem:[%s1341_s3 + $0x28] sm:$0xff] %v796_v57 }
 0x146 PF: > { %s13_s16 = sadd.s32 1, %s1167_s16   ;;  %s1342_s12 = smov %s1155_s13 }
 0x147   : > { %p10_p12 = scmp.ge.s32.totalorder %s13_s16, 11   ;;  %s1343_s13 = smov %s1226_s20 }
 0x148   : > { %s1344_s14 = smov %s1163_s15  ;;  %s1345_s15 = smov %s1347_s17 }
 0x149   :  { %12 = sbr.rel (!%p10_p12) target bundleno = 3 (0x3), region = 113 }

// kernel: alexnet_forward.18
= control target key start
LH: loop header
LB: loop body
LE: loop exit
PB: predicated region body
PF: predicated region fallthrough
CT: control target
= control target key end

     0   :  { %s271_s14 = smov 127   ;;  %s272_s19 = smov 126   ;;  %v20_v22 = vlaneseq  ;;  %s468_s0 = inlined_call_operand.vmem [shape: f32[24,256], index: 0, kind: input, shape index: {}]   ;;  %s469_s1 = inlined_call_operand.vmem [shape: f32[24,256], index: 1, kind: output, shape index: {}]  }
   0x1   :  { %v288_v0 = vld [vmem:[%s468_s0 + $0x20] sm:$0xff]  ;;  %v298_v2 = vld [vmem:[%s468_s0 + $0x8] sm:$0xff]  ;;  %v311_v5 = vld [vmem:[%s468_s0 + $0x10] sm:$0xff]  ;;  %s274_s20 = smov 2  }
   0x2   :  { %v293_v1 = vld [vmem:[%s468_s0] sm:$0xff]  ;;  %v302_v3 = vmul.f32 %v288_v0, %v288_v0  ;;  %v317_v6 = vmul.f32 %v298_v2, %v298_v2  ;;  %v321_v7 = vmul.f32 %v311_v5, %v311_v5  ;;  %v326_v8 = vld [vmem:[%s468_s0 + $0x28] sm:$0xff]  ;;  %v331_v9 = vld [vmem:[%s468_s0 + $0x18] sm:$0xff]  ;;  %s273_s0 = smov 1   ;;  %v363_v25 = vand.u32 127, %v20_v22 }
   0x3   :  { %v306_v4 = vmul.f32 %v293_v1, %v293_v1  ;;  %v337_v10 = vmul.f32 %v326_v8, %v326_v8  ;;  %v341_v11 = vmul.f32 %v331_v9, %v331_v9 }
   0x4   :  { %27 = vrot.lane.b32.xlu1 %v302_v3, %s271_s14  ;;  %v22_v28 = vadd.s32 128, %v363_v25  ;;  %vm35_vm0 = vcmp.lt.s32.totalorder %v363_v25, 127  ;;  %vm68_vm1 = vcmp.lt.s32.totalorder %v363_v25, 126  ;;  %vm101_vm4 = vcmp.lt.s32.totalorder %v363_v25, 1 }
   0x5   :  { %23 = vrot.lane.b32.xlu0 %v306_v4, %s271_s14  ;;  %vm108_vm5 = vcmp.ge.s32.totalorder %v363_v25, 1  ;;  %vm134_vm6 = vcmp.lt.s32.totalorder %v363_v25, 2  ;;  %vm141_vm7 = vcmp.ge.s32.totalorder %v363_v25, 2 }
   0x6   :  { %vm43_vm2 = vcmp.lt.s32.totalorder %v22_v28, 255  ;;  %vm76_vm3 = vcmp.lt.s32.totalorder %v22_v28, 254 }
   0x8   :  { %29 = vrot.lane.b32.xlu1 %v317_v6, %s271_s14 }
   0x9   :  { %25 = vrot.lane.b32.xlu0 %v321_v7, %s271_s14 }
   0xc   :  { %33 = vrot.lane.b32.xlu1 %v337_v10, %s271_s14 }
   0xd   :  { %31 = vrot.lane.b32.xlu0 %v341_v11, %s271_s14 }
  0x10   :  { %58 = vrot.lane.b32.xlu1 %v321_v7, %s272_s19 }
  0x11   :  { %56 = vrot.lane.b32.xlu0 %v306_v4, %s272_s19 }
  0x14   :  { %62 = vrot.lane.b32.xlu1 %v317_v6, %s272_s19 }
  0x15   :  { %60 = vrot.lane.b32.xlu0 %v302_v3, %s272_s19 }
  0x18   :  { %66 = vrot.lane.b32.xlu1 %v337_v10, %s272_s19 }
  0x19   :  { %64 = vrot.lane.b32.xlu0 %v341_v11, %s272_s19 }
  0x1c   :  { %91 = vrot.lane.b32.xlu1 %v321_v7, %s273_s0 }
  0x1d   :  { %89 = vrot.lane.b32.xlu0 %v306_v4, %s273_s0 }
  0x20   :  { %95 = vrot.lane.b32.xlu1 %v317_v6, %s273_s0 }
  0x21   :  { %93 = vrot.lane.b32.xlu0 %v302_v3, %s273_s0 }
  0x24   :  { %99 = vrot.lane.b32.xlu1 %v337_v10, %s273_s0 }
  0x25   :  { %97 = vrot.lane.b32.xlu0 %v341_v11, %s273_s0 }
  0x28   :  { %124 = vrot.lane.b32.xlu1 %v321_v7, %s274_s20 }
  0x29   :  { %122 = vrot.lane.b32.xlu0 %v306_v4, %s274_s20 }
  0x2c   :  { %128 = vrot.lane.b32.xlu1 %v317_v6, %s274_s20 }
  0x2d   :  { %126 = vrot.lane.b32.xlu0 %v302_v3, %s274_s20 }
  0x30   :  { %132 = vrot.lane.b32.xlu1 %v337_v10, %s274_s20 }
  0x31   :  { %130 = vrot.lane.b32.xlu0 %v341_v11, %s274_s20 }
  0x76   :  { %v28_v12 = vpop.permute.xlu1 %27 }
  0x77   :  { %v24_v13 = vpop.permute.xlu0 %23 }
  0x7a   :  { %v30_v14 = vpop.permute.xlu1 %29 }
  0x7b   :  { %v26_v15 = vpop.permute.xlu0 %25  ;;  %v39_v31 = vsel %vm35_vm0, %v30_v14, %v24_v13  ;;  %v36_v33 = vsel %vm35_vm0, %v24_v13, %v30_v14 }
  0x7c   :  { %v45_v38 = vsel %vm43_vm2, %v39_v31, 0.0  ;;  %v50_v44 = vadd.f32 %v36_v33, %v306_v4 }
  0x7d   :  { %v51_v48 = vadd.f32 %v45_v38, %v317_v6 }
  0x7e   :  { %v34_v16 = vpop.permute.xlu1 %33 }
  0x7f   :  { %v32_v17 = vpop.permute.xlu0 %31  ;;  %v41_v32 = vsel %vm35_vm0, %v34_v16, %v28_v12  ;;  %v38_v39 = vsel %vm35_vm0, %v28_v12, %v34_v16 }
  0x80   :  { %v40_v34 = vsel %vm35_vm0, %v32_v17, %v26_v15  ;;  %v49_v41 = vsel %vm43_vm2, %v41_v32, 0.0  ;;  %v37_v42 = vsel %vm35_vm0, %v26_v15, %v32_v17  ;;  %v54_v49 = vadd.f32 %v38_v39, %v302_v3 }
  0x81   :  { %v47_v45 = vsel %vm43_vm2, %v40_v34, 0.0  ;;  %v55_v54 = vadd.f32 %v49_v41, %v337_v10  ;;  %v52_v55 = vadd.f32 %v37_v42, %v321_v7 }
  0x82   :  { %v59_v18 = vpop.permute.xlu1 %58  ;;  %v53_v58 = vadd.f32 %v47_v45, %v341_v11 }
  0x83   :  { %v57_v19 = vpop.permute.xlu0 %56 }
  0x86   :  { %v63_v20 = vpop.permute.xlu1 %62 }
  0x87   :  { %v61_v21 = vpop.permute.xlu0 %60  ;;  %v72_v35 = vsel %vm68_vm1, %v63_v20, %v57_v19  ;;  %v69_v46 = vsel %vm68_vm1, %v57_v19, %v63_v20 }
  0x88   :  { %v78_v47 = vsel %vm76_vm3, %v72_v35, 0.0  ;;  %v83_v59 = vadd.f32 %v69_v46, %v50_v44 }
  0x89   :  { %v84_v60 = vadd.f32 %v78_v47, %v51_v48 }
  0x8a   :  { %v67_v23 = vpop.permute.xlu1 %66 }
  0x8b   :  { %v65_v24 = vpop.permute.xlu0 %64  ;;  %v74_v40 = vsel %vm68_vm1, %v67_v23, %v61_v21  ;;  %v71_v62 = vsel %vm68_vm1, %v61_v21, %v67_v23 }
  0x8c   :  { %v82_v50 = vsel %vm76_vm3, %v74_v40, 0.0  ;;  %v73_v51 = vsel %vm68_vm1, %v65_v24, %v59_v18  ;;  %v70_v3 = vsel %vm68_vm1, %v59_v18, %v65_v24  ;;  %v87_v18 = vadd.f32 %v71_v62, %v54_v49 }
  0x8d   :  { %v88_v63 = vadd.f32 %v82_v50, %v55_v54  ;;  %v80_v4 = vsel %vm76_vm3, %v73_v51, 0.0  ;;  %v85_v22 = vadd.f32 %v70_v3, %v52_v55 }
  0x8e   :  { %v92_v26 = vpop.permute.xlu1 %91  ;;  %v86_v19 = vadd.f32 %v80_v4, %v53_v58 }
  0x8f   :  { %v90_v27 = vpop.permute.xlu0 %89 }
  0x92   :  { %v96_v29 = vpop.permute.xlu1 %95 }
  0x93   :  { %v94_v30 = vpop.permute.xlu0 %93  ;;  %v105_v43 = vsel %vm101_vm4, %v96_v29, %v90_v27  ;;  %v102_v56 = vsel %vm101_vm4, %v90_v27, %v96_v29 }
  0x94   :  { %v110_v57 = vsel %vm108_vm5, %v105_v43, 0.0  ;;  %v117_v7 = vadd.f32 %v102_v56, %v84_v60 }
  0x95   :  { %v116_v6 = vadd.f32 %v110_v57, %v83_v59 }
  0x96   :  { %v100_v36 = vpop.permute.xlu1 %99 }
  0x97   :  { %v98_v37 = vpop.permute.xlu0 %97  ;;  %v107_v61 = vsel %vm101_vm4, %v100_v36, %v94_v30  ;;  %v104_v10 = vsel %vm101_vm4, %v94_v30, %v100_v36 }
  0x98   :  { %v103_v11 = vsel %vm101_vm4, %v92_v26, %v98_v37  ;;  %v114_v14 = vsel %vm108_vm5, %v107_v61, 0.0  ;;  %v106_v15 = vsel %vm101_vm4, %v98_v37, %v92_v26  ;;  %v121_v23 = vadd.f32 %v104_v10, %v88_v63 }
  0x99   :  { %v120_v27 = vadd.f32 %v114_v14, %v87_v18  ;;  %v112_v28 = vsel %vm108_vm5, %v106_v15, 0.0  ;;  %v119_v26 = vadd.f32 %v103_v11, %v86_v19 }
  0x9a   :  { %v125_v52 = vpop.permute.xlu1 %124  ;;  %v118_v44 = vadd.f32 %v112_v28, %v85_v22 }
  0x9b   :  { %v123_v53 = vpop.permute.xlu0 %122 }
  0x9e   :  { %v129_v12 = vpop.permute.xlu1 %128 }
  0x9f   :  { %v127_v13 = vpop.permute.xlu0 %126  ;;  %v135_v16 = vsel %vm134_vm6, %v123_v53, %v129_v12  ;;  %v138_v17 = vsel %vm134_vm6, %v129_v12, %v123_v53 }
  0xa0   :  { %v143_v20 = vsel %vm141_vm7, %v138_v17, 0.0  ;;  %v150_v21 = vadd.f32 %v135_v16, %v117_v7 }
  0xa1   :  { %v149_v24 = vadd.f32 %v143_v20, %v116_v6 }
  0xa2   :  { %v156_v29 = vmul.f32 2e-05, %v150_v21  ;;  %v133_v30 = vpop.permute.xlu1 %132 }
  0xa3   :  { %v131_v31 = vpop.permute.xlu0 %130  ;;  %v155_v32 = vmul.f32 2e-05, %v149_v24  ;;  %v137_v33 = vsel %vm134_vm6, %v127_v13, %v133_v30  ;;  %v140_v34 = vsel %vm134_vm6, %v133_v30, %v127_v13 }
  0xa4   :  { %v136_v35 = vsel %vm134_vm6, %v125_v52, %v131_v31  ;;  %v162_v36 = vadd.f32 1.0, %v156_v29  ;;  %v147_v37 = vsel %vm141_vm7, %v140_v34, 0.0  ;;  %v154_v38 = vadd.f32 %v137_v33, %v121_v23 }
  0xa5   :  { %v139_v39 = vsel %vm134_vm6, %v131_v31, %v125_v52  ;;  %v161_v40 = vadd.f32 1.0, %v155_v32  ;;  %v153_v41 = vadd.f32 %v147_v37, %v120_v27  ;;  %v152_v43 = vadd.f32 %v136_v35, %v119_v26 }
  0xa6   :  { %v145_v42 = vsel %vm141_vm7, %v139_v39, 0.0  ;;  %247 = vrsqrt.f32 %v162_v36  ;;  %v160_v46 = vmul.f32 2e-05, %v154_v38  ;;  %vm182_vm8 = vcmp.eq.f32.partialorder %v162_v36, inf }
  0xa7   :  { %249 = vrsqrt.f32 %v161_v40  ;;  %v159_v45 = vmul.f32 2e-05, %v153_v41  ;;  %v151_v47 = vadd.f32 %v145_v42, %v118_v44  ;;  %v158_v48 = vmul.f32 2e-05, %v152_v43 }
  0xa8   :  { %v166_v50 = vadd.f32 1.0, %v160_v46  ;;  %v185_v57 = vand.u32 2147483648, %v162_v36  ;;  %vm175_vm9 = vcmp.eq.f32.partialorder %v161_v40, inf  ;;  %v178_v58 = vand.u32 2147483648, %v161_v40 }
  0xa9   :  { %v165_v49 = vadd.f32 1.0, %v159_v45  ;;  %v157_v51 = vmul.f32 2e-05, %v151_v47  ;;  %v164_v53 = vadd.f32 1.0, %v158_v48  ;;  %vm184_vm10 = vcmp.eq.f32.partialorder %v162_v36, 0.0 }
  0xaa   :  { %vm177_vm11 = vcmp.eq.f32.partialorder %v161_v40, 0.0  ;;  %vm210_vm14 = vcmp.eq.f32.partialorder %v166_v50, inf  ;;  %vm212_vm15 = vcmp.eq.f32.partialorder %v166_v50, 0.0  ;;  %v213_v12 = vand.u32 2147483648, %v166_v50 }
  0xab   :  { %251 = vrsqrt.f32 %v165_v49  ;;  %v163_v52 = vadd.f32 1.0, %v157_v51  ;;  %vm203_vm12 = vcmp.eq.f32.partialorder %v165_v49, inf  ;;  %vm205_vm13 = vcmp.eq.f32.partialorder %v165_v49, 0.0 }
  0xac   :  { %253 = vrsqrt.f32 %v166_v50  ;;  %v206_v7 = vand.u32 2147483648, %v165_v49  ;;  %vm196_vm0 = vcmp.eq.f32.partialorder %v164_v53, inf  ;;  %vm198_vm1 = vcmp.eq.f32.partialorder %v164_v53, 0.0 }
  0xad   :  { %255 = vrsqrt.f32 %v164_v53  ;;  %v199_v17 = vand.u32 2147483648, %v164_v53  ;;  %vm189_vm2 = vcmp.eq.f32.partialorder %v163_v52, inf  ;;  %v192_v21 = vand.u32 2147483648, %v163_v52 }
  0xae   :  { %257 = vrsqrt.f32 %v163_v52  ;;  %vm191_vm3 = vcmp.eq.f32.partialorder %v163_v52, 0.0 }
  0xb3   :  { %v248_v54 = vpop.eup %247 }
  0xb4   :  { %v250_v25 = vpop.eup %249  ;;  %v181_v55 = vmul.f32 %v248_v54, %v162_v36 }
  0xb5   :  { %v174_v56 = vmul.f32 %v250_v25, %v161_v40 }
  0xb6   :  { %v183_v59 = vsel %vm182_vm8, %v162_v36, %v181_v55 }
  0xb7   :  { %v176_v60 = vsel %vm175_vm9, %v161_v40, %v174_v56  ;;  %v186_v61 = vsel %vm184_vm10, %v185_v57, %v183_v59 }
  0xb8   :  { %v179_v62 = vsel %vm177_vm11, %v178_v58, %v176_v60  ;;  %259 = vrsqrt.f32 %v186_v61  ;;  %v252_v63 = vpop.eup %251 }
  0xb9   :  { %261 = vrsqrt.f32 %v179_v62  ;;  %v254_v3 = vpop.eup %253  ;;  %v202_v4 = vmul.f32 %v252_v63, %v165_v49 }
  0xba   :  { %v256_v6 = vpop.eup %255  ;;  %v209_v10 = vmul.f32 %v254_v3, %v166_v50 }
  0xbb   :  { %v204_v11 = vsel %vm203_vm12, %v165_v49, %v202_v4  ;;  %v195_v13 = vmul.f32 %v256_v6, %v164_v53  ;;  %v258_v14 = vpop.eup %257 }
  0xbc   :  { %v207_v15 = vsel %vm205_vm13, %v206_v7, %v204_v11  ;;  %v211_v16 = vsel %vm210_vm14, %v166_v50, %v209_v10  ;;  %v188_v19 = vmul.f32 %v258_v14, %v163_v52 }
  0xbd   :  { %v214_v18 = vsel %vm212_vm15, %v213_v12, %v211_v16  ;;  %263 = vrsqrt.f32 %v207_v15  ;;  %v197_v20 = vsel %vm196_vm0, %v164_v53, %v195_v13 }
  0xbe   :  { %265 = vrsqrt.f32 %v214_v18  ;;  %v200_v22 = vsel %vm198_vm1, %v199_v17, %v197_v20  ;;  %v190_v23 = vsel %vm189_vm2, %v163_v52, %v188_v19 }
  0xbf   :  { %267 = vrsqrt.f32 %v200_v22  ;;  %v193_v24 = vsel %vm191_vm3, %v192_v21, %v190_v23 }
  0xc0   :  { %269 = vrsqrt.f32 %v193_v24 }
  0xc5   :  { %v260_v27 = vpop.eup %259 }
  0xc6   :  { %v262_v28 = vpop.eup %261  ;;  %v222_v26 = vmul.f32 %v260_v27, %v248_v54 }
  0xc7   :  { %v221_v29 = vmul.f32 %v262_v28, %v250_v25 }
  0xc8   :  { %v228_v30 = vmul.f32 %v222_v26, %v298_v2 }
  0xc9   :  { %v227_v31 = vmul.f32 %v221_v29, %v293_v1 }
  0xca   :  { %234 = vst [vmem:[%s469_s1 + $0x8] sm:$0xff] %v228_v30  ;;  %v264_v32 = vpop.eup %263 }
  0xcb   :  { %233 = vst [vmem:[%s469_s1] sm:$0xff] %v227_v31  ;;  %v266_v33 = vpop.eup %265  ;;  %v225_v34 = vmul.f32 %v264_v32, %v252_v63 }
  0xcc   :  { %v268_v35 = vpop.eup %267  ;;  %v226_v36 = vmul.f32 %v266_v33, %v254_v3 }
  0xcd   :  { %v231_v37 = vmul.f32 %v225_v34, %v288_v0  ;;  %v224_v38 = vmul.f32 %v268_v35, %v256_v6  ;;  %v270_v39 = vpop.eup %269 }
  0xce   :  { %v232_v2 = vmul.f32 %v226_v36, %v326_v8  ;;  %v223_v1 = vmul.f32 %v270_v39, %v258_v14 }
  0xcf   :  { %237 = vst [vmem:[%s469_s1 + $0x20] sm:$0xff] %v231_v37  ;;  %v230_v40 = vmul.f32 %v224_v38, %v331_v9 }
  0xd0   :  { %238 = vst [vmem:[%s469_s1 + $0x28] sm:$0xff] %v232_v2  ;;  %v229_v41 = vmul.f32 %v223_v1, %v311_v5 }
  0xd1   :  { %236 = vst [vmem:[%s469_s1 + $0x18] sm:$0xff] %v230_v40 }
  0xd2   :  { %235 = vst [vmem:[%s469_s1 + $0x10] sm:$0xff] %v229_v41 }

// kernel: alexnet_forward.19
= control target key start
LH: loop header
LB: loop body
LE: loop exit
PB: predicated region body
PF: predicated region fallthrough
CT: control target
= control target key end

     0   :  { %8 = vsyncpa [#allocation4], 0  ;;  %s2256_s0 = inlined_call_operand.vmem [shape: bf16[8,9216], index: 0, kind: input, shape index: {}]   ;;  %s2257_s1 = inlined_call_operand.hbm [shape: bf16[9216,4096], index: 1, kind: input, shape index: {}]   ;;  %s2258_s2 = inlined_call_operand.vmem [shape: f32[1,4096], index: 2, kind: input, shape index: {}]   ;;  %s2259_s3 = inlined_call_operand.vmem [shape: f32[8,4096], index: 3, kind: output, shape index: {}]  }
   0x1   :  { %10 = vsyncpa [#allocation4 + $0x1], 0  ;;  %s1966_s12 = smov 0   ;;  %s1968_s13 = smov 0  }
   0x2   :  { %s1970_s14 = smov 0   ;;  %s1972_s15 = smov 0  }
   0x3   :  { %s1974_s16 = smov 0   ;;  %s1976_s17 = smov 0  }
   0x4   :  { %s1978_s18 = smov 0   ;;  %s1980_s19 = smov 0  }
   0x5 LB: > { %s1421_s20 = sadd.s32 4294967295, %s1939_s19   ;;  %s28_s21 = sadd.s32 1, %s1931_s17  ;;  %s1939_s19 = sphi %s1980_s19, %s16_s19   ;;  %s1935_s18 = sphi %s1978_s18, %s2269_s18   ;;  %s1931_s17 = sphi %s1976_s17, %s2268_s17   ;;  %s1927_s16 = sphi %s1974_s16, %s2267_s16   ;;  %s1923_s15 = sphi %s1972_s15, %s2266_s15   ;;  %s1919_s14 = sphi %s1970_s14, %s2265_s14   ;;  %s1915_s13 = sphi %s1968_s13, %s2264_s13   ;;  %s1911_s12 = sphi %s1966_s12, %s2263_s12  }
   0x6   : > { %p29_p0 = scmp.ge.s32.totalorder %s28_s21, 18  ;;  %s31_s22 = sadd.s32 1, %s1935_s18 }
   0x7   : > { %s72_s23 = sadd.s32 1, %s1919_s14  ;;  %p79_p1 = scmp.ne.s32.totalorder %s1919_s14, %s1915_s13 }
   0x8   : > { %s2271_s21 = smov (%p29_p0, %s28_s21), 0  ;;  %s2273_s22 = smov (!%p29_p0, %s31_s22), %s1935_s18 }
   0x9   : > { %s67_s24 = ssub.s32 %s1931_s17, %s2271_s21  ;;  %p80_p2 = scmp.eq.s32.totalorder %s1939_s19, 0 }
   0xa   : > { %p33_p3 = scmp.ge.s32.totalorder %s2273_s22, 8  ;;  %p85_p4 = scmp.ne.s32.totalorder %s1915_s13, %s1911_s12 }
   0xb   : > { %p2017_p5 = por %p80_p2, %p79_p1  ;;  %p86_p6 = scmp.eq.s32.totalorder %s1421_s20, 0 }
   0xc   : > { %s2275_s22 = smov (%p33_p3, %s2273_s22), 0  ;;  %p1580_p8 = scmp.lt.s32.totalorder %s1939_s19, 144 }
   0xd   : > { %p2023_p7 = por %p86_p6, %p85_p4  ;;  %s68_s27 = ssub.s32 %s1935_s18, %s2275_s22 }
   0xe   : > { %s69_s28 = sor.u32 %s68_s27, %s67_s24  ;;  %s176_s29 = sand.u32 1, %s1919_s14  }
   0xf   : > { %p70_p9 = scmp.eq.s32.totalorder %s69_s28, 0  ;;  %s1425_s30 = sshll.u32 %s176_s29, 10 }
  0x10   : > { %s1427_s4 = sshll.u32 %s1935_s18, 2  ;;  %s1573_s6 = sshll.u32 %s1931_s17, 11 }
  0x11   : > { %s2033_s5 = scalar_select %p70_p9, %s1919_s14, %s72_s23  }
  0x12   : > { %s187_s7 = sadd.s32 %s1573_s6, %s1427_s4  ;;  %s180_s8 = scalar_lea.vmem [#allocation3], %s1425_s30 }
  0x13   : > { %s190_s9 = sshll.u32 %s180_s8, 4  ;;  %s1429_s10 = sshll.u32 %s187_s7, 6  ;;  %s191_s9 = int_to_ptr.vmem [resolvable:$true] %s190_s9 }
  0x14   : > { %s189_s20 = scalar_lea.hbm %s2257_s1, %s1429_s10  ;;  %p2043_p10 = pnand %p1580_p8, %p2017_p5 }
  0x15   : > { %s177_s27 = scalar_lea.sflag [#allocation4], %s176_s29  ;;  %s1858_s23 = scalar_lea.vmem %s191_s9, 16384 }
  0x16   : > { %p1847_p11 = pneg %p2043_p10  ;;  %p1859_p12 = scmp.ne.s32.totalorder %s191_s9, %s1858_s23 }
  0x17   : > { %s1941_s28 = smov [#allocation3]  }
  0x18   : > { %p1861_p13 = pnand %p1859_p12, %p1847_p11  ;;  %s1863_s30 = sshll.u32 %s1941_s28, 4  ;;  %s1864_s30 = int_to_ptr.vmem [resolvable:$false] %s1863_s30 }
  0x19   : > { %s1865_s4 = scalar_lea.vmem %s1864_s30, 32768  ;;  %p1866_p1 = scmp.lt.s32.totalorder %s191_s9, %s1864_s30 }
  0x1a   : > { %p1862_p0 = pneg %p1861_p13  ;;  %p1867_p2 = scmp.lt.s32.totalorder %s1865_s4, %s1858_s23 }
  0x1c   : > { %p1868_p3 = por %p1867_p2, %p1866_p1 }
  0x1e   : > { %p1869_p4 = pnand %p1868_p3, %p1862_p0 }
  0x20   : > { %1872 = shalt.err (!%p1869_p4)
}
  0x21   : > { %s1942_s25 = smov 2048   ;;  %s1943_s29 = smov 256  }
  0x22   : > { %s1944_s6 = smov 16   ;;  %p1430_p5 = scmp.ge.s32.totalorder %s1939_s19, 1 }
  0x23   : > { %1579 = dma.hbm_to_vmem [thread:$0]  (!%p2043_p10), %s189_s20, 16384, %s191_s9, %s177_s27, %s1942_s25, %s1943_s29, %s1944_s6  }
  0x24   : > { %p206_p6 = scmp.lt.s32.totalorder %s1939_s19, 145 }
  0x26   : > { %p207_p8 = pnand %p1430_p5, %p206_p6 }
  0x27   : > { %s212_s7 = sand.u32 (!%p207_p8), 1, %s1915_s13  }
  0x28   : > { %210 = sbr.rel (%p207_p8) target bundleno = 404 (0x194), region = 32  ;;  %s1431_s8 = sshll.u32 (!%p207_p8), %s212_s7, 10 }
  0x29   : > { %s213_s10 = scalar_lea.sflag (!%p207_p8), [#allocation4], %s212_s7  ;;  %s2054_s11 = scalar_lea.vmem (!%p207_p8), [#allocation3], %s1431_s8 }
  0x2d   : > { %1906 = dma.done.wait (%p2023_p7), %s213_s10, 16384  }
  0x2e   : > { %1908 = vsyncadd (%p2023_p7), %s213_s10, 4294950912  ;;  %s1432_s12 = sshll.u32 %s1923_s15, 2  ;;  %s1434_s9 = sshll.u32 %s1927_s16, 2 }
  0x2f   : > { %p259_p9 = scmp.lt.s32.totalorder %s1432_s12, 71  ;;  %p269_p10 = scmp.lt.s32.totalorder %s1434_s9, 31 }
  0x30   : > { %p1437_p7 = scmp.ne.s32.totalorder %s1923_s15, 0 }
  0x31   : > { %s2277_s12 = smov (!%p259_p9, %s1432_s12), 71  ;;  %s2279_s9 = smov (!%p269_p10, %s1434_s9), 31 }
  0x32   : > { %s1433_s20 = sshll.u32 %s2277_s12, 2  ;;  %s271_s30 = scalar_lea.vmem %s2258_s2, %s2279_s9 }
  0x33   : > { %s2067_s23 = scalar_lea.vmem %s2256_s0, %s1433_s20  ;;  %s1436_s4 = sshll.u32 %s2279_s9, 3 }
  0x34   : > { %s2077_s29 = scalar_lea.vmem %s2259_s3, %s1436_s4  ;;  %286 = sbr.rel (%p1437_p7) target bundleno = 60 (0x3c), region = 40 }
  0x39   : > { %v1945_v0 = vmov 0.0  }
  0x3a   : > { %287 = vst [vmem:[#allocation2 + $0x10] sm:$0xff] %v1945_v0  ;;  %288 = vst [vmem:[#allocation2] sm:$0xff] %v1945_v0 }
  0x3b   : > { %289 = vst [vmem:[#allocation2 + $0x18] sm:$0xff] %v1945_v0  ;;  %290 = vst [vmem:[#allocation2 + $0x8] sm:$0xff] %v1945_v0 }
  0x3c PF: > { %v1649_v1 = vld [vmem:[%s2054_s11 + $0xe4] ss:$16 sps:$4 sm:$0xff]   ;;  %v1653_v3 = vld [vmem:[%s2054_s11 + $0xe0] ss:$16 sps:$4 sm:$0xff]   ;;  %v296_v49 = vld [vmem:[%s2067_s23 + $0x8] sm:$0xff]  ;;  %p1570_p11 = scmp.ne.s32.totalorder %s1923_s15, 17 }
  0x3d   : > { %v1651_v2 = vld [vmem:[%s2054_s11 + $0x2e4] ss:$16 sps:$4 sm:$0xff]   ;;  %1079 = vmatprep.subr.bf16.mxu0 %v1649_v1  ;;  %v1654_v4 = vld [vmem:[%s2054_s11 + $0x2e0] ss:$16 sps:$4 sm:$0xff]   ;;  %v1441_v52 = vcombine.high %v296_v49, %v296_v49 }
  0x3e   : > { %1120 = vmatprep.subr.bf16.mxu1 %v1651_v2  ;;  %v1655_v5 = vld [vmem:[%s2054_s11 + $0xc4] ss:$16 sps:$4 sm:$0xff]   ;;  %1080 = vmatpush1.bf16.msra.mxu0 %v1653_v3  ;;  %v1659_v7 = vld [vmem:[%s2054_s11 + $0xc0] ss:$16 sps:$4 sm:$0xff]  }
  0x3f   : > { %1121 = vmatpush1.bf16.msra.mxu1 %v1654_v4  ;;  %v1657_v6 = vld [vmem:[%s2054_s11 + $0x2c4] ss:$16 sps:$4 sm:$0xff]   ;;  %1081 = vmatprep.subr.bf16.mxu0 %v1655_v5  ;;  %v1660_v8 = vld [vmem:[%s2054_s11 + $0x2c0] ss:$16 sps:$4 sm:$0xff]   ;;  %v1751_v5 = vld [vmem:[%s2054_s11 + $0xec] ss:$16 sps:$4 sm:$0xff]  }
  0x40   : > { %1122 = vmatprep.subr.bf16.mxu1 %v1657_v6  ;;  %v1661_v9 = vld [vmem:[%s2054_s11 + $0xa4] ss:$16 sps:$4 sm:$0xff]   ;;  %v1665_v11 = vld [vmem:[%s2054_s11 + $0xa0] ss:$16 sps:$4 sm:$0xff]   ;;  %1152 = vmatprep.mubr.bf16.mxu1 %v1441_v52  ;;  %v1754_v6 = vld [vmem:[%s2054_s11 + $0x2ec] ss:$16 sps:$4 sm:$0xff]  }
  0x41   : > { %v1663_v10 = vld [vmem:[%s2054_s11 + $0x2a4] ss:$16 sps:$4 sm:$0xff]   ;;  %v1666_v12 = vld [vmem:[%s2054_s11 + $0x2a0] ss:$16 sps:$4 sm:$0xff]  }
  0x42   : > { %1082 = vmatpush1.bf16.msra.mxu0 %v1659_v7  ;;  %v1667_v13 = vld [vmem:[%s2054_s11 + $0x84] ss:$16 sps:$4 sm:$0xff]   ;;  %v1671_v15 = vld [vmem:[%s2054_s11 + $0x80] ss:$16 sps:$4 sm:$0xff]  }
  0x43   : > { %1123 = vmatpush1.bf16.msra.mxu1 %v1660_v8  ;;  %1083 = vmatprep.subr.bf16.mxu0 %v1661_v9  ;;  %v1669_v14 = vld [vmem:[%s2054_s11 + $0x284] ss:$16 sps:$4 sm:$0xff]   ;;  %v1672_v16 = vld [vmem:[%s2054_s11 + $0x280] ss:$16 sps:$4 sm:$0xff]   ;;  %v2153_v8 = vcombine.low %v296_v49, %v296_v49  ;;  %v1749_v9 = vld [vmem:[%s2054_s11 + $0xe8] ss:$16 sps:$4 sm:$0xff]  }
  0x44   : > { %1124 = vmatprep.subr.bf16.mxu1 %v1663_v10  ;;  %v1673_v17 = vld [vmem:[%s2054_s11 + $0x64] ss:$16 sps:$4 sm:$0xff]   ;;  %v1677_v19 = vld [vmem:[%s2054_s11 + $0x60] ss:$16 sps:$4 sm:$0xff]   ;;  %v1752_v10 = vld [vmem:[%s2054_s11 + $0x2e8] ss:$16 sps:$4 sm:$0xff]  }
  0x45   : > { %v1675_v18 = vld [vmem:[%s2054_s11 + $0x264] ss:$16 sps:$4 sm:$0xff]   ;;  %v1678_v20 = vld [vmem:[%s2054_s11 + $0x260] ss:$16 sps:$4 sm:$0xff]   ;;  %v1809_v49 = vld [vmem:[%s2054_s11 + $0x1a8] ss:$16 sps:$4 sm:$0xff]  }
  0x46   : > { %1084 = vmatpush1.bf16.msra.mxu0 %v1665_v11  ;;  %v1679_v21 = vld [vmem:[%s2054_s11 + $0x44] ss:$16 sps:$4 sm:$0xff]   ;;  %v1683_v23 = vld [vmem:[%s2054_s11 + $0x40] ss:$16 sps:$4 sm:$0xff]   ;;  %v1757_v11 = vld [vmem:[%s2054_s11 + $0xcc] ss:$16 sps:$4 sm:$0xff]  }
  0x47   : > { %1125 = vmatpush1.bf16.msra.mxu1 %v1666_v12  ;;  %1085 = vmatprep.subr.bf16.mxu0 %v1667_v13  ;;  %v1681_v22 = vld [vmem:[%s2054_s11 + $0x244] ss:$16 sps:$4 sm:$0xff]   ;;  %v1684_v24 = vld [vmem:[%s2054_s11 + $0x240] ss:$16 sps:$4 sm:$0xff]   ;;  %v1760_v12 = vld [vmem:[%s2054_s11 + $0x2cc] ss:$16 sps:$4 sm:$0xff]  }
  0x48   : > { %1126 = vmatprep.subr.bf16.mxu1 %v1669_v14  ;;  %v1685_v25 = vld [vmem:[%s2054_s11 + $0x24] ss:$16 sps:$4 sm:$0xff]   ;;  %v1689_v27 = vld [vmem:[%s2054_s11 + $0x20] ss:$16 sps:$4 sm:$0xff]   ;;  %v1755_v13 = vld [vmem:[%s2054_s11 + $0xc8] ss:$16 sps:$4 sm:$0xff]  }
  0x49   : > { %v1687_v26 = vld [vmem:[%s2054_s11 + $0x224] ss:$16 sps:$4 sm:$0xff]   ;;  %v1690_v28 = vld [vmem:[%s2054_s11 + $0x220] ss:$16 sps:$4 sm:$0xff]   ;;  %v1758_v14 = vld [vmem:[%s2054_s11 + $0x2c8] ss:$16 sps:$4 sm:$0xff]  }
  0x4a   : > { %1086 = vmatpush1.bf16.msra.mxu0 %v1671_v15  ;;  %v1691_v29 = vld [vmem:[%s2054_s11 + $0x4] ss:$16 sps:$4 sm:$0xff]   ;;  %v1695_v31 = vld [vmem:[%s2054_s11] ss:$16 sps:$4 sm:$0xff]   ;;  %v1763_v15 = vld [vmem:[%s2054_s11 + $0xac] ss:$16 sps:$4 sm:$0xff]  }
  0x4b   : > { %1127 = vmatpush1.bf16.msra.mxu1 %v1672_v16  ;;  %1087 = vmatprep.subr.bf16.mxu0 %v1673_v17  ;;  %v1693_v30 = vld [vmem:[%s2054_s11 + $0x204] ss:$16 sps:$4 sm:$0xff]   ;;  %v1696_v32 = vld [vmem:[%s2054_s11 + $0x200] ss:$16 sps:$4 sm:$0xff]   ;;  %v1766_v16 = vld [vmem:[%s2054_s11 + $0x2ac] ss:$16 sps:$4 sm:$0xff]  }
  0x4c   : > { %1128 = vmatprep.subr.bf16.mxu1 %v1675_v18  ;;  %v1697_v33 = vld [vmem:[%s2054_s11 + $0x1e4] ss:$16 sps:$4 sm:$0xff]   ;;  %v1701_v35 = vld [vmem:[%s2054_s11 + $0x1e0] ss:$16 sps:$4 sm:$0xff]   ;;  %v1761_v17 = vld [vmem:[%s2054_s11 + $0xa8] ss:$16 sps:$4 sm:$0xff]  }
  0x4d   : > { %v1699_v34 = vld [vmem:[%s2054_s11 + $0x3e4] ss:$16 sps:$4 sm:$0xff]   ;;  %v1702_v36 = vld [vmem:[%s2054_s11 + $0x3e0] ss:$16 sps:$4 sm:$0xff]   ;;  %v1764_v18 = vld [vmem:[%s2054_s11 + $0x2a8] ss:$16 sps:$4 sm:$0xff]  }
  0x4e   : > { %1088 = vmatpush1.bf16.msra.mxu0 %v1677_v19  ;;  %v1703_v37 = vld [vmem:[%s2054_s11 + $0x1c4] ss:$16 sps:$4 sm:$0xff]   ;;  %v1707_v39 = vld [vmem:[%s2054_s11 + $0x1c0] ss:$16 sps:$4 sm:$0xff]   ;;  %v1769_v19 = vld [vmem:[%s2054_s11 + $0x8c] ss:$16 sps:$4 sm:$0xff]  }
  0x4f   : > { %1129 = vmatpush1.bf16.msra.mxu1 %v1678_v20  ;;  %1089 = vmatprep.subr.bf16.mxu0 %v1679_v21  ;;  %v1705_v38 = vld [vmem:[%s2054_s11 + $0x3c4] ss:$16 sps:$4 sm:$0xff]   ;;  %v1708_v40 = vld [vmem:[%s2054_s11 + $0x3c0] ss:$16 sps:$4 sm:$0xff]   ;;  %v1772_v20 = vld [vmem:[%s2054_s11 + $0x28c] ss:$16 sps:$4 sm:$0xff]  }
  0x50   : > { %1130 = vmatprep.subr.bf16.mxu1 %v1681_v22  ;;  %v1709_v41 = vld [vmem:[%s2054_s11 + $0x1a4] ss:$16 sps:$4 sm:$0xff]   ;;  %v1713_v43 = vld [vmem:[%s2054_s11 + $0x1a0] ss:$16 sps:$4 sm:$0xff]   ;;  %v1767_v21 = vld [vmem:[%s2054_s11 + $0x88] ss:$16 sps:$4 sm:$0xff]  }
  0x51   : > { %v1711_v42 = vld [vmem:[%s2054_s11 + $0x3a4] ss:$16 sps:$4 sm:$0xff]   ;;  %v1714_v44 = vld [vmem:[%s2054_s11 + $0x3a0] ss:$16 sps:$4 sm:$0xff]   ;;  %v1770_v22 = vld [vmem:[%s2054_s11 + $0x288] ss:$16 sps:$4 sm:$0xff]  }
  0x52   : > { %1090 = vmatpush1.bf16.msra.mxu0 %v1683_v23  ;;  %v1715_v45 = vld [vmem:[%s2054_s11 + $0x184] ss:$16 sps:$4 sm:$0xff]   ;;  %v1719_v50 = vld [vmem:[%s2054_s11 + $0x180] ss:$16 sps:$4 sm:$0xff]   ;;  %v1775_v23 = vld [vmem:[%s2054_s11 + $0x6c] ss:$16 sps:$4 sm:$0xff]  }
  0x53   : > { %1131 = vmatpush1.bf16.msra.mxu1 %v1684_v24  ;;  %1091 = vmatprep.subr.bf16.mxu0 %v1685_v25  ;;  %v1717_v46 = vld [vmem:[%s2054_s11 + $0x384] ss:$16 sps:$4 sm:$0xff]   ;;  %v1720_v51 = vld [vmem:[%s2054_s11 + $0x380] ss:$16 sps:$4 sm:$0xff]   ;;  %v1778_v24 = vld [vmem:[%s2054_s11 + $0x26c] ss:$16 sps:$4 sm:$0xff]  }
  0x54   : > { %1132 = vmatprep.subr.bf16.mxu1 %v1687_v26  ;;  %v295_v47 = vld [vmem:[%s2067_s23] sm:$0xff]  ;;  %v1773_v25 = vld [vmem:[%s2054_s11 + $0x68] ss:$16 sps:$4 sm:$0xff]  }
  0x55   : > { %v2127_v48 = vcombine.high %v295_v47, %v295_v47  ;;  %v1721_v53 = vld [vmem:[%s2054_s11 + $0x164] ss:$16 sps:$4 sm:$0xff]   ;;  %v1725_v55 = vld [vmem:[%s2054_s11 + $0x160] ss:$16 sps:$4 sm:$0xff]   ;;  %v2151_v7 = vcombine.low %v295_v47, %v295_v47  ;;  %v1776_v26 = vld [vmem:[%s2054_s11 + $0x268] ss:$16 sps:$4 sm:$0xff]  }
  0x56   : > { %1092 = vmatpush1.bf16.msra.mxu0 %v1689_v27  ;;  %v1723_v54 = vld [vmem:[%s2054_s11 + $0x364] ss:$16 sps:$4 sm:$0xff]   ;;  %v1726_v56 = vld [vmem:[%s2054_s11 + $0x360] ss:$16 sps:$4 sm:$0xff]   ;;  %v1781_v27 = vld [vmem:[%s2054_s11 + $0x4c] ss:$16 sps:$4 sm:$0xff]  }
  0x57   : > { %1133 = vmatpush1.bf16.msra.mxu1 %v1690_v28  ;;  %1093 = vmatprep.subr.bf16.mxu0 %v1691_v29  ;;  %v1727_v57 = vld [vmem:[%s2054_s11 + $0x144] ss:$16 sps:$4 sm:$0xff]   ;;  %v1731_v59 = vld [vmem:[%s2054_s11 + $0x140] ss:$16 sps:$4 sm:$0xff]   ;;  %v1784_v28 = vld [vmem:[%s2054_s11 + $0x24c] ss:$16 sps:$4 sm:$0xff]  }
  0x58   : > { %1134 = vmatprep.subr.bf16.mxu1 %v1693_v30  ;;  %1111 = vmatprep.mubr.bf16.mxu0 %v2127_v48  ;;  %v1729_v58 = vld [vmem:[%s2054_s11 + $0x344] ss:$16 sps:$4 sm:$0xff]   ;;  %v1732_v60 = vld [vmem:[%s2054_s11 + $0x340] ss:$16 sps:$4 sm:$0xff]   ;;  %v1779_v29 = vld [vmem:[%s2054_s11 + $0x48] ss:$16 sps:$4 sm:$0xff]  }
  0x59   : > { %v1733_v61 = vld [vmem:[%s2054_s11 + $0x124] ss:$16 sps:$4 sm:$0xff]   ;;  %v1737_v63 = vld [vmem:[%s2054_s11 + $0x120] ss:$16 sps:$4 sm:$0xff]   ;;  %v1782_v30 = vld [vmem:[%s2054_s11 + $0x248] ss:$16 sps:$4 sm:$0xff]  }
  0x5a   : > { %1094 = vmatpush1.bf16.msra.mxu0 %v1695_v31  ;;  %v1735_v62 = vld [vmem:[%s2054_s11 + $0x324] ss:$16 sps:$4 sm:$0xff]   ;;  %v1738_v0 = vld [vmem:[%s2054_s11 + $0x320] ss:$16 sps:$4 sm:$0xff]   ;;  %v1787_v31 = vld [vmem:[%s2054_s11 + $0x2c] ss:$16 sps:$4 sm:$0xff]  }
  0x5b   : > { %1135 = vmatpush1.bf16.msra.mxu1 %v1696_v32  ;;  %1095 = vmatprep.subr.bf16.mxu0 %v1697_v33  ;;  %v1739_v1 = vld [vmem:[%s2054_s11 + $0x104] ss:$16 sps:$4 sm:$0xff]   ;;  %v1743_v3 = vld [vmem:[%s2054_s11 + $0x100] ss:$16 sps:$4 sm:$0xff]   ;;  %v1790_v32 = vld [vmem:[%s2054_s11 + $0x22c] ss:$16 sps:$4 sm:$0xff]  }
  0x5c   : > { %1136 = vmatprep.subr.bf16.mxu1 %v1699_v34  ;;  %v1741_v2 = vld [vmem:[%s2054_s11 + $0x304] ss:$16 sps:$4 sm:$0xff]   ;;  %v1744_v4 = vld [vmem:[%s2054_s11 + $0x300] ss:$16 sps:$4 sm:$0xff]   ;;  %v1785_v33 = vld [vmem:[%s2054_s11 + $0x28] ss:$16 sps:$4 sm:$0xff]  }
  0x5d   : > { %v1788_v34 = vld [vmem:[%s2054_s11 + $0x228] ss:$16 sps:$4 sm:$0xff]   ;;  %v1811_v47 = vld [vmem:[%s2054_s11 + $0x1ac] ss:$16 sps:$4 sm:$0xff]  }
  0x5e   : > { %1096 = vmatpush2.bf16.msra.mxu0 %v1701_v35  ;;  %v1793_v35 = vld [vmem:[%s2054_s11 + $0xc] ss:$16 sps:$4 sm:$0xff]  }
  0x5f   : > { %1137 = vmatpush2.bf16.msra.mxu1 %v1702_v36  ;;  %1097 = vmatprep.subr.bf16.mxu0 %v1703_v37  ;;  %v1796_v36 = vld [vmem:[%s2054_s11 + $0x20c] ss:$16 sps:$4 sm:$0xff]   ;;  %v1791_v37 = vld [vmem:[%s2054_s11 + $0x8] ss:$16 sps:$4 sm:$0xff]  }
  0x60   : > { %1138 = vmatprep.subr.bf16.mxu1 %v1705_v38  ;;  %v1794_v38 = vld [vmem:[%s2054_s11 + $0x208] ss:$16 sps:$4 sm:$0xff]  }
  0x62   : > { %1098 = vmatpush2.bf16.msra.mxu0 %v1707_v39  ;;  %v1799_v39 = vld [vmem:[%s2054_s11 + $0x1ec] ss:$16 sps:$4 sm:$0xff]  }
  0x63   : > { %1139 = vmatpush2.bf16.msra.mxu1 %v1708_v40  ;;  %1099 = vmatprep.subr.bf16.mxu0 %v1709_v41  ;;  %v1802_v40 = vld [vmem:[%s2054_s11 + $0x3ec] ss:$16 sps:$4 sm:$0xff]   ;;  %v1797_v41 = vld [vmem:[%s2054_s11 + $0x1e8] ss:$16 sps:$4 sm:$0xff]  }
  0x64   : > { %1140 = vmatprep.subr.bf16.mxu1 %v1711_v42  ;;  %v1800_v42 = vld [vmem:[%s2054_s11 + $0x3e8] ss:$16 sps:$4 sm:$0xff]  }
  0x66   : > { %1100 = vmatpush2.bf16.msra.mxu0 %v1713_v43  ;;  %v1805_v43 = vld [vmem:[%s2054_s11 + $0x1cc] ss:$16 sps:$4 sm:$0xff]  }
  0x67   : > { %1141 = vmatpush2.bf16.msra.mxu1 %v1714_v44  ;;  %1101 = vmatprep.subr.bf16.mxu0 %v1715_v45  ;;  %v1808_v44 = vld [vmem:[%s2054_s11 + $0x3cc] ss:$16 sps:$4 sm:$0xff]   ;;  %v1803_v45 = vld [vmem:[%s2054_s11 + $0x1c8] ss:$16 sps:$4 sm:$0xff]  }
  0x68   : > { %1142 = vmatprep.subr.bf16.mxu1 %v1717_v46  ;;  %v1806_v46 = vld [vmem:[%s2054_s11 + $0x3c8] ss:$16 sps:$4 sm:$0xff]  }
  0x6a   : > { %1102 = vmatpush2.bf16.msra.mxu0 %v1719_v50  ;;  %v1812_v50 = vld [vmem:[%s2054_s11 + $0x3a8] ss:$16 sps:$4 sm:$0xff]  }
  0x6b   : > { %1143 = vmatpush2.bf16.msra.mxu1 %v1720_v51  ;;  %1103 = vmatprep.subr.bf16.mxu0 %v1721_v53  ;;  %v1817_v51 = vld [vmem:[%s2054_s11 + $0x18c] ss:$16 sps:$4 sm:$0xff]   ;;  %v1815_v53 = vld [vmem:[%s2054_s11 + $0x188] ss:$16 sps:$4 sm:$0xff]  }
  0x6c   : > { %1144 = vmatprep.subr.bf16.mxu1 %v1723_v54  ;;  %v1818_v54 = vld [vmem:[%s2054_s11 + $0x388] ss:$16 sps:$4 sm:$0xff]  }
  0x6e   : > { %1104 = vmatpush2.bf16.msra.mxu0 %v1725_v55  ;;  %v1823_v55 = vld [vmem:[%s2054_s11 + $0x16c] ss:$16 sps:$4 sm:$0xff]  }
  0x6f   : > { %1145 = vmatpush2.bf16.msra.mxu1 %v1726_v56  ;;  %1105 = vmatprep.subr.bf16.mxu0 %v1727_v57  ;;  %v1826_v56 = vld [vmem:[%s2054_s11 + $0x36c] ss:$16 sps:$4 sm:$0xff]   ;;  %v1821_v57 = vld [vmem:[%s2054_s11 + $0x168] ss:$16 sps:$4 sm:$0xff]  }
  0x70   : > { %1146 = vmatprep.subr.bf16.mxu1 %v1729_v58  ;;  %v1824_v58 = vld [vmem:[%s2054_s11 + $0x368] ss:$16 sps:$4 sm:$0xff]  }
  0x72   : > { %1106 = vmatpush2.bf16.msra.mxu0 %v1731_v59  ;;  %v1829_v59 = vld [vmem:[%s2054_s11 + $0x14c] ss:$16 sps:$4 sm:$0xff]  }
  0x73   : > { %1147 = vmatpush2.bf16.msra.mxu1 %v1732_v60  ;;  %1107 = vmatprep.subr.bf16.mxu0 %v1733_v61  ;;  %v1832_v60 = vld [vmem:[%s2054_s11 + $0x34c] ss:$16 sps:$4 sm:$0xff]   ;;  %v1827_v61 = vld [vmem:[%s2054_s11 + $0x148] ss:$16 sps:$4 sm:$0xff]  }
  0x74   : > { %1148 = vmatprep.subr.bf16.mxu1 %v1735_v62  ;;  %v1830_v62 = vld [vmem:[%s2054_s11 + $0x348] ss:$16 sps:$4 sm:$0xff]  }
  0x76   : > { %1108 = vmatpush2.bf16.msra.mxu0 %v1737_v63  ;;  %v1835_v63 = vld [vmem:[%s2054_s11 + $0x12c] ss:$16 sps:$4 sm:$0xff]  }
  0x77   : > { %1149 = vmatpush2.bf16.msra.mxu1 %v1738_v0  ;;  %1109 = vmatprep.subr.bf16.mxu0 %v1739_v1  ;;  %v1838_v0 = vld [vmem:[%s2054_s11 + $0x32c] ss:$16 sps:$4 sm:$0xff]   ;;  %v1833_v1 = vld [vmem:[%s2054_s11 + $0x128] ss:$16 sps:$4 sm:$0xff]  }
  0x78   : > { %1150 = vmatprep.subr.bf16.mxu1 %v1741_v2  ;;  %v1836_v2 = vld [vmem:[%s2054_s11 + $0x328] ss:$16 sps:$4 sm:$0xff]  }
  0x7a   : > { %1110 = vmatpush2.bf16.msra.mxu0 %v1743_v3  ;;  %v1841_v3 = vld [vmem:[%s2054_s11 + $0x10c] ss:$16 sps:$4 sm:$0xff]  }
  0x7b   : > { %1151 = vmatpush2.bf16.msra.mxu1 %v1744_v4  ;;  %1161 = vmatprep.subr.bf16.mxu0 %v1751_v5  ;;  %v1844_v4 = vld [vmem:[%s2054_s11 + $0x30c] ss:$16 sps:$4 sm:$0xff]   ;;  %v1839_v5 = vld [vmem:[%s2054_s11 + $0x108] ss:$16 sps:$4 sm:$0xff]  }
  0x7c   : > { %1202 = vmatprep.subr.bf16.mxu1 %v1754_v6  ;;  %v1842_v6 = vld [vmem:[%s2054_s11 + $0x308] ss:$16 sps:$4 sm:$0xff]  }
  0x7d   : > { %1112 = vmatmul.mubr.bf16.vlgmr.msra.gmra.mxu0 %v2151_v7 }
  0x7e   : > { %1153 = vmatmul.mubr.bf16.vlgmr.msra.gmra.mxu1 %v2153_v8  ;;  %1162 = vmatpush1.bf16.msra.mxu0 %v1749_v9 }
  0x7f   : > { %1203 = vmatpush1.bf16.msra.mxu1 %v1752_v10  ;;  %1163 = vmatprep.subr.bf16.mxu0 %v1757_v11  ;;  %v291_v10 = vld [vmem:[#allocation2 + $0x10] sm:$0xff] }
  0x80   : > { %1204 = vmatprep.subr.bf16.mxu1 %v1760_v12  ;;  %1193 = vmatprep.mubr.bf16.mxu0 %v2127_v48  ;;  %v1814_v48 = vld [vmem:[%s2054_s11 + $0x3ac] ss:$16 sps:$4 sm:$0xff]  }
  0x81   : > { %1234 = vmatprep.mubr.bf16.mxu1 %v1441_v52  ;;  %v1820_v52 = vld [vmem:[%s2054_s11 + $0x38c] ss:$16 sps:$4 sm:$0xff]  }
  0x82   : > { %1164 = vmatpush1.bf16.msra.mxu0 %v1755_v13 }
  0x83   : > { %1205 = vmatpush1.bf16.msra.mxu1 %v1758_v14  ;;  %1165 = vmatprep.subr.bf16.mxu0 %v1763_v15  ;;  %v292_v14 = vld [vmem:[#allocation2] sm:$0xff] }
  0x84   : > { %1206 = vmatprep.subr.bf16.mxu1 %v1766_v16 }
  0x86   : > { %1166 = vmatpush1.bf16.msra.mxu0 %v1761_v17 }
  0x87   : > { %1207 = vmatpush1.bf16.msra.mxu1 %v1764_v18  ;;  %1167 = vmatprep.subr.bf16.mxu0 %v1769_v19 }
  0x88   : > { %1208 = vmatprep.subr.bf16.mxu1 %v1772_v20 }
  0x8a   : > { %1168 = vmatpush1.bf16.msra.mxu0 %v1767_v21 }
  0x8b   : > { %1209 = vmatpush1.bf16.msra.mxu1 %v1770_v22  ;;  %1169 = vmatprep.subr.bf16.mxu0 %v1775_v23 }
  0x8c   : > { %1210 = vmatprep.subr.bf16.mxu1 %v1778_v24 }
  0x8e   : > { %1170 = vmatpush1.bf16.msra.mxu0 %v1773_v25 }
  0x8f   : > { %1211 = vmatpush1.bf16.msra.mxu1 %v1776_v26  ;;  %1171 = vmatprep.subr.bf16.mxu0 %v1781_v27  ;;  %v294_v26 = vld [vmem:[#allocation2 + $0x8] sm:$0xff] }
  0x90   : > { %1212 = vmatprep.subr.bf16.mxu1 %v1784_v28 }
  0x92   : > { %1172 = vmatpush1.bf16.msra.mxu0 %v1779_v29 }
  0x93   : > { %1213 = vmatpush1.bf16.msra.mxu1 %v1782_v30  ;;  %1173 = vmatprep.subr.bf16.mxu0 %v1787_v31 }
  0x94   : > { %1214 = vmatprep.subr.bf16.mxu1 %v1790_v32 }
  0x96   : > { %1174 = vmatpush1.bf16.msra.mxu0 %v1785_v33 }
  0x97   : > { %1215 = vmatpush1.bf16.msra.mxu1 %v1788_v34  ;;  %1175 = vmatprep.subr.bf16.mxu0 %v1793_v35 }
  0x98   : > { %1216 = vmatprep.subr.bf16.mxu1 %v1796_v36 }
  0x9a   : > { %1176 = vmatpush1.bf16.msra.mxu0 %v1791_v37 }
  0x9b   : > { %1217 = vmatpush1.bf16.msra.mxu1 %v1794_v38  ;;  %1177 = vmatprep.subr.bf16.mxu0 %v1799_v39 }
  0x9c   : > { %1218 = vmatprep.subr.bf16.mxu1 %v1802_v40 }
  0x9e   : > { %1178 = vmatpush2.bf16.msra.mxu0 %v1797_v41 }
  0x9f   : > { %1219 = vmatpush2.bf16.msra.mxu1 %v1800_v42  ;;  %1179 = vmatprep.subr.bf16.mxu0 %v1805_v43 }
  0xa0   : > { %1220 = vmatprep.subr.bf16.mxu1 %v1808_v44 }
  0xa2   : > { %1180 = vmatpush2.bf16.msra.mxu0 %v1803_v45 }
  0xa3   : > { %1221 = vmatpush2.bf16.msra.mxu1 %v1806_v46  ;;  %1181 = vmatprep.subr.bf16.mxu0 %v1811_v47 }
  0xa4   : > { %1222 = vmatprep.subr.bf16.mxu1 %v1814_v48 }
  0xa6   : > { %1182 = vmatpush2.bf16.msra.mxu0 %v1809_v49 }
  0xa7   : > { %1223 = vmatpush2.bf16.msra.mxu1 %v1812_v50  ;;  %1183 = vmatprep.subr.bf16.mxu0 %v1817_v51 }
  0xa8   : > { %1224 = vmatprep.subr.bf16.mxu1 %v1820_v52 }
  0xaa   : > { %1184 = vmatpush2.bf16.msra.mxu0 %v1815_v53 }
  0xab   : > { %1225 = vmatpush2.bf16.msra.mxu1 %v1818_v54  ;;  %1185 = vmatprep.subr.bf16.mxu0 %v1823_v55 }
  0xac   : > { %1226 = vmatprep.subr.bf16.mxu1 %v1826_v56 }
  0xae   : > { %1186 = vmatpush2.bf16.msra.mxu0 %v1821_v57 }
  0xaf   : > { %1227 = vmatpush2.bf16.msra.mxu1 %v1824_v58  ;;  %1187 = vmatprep.subr.bf16.mxu0 %v1829_v59 }
  0xb0   : > { %1228 = vmatprep.subr.bf16.mxu1 %v1832_v60 }
  0xb2   : > { %1188 = vmatpush2.bf16.msra.mxu0 %v1827_v61 }
  0xb3   : > { %1229 = vmatpush2.bf16.msra.mxu1 %v1830_v62  ;;  %1189 = vmatprep.subr.bf16.mxu0 %v1835_v63 }
  0xb4   : > { %1230 = vmatprep.subr.bf16.mxu1 %v1838_v0 }
  0xb6   : > { %1190 = vmatpush2.bf16.msra.mxu0 %v1833_v1 }
  0xb7   : > { %1231 = vmatpush2.bf16.msra.mxu1 %v1836_v2  ;;  %1191 = vmatprep.subr.bf16.mxu0 %v1841_v3 }
  0xb8   : > { %1232 = vmatprep.subr.bf16.mxu1 %v1844_v4 }
  0xba   : > { %1192 = vmatpush2.bf16.msra.mxu0 %v1839_v5 }
  0xbb   : > { %1233 = vmatpush2.bf16.msra.mxu1 %v1842_v6 }
  0xbd   : > { %1194 = vmatmul.mubr.bf16.vlgmr.msra.gmra.mxu0 %v2151_v7  ;;  %v293_v7 = vld [vmem:[#allocation2 + $0x18] sm:$0xff] }
  0xbe   : > { %1235 = vmatmul.mubr.bf16.vlgmr.msra.gmra.mxu1 %v2153_v8 }
 0x13d   : > { %v1113_v9 = vpop.f32.mrf.mxu0 }
 0x13e   : > { %v1154_v11 = vpop.f32.mrf.mxu1 }
 0x13f   : > { %v1155_v12 = vadd.f32 %v1154_v11, %v1113_v9  ;;  %v1115_v13 = vpop.f32.mrf.mxu0 }
 0x140   : > { %v1156_v15 = vpop.f32.mrf.mxu1 }
 0x141   : > { %v1243_v16 = vadd.f32 %v1155_v12, %v291_v10  ;;  %v1157_v17 = vadd.f32 %v1156_v15, %v1115_v13  ;;  %v1117_v18 = vpop.f32.mrf.mxu0 }
 0x142   : > { %v1158_v19 = vpop.f32.mrf.mxu1 }
 0x143   : > { %1247 = vst [vmem:[#allocation2 + $0x10] sm:$0xff] %v1243_v16  ;;  %v1244_v20 = vadd.f32 %v1157_v17, %v292_v14  ;;  %v1118_v21 = vpop.f32.mrf.mxu0 }
 0x144   : > { %v1159_v22 = vpop.f32.mrf.mxu1 }
 0x145   : > { %1248 = vst [vmem:[#allocation2] sm:$0xff] %v1244_v20 }
 0x17d   : > { %v1195_v23 = vpop.f32.mrf.mxu0 }
 0x17e   : > { %v1236_v24 = vpop.f32.mrf.mxu1 }
 0x17f   : > { %v1237_v8 = vadd.f32 %v1236_v24, %v1195_v23  ;;  %v1197_v25 = vpop.f32.mrf.mxu0 }
 0x180   : > { %v1238_v27 = vpop.f32.mrf.mxu1 }
 0x181   : > { %v1245_v28 = vadd.f32 %v1237_v8, %v293_v7  ;;  %v1239_v29 = vadd.f32 %v1238_v27, %v1197_v25  ;;  %v1199_v30 = vpop.f32.mrf.mxu0  ;;  %1254 = sbr.rel (%p1570_p11) target bundleno = 404 (0x194), region = 44 }
 0x182   : > { %v1240_v31 = vpop.f32.mrf.mxu1 }
 0x183   : > { %1249 = vst [vmem:[#allocation2 + $0x18] sm:$0xff] %v1245_v28  ;;  %v1246_v32 = vadd.f32 %v1239_v29, %v294_v26  ;;  %v1200_v33 = vpop.f32.mrf.mxu0 }
 0x184   : > { %v1241_v34 = vpop.f32.mrf.mxu1 }
 0x185   : > { %1250 = vst [vmem:[#allocation2 + $0x8] sm:$0xff] %v1246_v32 }
 0x186   : > { %v1261_v35 = vlaneseq  ;;  %v1259_v37 = vld [vmem:[%s271_s30] sm:$0xf]  ;;  %v1255_v38 = vld [vmem:[#allocation2 + $0x10] sm:$0xff] }
 0x187   : > { %v1256_v43 = vld [vmem:[#allocation2] sm:$0xff] }
 0x188   : > { %v1262_v36 = vshrl.u32 %v1261_v35, 7 }
 0x18a   : > { %v1263_v39 = vsub.s32 0, %v1262_v36  ;;  %v1267_v40 = vsub.s32 1, %v1262_v36  ;;  %v1271_v41 = vsub.s32 2, %v1262_v36  ;;  %v1275_v42 = vsub.s32 3, %v1262_v36  ;;  %v1257_v44 = vld [vmem:[#allocation2 + $0x18] sm:$0xff] }
 0x18c   : > { %v1258_v45 = vld [vmem:[#allocation2 + $0x8] sm:$0xff]  ;;  %v1264_v46 = vrot.slane %v1259_v37, %v1263_v39  ;;  %v1268_v47 = vrot.slane %v1259_v37, %v1267_v40  ;;  %v1272_v48 = vrot.slane %v1259_v37, %v1271_v41  ;;  %v1276_v49 = vrot.slane %v1259_v37, %v1275_v42 }
 0x18e   : > { %v1281_v50 = vadd.f32 %v1264_v46, %v1255_v38  ;;  %v1282_v51 = vadd.f32 %v1268_v47, %v1256_v43  ;;  %v1283_v52 = vadd.f32 %v1272_v48, %v1257_v44  ;;  %v1284_v53 = vadd.f32 %v1276_v49, %v1258_v45 }
 0x190   : > { %v1285_v54 = vmax.f32 %v1281_v50, 0.0  ;;  %v1286_v55 = vmax.f32 %v1282_v51, 0.0  ;;  %v1287_v56 = vmax.f32 %v1283_v52, 0.0  ;;  %v1288_v57 = vmax.f32 %v1284_v53, 0.0 }
 0x192   : > { %1289 = vst [vmem:[%s2077_s29] sm:$0xff] %v1285_v54  ;;  %1290 = vst [vmem:[%s2077_s29 + $0x8] sm:$0xff] %v1286_v55 }
 0x193   : > { %1291 = vst [vmem:[%s2077_s29 + $0x10] sm:$0xff] %v1287_v56  ;;  %1292 = vst [vmem:[%s2077_s29 + $0x18] sm:$0xff] %v1288_v57 }
 0x194 PF: > { %s16_s19 = sadd.s32 1, %s1939_s19   ;;  %s2263_s12 = smov %s1915_s13 }
 0x195   : > { %p13_p12 = scmp.ge.s32.totalorder %s16_s19, 146   ;;  %s2264_s13 = smov %s1919_s14 }
 0x196   : > { %s2265_s14 = smov %s2033_s5  ;;  %s2266_s15 = smov %s1931_s17 }
 0x197   : > { %s2267_s16 = smov %s1935_s18  ;;  %s2268_s17 = smov %s2271_s21 }
 0x198   : > { %s2269_s18 = smov %s2275_s22  ;;  %15 = sbr.rel (!%p13_p12) target bundleno = 5 (0x5), region = 86 }
 0x19d   :  { %1323 = vsyncpa [#allocation4], 1 }
 0x19e   :  { %1325 = vsyncpa [#allocation4 + $0x1], 1 }

// kernel: alexnet_forward.20
= control target key start
LH: loop header
LB: loop body
LE: loop exit
PB: predicated region body
PF: predicated region fallthrough
CT: control target
= control target key end

     0   :  { %s2153_s12 = smov 0   ;;  %s2155_s13 = smov 0   ;;  %s2671_s0 = inlined_call_operand.vmem [shape: bf16[8,4096], index: 0, kind: input, shape index: {}]   ;;  %s2672_s1 = inlined_call_operand.vmem [shape: bf16[4096,4096], index: 1, kind: input, shape index: {}]   ;;  %s2673_s2 = inlined_call_operand.vmem [shape: f32[1,4096], index: 2, kind: input, shape index: {}]   ;;  %s2674_s3 = inlined_call_operand.vmem [shape: f32[8,4096], index: 3, kind: output, shape index: {}]  }
   0x1   :  { %s2157_s14 = smov 0   ;;  %s2159_s15 = smov 0  }
   0x2   :  { %s2161_s16 = smov 0   ;;  %s2163_s17 = smov 0  }
   0x3   :  { %s2165_s18 = smov 0  }
   0x4 LB: > { %s25_s19 = sadd.s32 1, %s2122_s16  ;;  %s28_s20 = sadd.s32 1, %s2126_s17  ;;  %s2130_s18 = sphi %s2165_s18, %s13_s18   ;;  %s2126_s17 = sphi %s2163_s17, %s2680_s17   ;;  %s2122_s16 = sphi %s2161_s16, %s2679_s16   ;;  %s2118_s15 = sphi %s2159_s15, %s2678_s15   ;;  %s2114_s14 = sphi %s2157_s14, %s2677_s14   ;;  %s2110_s13 = sphi %s2155_s13, %s2676_s13   ;;  %s2106_s12 = sphi %s2153_s12, %s2675_s12  }
   0x5   : > { %p26_p0 = scmp.ge.s32.totalorder %s25_s19, 8  ;;  %p76_p1 = scmp.ne.s32.totalorder %s2110_s13, %s2106_s12 }
   0x6   : > { %p77_p2 = scmp.eq.s32.totalorder %s2130_s18, 0  ;;  %s69_s24 = sadd.s32 1, %s2110_s13 }
   0x7   : > { %s2682_s19 = smov (%p26_p0, %s25_s19), 0  ;;  %s2684_s20 = smov (!%p26_p0, %s28_s20), %s2126_s17 }
   0x8   : > { %p78_p3 = por %p77_p2, %p76_p1  ;;  %p30_p4 = scmp.ge.s32.totalorder %s2684_s20, 8 }
   0x9   : > { %s64_s21 = ssub.s32 %s2122_s16, %s2682_s19  ;;  %p1673_p6 = scmp.ge.s32.totalorder %s2130_s18, 64 }
   0xa   : > { %s2686_s20 = smov (%p30_p4, %s2684_s20), 0 }
   0xb   : > { %s65_s22 = ssub.s32 %s2126_s17, %s2686_s20  ;;  %156 = sbr.rel (%p1673_p6) target bundleno = 87 (0x57), region = 16 }
   0xc   : > { %s66_s23 = sor.u32 %s65_s22, %s64_s21 }
   0xd   : > { %p67_p5 = scmp.eq.s32.totalorder %s66_s23, 0 }
   0xf   : > { %s2204_s25 = scalar_select %p67_p5, %s2110_s13, %s69_s24  }
  0x10   : > { %172 = sbr.rel (!%p78_p3) target bundleno = 87 (0x57), region = 24  ;;  %s174_s26 = sand.u32 (%p78_p3), 1, %s2110_s13  }
  0x11   : > { %s1676_s27 = sshll.u32 (%p78_p3), %s2126_s17, 2  ;;  %s1674_s28 = sshll.u32 (%p78_p3), %s174_s26, 10 }
  0x12   : > { %s1822_s29 = sshll.u32 (%p78_p3), %s2122_s16, 11  ;;  %s2218_s8 = scalar_lea.vmem (%p78_p3), [#allocation3], %s1674_s28 }
  0x13   : > { %s180_s30 = sadd.s32 (%p78_p3), %s1822_s29, %s1676_s27 }
  0x14   : > { %s1678_s4 = sshll.u32 (%p78_p3), %s180_s30, 2 }
  0x15   : > { %s2213_s7 = scalar_lea.vmem %s2672_s1, %s1678_s4 }
  0x16   : > { %v195_v0 = vld [vmem:[%s2213_s7] sm:$0xff]  ;;  %v197_v1 = vld [vmem:[%s2213_s7 + $0x8] sm:$0xff] }
  0x17   : > { %v199_v2 = vld [vmem:[%s2213_s7 + $0x80] sm:$0xff]  ;;  %196 = vst [vmem:[%s2218_s8] sm:$0xff] %v195_v0  ;;  %198 = vst [vmem:[%s2218_s8 + $0x8] sm:$0xff] %v197_v1  ;;  %v201_v3 = vld [vmem:[%s2213_s7 + $0x88] sm:$0xff] }
  0x18   : > { %200 = vst [vmem:[%s2218_s8 + $0x10] sm:$0xff] %v199_v2  ;;  %v203_v4 = vld [vmem:[%s2213_s7 + $0x100] sm:$0xff]  ;;  %v205_v5 = vld [vmem:[%s2213_s7 + $0x108] sm:$0xff]  ;;  %202 = vst [vmem:[%s2218_s8 + $0x18] sm:$0xff] %v201_v3 }
  0x19   : > { %204 = vst [vmem:[%s2218_s8 + $0x20] sm:$0xff] %v203_v4  ;;  %206 = vst [vmem:[%s2218_s8 + $0x28] sm:$0xff] %v205_v5  ;;  %v207_v6 = vld [vmem:[%s2213_s7 + $0x180] sm:$0xff]  ;;  %v209_v7 = vld [vmem:[%s2213_s7 + $0x188] sm:$0xff] }
  0x1a   : > { %v211_v8 = vld [vmem:[%s2213_s7 + $0x200] sm:$0xff]  ;;  %208 = vst [vmem:[%s2218_s8 + $0x30] sm:$0xff] %v207_v6  ;;  %210 = vst [vmem:[%s2218_s8 + $0x38] sm:$0xff] %v209_v7  ;;  %v213_v9 = vld [vmem:[%s2213_s7 + $0x208] sm:$0xff] }
  0x1b   : > { %212 = vst [vmem:[%s2218_s8 + $0x40] sm:$0xff] %v211_v8  ;;  %v215_v10 = vld [vmem:[%s2213_s7 + $0x280] sm:$0xff]  ;;  %v217_v11 = vld [vmem:[%s2213_s7 + $0x288] sm:$0xff]  ;;  %214 = vst [vmem:[%s2218_s8 + $0x48] sm:$0xff] %v213_v9 }
  0x1c   : > { %216 = vst [vmem:[%s2218_s8 + $0x50] sm:$0xff] %v215_v10  ;;  %218 = vst [vmem:[%s2218_s8 + $0x58] sm:$0xff] %v217_v11  ;;  %v219_v12 = vld [vmem:[%s2213_s7 + $0x300] sm:$0xff]  ;;  %v221_v13 = vld [vmem:[%s2213_s7 + $0x308] sm:$0xff] }
  0x1d   : > { %v223_v14 = vld [vmem:[%s2213_s7 + $0x380] sm:$0xff]  ;;  %220 = vst [vmem:[%s2218_s8 + $0x60] sm:$0xff] %v219_v12  ;;  %222 = vst [vmem:[%s2218_s8 + $0x68] sm:$0xff] %v221_v13  ;;  %v225_v15 = vld [vmem:[%s2213_s7 + $0x388] sm:$0xff] }
  0x1e   : > { %224 = vst [vmem:[%s2218_s8 + $0x70] sm:$0xff] %v223_v14  ;;  %v227_v16 = vld [vmem:[%s2213_s7 + $0x400] sm:$0xff]  ;;  %v229_v17 = vld [vmem:[%s2213_s7 + $0x408] sm:$0xff]  ;;  %226 = vst [vmem:[%s2218_s8 + $0x78] sm:$0xff] %v225_v15 }
  0x1f   : > { %228 = vst [vmem:[%s2218_s8 + $0x80] sm:$0xff] %v227_v16  ;;  %230 = vst [vmem:[%s2218_s8 + $0x88] sm:$0xff] %v229_v17  ;;  %v231_v18 = vld [vmem:[%s2213_s7 + $0x480] sm:$0xff]  ;;  %v233_v19 = vld [vmem:[%s2213_s7 + $0x488] sm:$0xff] }
  0x20   : > { %v235_v20 = vld [vmem:[%s2213_s7 + $0x500] sm:$0xff]  ;;  %232 = vst [vmem:[%s2218_s8 + $0x90] sm:$0xff] %v231_v18  ;;  %234 = vst [vmem:[%s2218_s8 + $0x98] sm:$0xff] %v233_v19  ;;  %v237_v21 = vld [vmem:[%s2213_s7 + $0x508] sm:$0xff] }
  0x21   : > { %236 = vst [vmem:[%s2218_s8 + $0xa0] sm:$0xff] %v235_v20  ;;  %v239_v22 = vld [vmem:[%s2213_s7 + $0x580] sm:$0xff]  ;;  %v241_v23 = vld [vmem:[%s2213_s7 + $0x588] sm:$0xff]  ;;  %238 = vst [vmem:[%s2218_s8 + $0xa8] sm:$0xff] %v237_v21 }
  0x22   : > { %240 = vst [vmem:[%s2218_s8 + $0xb0] sm:$0xff] %v239_v22  ;;  %242 = vst [vmem:[%s2218_s8 + $0xb8] sm:$0xff] %v241_v23  ;;  %v243_v24 = vld [vmem:[%s2213_s7 + $0x600] sm:$0xff]  ;;  %v245_v25 = vld [vmem:[%s2213_s7 + $0x608] sm:$0xff] }
  0x23   : > { %v247_v26 = vld [vmem:[%s2213_s7 + $0x680] sm:$0xff]  ;;  %244 = vst [vmem:[%s2218_s8 + $0xc0] sm:$0xff] %v243_v24  ;;  %246 = vst [vmem:[%s2218_s8 + $0xc8] sm:$0xff] %v245_v25  ;;  %v249_v27 = vld [vmem:[%s2213_s7 + $0x688] sm:$0xff] }
  0x24   : > { %248 = vst [vmem:[%s2218_s8 + $0xd0] sm:$0xff] %v247_v26  ;;  %v251_v28 = vld [vmem:[%s2213_s7 + $0x700] sm:$0xff]  ;;  %v253_v29 = vld [vmem:[%s2213_s7 + $0x708] sm:$0xff]  ;;  %250 = vst [vmem:[%s2218_s8 + $0xd8] sm:$0xff] %v249_v27 }
  0x25   : > { %252 = vst [vmem:[%s2218_s8 + $0xe0] sm:$0xff] %v251_v28  ;;  %254 = vst [vmem:[%s2218_s8 + $0xe8] sm:$0xff] %v253_v29  ;;  %v255_v30 = vld [vmem:[%s2213_s7 + $0x780] sm:$0xff]  ;;  %v257_v31 = vld [vmem:[%s2213_s7 + $0x788] sm:$0xff] }
  0x26   : > { %v259_v32 = vld [vmem:[%s2213_s7 + $0x800] sm:$0xff]  ;;  %256 = vst [vmem:[%s2218_s8 + $0xf0] sm:$0xff] %v255_v30  ;;  %258 = vst [vmem:[%s2218_s8 + $0xf8] sm:$0xff] %v257_v31  ;;  %v261_v33 = vld [vmem:[%s2213_s7 + $0x808] sm:$0xff] }
  0x27   : > { %260 = vst [vmem:[%s2218_s8 + $0x100] sm:$0xff] %v259_v32  ;;  %v263_v34 = vld [vmem:[%s2213_s7 + $0x880] sm:$0xff]  ;;  %v265_v35 = vld [vmem:[%s2213_s7 + $0x888] sm:$0xff]  ;;  %262 = vst [vmem:[%s2218_s8 + $0x108] sm:$0xff] %v261_v33 }
  0x28   : > { %264 = vst [vmem:[%s2218_s8 + $0x110] sm:$0xff] %v263_v34  ;;  %266 = vst [vmem:[%s2218_s8 + $0x118] sm:$0xff] %v265_v35  ;;  %v267_v36 = vld [vmem:[%s2213_s7 + $0x900] sm:$0xff]  ;;  %v269_v37 = vld [vmem:[%s2213_s7 + $0x908] sm:$0xff] }
  0x29   : > { %v271_v38 = vld [vmem:[%s2213_s7 + $0x980] sm:$0xff]  ;;  %268 = vst [vmem:[%s2218_s8 + $0x120] sm:$0xff] %v267_v36  ;;  %270 = vst [vmem:[%s2218_s8 + $0x128] sm:$0xff] %v269_v37  ;;  %v273_v39 = vld [vmem:[%s2213_s7 + $0x988] sm:$0xff] }
  0x2a   : > { %272 = vst [vmem:[%s2218_s8 + $0x130] sm:$0xff] %v271_v38  ;;  %v275_v40 = vld [vmem:[%s2213_s7 + $0xa00] sm:$0xff]  ;;  %v277_v41 = vld [vmem:[%s2213_s7 + $0xa08] sm:$0xff]  ;;  %274 = vst [vmem:[%s2218_s8 + $0x138] sm:$0xff] %v273_v39 }
  0x2b   : > { %276 = vst [vmem:[%s2218_s8 + $0x140] sm:$0xff] %v275_v40  ;;  %278 = vst [vmem:[%s2218_s8 + $0x148] sm:$0xff] %v277_v41  ;;  %v279_v42 = vld [vmem:[%s2213_s7 + $0xa80] sm:$0xff]  ;;  %v281_v43 = vld [vmem:[%s2213_s7 + $0xa88] sm:$0xff] }
  0x2c   : > { %v283_v44 = vld [vmem:[%s2213_s7 + $0xb00] sm:$0xff]  ;;  %280 = vst [vmem:[%s2218_s8 + $0x150] sm:$0xff] %v279_v42  ;;  %282 = vst [vmem:[%s2218_s8 + $0x158] sm:$0xff] %v281_v43  ;;  %v285_v45 = vld [vmem:[%s2213_s7 + $0xb08] sm:$0xff] }
  0x2d   : > { %284 = vst [vmem:[%s2218_s8 + $0x160] sm:$0xff] %v283_v44  ;;  %v287_v46 = vld [vmem:[%s2213_s7 + $0xb80] sm:$0xff]  ;;  %v289_v47 = vld [vmem:[%s2213_s7 + $0xb88] sm:$0xff]  ;;  %286 = vst [vmem:[%s2218_s8 + $0x168] sm:$0xff] %v285_v45 }
  0x2e   : > { %288 = vst [vmem:[%s2218_s8 + $0x170] sm:$0xff] %v287_v46  ;;  %290 = vst [vmem:[%s2218_s8 + $0x178] sm:$0xff] %v289_v47  ;;  %v291_v48 = vld [vmem:[%s2213_s7 + $0xc00] sm:$0xff]  ;;  %v293_v49 = vld [vmem:[%s2213_s7 + $0xc08] sm:$0xff] }
  0x2f   : > { %v295_v50 = vld [vmem:[%s2213_s7 + $0xc80] sm:$0xff]  ;;  %292 = vst [vmem:[%s2218_s8 + $0x180] sm:$0xff] %v291_v48  ;;  %294 = vst [vmem:[%s2218_s8 + $0x188] sm:$0xff] %v293_v49  ;;  %v297_v51 = vld [vmem:[%s2213_s7 + $0xc88] sm:$0xff] }
  0x30   : > { %296 = vst [vmem:[%s2218_s8 + $0x190] sm:$0xff] %v295_v50  ;;  %v299_v52 = vld [vmem:[%s2213_s7 + $0xd00] sm:$0xff]  ;;  %v301_v53 = vld [vmem:[%s2213_s7 + $0xd08] sm:$0xff]  ;;  %298 = vst [vmem:[%s2218_s8 + $0x198] sm:$0xff] %v297_v51 }
  0x31   : > { %300 = vst [vmem:[%s2218_s8 + $0x1a0] sm:$0xff] %v299_v52  ;;  %302 = vst [vmem:[%s2218_s8 + $0x1a8] sm:$0xff] %v301_v53  ;;  %v303_v54 = vld [vmem:[%s2213_s7 + $0xd80] sm:$0xff]  ;;  %v305_v55 = vld [vmem:[%s2213_s7 + $0xd88] sm:$0xff] }
  0x32   : > { %v307_v56 = vld [vmem:[%s2213_s7 + $0xe00] sm:$0xff]  ;;  %304 = vst [vmem:[%s2218_s8 + $0x1b0] sm:$0xff] %v303_v54  ;;  %306 = vst [vmem:[%s2218_s8 + $0x1b8] sm:$0xff] %v305_v55  ;;  %v309_v57 = vld [vmem:[%s2213_s7 + $0xe08] sm:$0xff] }
  0x33   : > { %308 = vst [vmem:[%s2218_s8 + $0x1c0] sm:$0xff] %v307_v56  ;;  %v311_v58 = vld [vmem:[%s2213_s7 + $0xe80] sm:$0xff]  ;;  %v313_v59 = vld [vmem:[%s2213_s7 + $0xe88] sm:$0xff]  ;;  %310 = vst [vmem:[%s2218_s8 + $0x1c8] sm:$0xff] %v309_v57 }
  0x34   : > { %312 = vst [vmem:[%s2218_s8 + $0x1d0] sm:$0xff] %v311_v58  ;;  %314 = vst [vmem:[%s2218_s8 + $0x1d8] sm:$0xff] %v313_v59  ;;  %v315_v60 = vld [vmem:[%s2213_s7 + $0xf00] sm:$0xff]  ;;  %v317_v61 = vld [vmem:[%s2213_s7 + $0xf08] sm:$0xff] }
  0x35   : > { %v319_v62 = vld [vmem:[%s2213_s7 + $0xf80] sm:$0xff]  ;;  %316 = vst [vmem:[%s2218_s8 + $0x1e0] sm:$0xff] %v315_v60  ;;  %318 = vst [vmem:[%s2218_s8 + $0x1e8] sm:$0xff] %v317_v61  ;;  %v321_v63 = vld [vmem:[%s2213_s7 + $0xf88] sm:$0xff] }
  0x36   : > { %320 = vst [vmem:[%s2218_s8 + $0x1f0] sm:$0xff] %v319_v62  ;;  %v323_v0 = vld [vmem:[%s2213_s7 + $0x1000] sm:$0xff]  ;;  %v325_v1 = vld [vmem:[%s2213_s7 + $0x1008] sm:$0xff]  ;;  %322 = vst [vmem:[%s2218_s8 + $0x1f8] sm:$0xff] %v321_v63 }
  0x37   : > { %324 = vst [vmem:[%s2218_s8 + $0x200] sm:$0xff] %v323_v0  ;;  %326 = vst [vmem:[%s2218_s8 + $0x208] sm:$0xff] %v325_v1  ;;  %v327_v2 = vld [vmem:[%s2213_s7 + $0x1080] sm:$0xff]  ;;  %v329_v3 = vld [vmem:[%s2213_s7 + $0x1088] sm:$0xff] }
  0x38   : > { %v331_v4 = vld [vmem:[%s2213_s7 + $0x1100] sm:$0xff]  ;;  %328 = vst [vmem:[%s2218_s8 + $0x210] sm:$0xff] %v327_v2  ;;  %330 = vst [vmem:[%s2218_s8 + $0x218] sm:$0xff] %v329_v3  ;;  %v333_v5 = vld [vmem:[%s2213_s7 + $0x1108] sm:$0xff] }
  0x39   : > { %332 = vst [vmem:[%s2218_s8 + $0x220] sm:$0xff] %v331_v4  ;;  %v335_v6 = vld [vmem:[%s2213_s7 + $0x1180] sm:$0xff]  ;;  %v337_v7 = vld [vmem:[%s2213_s7 + $0x1188] sm:$0xff]  ;;  %334 = vst [vmem:[%s2218_s8 + $0x228] sm:$0xff] %v333_v5 }
  0x3a   : > { %336 = vst [vmem:[%s2218_s8 + $0x230] sm:$0xff] %v335_v6  ;;  %338 = vst [vmem:[%s2218_s8 + $0x238] sm:$0xff] %v337_v7  ;;  %v339_v8 = vld [vmem:[%s2213_s7 + $0x1200] sm:$0xff]  ;;  %v341_v9 = vld [vmem:[%s2213_s7 + $0x1208] sm:$0xff] }
  0x3b   : > { %v343_v10 = vld [vmem:[%s2213_s7 + $0x1280] sm:$0xff]  ;;  %340 = vst [vmem:[%s2218_s8 + $0x240] sm:$0xff] %v339_v8  ;;  %342 = vst [vmem:[%s2218_s8 + $0x248] sm:$0xff] %v341_v9  ;;  %v345_v11 = vld [vmem:[%s2213_s7 + $0x1288] sm:$0xff] }
  0x3c   : > { %344 = vst [vmem:[%s2218_s8 + $0x250] sm:$0xff] %v343_v10  ;;  %v347_v12 = vld [vmem:[%s2213_s7 + $0x1300] sm:$0xff]  ;;  %v349_v13 = vld [vmem:[%s2213_s7 + $0x1308] sm:$0xff]  ;;  %346 = vst [vmem:[%s2218_s8 + $0x258] sm:$0xff] %v345_v11 }
  0x3d   : > { %348 = vst [vmem:[%s2218_s8 + $0x260] sm:$0xff] %v347_v12  ;;  %350 = vst [vmem:[%s2218_s8 + $0x268] sm:$0xff] %v349_v13  ;;  %v351_v14 = vld [vmem:[%s2213_s7 + $0x1380] sm:$0xff]  ;;  %v353_v15 = vld [vmem:[%s2213_s7 + $0x1388] sm:$0xff] }
  0x3e   : > { %v355_v16 = vld [vmem:[%s2213_s7 + $0x1400] sm:$0xff]  ;;  %352 = vst [vmem:[%s2218_s8 + $0x270] sm:$0xff] %v351_v14  ;;  %354 = vst [vmem:[%s2218_s8 + $0x278] sm:$0xff] %v353_v15  ;;  %v357_v17 = vld [vmem:[%s2213_s7 + $0x1408] sm:$0xff] }
  0x3f   : > { %356 = vst [vmem:[%s2218_s8 + $0x280] sm:$0xff] %v355_v16  ;;  %v359_v18 = vld [vmem:[%s2213_s7 + $0x1480] sm:$0xff]  ;;  %v361_v19 = vld [vmem:[%s2213_s7 + $0x1488] sm:$0xff]  ;;  %358 = vst [vmem:[%s2218_s8 + $0x288] sm:$0xff] %v357_v17 }
  0x40   : > { %360 = vst [vmem:[%s2218_s8 + $0x290] sm:$0xff] %v359_v18  ;;  %362 = vst [vmem:[%s2218_s8 + $0x298] sm:$0xff] %v361_v19  ;;  %v363_v20 = vld [vmem:[%s2213_s7 + $0x1500] sm:$0xff]  ;;  %v365_v21 = vld [vmem:[%s2213_s7 + $0x1508] sm:$0xff] }
  0x41   : > { %v367_v22 = vld [vmem:[%s2213_s7 + $0x1580] sm:$0xff]  ;;  %364 = vst [vmem:[%s2218_s8 + $0x2a0] sm:$0xff] %v363_v20  ;;  %366 = vst [vmem:[%s2218_s8 + $0x2a8] sm:$0xff] %v365_v21  ;;  %v369_v23 = vld [vmem:[%s2213_s7 + $0x1588] sm:$0xff] }
  0x42   : > { %368 = vst [vmem:[%s2218_s8 + $0x2b0] sm:$0xff] %v367_v22  ;;  %v371_v24 = vld [vmem:[%s2213_s7 + $0x1600] sm:$0xff]  ;;  %v373_v25 = vld [vmem:[%s2213_s7 + $0x1608] sm:$0xff]  ;;  %370 = vst [vmem:[%s2218_s8 + $0x2b8] sm:$0xff] %v369_v23 }
  0x43   : > { %372 = vst [vmem:[%s2218_s8 + $0x2c0] sm:$0xff] %v371_v24  ;;  %374 = vst [vmem:[%s2218_s8 + $0x2c8] sm:$0xff] %v373_v25  ;;  %v375_v26 = vld [vmem:[%s2213_s7 + $0x1680] sm:$0xff]  ;;  %v377_v27 = vld [vmem:[%s2213_s7 + $0x1688] sm:$0xff] }
  0x44   : > { %v379_v28 = vld [vmem:[%s2213_s7 + $0x1700] sm:$0xff]  ;;  %376 = vst [vmem:[%s2218_s8 + $0x2d0] sm:$0xff] %v375_v26  ;;  %378 = vst [vmem:[%s2218_s8 + $0x2d8] sm:$0xff] %v377_v27  ;;  %v381_v29 = vld [vmem:[%s2213_s7 + $0x1708] sm:$0xff] }
  0x45   : > { %380 = vst [vmem:[%s2218_s8 + $0x2e0] sm:$0xff] %v379_v28  ;;  %v383_v30 = vld [vmem:[%s2213_s7 + $0x1780] sm:$0xff]  ;;  %v385_v31 = vld [vmem:[%s2213_s7 + $0x1788] sm:$0xff]  ;;  %382 = vst [vmem:[%s2218_s8 + $0x2e8] sm:$0xff] %v381_v29 }
  0x46   : > { %384 = vst [vmem:[%s2218_s8 + $0x2f0] sm:$0xff] %v383_v30  ;;  %386 = vst [vmem:[%s2218_s8 + $0x2f8] sm:$0xff] %v385_v31  ;;  %v387_v32 = vld [vmem:[%s2213_s7 + $0x1800] sm:$0xff]  ;;  %v389_v33 = vld [vmem:[%s2213_s7 + $0x1808] sm:$0xff] }
  0x47   : > { %v391_v34 = vld [vmem:[%s2213_s7 + $0x1880] sm:$0xff]  ;;  %388 = vst [vmem:[%s2218_s8 + $0x300] sm:$0xff] %v387_v32  ;;  %390 = vst [vmem:[%s2218_s8 + $0x308] sm:$0xff] %v389_v33  ;;  %v393_v35 = vld [vmem:[%s2213_s7 + $0x1888] sm:$0xff] }
  0x48   : > { %392 = vst [vmem:[%s2218_s8 + $0x310] sm:$0xff] %v391_v34  ;;  %v395_v36 = vld [vmem:[%s2213_s7 + $0x1900] sm:$0xff]  ;;  %v397_v37 = vld [vmem:[%s2213_s7 + $0x1908] sm:$0xff]  ;;  %394 = vst [vmem:[%s2218_s8 + $0x318] sm:$0xff] %v393_v35 }
  0x49   : > { %396 = vst [vmem:[%s2218_s8 + $0x320] sm:$0xff] %v395_v36  ;;  %398 = vst [vmem:[%s2218_s8 + $0x328] sm:$0xff] %v397_v37  ;;  %v399_v38 = vld [vmem:[%s2213_s7 + $0x1980] sm:$0xff]  ;;  %v401_v39 = vld [vmem:[%s2213_s7 + $0x1988] sm:$0xff] }
  0x4a   : > { %v403_v40 = vld [vmem:[%s2213_s7 + $0x1a00] sm:$0xff]  ;;  %400 = vst [vmem:[%s2218_s8 + $0x330] sm:$0xff] %v399_v38  ;;  %402 = vst [vmem:[%s2218_s8 + $0x338] sm:$0xff] %v401_v39  ;;  %v405_v41 = vld [vmem:[%s2213_s7 + $0x1a08] sm:$0xff] }
  0x4b   : > { %404 = vst [vmem:[%s2218_s8 + $0x340] sm:$0xff] %v403_v40  ;;  %v407_v42 = vld [vmem:[%s2213_s7 + $0x1a80] sm:$0xff]  ;;  %v409_v43 = vld [vmem:[%s2213_s7 + $0x1a88] sm:$0xff]  ;;  %406 = vst [vmem:[%s2218_s8 + $0x348] sm:$0xff] %v405_v41 }
  0x4c   : > { %408 = vst [vmem:[%s2218_s8 + $0x350] sm:$0xff] %v407_v42  ;;  %410 = vst [vmem:[%s2218_s8 + $0x358] sm:$0xff] %v409_v43  ;;  %v411_v44 = vld [vmem:[%s2213_s7 + $0x1b00] sm:$0xff]  ;;  %v413_v45 = vld [vmem:[%s2213_s7 + $0x1b08] sm:$0xff] }
  0x4d   : > { %v415_v46 = vld [vmem:[%s2213_s7 + $0x1b80] sm:$0xff]  ;;  %412 = vst [vmem:[%s2218_s8 + $0x360] sm:$0xff] %v411_v44  ;;  %414 = vst [vmem:[%s2218_s8 + $0x368] sm:$0xff] %v413_v45  ;;  %v417_v47 = vld [vmem:[%s2213_s7 + $0x1b88] sm:$0xff] }
  0x4e   : > { %416 = vst [vmem:[%s2218_s8 + $0x370] sm:$0xff] %v415_v46  ;;  %v419_v48 = vld [vmem:[%s2213_s7 + $0x1c00] sm:$0xff]  ;;  %v421_v49 = vld [vmem:[%s2213_s7 + $0x1c08] sm:$0xff]  ;;  %418 = vst [vmem:[%s2218_s8 + $0x378] sm:$0xff] %v417_v47 }
  0x4f   : > { %420 = vst [vmem:[%s2218_s8 + $0x380] sm:$0xff] %v419_v48  ;;  %422 = vst [vmem:[%s2218_s8 + $0x388] sm:$0xff] %v421_v49  ;;  %v423_v50 = vld [vmem:[%s2213_s7 + $0x1c80] sm:$0xff]  ;;  %v425_v51 = vld [vmem:[%s2213_s7 + $0x1c88] sm:$0xff] }
  0x50   : > { %v427_v52 = vld [vmem:[%s2213_s7 + $0x1d00] sm:$0xff]  ;;  %424 = vst [vmem:[%s2218_s8 + $0x390] sm:$0xff] %v423_v50  ;;  %426 = vst [vmem:[%s2218_s8 + $0x398] sm:$0xff] %v425_v51  ;;  %v429_v53 = vld [vmem:[%s2213_s7 + $0x1d08] sm:$0xff] }
  0x51   : > { %428 = vst [vmem:[%s2218_s8 + $0x3a0] sm:$0xff] %v427_v52  ;;  %v431_v54 = vld [vmem:[%s2213_s7 + $0x1d80] sm:$0xff]  ;;  %v433_v55 = vld [vmem:[%s2213_s7 + $0x1d88] sm:$0xff]  ;;  %430 = vst [vmem:[%s2218_s8 + $0x3a8] sm:$0xff] %v429_v53 }
  0x52   : > { %432 = vst [vmem:[%s2218_s8 + $0x3b0] sm:$0xff] %v431_v54  ;;  %434 = vst [vmem:[%s2218_s8 + $0x3b8] sm:$0xff] %v433_v55  ;;  %v435_v56 = vld [vmem:[%s2213_s7 + $0x1e00] sm:$0xff]  ;;  %v437_v57 = vld [vmem:[%s2213_s7 + $0x1e08] sm:$0xff] }
  0x53   : > { %v439_v58 = vld [vmem:[%s2213_s7 + $0x1e80] sm:$0xff]  ;;  %436 = vst [vmem:[%s2218_s8 + $0x3c0] sm:$0xff] %v435_v56  ;;  %438 = vst [vmem:[%s2218_s8 + $0x3c8] sm:$0xff] %v437_v57  ;;  %v441_v59 = vld [vmem:[%s2213_s7 + $0x1e88] sm:$0xff] }
  0x54   : > { %440 = vst [vmem:[%s2218_s8 + $0x3d0] sm:$0xff] %v439_v58  ;;  %v443_v60 = vld [vmem:[%s2213_s7 + $0x1f00] sm:$0xff]  ;;  %v445_v61 = vld [vmem:[%s2213_s7 + $0x1f08] sm:$0xff]  ;;  %442 = vst [vmem:[%s2218_s8 + $0x3d8] sm:$0xff] %v441_v59 }
  0x55   : > { %444 = vst [vmem:[%s2218_s8 + $0x3e0] sm:$0xff] %v443_v60  ;;  %446 = vst [vmem:[%s2218_s8 + $0x3e8] sm:$0xff] %v445_v61  ;;  %v447_v62 = vld [vmem:[%s2213_s7 + $0x1f80] sm:$0xff]  ;;  %v449_v63 = vld [vmem:[%s2213_s7 + $0x1f88] sm:$0xff] }
  0x56   : > { %448 = vst [vmem:[%s2218_s8 + $0x3f0] sm:$0xff] %v447_v62  ;;  %450 = vst [vmem:[%s2218_s8 + $0x3f8] sm:$0xff] %v449_v63 }
  0x57 PF: > { %p1679_p7 = scmp.ge.s32.totalorder %s2130_s18, 1  ;;  %p463_p8 = scmp.lt.s32.totalorder %s2130_s18, 65 }
  0x59   : > { %p464_p9 = pnand %p1679_p7, %p463_p8 }
  0x5a   : > { %s470_s9 = sand.u32 (!%p464_p9), 1, %s2106_s12   ;;  %s1681_s10 = sshll.u32 (!%p464_p9), %s2114_s14, 2 }
  0x5b   : > { %467 = sbr.rel (%p464_p9) target bundleno = 451 (0x1c3), region = 51  ;;  %s1680_s11 = sshll.u32 (!%p464_p9), %s470_s9, 10 }
  0x5c   : > { %p513_p10 = scmp.lt.s32.totalorder (!%p464_p9), %s1681_s10, 31  ;;  %s1683_s21 = sshll.u32 (!%p464_p9), %s2118_s15, 2 }
  0x5d   : > { %p523_p11 = scmp.lt.s32.totalorder (!%p464_p9), %s1683_s21, 31  ;;  %s2495_s5 = scalar_lea.vmem (!%p464_p9), [#allocation3], %s1680_s11 }
  0x5e   : > { %p1686_p12 = scmp.ne.s32.totalorder (!%p464_p9), %s2114_s14, 0 }
  0x60   : > { %s2688_s10 = smov (!%p513_p10, %s1681_s10), 31  ;;  %s2690_s21 = smov (!%p523_p11, %s1683_s21), 31 }
  0x61   : > { %s1682_s22 = sshll.u32 %s2688_s10, 2  ;;  %s525_s12 = scalar_lea.vmem %s2673_s2, %s2690_s21 }
  0x62   : > { %s2481_s26 = scalar_lea.vmem %s2671_s0, %s1682_s22  ;;  %s1685_s29 = sshll.u32 %s2690_s21, 3 }
  0x63   : > { %s2493_s15 = scalar_lea.vmem %s2674_s3, %s1685_s29  ;;  %540 = sbr.rel (%p1686_p12) target bundleno = 107 (0x6b), region = 59 }
  0x68   : > { %v2132_v0 = vmov 0.0  }
  0x69   : > { %541 = vst [vmem:[#allocation2 + $0x10] sm:$0xff] %v2132_v0  ;;  %542 = vst [vmem:[#allocation2] sm:$0xff] %v2132_v0 }
  0x6a   : > { %543 = vst [vmem:[#allocation2 + $0x18] sm:$0xff] %v2132_v0  ;;  %544 = vst [vmem:[#allocation2 + $0x8] sm:$0xff] %v2132_v0 }
  0x6b PF: > { %v1880_v1 = vld [vmem:[%s2495_s5 + $0xe4] ss:$16 sps:$4 sm:$0xff]   ;;  %v1884_v3 = vld [vmem:[%s2495_s5 + $0xe0] ss:$16 sps:$4 sm:$0xff]   ;;  %v550_v49 = vld [vmem:[%s2481_s26 + $0x8] sm:$0xff]  ;;  %p1819_p13 = scmp.ne.s32.totalorder %s2114_s14, 7 }
  0x6c   : > { %v1882_v2 = vld [vmem:[%s2495_s5 + $0x2e4] ss:$16 sps:$4 sm:$0xff]   ;;  %1333 = vmatprep.subr.bf16.mxu0 %v1880_v1  ;;  %v1885_v4 = vld [vmem:[%s2495_s5 + $0x2e0] ss:$16 sps:$4 sm:$0xff]   ;;  %v1690_v52 = vcombine.high %v550_v49, %v550_v49 }
  0x6d   : > { %1374 = vmatprep.subr.bf16.mxu1 %v1882_v2  ;;  %v1886_v5 = vld [vmem:[%s2495_s5 + $0xc4] ss:$16 sps:$4 sm:$0xff]   ;;  %1334 = vmatpush1.bf16.msra.mxu0 %v1884_v3  ;;  %v1890_v7 = vld [vmem:[%s2495_s5 + $0xc0] ss:$16 sps:$4 sm:$0xff]  }
  0x6e   : > { %1375 = vmatpush1.bf16.msra.mxu1 %v1885_v4  ;;  %v1888_v6 = vld [vmem:[%s2495_s5 + $0x2c4] ss:$16 sps:$4 sm:$0xff]   ;;  %1335 = vmatprep.subr.bf16.mxu0 %v1886_v5  ;;  %v1891_v8 = vld [vmem:[%s2495_s5 + $0x2c0] ss:$16 sps:$4 sm:$0xff]   ;;  %v1982_v5 = vld [vmem:[%s2495_s5 + $0xec] ss:$16 sps:$4 sm:$0xff]  }
  0x6f   : > { %1376 = vmatprep.subr.bf16.mxu1 %v1888_v6  ;;  %v1892_v9 = vld [vmem:[%s2495_s5 + $0xa4] ss:$16 sps:$4 sm:$0xff]   ;;  %v1896_v11 = vld [vmem:[%s2495_s5 + $0xa0] ss:$16 sps:$4 sm:$0xff]   ;;  %1406 = vmatprep.mubr.bf16.mxu1 %v1690_v52  ;;  %v1985_v6 = vld [vmem:[%s2495_s5 + $0x2ec] ss:$16 sps:$4 sm:$0xff]  }
  0x70   : > { %v1894_v10 = vld [vmem:[%s2495_s5 + $0x2a4] ss:$16 sps:$4 sm:$0xff]   ;;  %v1897_v12 = vld [vmem:[%s2495_s5 + $0x2a0] ss:$16 sps:$4 sm:$0xff]  }
  0x71   : > { %1336 = vmatpush1.bf16.msra.mxu0 %v1890_v7  ;;  %v1898_v13 = vld [vmem:[%s2495_s5 + $0x84] ss:$16 sps:$4 sm:$0xff]   ;;  %v1902_v15 = vld [vmem:[%s2495_s5 + $0x80] ss:$16 sps:$4 sm:$0xff]  }
  0x72   : > { %1377 = vmatpush1.bf16.msra.mxu1 %v1891_v8  ;;  %1337 = vmatprep.subr.bf16.mxu0 %v1892_v9  ;;  %v1900_v14 = vld [vmem:[%s2495_s5 + $0x284] ss:$16 sps:$4 sm:$0xff]   ;;  %v1903_v16 = vld [vmem:[%s2495_s5 + $0x280] ss:$16 sps:$4 sm:$0xff]   ;;  %v2571_v8 = vcombine.low %v550_v49, %v550_v49  ;;  %v1980_v9 = vld [vmem:[%s2495_s5 + $0xe8] ss:$16 sps:$4 sm:$0xff]  }
  0x73   : > { %1378 = vmatprep.subr.bf16.mxu1 %v1894_v10  ;;  %v1904_v17 = vld [vmem:[%s2495_s5 + $0x64] ss:$16 sps:$4 sm:$0xff]   ;;  %v1908_v19 = vld [vmem:[%s2495_s5 + $0x60] ss:$16 sps:$4 sm:$0xff]   ;;  %v1983_v10 = vld [vmem:[%s2495_s5 + $0x2e8] ss:$16 sps:$4 sm:$0xff]  }
  0x74   : > { %v1906_v18 = vld [vmem:[%s2495_s5 + $0x264] ss:$16 sps:$4 sm:$0xff]   ;;  %v1909_v20 = vld [vmem:[%s2495_s5 + $0x260] ss:$16 sps:$4 sm:$0xff]   ;;  %v2040_v49 = vld [vmem:[%s2495_s5 + $0x1a8] ss:$16 sps:$4 sm:$0xff]  }
  0x75   : > { %1338 = vmatpush1.bf16.msra.mxu0 %v1896_v11  ;;  %v1910_v21 = vld [vmem:[%s2495_s5 + $0x44] ss:$16 sps:$4 sm:$0xff]   ;;  %v1914_v23 = vld [vmem:[%s2495_s5 + $0x40] ss:$16 sps:$4 sm:$0xff]   ;;  %v1988_v11 = vld [vmem:[%s2495_s5 + $0xcc] ss:$16 sps:$4 sm:$0xff]  }
  0x76   : > { %1379 = vmatpush1.bf16.msra.mxu1 %v1897_v12  ;;  %1339 = vmatprep.subr.bf16.mxu0 %v1898_v13  ;;  %v1912_v22 = vld [vmem:[%s2495_s5 + $0x244] ss:$16 sps:$4 sm:$0xff]   ;;  %v1915_v24 = vld [vmem:[%s2495_s5 + $0x240] ss:$16 sps:$4 sm:$0xff]   ;;  %v1991_v12 = vld [vmem:[%s2495_s5 + $0x2cc] ss:$16 sps:$4 sm:$0xff]  }
  0x77   : > { %1380 = vmatprep.subr.bf16.mxu1 %v1900_v14  ;;  %v1916_v25 = vld [vmem:[%s2495_s5 + $0x24] ss:$16 sps:$4 sm:$0xff]   ;;  %v1920_v27 = vld [vmem:[%s2495_s5 + $0x20] ss:$16 sps:$4 sm:$0xff]   ;;  %v1986_v13 = vld [vmem:[%s2495_s5 + $0xc8] ss:$16 sps:$4 sm:$0xff]  }
  0x78   : > { %v1918_v26 = vld [vmem:[%s2495_s5 + $0x224] ss:$16 sps:$4 sm:$0xff]   ;;  %v1921_v28 = vld [vmem:[%s2495_s5 + $0x220] ss:$16 sps:$4 sm:$0xff]   ;;  %v1989_v14 = vld [vmem:[%s2495_s5 + $0x2c8] ss:$16 sps:$4 sm:$0xff]  }
  0x79   : > { %1340 = vmatpush1.bf16.msra.mxu0 %v1902_v15  ;;  %v1922_v29 = vld [vmem:[%s2495_s5 + $0x4] ss:$16 sps:$4 sm:$0xff]   ;;  %v1926_v31 = vld [vmem:[%s2495_s5] ss:$16 sps:$4 sm:$0xff]   ;;  %v1994_v15 = vld [vmem:[%s2495_s5 + $0xac] ss:$16 sps:$4 sm:$0xff]  }
  0x7a   : > { %1381 = vmatpush1.bf16.msra.mxu1 %v1903_v16  ;;  %1341 = vmatprep.subr.bf16.mxu0 %v1904_v17  ;;  %v1924_v30 = vld [vmem:[%s2495_s5 + $0x204] ss:$16 sps:$4 sm:$0xff]   ;;  %v1927_v32 = vld [vmem:[%s2495_s5 + $0x200] ss:$16 sps:$4 sm:$0xff]   ;;  %v1997_v16 = vld [vmem:[%s2495_s5 + $0x2ac] ss:$16 sps:$4 sm:$0xff]  }
  0x7b   : > { %1382 = vmatprep.subr.bf16.mxu1 %v1906_v18  ;;  %v1928_v33 = vld [vmem:[%s2495_s5 + $0x1e4] ss:$16 sps:$4 sm:$0xff]   ;;  %v1932_v35 = vld [vmem:[%s2495_s5 + $0x1e0] ss:$16 sps:$4 sm:$0xff]   ;;  %v1992_v17 = vld [vmem:[%s2495_s5 + $0xa8] ss:$16 sps:$4 sm:$0xff]  }
  0x7c   : > { %v1930_v34 = vld [vmem:[%s2495_s5 + $0x3e4] ss:$16 sps:$4 sm:$0xff]   ;;  %v1933_v36 = vld [vmem:[%s2495_s5 + $0x3e0] ss:$16 sps:$4 sm:$0xff]   ;;  %v1995_v18 = vld [vmem:[%s2495_s5 + $0x2a8] ss:$16 sps:$4 sm:$0xff]  }
  0x7d   : > { %1342 = vmatpush1.bf16.msra.mxu0 %v1908_v19  ;;  %v1934_v37 = vld [vmem:[%s2495_s5 + $0x1c4] ss:$16 sps:$4 sm:$0xff]   ;;  %v1938_v39 = vld [vmem:[%s2495_s5 + $0x1c0] ss:$16 sps:$4 sm:$0xff]   ;;  %v2000_v19 = vld [vmem:[%s2495_s5 + $0x8c] ss:$16 sps:$4 sm:$0xff]  }
  0x7e   : > { %1383 = vmatpush1.bf16.msra.mxu1 %v1909_v20  ;;  %1343 = vmatprep.subr.bf16.mxu0 %v1910_v21  ;;  %v1936_v38 = vld [vmem:[%s2495_s5 + $0x3c4] ss:$16 sps:$4 sm:$0xff]   ;;  %v1939_v40 = vld [vmem:[%s2495_s5 + $0x3c0] ss:$16 sps:$4 sm:$0xff]   ;;  %v2003_v20 = vld [vmem:[%s2495_s5 + $0x28c] ss:$16 sps:$4 sm:$0xff]  }
  0x7f   : > { %1384 = vmatprep.subr.bf16.mxu1 %v1912_v22  ;;  %v1940_v41 = vld [vmem:[%s2495_s5 + $0x1a4] ss:$16 sps:$4 sm:$0xff]   ;;  %v1944_v43 = vld [vmem:[%s2495_s5 + $0x1a0] ss:$16 sps:$4 sm:$0xff]   ;;  %v1998_v21 = vld [vmem:[%s2495_s5 + $0x88] ss:$16 sps:$4 sm:$0xff]  }
  0x80   : > { %v1942_v42 = vld [vmem:[%s2495_s5 + $0x3a4] ss:$16 sps:$4 sm:$0xff]   ;;  %v1945_v44 = vld [vmem:[%s2495_s5 + $0x3a0] ss:$16 sps:$4 sm:$0xff]   ;;  %v2001_v22 = vld [vmem:[%s2495_s5 + $0x288] ss:$16 sps:$4 sm:$0xff]  }
  0x81   : > { %1344 = vmatpush1.bf16.msra.mxu0 %v1914_v23  ;;  %v1946_v45 = vld [vmem:[%s2495_s5 + $0x184] ss:$16 sps:$4 sm:$0xff]   ;;  %v1950_v50 = vld [vmem:[%s2495_s5 + $0x180] ss:$16 sps:$4 sm:$0xff]   ;;  %v2006_v23 = vld [vmem:[%s2495_s5 + $0x6c] ss:$16 sps:$4 sm:$0xff]  }
  0x82   : > { %1385 = vmatpush1.bf16.msra.mxu1 %v1915_v24  ;;  %1345 = vmatprep.subr.bf16.mxu0 %v1916_v25  ;;  %v1948_v46 = vld [vmem:[%s2495_s5 + $0x384] ss:$16 sps:$4 sm:$0xff]   ;;  %v1951_v51 = vld [vmem:[%s2495_s5 + $0x380] ss:$16 sps:$4 sm:$0xff]   ;;  %v2009_v24 = vld [vmem:[%s2495_s5 + $0x26c] ss:$16 sps:$4 sm:$0xff]  }
  0x83   : > { %1386 = vmatprep.subr.bf16.mxu1 %v1918_v26  ;;  %v549_v47 = vld [vmem:[%s2481_s26] sm:$0xff]  ;;  %v2004_v25 = vld [vmem:[%s2495_s5 + $0x68] ss:$16 sps:$4 sm:$0xff]  }
  0x84   : > { %v2545_v48 = vcombine.high %v549_v47, %v549_v47  ;;  %v1952_v53 = vld [vmem:[%s2495_s5 + $0x164] ss:$16 sps:$4 sm:$0xff]   ;;  %v1956_v55 = vld [vmem:[%s2495_s5 + $0x160] ss:$16 sps:$4 sm:$0xff]   ;;  %v2569_v7 = vcombine.low %v549_v47, %v549_v47  ;;  %v2007_v26 = vld [vmem:[%s2495_s5 + $0x268] ss:$16 sps:$4 sm:$0xff]  }
  0x85   : > { %1346 = vmatpush1.bf16.msra.mxu0 %v1920_v27  ;;  %v1954_v54 = vld [vmem:[%s2495_s5 + $0x364] ss:$16 sps:$4 sm:$0xff]   ;;  %v1957_v56 = vld [vmem:[%s2495_s5 + $0x360] ss:$16 sps:$4 sm:$0xff]   ;;  %v2012_v27 = vld [vmem:[%s2495_s5 + $0x4c] ss:$16 sps:$4 sm:$0xff]  }
  0x86   : > { %1387 = vmatpush1.bf16.msra.mxu1 %v1921_v28  ;;  %1347 = vmatprep.subr.bf16.mxu0 %v1922_v29  ;;  %v1958_v57 = vld [vmem:[%s2495_s5 + $0x144] ss:$16 sps:$4 sm:$0xff]   ;;  %v1962_v59 = vld [vmem:[%s2495_s5 + $0x140] ss:$16 sps:$4 sm:$0xff]   ;;  %v2015_v28 = vld [vmem:[%s2495_s5 + $0x24c] ss:$16 sps:$4 sm:$0xff]  }
  0x87   : > { %1388 = vmatprep.subr.bf16.mxu1 %v1924_v30  ;;  %1365 = vmatprep.mubr.bf16.mxu0 %v2545_v48  ;;  %v1960_v58 = vld [vmem:[%s2495_s5 + $0x344] ss:$16 sps:$4 sm:$0xff]   ;;  %v1963_v60 = vld [vmem:[%s2495_s5 + $0x340] ss:$16 sps:$4 sm:$0xff]   ;;  %v2010_v29 = vld [vmem:[%s2495_s5 + $0x48] ss:$16 sps:$4 sm:$0xff]  }
  0x88   : > { %v1964_v61 = vld [vmem:[%s2495_s5 + $0x124] ss:$16 sps:$4 sm:$0xff]   ;;  %v1968_v63 = vld [vmem:[%s2495_s5 + $0x120] ss:$16 sps:$4 sm:$0xff]   ;;  %v2013_v30 = vld [vmem:[%s2495_s5 + $0x248] ss:$16 sps:$4 sm:$0xff]  }
  0x89   : > { %1348 = vmatpush1.bf16.msra.mxu0 %v1926_v31  ;;  %v1966_v62 = vld [vmem:[%s2495_s5 + $0x324] ss:$16 sps:$4 sm:$0xff]   ;;  %v1969_v0 = vld [vmem:[%s2495_s5 + $0x320] ss:$16 sps:$4 sm:$0xff]   ;;  %v2018_v31 = vld [vmem:[%s2495_s5 + $0x2c] ss:$16 sps:$4 sm:$0xff]  }
  0x8a   : > { %1389 = vmatpush1.bf16.msra.mxu1 %v1927_v32  ;;  %1349 = vmatprep.subr.bf16.mxu0 %v1928_v33  ;;  %v1970_v1 = vld [vmem:[%s2495_s5 + $0x104] ss:$16 sps:$4 sm:$0xff]   ;;  %v1974_v3 = vld [vmem:[%s2495_s5 + $0x100] ss:$16 sps:$4 sm:$0xff]   ;;  %v2021_v32 = vld [vmem:[%s2495_s5 + $0x22c] ss:$16 sps:$4 sm:$0xff]  }
  0x8b   : > { %1390 = vmatprep.subr.bf16.mxu1 %v1930_v34  ;;  %v1972_v2 = vld [vmem:[%s2495_s5 + $0x304] ss:$16 sps:$4 sm:$0xff]   ;;  %v1975_v4 = vld [vmem:[%s2495_s5 + $0x300] ss:$16 sps:$4 sm:$0xff]   ;;  %v2016_v33 = vld [vmem:[%s2495_s5 + $0x28] ss:$16 sps:$4 sm:$0xff]  }
  0x8c   : > { %v2019_v34 = vld [vmem:[%s2495_s5 + $0x228] ss:$16 sps:$4 sm:$0xff]   ;;  %v2042_v47 = vld [vmem:[%s2495_s5 + $0x1ac] ss:$16 sps:$4 sm:$0xff]  }
  0x8d   : > { %1350 = vmatpush2.bf16.msra.mxu0 %v1932_v35  ;;  %v2024_v35 = vld [vmem:[%s2495_s5 + $0xc] ss:$16 sps:$4 sm:$0xff]  }
  0x8e   : > { %1391 = vmatpush2.bf16.msra.mxu1 %v1933_v36  ;;  %1351 = vmatprep.subr.bf16.mxu0 %v1934_v37  ;;  %v2027_v36 = vld [vmem:[%s2495_s5 + $0x20c] ss:$16 sps:$4 sm:$0xff]   ;;  %v2022_v37 = vld [vmem:[%s2495_s5 + $0x8] ss:$16 sps:$4 sm:$0xff]  }
  0x8f   : > { %1392 = vmatprep.subr.bf16.mxu1 %v1936_v38  ;;  %v2025_v38 = vld [vmem:[%s2495_s5 + $0x208] ss:$16 sps:$4 sm:$0xff]  }
  0x91   : > { %1352 = vmatpush2.bf16.msra.mxu0 %v1938_v39  ;;  %v2030_v39 = vld [vmem:[%s2495_s5 + $0x1ec] ss:$16 sps:$4 sm:$0xff]  }
  0x92   : > { %1393 = vmatpush2.bf16.msra.mxu1 %v1939_v40  ;;  %1353 = vmatprep.subr.bf16.mxu0 %v1940_v41  ;;  %v2033_v40 = vld [vmem:[%s2495_s5 + $0x3ec] ss:$16 sps:$4 sm:$0xff]   ;;  %v2028_v41 = vld [vmem:[%s2495_s5 + $0x1e8] ss:$16 sps:$4 sm:$0xff]  }
  0x93   : > { %1394 = vmatprep.subr.bf16.mxu1 %v1942_v42  ;;  %v2031_v42 = vld [vmem:[%s2495_s5 + $0x3e8] ss:$16 sps:$4 sm:$0xff]  }
  0x95   : > { %1354 = vmatpush2.bf16.msra.mxu0 %v1944_v43  ;;  %v2036_v43 = vld [vmem:[%s2495_s5 + $0x1cc] ss:$16 sps:$4 sm:$0xff]  }
  0x96   : > { %1395 = vmatpush2.bf16.msra.mxu1 %v1945_v44  ;;  %1355 = vmatprep.subr.bf16.mxu0 %v1946_v45  ;;  %v2039_v44 = vld [vmem:[%s2495_s5 + $0x3cc] ss:$16 sps:$4 sm:$0xff]   ;;  %v2034_v45 = vld [vmem:[%s2495_s5 + $0x1c8] ss:$16 sps:$4 sm:$0xff]  }
  0x97   : > { %1396 = vmatprep.subr.bf16.mxu1 %v1948_v46  ;;  %v2037_v46 = vld [vmem:[%s2495_s5 + $0x3c8] ss:$16 sps:$4 sm:$0xff]  }
  0x99   : > { %1356 = vmatpush2.bf16.msra.mxu0 %v1950_v50  ;;  %v2043_v50 = vld [vmem:[%s2495_s5 + $0x3a8] ss:$16 sps:$4 sm:$0xff]  }
  0x9a   : > { %1397 = vmatpush2.bf16.msra.mxu1 %v1951_v51  ;;  %1357 = vmatprep.subr.bf16.mxu0 %v1952_v53  ;;  %v2048_v51 = vld [vmem:[%s2495_s5 + $0x18c] ss:$16 sps:$4 sm:$0xff]   ;;  %v2046_v53 = vld [vmem:[%s2495_s5 + $0x188] ss:$16 sps:$4 sm:$0xff]  }
  0x9b   : > { %1398 = vmatprep.subr.bf16.mxu1 %v1954_v54  ;;  %v2049_v54 = vld [vmem:[%s2495_s5 + $0x388] ss:$16 sps:$4 sm:$0xff]  }
  0x9d   : > { %1358 = vmatpush2.bf16.msra.mxu0 %v1956_v55  ;;  %v2054_v55 = vld [vmem:[%s2495_s5 + $0x16c] ss:$16 sps:$4 sm:$0xff]  }
  0x9e   : > { %1399 = vmatpush2.bf16.msra.mxu1 %v1957_v56  ;;  %1359 = vmatprep.subr.bf16.mxu0 %v1958_v57  ;;  %v2057_v56 = vld [vmem:[%s2495_s5 + $0x36c] ss:$16 sps:$4 sm:$0xff]   ;;  %v2052_v57 = vld [vmem:[%s2495_s5 + $0x168] ss:$16 sps:$4 sm:$0xff]  }
  0x9f   : > { %1400 = vmatprep.subr.bf16.mxu1 %v1960_v58  ;;  %v2055_v58 = vld [vmem:[%s2495_s5 + $0x368] ss:$16 sps:$4 sm:$0xff]  }
  0xa1   : > { %1360 = vmatpush2.bf16.msra.mxu0 %v1962_v59  ;;  %v2060_v59 = vld [vmem:[%s2495_s5 + $0x14c] ss:$16 sps:$4 sm:$0xff]  }
  0xa2   : > { %1401 = vmatpush2.bf16.msra.mxu1 %v1963_v60  ;;  %1361 = vmatprep.subr.bf16.mxu0 %v1964_v61  ;;  %v2063_v60 = vld [vmem:[%s2495_s5 + $0x34c] ss:$16 sps:$4 sm:$0xff]   ;;  %v2058_v61 = vld [vmem:[%s2495_s5 + $0x148] ss:$16 sps:$4 sm:$0xff]  }
  0xa3   : > { %1402 = vmatprep.subr.bf16.mxu1 %v1966_v62  ;;  %v2061_v62 = vld [vmem:[%s2495_s5 + $0x348] ss:$16 sps:$4 sm:$0xff]  }
  0xa5   : > { %1362 = vmatpush2.bf16.msra.mxu0 %v1968_v63  ;;  %v2066_v63 = vld [vmem:[%s2495_s5 + $0x12c] ss:$16 sps:$4 sm:$0xff]  }
  0xa6   : > { %1403 = vmatpush2.bf16.msra.mxu1 %v1969_v0  ;;  %1363 = vmatprep.subr.bf16.mxu0 %v1970_v1  ;;  %v2069_v0 = vld [vmem:[%s2495_s5 + $0x32c] ss:$16 sps:$4 sm:$0xff]   ;;  %v2064_v1 = vld [vmem:[%s2495_s5 + $0x128] ss:$16 sps:$4 sm:$0xff]  }
  0xa7   : > { %1404 = vmatprep.subr.bf16.mxu1 %v1972_v2  ;;  %v2067_v2 = vld [vmem:[%s2495_s5 + $0x328] ss:$16 sps:$4 sm:$0xff]  }
  0xa9   : > { %1364 = vmatpush2.bf16.msra.mxu0 %v1974_v3  ;;  %v2072_v3 = vld [vmem:[%s2495_s5 + $0x10c] ss:$16 sps:$4 sm:$0xff]  }
  0xaa   : > { %1405 = vmatpush2.bf16.msra.mxu1 %v1975_v4  ;;  %1415 = vmatprep.subr.bf16.mxu0 %v1982_v5  ;;  %v2075_v4 = vld [vmem:[%s2495_s5 + $0x30c] ss:$16 sps:$4 sm:$0xff]   ;;  %v2070_v5 = vld [vmem:[%s2495_s5 + $0x108] ss:$16 sps:$4 sm:$0xff]  }
  0xab   : > { %1456 = vmatprep.subr.bf16.mxu1 %v1985_v6  ;;  %v2073_v6 = vld [vmem:[%s2495_s5 + $0x308] ss:$16 sps:$4 sm:$0xff]  }
  0xac   : > { %1366 = vmatmul.mubr.bf16.vlgmr.msra.gmra.mxu0 %v2569_v7 }
  0xad   : > { %1407 = vmatmul.mubr.bf16.vlgmr.msra.gmra.mxu1 %v2571_v8  ;;  %1416 = vmatpush1.bf16.msra.mxu0 %v1980_v9 }
  0xae   : > { %1457 = vmatpush1.bf16.msra.mxu1 %v1983_v10  ;;  %1417 = vmatprep.subr.bf16.mxu0 %v1988_v11  ;;  %v545_v10 = vld [vmem:[#allocation2 + $0x10] sm:$0xff] }
  0xaf   : > { %1458 = vmatprep.subr.bf16.mxu1 %v1991_v12  ;;  %1447 = vmatprep.mubr.bf16.mxu0 %v2545_v48  ;;  %v2045_v48 = vld [vmem:[%s2495_s5 + $0x3ac] ss:$16 sps:$4 sm:$0xff]  }
  0xb0   : > { %1488 = vmatprep.mubr.bf16.mxu1 %v1690_v52  ;;  %v2051_v52 = vld [vmem:[%s2495_s5 + $0x38c] ss:$16 sps:$4 sm:$0xff]  }
  0xb1   : > { %1418 = vmatpush1.bf16.msra.mxu0 %v1986_v13 }
  0xb2   : > { %1459 = vmatpush1.bf16.msra.mxu1 %v1989_v14  ;;  %1419 = vmatprep.subr.bf16.mxu0 %v1994_v15  ;;  %v546_v14 = vld [vmem:[#allocation2] sm:$0xff] }
  0xb3   : > { %1460 = vmatprep.subr.bf16.mxu1 %v1997_v16 }
  0xb5   : > { %1420 = vmatpush1.bf16.msra.mxu0 %v1992_v17 }
  0xb6   : > { %1461 = vmatpush1.bf16.msra.mxu1 %v1995_v18  ;;  %1421 = vmatprep.subr.bf16.mxu0 %v2000_v19 }
  0xb7   : > { %1462 = vmatprep.subr.bf16.mxu1 %v2003_v20 }
  0xb9   : > { %1422 = vmatpush1.bf16.msra.mxu0 %v1998_v21 }
  0xba   : > { %1463 = vmatpush1.bf16.msra.mxu1 %v2001_v22  ;;  %1423 = vmatprep.subr.bf16.mxu0 %v2006_v23 }
  0xbb   : > { %1464 = vmatprep.subr.bf16.mxu1 %v2009_v24 }
  0xbd   : > { %1424 = vmatpush1.bf16.msra.mxu0 %v2004_v25 }
  0xbe   : > { %1465 = vmatpush1.bf16.msra.mxu1 %v2007_v26  ;;  %1425 = vmatprep.subr.bf16.mxu0 %v2012_v27  ;;  %v548_v26 = vld [vmem:[#allocation2 + $0x8] sm:$0xff] }
  0xbf   : > { %1466 = vmatprep.subr.bf16.mxu1 %v2015_v28 }
  0xc1   : > { %1426 = vmatpush1.bf16.msra.mxu0 %v2010_v29 }
  0xc2   : > { %1467 = vmatpush1.bf16.msra.mxu1 %v2013_v30  ;;  %1427 = vmatprep.subr.bf16.mxu0 %v2018_v31 }
  0xc3   : > { %1468 = vmatprep.subr.bf16.mxu1 %v2021_v32 }
  0xc5   : > { %1428 = vmatpush1.bf16.msra.mxu0 %v2016_v33 }
  0xc6   : > { %1469 = vmatpush1.bf16.msra.mxu1 %v2019_v34  ;;  %1429 = vmatprep.subr.bf16.mxu0 %v2024_v35 }
  0xc7   : > { %1470 = vmatprep.subr.bf16.mxu1 %v2027_v36 }
  0xc9   : > { %1430 = vmatpush1.bf16.msra.mxu0 %v2022_v37 }
  0xca   : > { %1471 = vmatpush1.bf16.msra.mxu1 %v2025_v38  ;;  %1431 = vmatprep.subr.bf16.mxu0 %v2030_v39 }
  0xcb   : > { %1472 = vmatprep.subr.bf16.mxu1 %v2033_v40 }
  0xcd   : > { %1432 = vmatpush2.bf16.msra.mxu0 %v2028_v41 }
  0xce   : > { %1473 = vmatpush2.bf16.msra.mxu1 %v2031_v42  ;;  %1433 = vmatprep.subr.bf16.mxu0 %v2036_v43 }
  0xcf   : > { %1474 = vmatprep.subr.bf16.mxu1 %v2039_v44 }
  0xd1   : > { %1434 = vmatpush2.bf16.msra.mxu0 %v2034_v45 }
  0xd2   : > { %1475 = vmatpush2.bf16.msra.mxu1 %v2037_v46  ;;  %1435 = vmatprep.subr.bf16.mxu0 %v2042_v47 }
  0xd3   : > { %1476 = vmatprep.subr.bf16.mxu1 %v2045_v48 }
  0xd5   : > { %1436 = vmatpush2.bf16.msra.mxu0 %v2040_v49 }
  0xd6   : > { %1477 = vmatpush2.bf16.msra.mxu1 %v2043_v50  ;;  %1437 = vmatprep.subr.bf16.mxu0 %v2048_v51 }
  0xd7   : > { %1478 = vmatprep.subr.bf16.mxu1 %v2051_v52 }
  0xd9   : > { %1438 = vmatpush2.bf16.msra.mxu0 %v2046_v53 }
  0xda   : > { %1479 = vmatpush2.bf16.msra.mxu1 %v2049_v54  ;;  %1439 = vmatprep.subr.bf16.mxu0 %v2054_v55 }
  0xdb   : > { %1480 = vmatprep.subr.bf16.mxu1 %v2057_v56 }
  0xdd   : > { %1440 = vmatpush2.bf16.msra.mxu0 %v2052_v57 }
  0xde   : > { %1481 = vmatpush2.bf16.msra.mxu1 %v2055_v58  ;;  %1441 = vmatprep.subr.bf16.mxu0 %v2060_v59 }
  0xdf   : > { %1482 = vmatprep.subr.bf16.mxu1 %v2063_v60 }
  0xe1   : > { %1442 = vmatpush2.bf16.msra.mxu0 %v2058_v61 }
  0xe2   : > { %1483 = vmatpush2.bf16.msra.mxu1 %v2061_v62  ;;  %1443 = vmatprep.subr.bf16.mxu0 %v2066_v63 }
  0xe3   : > { %1484 = vmatprep.subr.bf16.mxu1 %v2069_v0 }
  0xe5   : > { %1444 = vmatpush2.bf16.msra.mxu0 %v2064_v1 }
  0xe6   : > { %1485 = vmatpush2.bf16.msra.mxu1 %v2067_v2  ;;  %1445 = vmatprep.subr.bf16.mxu0 %v2072_v3 }
  0xe7   : > { %1486 = vmatprep.subr.bf16.mxu1 %v2075_v4 }
  0xe9   : > { %1446 = vmatpush2.bf16.msra.mxu0 %v2070_v5 }
  0xea   : > { %1487 = vmatpush2.bf16.msra.mxu1 %v2073_v6 }
  0xec   : > { %1448 = vmatmul.mubr.bf16.vlgmr.msra.gmra.mxu0 %v2569_v7  ;;  %v547_v7 = vld [vmem:[#allocation2 + $0x18] sm:$0xff] }
  0xed   : > { %1489 = vmatmul.mubr.bf16.vlgmr.msra.gmra.mxu1 %v2571_v8 }
 0x16c   : > { %v1367_v9 = vpop.f32.mrf.mxu0 }
 0x16d   : > { %v1408_v11 = vpop.f32.mrf.mxu1 }
 0x16e   : > { %v1409_v12 = vadd.f32 %v1408_v11, %v1367_v9  ;;  %v1369_v13 = vpop.f32.mrf.mxu0 }
 0x16f   : > { %v1410_v15 = vpop.f32.mrf.mxu1 }
 0x170   : > { %v1497_v16 = vadd.f32 %v1409_v12, %v545_v10  ;;  %v1411_v17 = vadd.f32 %v1410_v15, %v1369_v13  ;;  %v1371_v18 = vpop.f32.mrf.mxu0 }
 0x171   : > { %v1412_v19 = vpop.f32.mrf.mxu1 }
 0x172   : > { %1501 = vst [vmem:[#allocation2 + $0x10] sm:$0xff] %v1497_v16  ;;  %v1498_v20 = vadd.f32 %v1411_v17, %v546_v14  ;;  %v1372_v21 = vpop.f32.mrf.mxu0 }
 0x173   : > { %v1413_v22 = vpop.f32.mrf.mxu1 }
 0x174   : > { %1502 = vst [vmem:[#allocation2] sm:$0xff] %v1498_v20 }
 0x1ac   : > { %v1449_v23 = vpop.f32.mrf.mxu0 }
 0x1ad   : > { %v1490_v24 = vpop.f32.mrf.mxu1 }
 0x1ae   : > { %v1491_v8 = vadd.f32 %v1490_v24, %v1449_v23  ;;  %v1451_v25 = vpop.f32.mrf.mxu0 }
 0x1af   : > { %v1492_v27 = vpop.f32.mrf.mxu1 }
 0x1b0   : > { %v1499_v28 = vadd.f32 %v1491_v8, %v547_v7  ;;  %v1493_v29 = vadd.f32 %v1492_v27, %v1451_v25  ;;  %v1453_v30 = vpop.f32.mrf.mxu0  ;;  %1508 = sbr.rel (%p1819_p13) target bundleno = 451 (0x1c3), region = 63 }
 0x1b1   : > { %v1494_v31 = vpop.f32.mrf.mxu1 }
 0x1b2   : > { %1503 = vst [vmem:[#allocation2 + $0x18] sm:$0xff] %v1499_v28  ;;  %v1500_v32 = vadd.f32 %v1493_v29, %v548_v26  ;;  %v1454_v33 = vpop.f32.mrf.mxu0 }
 0x1b3   : > { %v1495_v34 = vpop.f32.mrf.mxu1 }
 0x1b4   : > { %1504 = vst [vmem:[#allocation2 + $0x8] sm:$0xff] %v1500_v32 }
 0x1b5   : > { %v1515_v35 = vlaneseq  ;;  %v1513_v37 = vld [vmem:[%s525_s12] sm:$0xf]  ;;  %v1509_v38 = vld [vmem:[#allocation2 + $0x10] sm:$0xff] }
 0x1b6   : > { %v1510_v43 = vld [vmem:[#allocation2] sm:$0xff] }
 0x1b7   : > { %v1516_v36 = vshrl.u32 %v1515_v35, 7 }
 0x1b9   : > { %v1517_v39 = vsub.s32 0, %v1516_v36  ;;  %v1521_v40 = vsub.s32 1, %v1516_v36  ;;  %v1525_v41 = vsub.s32 2, %v1516_v36  ;;  %v1529_v42 = vsub.s32 3, %v1516_v36  ;;  %v1511_v44 = vld [vmem:[#allocation2 + $0x18] sm:$0xff] }
 0x1bb   : > { %v1512_v45 = vld [vmem:[#allocation2 + $0x8] sm:$0xff]  ;;  %v1518_v46 = vrot.slane %v1513_v37, %v1517_v39  ;;  %v1522_v47 = vrot.slane %v1513_v37, %v1521_v40  ;;  %v1526_v48 = vrot.slane %v1513_v37, %v1525_v41  ;;  %v1530_v49 = vrot.slane %v1513_v37, %v1529_v42 }
 0x1bd   : > { %v1535_v50 = vadd.f32 %v1518_v46, %v1509_v38  ;;  %v1536_v51 = vadd.f32 %v1522_v47, %v1510_v43  ;;  %v1537_v52 = vadd.f32 %v1526_v48, %v1511_v44  ;;  %v1538_v53 = vadd.f32 %v1530_v49, %v1512_v45 }
 0x1bf   : > { %v1539_v54 = vmax.f32 %v1535_v50, 0.0  ;;  %v1540_v55 = vmax.f32 %v1536_v51, 0.0  ;;  %v1541_v56 = vmax.f32 %v1537_v52, 0.0  ;;  %v1542_v57 = vmax.f32 %v1538_v53, 0.0 }
 0x1c1   : > { %1543 = vst [vmem:[%s2493_s15] sm:$0xff] %v1539_v54  ;;  %1544 = vst [vmem:[%s2493_s15 + $0x8] sm:$0xff] %v1540_v55 }
 0x1c2   : > { %1545 = vst [vmem:[%s2493_s15 + $0x10] sm:$0xff] %v1541_v56  ;;  %1546 = vst [vmem:[%s2493_s15 + $0x18] sm:$0xff] %v1542_v57 }
 0x1c3 PF: > { %s13_s18 = sadd.s32 1, %s2130_s18   ;;  %s2675_s12 = smov %s2110_s13 }
 0x1c4   : > { %p10_p0 = scmp.ge.s32.totalorder %s13_s18, 66   ;;  %s2676_s13 = smov %s2204_s25 }
 0x1c5   : > { %s2677_s14 = smov %s2122_s16  ;;  %s2678_s15 = smov %s2126_s17 }
 0x1c6   : > { %s2679_s16 = smov %s2682_s19  ;;  %s2680_s17 = smov %s2686_s20 }
 0x1c7   :  { %12 = sbr.rel (!%p10_p0) target bundleno = 4 (0x4), region = 104 }

// kernel: alexnet_forward.21
= control target key start
LH: loop header
LB: loop body
LE: loop exit
PB: predicated region body
PF: predicated region fallthrough
CT: control target
= control target key end

     0   :  { %s940_s12 = smov 0   ;;  %s942_s13 = smov 0   ;;  %s1023_s0 = inlined_call_operand.vmem [shape: bf16[8,4096], index: 0, kind: input, shape index: {}]   ;;  %s1024_s1 = inlined_call_operand.vmem [shape: bf16[4096,128], index: 1, kind: input, shape index: {}]   ;;  %s1025_s2 = inlined_call_operand.vmem [shape: f32[1,128], index: 2, kind: input, shape index: {}]   ;;  %s1026_s3 = inlined_call_operand.vmem [shape: f32[8,128], index: 3, kind: output, shape index: {}]  }
   0x1   :  { %s944_s14 = smov 0  }
   0x2 LB: > { %s25_s15 = sadd.s32 1, %s913_s13  ;;  %p743_p0 = scmp.ge.s32.totalorder %s917_s14, 1  ;;  %s917_s14 = sphi %s944_s14, %s13_s14   ;;  %s913_s13 = sphi %s942_s13, %s1028_s13   ;;  %s909_s12 = sphi %s940_s12, %s1027_s12  }
   0x3   : > { %p26_p1 = scmp.ge.s32.totalorder %s25_s15, 8  ;;  %p189_p2 = scmp.lt.s32.totalorder %s917_s14, 9 }
   0x5   : > { %s1030_s15 = smov (%p26_p1, %s25_s15), 0  ;;  %p190_p3 = pnand %p743_p0, %p189_p2 }
   0x6   : > { %s744_s16 = sshll.u32 (!%p190_p3), %s909_s12, 2  ;;  %s746_s17 = sshll.u32 (!%p190_p3), %s909_s12, 6 }
   0x7   : > { %193 = sbr.rel (%p190_p3) target bundleno = 269 (0x10d), region = 32  ;;  %p233_p4 = scmp.lt.s32.totalorder (!%p190_p3), %s744_s16, 31 }
   0x8   : > { %p241_p5 = scmp.lt.s32.totalorder (!%p190_p3), %s746_s17, 511  ;;  %p748_p6 = scmp.ne.s32.totalorder (!%p190_p3), %s909_s12, 0 }
   0xc   : > { %s1032_s16 = smov (!%p233_p4, %s744_s16), 31  ;;  %s1034_s17 = smov (!%p241_p5, %s746_s17), 511 }
   0xd   : > { %s745_s18 = sshll.u32 %s1032_s16, 2  ;;  %s747_s22 = sshll.u32 %s1034_s17, 2 }
   0xe   : > { %s965_s21 = scalar_lea.vmem %s1023_s0, %s745_s18  ;;  %s970_s25 = scalar_lea.vmem %s1024_s1, %s747_s22 }
   0xf   : > { %263 = sbr.rel (%p748_p6) target bundleno = 22 (0x16), region = 36 }
  0x14   : > { %v919_v0 = vmov 0.0  }
  0x15   : > { %264 = vst [vmem:[#allocation2] sm:$0xff] %v919_v0 }
  0x16 PF: > { %v859_v1 = vld [vmem:[%s970_s25 + $0x78] sm:$0xff]   ;;  %v863_v5 = vld [vmem:[%s970_s25 + $0x70] sm:$0xff]   ;;  %v867_v9 = vld [vmem:[%s970_s25 + $0x68] sm:$0xff]   ;;  %p785_p7 = scmp.ne.s32.totalorder %s909_s12, 7 }
  0x17   : > { %v860_v2 = vld [vmem:[%s970_s25 + $0xf8] sm:$0xff]   ;;  %790 = vmatprep.subr.bf16.mxu0 %v859_v1  ;;  %v864_v6 = vld [vmem:[%s970_s25 + $0xf0] sm:$0xff]   ;;  %v868_v10 = vld [vmem:[%s970_s25 + $0xe8] sm:$0xff]  }
  0x18   : > { %v861_v3 = vld [vmem:[%s970_s25 + $0x38] sm:$0xff]   ;;  %812 = vmatprep.subr.bf16.mxu1 %v860_v2  ;;  %v865_v7 = vld [vmem:[%s970_s25 + $0x30] sm:$0xff]   ;;  %v869_v11 = vld [vmem:[%s970_s25 + $0x28] sm:$0xff]  }
  0x19   : > { %v862_v4 = vld [vmem:[%s970_s25 + $0xb8] sm:$0xff]   ;;  %791 = vmatpush3.bf16.msra.mxu0 %v861_v3  ;;  %v866_v8 = vld [vmem:[%s970_s25 + $0xb0] sm:$0xff]   ;;  %v870_v12 = vld [vmem:[%s970_s25 + $0xa8] sm:$0xff]  }
  0x1a   : > { %813 = vmatpush3.bf16.msra.mxu1 %v862_v4  ;;  %792 = vmatprep.subr.bf16.mxu0 %v863_v5  ;;  %v871_v13 = vld [vmem:[%s970_s25 + $0x60] sm:$0xff]   ;;  %v875_v17 = vld [vmem:[%s970_s25 + $0x58] sm:$0xff]   ;;  %v879_v21 = vld [vmem:[%s970_s25 + $0x50] sm:$0xff]  }
  0x1b   : > { %814 = vmatprep.subr.bf16.mxu1 %v864_v6  ;;  %v872_v14 = vld [vmem:[%s970_s25 + $0xe0] sm:$0xff]   ;;  %v876_v18 = vld [vmem:[%s970_s25 + $0xd8] sm:$0xff]   ;;  %v880_v22 = vld [vmem:[%s970_s25 + $0xd0] sm:$0xff]  }
  0x1c   : > { %v873_v15 = vld [vmem:[%s970_s25 + $0x20] sm:$0xff]   ;;  %v877_v19 = vld [vmem:[%s970_s25 + $0x18] sm:$0xff]   ;;  %v881_v23 = vld [vmem:[%s970_s25 + $0x10] sm:$0xff]  }
  0x1d   : > { %793 = vmatpush3.bf16.msra.mxu0 %v865_v7  ;;  %v874_v16 = vld [vmem:[%s970_s25 + $0xa0] sm:$0xff]   ;;  %v878_v20 = vld [vmem:[%s970_s25 + $0x98] sm:$0xff]   ;;  %v882_v24 = vld [vmem:[%s970_s25 + $0x90] sm:$0xff]  }
  0x1e   : > { %815 = vmatpush3.bf16.msra.mxu1 %v866_v8  ;;  %794 = vmatprep.subr.bf16.mxu0 %v867_v9  ;;  %v883_v25 = vld [vmem:[%s970_s25 + $0x48] sm:$0xff]   ;;  %v887_v29 = vld [vmem:[%s970_s25 + $0x40] sm:$0xff]  }
  0x1f   : > { %816 = vmatprep.subr.bf16.mxu1 %v868_v10  ;;  %v884_v26 = vld [vmem:[%s970_s25 + $0xc8] sm:$0xff]   ;;  %v888_v30 = vld [vmem:[%s970_s25 + $0xc0] sm:$0xff]  }
  0x20   : > { %v885_v27 = vld [vmem:[%s970_s25 + $0x8] sm:$0xff]   ;;  %v889_v31 = vld [vmem:[%s970_s25] sm:$0xff]  }
  0x21   : > { %795 = vmatpush3.bf16.msra.mxu0 %v869_v11  ;;  %v886_v28 = vld [vmem:[%s970_s25 + $0x88] sm:$0xff]   ;;  %v890_v32 = vld [vmem:[%s970_s25 + $0x80] sm:$0xff]  }
  0x22   : > { %817 = vmatpush3.bf16.msra.mxu1 %v870_v12  ;;  %796 = vmatprep.subr.bf16.mxu0 %v871_v13  ;;  %v266_v33 = vld [vmem:[%s965_s21] sm:$0xff]  ;;  %v267_v34 = vld [vmem:[%s965_s21 + $0x8] sm:$0xff] }
  0x23   : > { %818 = vmatprep.subr.bf16.mxu1 %v872_v14  ;;  %v749_v35 = vcombine.low %v266_v33, %v266_v33  ;;  %v750_v36 = vcombine.high %v266_v33, %v266_v33  ;;  %v751_v37 = vcombine.low %v267_v34, %v267_v34  ;;  %v752_v38 = vcombine.high %v267_v34, %v267_v34  ;;  %v265_v45 = vld [vmem:[#allocation2] sm:$0xff] }
  0x25   : > { %797 = vmatpush3.bf16.msra.mxu0 %v873_v15  ;;  %570 = vmatprep.mubr.bf16.mxu0 %v750_v36 }
  0x26   : > { %819 = vmatpush3.bf16.msra.mxu1 %v874_v16  ;;  %798 = vmatprep.subr.bf16.mxu0 %v875_v17 }
  0x27   : > { %820 = vmatprep.subr.bf16.mxu1 %v876_v18  ;;  %610 = vmatprep.mubr.bf16.mxu1 %v752_v38 }
  0x29   : > { %799 = vmatpush3.bf16.msra.mxu0 %v877_v19 }
  0x2a   : > { %821 = vmatpush3.bf16.msra.mxu1 %v878_v20  ;;  %800 = vmatprep.subr.bf16.mxu0 %v879_v21 }
  0x2b   : > { %822 = vmatprep.subr.bf16.mxu1 %v880_v22 }
  0x2d   : > { %801 = vmatpush3.bf16.msra.mxu0 %v881_v23 }
  0x2e   : > { %823 = vmatpush3.bf16.msra.mxu1 %v882_v24  ;;  %802 = vmatprep.subr.bf16.mxu0 %v883_v25 }
  0x2f   : > { %824 = vmatprep.subr.bf16.mxu1 %v884_v26 }
  0x31   : > { %803 = vmatpush3.bf16.msra.mxu0 %v885_v27 }
  0x32   : > { %825 = vmatpush3.bf16.msra.mxu1 %v886_v28  ;;  %804 = vmatprep.subr.bf16.mxu0 %v887_v29 }
  0x33   : > { %826 = vmatprep.subr.bf16.mxu1 %v888_v30 }
  0x35   : > { %805 = vmatpush3.bf16.msra.mxu0 %v889_v31 }
  0x36   : > { %827 = vmatpush3.bf16.msra.mxu1 %v890_v32 }
  0x38   : > { %571 = vmatmul.mubr.bf16.vlgmr.msra.gmra.mxu0 %v749_v35 }
  0x39   : > { %611 = vmatmul.mubr.bf16.vlgmr.msra.gmra.mxu1 %v751_v37 }
  0xf8   : > { %v806_v39 = vpop.f32.mrf.mxu0 }
  0xf9   : > { %v828_v40 = vpop.f32.mrf.mxu1 }
  0xfa   : > { %v807_v41 = vpop.f32.mrf.mxu0 }
  0xfb   : > { %v829_v42 = vpop.f32.mrf.mxu1  ;;  %v808_v43 = vadd.f32 %v807_v41, %v806_v39 }
  0xfc   : > { %v830_v44 = vadd.f32 %v829_v42, %v828_v40  ;;  %v809_v46 = vpop.f32.mrf.mxu0 }
  0xfd   : > { %v831_v47 = vpop.f32.mrf.mxu1 }
  0xfe   : > { %v613_v48 = vadd.f32 %v830_v44, %v808_v43  ;;  %v810_v49 = vpop.f32.mrf.mxu0  ;;  %623 = sbr.rel (%p785_p7) target bundleno = 269 (0x10d), region = 40 }
  0xff   : > { %v832_v50 = vpop.f32.mrf.mxu1 }
 0x100   : > { %v618_v51 = vadd.f32 %v613_v48, %v265_v45 }
 0x102   : > { %619 = vst [vmem:[#allocation2] sm:$0xff] %v618_v51 }
 0x103   : > { %v786_v53 = vld [vmem:[%s1025_s2] ss:$0 sm:$0xff] }
 0x109   : > { %v624_v52 = vld [vmem:[#allocation2] sm:$0xff] }
 0x10a   : > { %v632_v54 = vadd.f32 %v786_v53, %v624_v52 }
 0x10c   : > { %633 = vst [vmem:[%s1026_s3] sm:$0xff] %v632_v54 }
 0x10d PF: > { %s13_s14 = sadd.s32 1, %s917_s14   ;;  %s1027_s12 = smov %s913_s13 }
 0x10e   : > { %p10_p8 = scmp.ge.s32.totalorder %s13_s14, 10   ;;  %s1028_s13 = smov %s1030_s15 }
 0x110   :  { %12 = sbr.rel (!%p10_p8) target bundleno = 2 (0x2), region = 76 }

</bundles_post_ra>
